<compile_context>
chip_gen: v7x
topology: tpu7x:2x2x1
jax: 0.10.0
libtpu: 0.0.40
codegen_flags: <defaults>
</compile_context>

<pallas_src>
import jax
import jax.numpy as jnp
from jax.experimental import pallas as pl
from jax.experimental.pallas import tpu as pltpu

C_IN = 1472
C_MID = 736
C_OUT = 256
BN_EPS = 1e-5


def _samm_kernel(x_ref,
                 s1_ref, t1_ref, w1_ref, b1_ref,
                 s2_ref, t2_ref, w2_ref, b2_ref,
                 s3_ref, t3_ref, w3_ref, b3_ref,
                 o_ref):
    x = x_ref[...]                                             # (tm, C_IN)

    # branch 1: BN -> ReLU -> 1x1 conv
    h1 = jnp.maximum(x * s1_ref[...] + t1_ref[...], 0.0)
    x1 = jnp.dot(h1, w1_ref[...],
                 preferred_element_type=jnp.float32) + b1_ref[...]

    # branch 2: BN -> ReLU -> 1x1 conv
    h2 = jnp.maximum(x * s2_ref[...] + t2_ref[...], 0.0)
    x2 = jnp.dot(h2, w2_ref[...],
                 preferred_element_type=jnp.float32) + b2_ref[...]

    # branch 3 consumes branch 2: BN -> ReLU -> 1x1 conv
    h3 = jnp.maximum(x2 * s3_ref[...] + t3_ref[...], 0.0)
    x3 = jnp.dot(h3, w3_ref[...],
                 preferred_element_type=jnp.float32) + b3_ref[...]

    o_ref[...] = jax.nn.sigmoid(x3) * x1


def _round_up(n, m):
    return ((n + m - 1) // m) * m


def samm_forward(x, params, *, tm_max=256):
    """x: (B, 1472, H, W) float32 (NCHW).  Returns (B, 256, H, W) float32."""
    B, C, H, W = x.shape
    assert C == C_IN
    N = B * H * W

    # Fold eval-mode BatchNorm (running stats) into per-channel scale/shift.
    # TODO(synk): training-mode BatchNorm (batch statistics) is not implemented.
    def bn_fold(g, b, m, v):
        scale = g / jnp.sqrt(v + BN_EPS)
        shift = b - m * scale
        return scale.astype(jnp.float32), shift.astype(jnp.float32)

    s1, t1 = bn_fold(params["bn1_gamma"], params["bn1_beta"],
                     params["bn1_mean"], params["bn1_var"])
    s2, t2 = bn_fold(params["bn2_gamma"], params["bn2_beta"],
                     params["bn2_mean"], params["bn2_var"])
    s3, t3 = bn_fold(params["bn3_gamma"], params["bn3_beta"],
                     params["bn3_mean"], params["bn3_var"])

    # channels-last pixels + pre-transposed weights -> lane-dense MXU matmuls
    xf = jnp.transpose(x, (0, 2, 3, 1)).reshape(N, C_IN)
    w1t = params["w1"].reshape(C_OUT, C_IN).T        # (C_IN, C_OUT)
    w2t = params["w2"].reshape(C_MID, C_IN).T        # (C_IN, C_MID)
    w3t = params["w3"].reshape(C_OUT, C_MID).T       # (C_MID, C_OUT)
    b1 = params["b1"].reshape(1, C_OUT)
    b2 = params["b2"].reshape(1, C_MID)
    b3 = params["b3"].reshape(1, C_OUT)

    # Row tiling: pad pixel count to a sublane multiple; tile at <= tm_max rows.
    if N <= tm_max:
        n_pad = _round_up(N, 8)
        tm = n_pad
    else:
        tm = tm_max
        n_pad = _round_up(N, tm)
    if n_pad != N:
        xf = jnp.pad(xf, ((0, n_pad - N), (0, 0)))

    grid = (n_pad // tm,)

    def row_spec(c):
        return pl.BlockSpec((tm, c), lambda i: (i, 0))

    def const_spec(r, c):
        # Same block every grid step -> stays VMEM-resident, DMA'd once.
        return pl.BlockSpec((r, c), lambda i: (0, 0))

    out_f = pl.pallas_call(
        _samm_kernel,
        out_shape=jax.ShapeDtypeStruct((n_pad, C_OUT), jnp.float32),
        grid_spec=pltpu.PrefetchScalarGridSpec(
            num_scalar_prefetch=0,
            grid=grid,
            in_specs=[
                row_spec(C_IN),
                const_spec(1, C_IN), const_spec(1, C_IN),
                const_spec(C_IN, C_OUT), const_spec(1, C_OUT),
                const_spec(1, C_IN), const_spec(1, C_IN),
                const_spec(C_IN, C_MID), const_spec(1, C_MID),
                const_spec(1, C_MID), const_spec(1, C_MID),
                const_spec(C_MID, C_OUT), const_spec(1, C_OUT),
            ],
            out_specs=row_spec(C_OUT),
        ),
        compiler_params=pltpu.CompilerParams(
            dimension_semantics=("parallel",),
            vmem_limit_bytes=48 * 1024 * 1024,
        ),
    )(xf,
      s1.reshape(1, C_IN), t1.reshape(1, C_IN), w1t, b1,
      s2.reshape(1, C_IN), t2.reshape(1, C_IN), w2t, b2,
      s3.reshape(1, C_MID), t3.reshape(1, C_MID), w3t, b3)

    out = out_f[:N].reshape(B, H, W, C_OUT).transpose(0, 3, 1, 2)
    return out


if __name__ == "__main__":
    key = jax.random.PRNGKey(0)
    ks = jax.random.split(key, 19)

    B, H, W = 2, 4, 4
    x = jax.random.normal(ks[0], (B, C_IN, H, W), dtype=jnp.float32)

    def rnd(k, shape, scale=0.02):
        return jax.random.normal(k, shape, dtype=jnp.float32) * scale

    params = dict(
        bn1_gamma=1.0 + rnd(ks[1], (C_IN,)), bn1_beta=rnd(ks[2], (C_IN,)),
        bn1_mean=rnd(ks[3], (C_IN,)), bn1_var=1.0 + jnp.abs(rnd(ks[4], (C_IN,))),
        w1=rnd(ks[5], (C_OUT, C_IN, 1, 1)), b1=rnd(ks[6], (C_OUT,)),
        bn2_gamma=1.0 + rnd(ks[7], (C_IN,)), bn2_beta=rnd(ks[8], (C_IN,)),
        bn2_mean=rnd(ks[9], (C_IN,)), bn2_var=1.0 + jnp.abs(rnd(ks[10], (C_IN,))),
        w2=rnd(ks[11], (C_MID, C_IN, 1, 1)), b2=rnd(ks[12], (C_MID,)),
        bn3_gamma=1.0 + rnd(ks[13], (C_MID,)), bn3_beta=rnd(ks[14], (C_MID,)),
        bn3_mean=rnd(ks[15], (C_MID,)), bn3_var=1.0 + jnp.abs(rnd(ks[16], (C_MID,))),
        w3=rnd(ks[17], (C_OUT, C_MID, 1, 1)), b3=rnd(ks[18], (C_OUT,)),
    )

    out = samm_forward(x, params)
    out = jax.block_until_ready(out)

    # Pure-JAX reference (eval-mode BN semantics).
    def bn_relu(v, g, b, m, var):
        s = g / jnp.sqrt(var + BN_EPS)
        t = b - m * s
        return jnp.maximum(v * s[None, :, None, None] + t[None, :, None, None], 0.0)

    def conv1x1(v, w, b):
        return jnp.einsum("bchw,oc->bohw", v,
                          w.reshape(w.shape[0], w.shape[1]),
                          precision=jax.lax.Precision.HIGHEST) \
            + b[None, :, None, None]

    h1 = bn_relu(x, params["bn1_gamma"], params["bn1_beta"],
                 params["bn1_mean"], params["bn1_var"])
    x1 = conv1x1(h1, params["w1"], params["b1"])
    h2 = bn_relu(x, params["bn2_gamma"], params["bn2_beta"],
                 params["bn2_mean"], params["bn2_var"])
    x2 = conv1x1(h2, params["w2"], params["b2"])
    h3 = bn_relu(x2, params["bn3_gamma"], params["bn3_beta"],
                 params["bn3_mean"], params["bn3_var"])
    x3 = conv1x1(h3, params["w3"], params["b3"])
    ref = jax.nn.sigmoid(x3) * x1

    assert out.shape == (B, C_OUT, H, W)
    assert jnp.allclose(out, ref, atol=2e-2, rtol=2e-2), "mismatch vs reference"
    print("KERNEL_OK")
</pallas_src>

<mosaic_0001>
module attributes {stable_mosaic.version = 11 : i64} {
  func.func @_samm_kernel(%arg0: i32, %arg1: memref<32x1472xf32, #tpu.memory_space<vmem>>, %arg2: memref<1x1472xf32, #tpu.memory_space<vmem>>, %arg3: memref<1x1472xf32, #tpu.memory_space<vmem>>, %arg4: memref<1472x256xf32, #tpu.memory_space<vmem>>, %arg5: memref<1x256xf32, #tpu.memory_space<vmem>>, %arg6: memref<1x1472xf32, #tpu.memory_space<vmem>>, %arg7: memref<1x1472xf32, #tpu.memory_space<vmem>>, %arg8: memref<1472x736xf32, #tpu.memory_space<vmem>>, %arg9: memref<1x736xf32, #tpu.memory_space<vmem>>, %arg10: memref<1x736xf32, #tpu.memory_space<vmem>>, %arg11: memref<1x736xf32, #tpu.memory_space<vmem>>, %arg12: memref<736x256xf32, #tpu.memory_space<vmem>>, %arg13: memref<1x256xf32, #tpu.memory_space<vmem>>, %arg14: memref<32x256xf32, #tpu.memory_space<vmem>>) attributes {dimension_semantics = [#tpu.dimension_semantics<parallel>], iteration_bounds = array<i64: 1>, scalar_prefetch = 0 : i64, scratch_operands = 0 : i64, tpu.core_type = #tpu.core_type<tc>, window_params = [{transform_indices = @transform_0, window_bounds = array<i64: 32, 1472>}, {pipeline_mode = #tpu.pipeline_mode<synchronous>, transform_indices = @transform_1, window_bounds = array<i64: 1, 1472>}, {pipeline_mode = #tpu.pipeline_mode<synchronous>, transform_indices = @transform_2, window_bounds = array<i64: 1, 1472>}, {pipeline_mode = #tpu.pipeline_mode<synchronous>, transform_indices = @transform_3, window_bounds = array<i64: 1472, 256>}, {pipeline_mode = #tpu.pipeline_mode<synchronous>, transform_indices = @transform_4, window_bounds = array<i64: 1, 256>}, {pipeline_mode = #tpu.pipeline_mode<synchronous>, transform_indices = @transform_5, window_bounds = array<i64: 1, 1472>}, {pipeline_mode = #tpu.pipeline_mode<synchronous>, transform_indices = @transform_6, window_bounds = array<i64: 1, 1472>}, {pipeline_mode = #tpu.pipeline_mode<synchronous>, transform_indices = @transform_7, window_bounds = array<i64: 1472, 736>}, {pipeline_mode = #tpu.pipeline_mode<synchronous>, transform_indices = @transform_8, window_bounds = array<i64: 1, 736>}, {pipeline_mode = #tpu.pipeline_mode<synchronous>, transform_indices = @transform_9, window_bounds = array<i64: 1, 736>}, {pipeline_mode = #tpu.pipeline_mode<synchronous>, transform_indices = @transform_10, window_bounds = array<i64: 1, 736>}, {pipeline_mode = #tpu.pipeline_mode<synchronous>, transform_indices = @transform_11, window_bounds = array<i64: 736, 256>}, {pipeline_mode = #tpu.pipeline_mode<synchronous>, transform_indices = @transform_12, window_bounds = array<i64: 1, 256>}, {transform_indices = @transform_13, window_bounds = array<i64: 32, 256>}]} {
    %c0 = arith.constant 0 : index
    %c0_0 = arith.constant 0 : index
    %0 = vector.load %arg1[%c0, %c0_0] : memref<32x1472xf32, #tpu.memory_space<vmem>>, vector<32x1472xf32>
    %c0_1 = arith.constant 0 : index
    %c0_2 = arith.constant 0 : index
    %1 = vector.load %arg2[%c0_1, %c0_2] : memref<1x1472xf32, #tpu.memory_space<vmem>>, vector<1x1472xf32>
    %2 = vector.broadcast %1 : vector<1x1472xf32> to vector<32x1472xf32>
    %3 = arith.mulf %0, %2 : vector<32x1472xf32>
    %c0_3 = arith.constant 0 : index
    %c0_4 = arith.constant 0 : index
    %4 = vector.load %arg3[%c0_3, %c0_4] : memref<1x1472xf32, #tpu.memory_space<vmem>>, vector<1x1472xf32>
    %5 = vector.broadcast %4 : vector<1x1472xf32> to vector<32x1472xf32>
    %6 = arith.addf %3, %5 : vector<32x1472xf32>
    %cst = arith.constant 0.000000e+00 : f32
    %7 = vector.broadcast %cst : f32 to vector<32x1472xf32>
    %8 = arith.maximumf %6, %7 : vector<32x1472xf32>
    %c0_5 = arith.constant 0 : index
    %c0_6 = arith.constant 0 : index
    %9 = vector.load %arg4[%c0_5, %c0_6] : memref<1472x256xf32, #tpu.memory_space<vmem>>, vector<1472x256xf32>
    %cst_7 = arith.constant dense<0.000000e+00> : vector<32x256xf32>
    %10 = tpu.matmul %8, %9, %cst_7 {dimension_numbers = #tpu.dot_dimension_numbers<[1], [0], [0], [1], [0, 0, 1, 1], [], []>} : vector<32x1472xf32>, vector<1472x256xf32>, vector<32x256xf32> -> vector<32x256xf32>
    %c0_8 = arith.constant 0 : index
    %c0_9 = arith.constant 0 : index
    %11 = vector.load %arg5[%c0_8, %c0_9] : memref<1x256xf32, #tpu.memory_space<vmem>>, vector<1x256xf32>
    %12 = vector.broadcast %11 : vector<1x256xf32> to vector<32x256xf32>
    %13 = arith.addf %10, %12 : vector<32x256xf32>
    %c0_10 = arith.constant 0 : index
    %c0_11 = arith.constant 0 : index
    %14 = vector.load %arg6[%c0_10, %c0_11] : memref<1x1472xf32, #tpu.memory_space<vmem>>, vector<1x1472xf32>
    %15 = vector.broadcast %14 : vector<1x1472xf32> to vector<32x1472xf32>
    %16 = arith.mulf %0, %15 : vector<32x1472xf32>
    %c0_12 = arith.constant 0 : index
    %c0_13 = arith.constant 0 : index
    %17 = vector.load %arg7[%c0_12, %c0_13] : memref<1x1472xf32, #tpu.memory_space<vmem>>, vector<1x1472xf32>
    %18 = vector.broadcast %17 : vector<1x1472xf32> to vector<32x1472xf32>
    %19 = arith.addf %16, %18 : vector<32x1472xf32>
    %cst_14 = arith.constant 0.000000e+00 : f32
    %20 = vector.broadcast %cst_14 : f32 to vector<32x1472xf32>
    %21 = arith.maximumf %19, %20 : vector<32x1472xf32>
    %c0_15 = arith.constant 0 : index
    %c0_16 = arith.constant 0 : index
    %22 = vector.load %arg8[%c0_15, %c0_16] : memref<1472x736xf32, #tpu.memory_space<vmem>>, vector<1472x736xf32>
    %cst_17 = arith.constant dense<0.000000e+00> : vector<32x736xf32>
    %23 = tpu.matmul %21, %22, %cst_17 {dimension_numbers = #tpu.dot_dimension_numbers<[1], [0], [0], [1], [0, 0, 1, 1], [], []>} : vector<32x1472xf32>, vector<1472x736xf32>, vector<32x736xf32> -> vector<32x736xf32>
    %c0_18 = arith.constant 0 : index
    %c0_19 = arith.constant 0 : index
    %24 = vector.load %arg9[%c0_18, %c0_19] : memref<1x736xf32, #tpu.memory_space<vmem>>, vector<1x736xf32>
    %25 = vector.broadcast %24 : vector<1x736xf32> to vector<32x736xf32>
    %26 = arith.addf %23, %25 : vector<32x736xf32>
    %c0_20 = arith.constant 0 : index
    %c0_21 = arith.constant 0 : index
    %27 = vector.load %arg10[%c0_20, %c0_21] : memref<1x736xf32, #tpu.memory_space<vmem>>, vector<1x736xf32>
    %28 = vector.broadcast %27 : vector<1x736xf32> to vector<32x736xf32>
    %29 = arith.mulf %26, %28 : vector<32x736xf32>
    %c0_22 = arith.constant 0 : index
    %c0_23 = arith.constant 0 : index
    %30 = vector.load %arg11[%c0_22, %c0_23] : memref<1x736xf32, #tpu.memory_space<vmem>>, vector<1x736xf32>
    %31 = vector.broadcast %30 : vector<1x736xf32> to vector<32x736xf32>
    %32 = arith.addf %29, %31 : vector<32x736xf32>
    %cst_24 = arith.constant 0.000000e+00 : f32
    %33 = vector.broadcast %cst_24 : f32 to vector<32x736xf32>
    %34 = arith.maximumf %32, %33 : vector<32x736xf32>
    %c0_25 = arith.constant 0 : index
    %c0_26 = arith.constant 0 : index
    %35 = vector.load %arg12[%c0_25, %c0_26] : memref<736x256xf32, #tpu.memory_space<vmem>>, vector<736x256xf32>
    %cst_27 = arith.constant dense<0.000000e+00> : vector<32x256xf32>
    %36 = tpu.matmul %34, %35, %cst_27 {dimension_numbers = #tpu.dot_dimension_numbers<[1], [0], [0], [1], [0, 0, 1, 1], [], []>} : vector<32x736xf32>, vector<736x256xf32>, vector<32x256xf32> -> vector<32x256xf32>
    %c0_28 = arith.constant 0 : index
    %c0_29 = arith.constant 0 : index
    %37 = vector.load %arg13[%c0_28, %c0_29] : memref<1x256xf32, #tpu.memory_space<vmem>>, vector<1x256xf32>
    %38 = vector.broadcast %37 : vector<1x256xf32> to vector<32x256xf32>
    %39 = arith.addf %36, %38 : vector<32x256xf32>
    %40 = arith.negf %39 : vector<32x256xf32>
    %41 = math.exp %40 : vector<32x256xf32>
    %cst_30 = arith.constant 1.000000e+00 : f32
    %42 = vector.broadcast %cst_30 : f32 to vector<32x256xf32>
    %43 = arith.addf %42, %41 : vector<32x256xf32>
    %44 = arith.divf %42, %43 : vector<32x256xf32>
    %45 = arith.mulf %44, %13 : vector<32x256xf32>
    %c0_31 = arith.constant 0 : index
    %c0_32 = arith.constant 0 : index
    %46 = vector.load %arg14[%c0_31, %c0_32] : memref<32x256xf32, #tpu.memory_space<vmem>>, vector<32x256xf32>
    tpu.vector_store %arg14[%c0_31, %c0_32], %45 {strides = array<i32>} : memref<32x256xf32, #tpu.memory_space<vmem>>, vector<32x256xf32>,
    return
  }
  func.func @transform_0(%arg0: i32) -> (i32, i32) {
    %c0_i32 = arith.constant 0 : i32
    %c0_i32_0 = arith.constant 0 : i32
    return %arg0, %c0_i32 : i32, i32
  }
  func.func @transform_1(%arg0: i32) -> (i32, i32) {
    %c0_i32 = arith.constant 0 : i32
    %c0_i32_0 = arith.constant 0 : i32
    %c0_i32_1 = arith.constant 0 : i32
    return %c0_i32, %c0_i32_0 : i32, i32
  }
  func.func @transform_2(%arg0: i32) -> (i32, i32) {
    %c0_i32 = arith.constant 0 : i32
    %c0_i32_0 = arith.constant 0 : i32
    %c0_i32_1 = arith.constant 0 : i32
    return %c0_i32, %c0_i32_0 : i32, i32
  }
  func.func @transform_3(%arg0: i32) -> (i32, i32) {
    %c0_i32 = arith.constant 0 : i32
    %c0_i32_0 = arith.constant 0 : i32
    %c0_i32_1 = arith.constant 0 : i32
    return %c0_i32, %c0_i32_0 : i32, i32
  }
  func.func @transform_4(%arg0: i32) -> (i32, i32) {
    %c0_i32 = arith.constant 0 : i32
    %c0_i32_0 = arith.constant 0 : i32
    %c0_i32_1 = arith.constant 0 : i32
    return %c0_i32, %c0_i32_0 : i32, i32
  }
  func.func @transform_5(%arg0: i32) -> (i32, i32) {
    %c0_i32 = arith.constant 0 : i32
    %c0_i32_0 = arith.constant 0 : i32
    %c0_i32_1 = arith.constant 0 : i32
    return %c0_i32, %c0_i32_0 : i32, i32
  }
  func.func @transform_6(%arg0: i32) -> (i32, i32) {
    %c0_i32 = arith.constant 0 : i32
    %c0_i32_0 = arith.constant 0 : i32
    %c0_i32_1 = arith.constant 0 : i32
    return %c0_i32, %c0_i32_0 : i32, i32
  }
  func.func @transform_7(%arg0: i32) -> (i32, i32) {
    %c0_i32 = arith.constant 0 : i32
    %c0_i32_0 = arith.constant 0 : i32
    %c0_i32_1 = arith.constant 0 : i32
    return %c0_i32, %c0_i32_0 : i32, i32
  }
  func.func @transform_8(%arg0: i32) -> (i32, i32) {
    %c0_i32 = arith.constant 0 : i32
    %c0_i32_0 = arith.constant 0 : i32
    %c0_i32_1 = arith.constant 0 : i32
    return %c0_i32, %c0_i32_0 : i32, i32
  }
  func.func @transform_9(%arg0: i32) -> (i32, i32) {
    %c0_i32 = arith.constant 0 : i32
    %c0_i32_0 = arith.constant 0 : i32
    %c0_i32_1 = arith.constant 0 : i32
    return %c0_i32, %c0_i32_0 : i32, i32
  }
  func.func @transform_10(%arg0: i32) -> (i32, i32) {
    %c0_i32 = arith.constant 0 : i32
    %c0_i32_0 = arith.constant 0 : i32
    %c0_i32_1 = arith.constant 0 : i32
    return %c0_i32, %c0_i32_0 : i32, i32
  }
  func.func @transform_11(%arg0: i32) -> (i32, i32) {
    %c0_i32 = arith.constant 0 : i32
    %c0_i32_0 = arith.constant 0 : i32
    %c0_i32_1 = arith.constant 0 : i32
    return %c0_i32, %c0_i32_0 : i32, i32
  }
  func.func @transform_12(%arg0: i32) -> (i32, i32) {
    %c0_i32 = arith.constant 0 : i32
    %c0_i32_0 = arith.constant 0 : i32
    %c0_i32_1 = arith.constant 0 : i32
    return %c0_i32, %c0_i32_0 : i32, i32
  }
  func.func @transform_13(%arg0: i32) -> (i32, i32) {
    %c0_i32 = arith.constant 0 : i32
    %c0_i32_0 = arith.constant 0 : i32
    return %arg0, %c0_i32 : i32, i32
  }
}

</mosaic_0001>

<bundles_post_ra>
// kernel: tpu_custom_call.1
= control target key start
LH: loop header
LB: loop body
LE: loop exit
PB: predicated region body
PF: predicated region fallthrough
CT: control target
= control target key end

     0   :  { %18 = vsyncpa [#allocation3], 0  ;;  %s8769_s0 = inlined_call_operand.hbm [shape: f32[32,1472], index: 0, kind: input, shape index: {}]   ;;  %s8770_s1 = inlined_call_operand.hbm [shape: f32[1,1472], index: 1, kind: input, shape index: {}]   ;;  %s8771_s2 = inlined_call_operand.hbm [shape: f32[1,1472], index: 2, kind: input, shape index: {}]   ;;  %s8772_s3 = inlined_call_operand.hbm [shape: f32[1472,256], index: 3, kind: input, shape index: {}]   ;;  %s8773_s4 = inlined_call_operand.hbm [shape: f32[1,256], index: 4, kind: input, shape index: {}]   ;;  %s8774_s5 = inlined_call_operand.hbm [shape: f32[1,1472], index: 5, kind: input, shape index: {}]   ;;  %s8775_s6 = inlined_call_operand.hbm [shape: f32[1,1472], index: 6, kind: input, shape index: {}]   ;;  %s8776_s7 = inlined_call_operand.hbm [shape: f32[1472,736], index: 7, kind: input, shape index: {}]   ;;  %s8777_s8 = inlined_call_operand.hbm [shape: f32[1,736], index: 8, kind: input, shape index: {}]   ;;  %s8778_s9 = inlined_call_operand.hbm [shape: f32[1,736], index: 9, kind: input, shape index: {}]   ;;  %s8779_s10 = inlined_call_operand.hbm [shape: f32[1,736], index: 10, kind: input, shape index: {}]   ;;  %s8780_s11 = inlined_call_operand.hbm [shape: f32[736,256], index: 11, kind: input, shape index: {}]   ;;  %s8781_s12 = inlined_call_operand.hbm [shape: f32[1,256], index: 12, kind: input, shape index: {}]   ;;  %s8782_s13 = inlined_call_operand.hbm [shape: f32[32,256], index: 13, kind: output, shape index: {}]  }
   0x1   :  { %19 = vsyncpa [#allocation6], 0 }
   0x2   :  { %20 = vsyncpa [#allocation9], 0 }
   0x3   :  { %21 = vsyncpa [#allocation12], 0 }
   0x4   :  { %22 = vsyncpa [#allocation15], 0 }
   0x5   :  { %23 = vsyncpa [#allocation18], 0 }
   0x6   :  { %24 = vsyncpa [#allocation21], 0 }
   0x7   :  { %25 = vsyncpa [#allocation4], 0  ;;  %s7505_s25 = smov [#allocation5]   ;;  %s7506_s27 = smov [#allocation8]  }
   0x8   :  { %s44_s26 = sshll.u32 %s7505_s25, 4  ;;  %s63_s28 = sshll.u32 %s7506_s27, 4  ;;  %s45_s26 = int_to_ptr.vmem [resolvable:$true] %s44_s26  ;;  %s7595_s28 = int_to_ptr.vmem [resolvable:$true] %s63_s28 }
   0x9   :  { %s7181_s14 = scalar_lea.hbm %s8770_s1, 192 }
   0xa   :  { %p7182_p0 = scmp.ne.s32.totalorder %s8770_s1, %s7181_s14  ;;  %p7185_p1 = scmp.lt.u32.totalorder %s7181_s14, %s8770_s1 }
   0xc   :  { %p7187_p2 = pnand %p7185_p1, %p7182_p0 }
   0xe   :  { %7190 = shalt.err (!%p7187_p2)
}
   0xf   :  { %s7191_s19 = scalar_lea.vmem %s45_s26, 192  ;;  %p7196_p4 = scmp.lt.s32.totalorder %s45_s26, %s45_s26 }
  0x10   :  { %p7192_p3 = scmp.ne.s32.totalorder %s45_s26, %s7191_s19  ;;  %p7197_p5 = scmp.lt.s32.totalorder %s7191_s19, %s7191_s19 }
  0x12   :  { %p7198_p6 = por %p7197_p5, %p7196_p4 }
  0x14   :  { %p7199_p7 = pnand %p7198_p6, %p7192_p3 }
  0x16   :  { %7202 = shalt.err (!%p7199_p7)
}
  0x17   :  { %47 = dma.hbm_to_vmem [thread:$0]  %s8770_s1, 192, %s45_s26, [#allocation6]  }
  0x18   :  { %s7203_s24 = scalar_lea.hbm %s8772_s3, 47104 }
  0x19   :  { %p7204_p8 = scmp.ne.s32.totalorder %s8772_s3, %s7203_s24  ;;  %p7207_p9 = scmp.lt.u32.totalorder %s7203_s24, %s8772_s3 }
  0x1b   :  { %p7209_p10 = pnand %p7207_p9, %p7204_p8 }
  0x1d   :  { %7212 = shalt.err (!%p7209_p10)
}
  0x1e   :  { %s7213_s14 = scalar_lea.vmem %s7595_s28, 47104  ;;  %p7218_p12 = scmp.lt.s32.totalorder %s7595_s28, %s7595_s28 }
  0x1f   :  { %p7214_p11 = scmp.ne.s32.totalorder %s7595_s28, %s7213_s14  ;;  %p7219_p13 = scmp.lt.s32.totalorder %s7213_s14, %s7213_s14 }
  0x21   :  { %p7220_p0 = por %p7219_p13, %p7218_p12 }
  0x23   :  { %p7221_p1 = pnand %p7220_p0, %p7214_p11 }
  0x25   :  { %7224 = shalt.err (!%p7221_p1)
}
  0x26   :  { %s7507_s1 = smov 256   ;;  %s7508_s26 = smov 16  }
  0x27   :  { %69 = dma.hbm_to_vmem [thread:$0]  %s8772_s3, 47104, %s7595_s28, [#allocation9], %s7507_s1, %s7507_s1, %s7508_s26  }
  0x28   :  { %s7509_s17 = smov [#allocation11]   ;;  %s7510_s19 = smov [#allocation14]  }
  0x29   :  { %s86_s18 = sshll.u32 %s7509_s17, 4  ;;  %s105_s20 = sshll.u32 %s7510_s19, 4  ;;  %s87_s18 = int_to_ptr.vmem [resolvable:$true] %s86_s18  ;;  %s7629_s20 = int_to_ptr.vmem [resolvable:$true] %s105_s20 }
  0x2a   :  { %s7225_s23 = scalar_lea.hbm %s8774_s5, 192 }
  0x2b   :  { %p7226_p2 = scmp.ne.s32.totalorder %s8774_s5, %s7225_s23  ;;  %p7229_p3 = scmp.lt.u32.totalorder %s7225_s23, %s8774_s5 }
  0x2d   :  { %p7231_p4 = pnand %p7229_p3, %p7226_p2 }
  0x2f   :  { %7234 = shalt.err (!%p7231_p4)
}
  0x30   :  { %s7235_s3 = scalar_lea.vmem %s87_s18, 192  ;;  %p7240_p6 = scmp.lt.s32.totalorder %s87_s18, %s87_s18 }
  0x31   :  { %p7236_p5 = scmp.ne.s32.totalorder %s87_s18, %s7235_s3  ;;  %p7241_p7 = scmp.lt.s32.totalorder %s7235_s3, %s7235_s3 }
  0x33   :  { %p7242_p8 = por %p7241_p7, %p7240_p6 }
  0x35   :  { %p7243_p9 = pnand %p7242_p8, %p7236_p5 }
  0x37   :  { %7246 = shalt.err (!%p7243_p9)
}
  0x38   :  { %89 = dma.hbm_to_vmem [thread:$0]  %s8774_s5, 192, %s87_s18, [#allocation12]  }
  0x39   :  { %s7247_s16 = scalar_lea.hbm %s8776_s7, 141312 }
  0x3a   :  { %p7248_p10 = scmp.ne.s32.totalorder %s8776_s7, %s7247_s16  ;;  %p7251_p11 = scmp.lt.u32.totalorder %s7247_s16, %s8776_s7 }
  0x3c   :  { %p7253_p12 = pnand %p7251_p11, %p7248_p10 }
  0x3e   :  { %7256 = shalt.err (!%p7253_p12)
}
  0x3f   :  { %s7257_s23 = scalar_lea.vmem %s7629_s20, 141312  ;;  %p7262_p0 = scmp.lt.s32.totalorder %s7629_s20, %s7629_s20 }
  0x40   :  { %p7258_p13 = scmp.ne.s32.totalorder %s7629_s20, %s7257_s23  ;;  %p7263_p1 = scmp.lt.s32.totalorder %s7257_s23, %s7257_s23 }
  0x42   :  { %p7264_p2 = por %p7263_p1, %p7262_p0 }
  0x44   :  { %p7265_p3 = pnand %p7264_p2, %p7258_p13 }
  0x46   :  { %7268 = shalt.err (!%p7265_p3)
}
  0x47   :  { %s7511_s5 = smov 768   ;;  %s7512_s18 = smov 48  }
  0x48   :  { %111 = dma.hbm_to_vmem [thread:$0]  %s8776_s7, 141312, %s7629_s20, [#allocation15], %s7511_s5, %s7511_s5, %s7512_s18  }
  0x49   :  { %s7513_s27 = smov [#allocation17]   ;;  %s7514_s3 = smov [#allocation20]  }
  0x4a   :  { %s128_s29 = sshll.u32 %s7513_s27, 4  ;;  %s147_s28 = sshll.u32 %s7514_s3, 4  ;;  %s129_s29 = int_to_ptr.vmem [resolvable:$true] %s128_s29  ;;  %s7660_s28 = int_to_ptr.vmem [resolvable:$true] %s147_s28 }
  0x4b   :  { %s7269_s15 = scalar_lea.hbm %s8778_s9, 96 }
  0x4c   :  { %p7270_p4 = scmp.ne.s32.totalorder %s8778_s9, %s7269_s15  ;;  %p7273_p5 = scmp.lt.u32.totalorder %s7269_s15, %s8778_s9 }
  0x4e   :  { %p7275_p6 = pnand %p7273_p5, %p7270_p4 }
  0x50   :  { %7278 = shalt.err (!%p7275_p6)
}
  0x51   :  { %s7279_s7 = scalar_lea.vmem %s129_s29, 96  ;;  %p7284_p8 = scmp.lt.s32.totalorder %s129_s29, %s129_s29 }
  0x52   :  { %p7280_p7 = scmp.ne.s32.totalorder %s129_s29, %s7279_s7  ;;  %p7285_p9 = scmp.lt.s32.totalorder %s7279_s7, %s7279_s7 }
  0x54   :  { %p7286_p10 = por %p7285_p9, %p7284_p8 }
  0x56   :  { %p7287_p11 = pnand %p7286_p10, %p7280_p7 }
  0x58   :  { %7290 = shalt.err (!%p7287_p11)
}
  0x59   :  { %131 = dma.hbm_to_vmem [thread:$0]  %s8778_s9, 96, %s129_s29, [#allocation18]  }
  0x5a   :  { %s7291_s18 = scalar_lea.hbm %s8780_s11, 23552 }
  0x5b   :  { %p7292_p12 = scmp.ne.s32.totalorder %s8780_s11, %s7291_s18  ;;  %p7295_p13 = scmp.lt.u32.totalorder %s7291_s18, %s8780_s11 }
  0x5d   :  { %p7297_p0 = pnand %p7295_p13, %p7292_p12 }
  0x5f   :  { %7300 = shalt.err (!%p7297_p0)
}
  0x60   :  { %s7301_s30 = scalar_lea.vmem %s7660_s28, 23552  ;;  %p7306_p2 = scmp.lt.s32.totalorder %s7660_s28, %s7660_s28 }
  0x61   :  { %p7302_p1 = scmp.ne.s32.totalorder %s7660_s28, %s7301_s30  ;;  %p7307_p3 = scmp.lt.s32.totalorder %s7301_s30, %s7301_s30 }
  0x63   :  { %p7308_p4 = por %p7307_p3, %p7306_p2 }
  0x65   :  { %p7309_p5 = pnand %p7308_p4, %p7302_p1 }
  0x67   :  { %7312 = shalt.err (!%p7309_p5)
}
  0x68   :  { %153 = dma.hbm_to_vmem [thread:$0]  %s8780_s11, 23552, %s7660_s28, [#allocation21], %s7507_s1, %s7507_s1, %s7508_s26  }
  0x69   :  { %s7515_s14 = smov [#allocation2]   ;;  %s7313_s19 = scalar_lea.hbm %s8769_s0, 6144 }
  0x6a   :  { %s31_s15 = sshll.u32 %s7515_s14, 4  ;;  %p7314_p6 = scmp.ne.s32.totalorder %s8769_s0, %s7313_s19  ;;  %s32_s15 = int_to_ptr.vmem [resolvable:$true] %s31_s15 }
  0x6b   :  { %p7317_p7 = scmp.lt.u32.totalorder %s7313_s19, %s8769_s0 }
  0x6d   :  { %p7319_p8 = pnand %p7317_p7, %p7314_p6 }
  0x6f   :  { %7322 = shalt.err (!%p7319_p8)
}
  0x70   :  { %s7323_s23 = scalar_lea.vmem %s32_s15, 6144  ;;  %p7328_p10 = scmp.lt.s32.totalorder %s32_s15, %s32_s15 }
  0x71   :  { %p7324_p9 = scmp.ne.s32.totalorder %s32_s15, %s7323_s23  ;;  %p7329_p11 = scmp.lt.s32.totalorder %s7323_s23, %s7323_s23 }
  0x73   :  { %p7330_p12 = por %p7329_p11, %p7328_p10 }
  0x75   :  { %p7331_p13 = pnand %p7330_p12, %p7324_p9 }
  0x77   :  { %7334 = shalt.err (!%p7331_p13)
}
  0x78   :  { %s7516_s11 = smov 1536   ;;  %s7517_s28 = smov 96  }
  0x79   :  { %37 = dma.hbm_to_vmem [thread:$0]  %s8769_s0, 6144, %s32_s15, [#allocation3], %s7516_s11, %s7516_s11, %s7517_s28  }
  0x7a   :  { %s7518_s24 = smov [#allocation7]   ;;  %s7519_s27 = smov [#allocation10]  }
  0x7b   :  { %s54_s25 = sshll.u32 %s7518_s24, 4  ;;  %s76_s3 = sshll.u32 %s7519_s27, 4  ;;  %s55_s25 = int_to_ptr.vmem [resolvable:$true] %s54_s25  ;;  %s77_s3 = int_to_ptr.vmem [resolvable:$true] %s76_s3 }
  0x7c   :  { %s7335_s29 = scalar_lea.hbm %s8771_s2, 192 }
  0x7d   :  { %p7336_p0 = scmp.ne.s32.totalorder %s8771_s2, %s7335_s29  ;;  %p7339_p1 = scmp.lt.u32.totalorder %s7335_s29, %s8771_s2 }
  0x7f   :  { %p7341_p2 = pnand %p7339_p1, %p7336_p0 }
  0x81   :  { %7344 = shalt.err (!%p7341_p2)
}
  0x82   :  { %s7345_s0 = scalar_lea.vmem %s55_s25, 192  ;;  %p7350_p4 = scmp.lt.s32.totalorder %s55_s25, %s55_s25 }
  0x83   :  { %p7346_p3 = scmp.ne.s32.totalorder %s55_s25, %s7345_s0  ;;  %p7351_p5 = scmp.lt.s32.totalorder %s7345_s0, %s7345_s0 }
  0x85   :  { %p7352_p6 = por %p7351_p5, %p7350_p4 }
  0x87   :  { %p7353_p7 = pnand %p7352_p6, %p7346_p3 }
  0x89   :  { %7356 = shalt.err (!%p7353_p7)
}
  0x8a   :  { %57 = dma.hbm_to_vmem [thread:$0]  %s8771_s2, 192, %s55_s25, [#allocation6]  }
  0x8b   :  { %s7357_s22 = scalar_lea.hbm %s8773_s4, 32 }
  0x8c   :  { %p7358_p8 = scmp.ne.s32.totalorder %s8773_s4, %s7357_s22  ;;  %p7361_p9 = scmp.lt.u32.totalorder %s7357_s22, %s8773_s4 }
  0x8e   :  { %p7363_p10 = pnand %p7361_p9, %p7358_p8 }
  0x90   :  { %7366 = shalt.err (!%p7363_p10)
}
  0x91   :  { %s7367_s18 = scalar_lea.vmem %s77_s3, 32  ;;  %p7372_p12 = scmp.lt.s32.totalorder %s77_s3, %s77_s3 }
  0x92   :  { %p7368_p11 = scmp.ne.s32.totalorder %s77_s3, %s7367_s18  ;;  %p7373_p13 = scmp.lt.s32.totalorder %s7367_s18, %s7367_s18 }
  0x94   :  { %p7374_p0 = por %p7373_p13, %p7372_p12 }
  0x96   :  { %p7375_p1 = pnand %p7374_p0, %p7368_p11 }
  0x98   :  { %7378 = shalt.err (!%p7375_p1)
}
  0x99   :  { %79 = dma.hbm_to_vmem [thread:$0]  %s8773_s4, 32, %s77_s3, [#allocation9]  }
  0x9a   :  { %s7520_s25 = smov [#allocation13]   ;;  %s7521_s30 = smov [#allocation16]  }
  0x9b   :  { %s96_s27 = sshll.u32 %s7520_s25, 4  ;;  %s118_s9 = sshll.u32 %s7521_s30, 4  ;;  %s97_s27 = int_to_ptr.vmem [resolvable:$true] %s96_s27  ;;  %s119_s9 = int_to_ptr.vmem [resolvable:$true] %s118_s9 }
  0x9c   :  { %s7379_s16 = scalar_lea.hbm %s8775_s6, 192 }
  0x9d   :  { %p7380_p2 = scmp.ne.s32.totalorder %s8775_s6, %s7379_s16  ;;  %p7383_p3 = scmp.lt.u32.totalorder %s7379_s16, %s8775_s6 }
  0x9f   :  { %p7385_p4 = pnand %p7383_p3, %p7380_p2 }
  0xa1   :  { %7388 = shalt.err (!%p7385_p4)
}
  0xa2   :  { %s7389_s4 = scalar_lea.vmem %s97_s27, 192  ;;  %p7394_p6 = scmp.lt.s32.totalorder %s97_s27, %s97_s27 }
  0xa3   :  { %p7390_p5 = scmp.ne.s32.totalorder %s97_s27, %s7389_s4  ;;  %p7395_p7 = scmp.lt.s32.totalorder %s7389_s4, %s7389_s4 }
  0xa5   :  { %p7396_p8 = por %p7395_p7, %p7394_p6 }
  0xa7   :  { %p7397_p9 = pnand %p7396_p8, %p7390_p5 }
  0xa9   :  { %7400 = shalt.err (!%p7397_p9)
}
  0xaa   :  { %99 = dma.hbm_to_vmem [thread:$0]  %s8775_s6, 192, %s97_s27, [#allocation12]  }
  0xab   :  { %s7401_s22 = scalar_lea.hbm %s8777_s8, 96 }
  0xac   :  { %p7402_p10 = scmp.ne.s32.totalorder %s8777_s8, %s7401_s22  ;;  %p7405_p11 = scmp.lt.u32.totalorder %s7401_s22, %s8777_s8 }
  0xae   :  { %p7407_p12 = pnand %p7405_p11, %p7402_p10 }
  0xb0   :  { %7410 = shalt.err (!%p7407_p12)
}
  0xb1   :  { %s7411_s18 = scalar_lea.vmem %s119_s9, 96  ;;  %p7416_p0 = scmp.lt.s32.totalorder %s119_s9, %s119_s9 }
  0xb2   :  { %p7412_p13 = scmp.ne.s32.totalorder %s119_s9, %s7411_s18  ;;  %p7417_p1 = scmp.lt.s32.totalorder %s7411_s18, %s7411_s18 }
  0xb4   :  { %p7418_p2 = por %p7417_p1, %p7416_p0 }
  0xb6   :  { %p7419_p3 = pnand %p7418_p2, %p7412_p13 }
  0xb8   :  { %7422 = shalt.err (!%p7419_p3)
}
  0xb9   :  { %121 = dma.hbm_to_vmem [thread:$0]  %s8777_s8, 96, %s119_s9, [#allocation15]  }
  0xba   :  { %s7522_s24 = smov [#allocation19]   ;;  %s7523_s27 = smov [#allocation22]  }
  0xbb   :  { %s138_s25 = sshll.u32 %s7522_s24, 4  ;;  %s160_s30 = sshll.u32 %s7523_s27, 4  ;;  %s139_s25 = int_to_ptr.vmem [resolvable:$true] %s138_s25  ;;  %s161_s30 = int_to_ptr.vmem [resolvable:$true] %s160_s30 }
  0xbc   :  { %s7423_s16 = scalar_lea.hbm %s8779_s10, 96 }
  0xbd   :  { %p7424_p4 = scmp.ne.s32.totalorder %s8779_s10, %s7423_s16  ;;  %p7427_p5 = scmp.lt.u32.totalorder %s7423_s16, %s8779_s10 }
  0xbf   :  { %p7429_p6 = pnand %p7427_p5, %p7424_p4 }
  0xc1   :  { %7432 = shalt.err (!%p7429_p6)
}
  0xc2   :  { %s7433_s8 = scalar_lea.vmem %s139_s25, 96  ;;  %p7438_p8 = scmp.lt.s32.totalorder %s139_s25, %s139_s25 }
  0xc3   :  { %p7434_p7 = scmp.ne.s32.totalorder %s139_s25, %s7433_s8  ;;  %p7439_p9 = scmp.lt.s32.totalorder %s7433_s8, %s7433_s8 }
  0xc5   :  { %p7440_p10 = por %p7439_p9, %p7438_p8 }
  0xc7   :  { %p7441_p11 = pnand %p7440_p10, %p7434_p7 }
  0xc9   :  { %7444 = shalt.err (!%p7441_p11)
}
  0xca   :  { %141 = dma.hbm_to_vmem [thread:$0]  %s8779_s10, 96, %s139_s25, [#allocation18]  }
  0xcb   :  { %s7445_s7 = scalar_lea.hbm %s8781_s12, 32 }
  0xcc   :  { %p7446_p12 = scmp.ne.s32.totalorder %s8781_s12, %s7445_s7  ;;  %p7449_p13 = scmp.lt.u32.totalorder %s7445_s7, %s8781_s12 }
  0xce   :  { %p7451_p0 = pnand %p7449_p13, %p7446_p12 }
  0xd0   :  { %7454 = shalt.err (!%p7451_p0)
}
  0xd1   :  { %s7455_s28 = scalar_lea.vmem %s161_s30, 32  ;;  %p7460_p2 = scmp.lt.s32.totalorder %s161_s30, %s161_s30 }
  0xd2   :  { %p7456_p1 = scmp.ne.s32.totalorder %s161_s30, %s7455_s28  ;;  %p7461_p3 = scmp.lt.s32.totalorder %s7455_s28, %s7455_s28 }
  0xd4   :  { %p7462_p4 = por %p7461_p3, %p7460_p2 }
  0xd6   :  { %p7463_p5 = pnand %p7462_p4, %p7456_p1 }
  0xd8   :  { %7466 = shalt.err (!%p7463_p5)
}
  0xd9   :  { %163 = dma.hbm_to_vmem [thread:$0]  %s8781_s12, 32, %s161_s30, [#allocation21]  }
  0xda   :  { %7489 = dma.done.wait [#allocation3], 6144  }
  0xdb   :  { %7490 = vsyncadd [#allocation3], 4294961152 }
  0xdc   :  { %7491 = dma.done.wait [#allocation6], 384  }
  0xdd   :  { %7492 = vsyncadd [#allocation6], 4294966912 }
  0xde   :  { %7493 = dma.done.wait [#allocation9], 47136  }
  0xdf   :  { %7494 = vsyncadd [#allocation9], 4294920160 }
  0xe0   :  { %7495 = dma.done.wait [#allocation12], 384  }
  0xe1   :  { %7496 = vsyncadd [#allocation12], 4294966912 }
  0xe2   :  { %7497 = dma.done.wait [#allocation15], 141408  }
  0xe3   :  { %7498 = vsyncadd [#allocation15], 4294825888 }
  0xe4   :  { %7499 = dma.done.wait [#allocation18], 192  }
  0xe5   :  { %7500 = vsyncadd [#allocation18], 4294967104 }
  0xe6   :  { %7501 = dma.done.wait [#allocation21], 23584  }
  0xe7   :  { %7502 = vsyncadd [#allocation21], 4294943712  ;;  %v524_v0 = vld [vmem:[#allocation8 + $0x8] sm:$0xff]  ;;  %v526_v1 = vld [vmem:[#allocation8 + $0x18] sm:$0xff]  ;;  %vm903_vm0 = vcmask 523264   ;;  %vm4804_vm1 = vcmask 785408  }
  0xe8   :  { %v588_v2 = vld [vmem:[#allocation8 + $0x208] sm:$0xff]  ;;  %v5199_v3 = vpack.c.bf16 %v526_v1, %v524_v0  ;;  %v590_v4 = vld [vmem:[#allocation8 + $0x218] sm:$0xff]  ;;  %v523_v5 = vld [vmem:[#allocation8] sm:$0xff]  ;;  %s7524_s12 = smov [#allocation23]  }
  0xe9   :  { %v525_v6 = vld [vmem:[#allocation8 + $0x10] sm:$0xff]  ;;  %v5263_v7 = vpack.c.bf16 %v590_v4, %v588_v2  ;;  %v587_v9 = vld [vmem:[#allocation8 + $0x200] sm:$0xff]  ;;  %v528_v11 = vld [vmem:[#allocation8 + $0x28] sm:$0xff]  ;;  %s5153_s18 = sshll.u32 %s7524_s12, 4  ;;  %s5154_s18 = int_to_ptr.vmem [resolvable:$true] %s5153_s18 }
  0xea   :  { %v5201_v8 = vpack.c.bf16 %v525_v6, %v523_v5  ;;  %v589_v10 = vld [vmem:[#allocation8 + $0x210] sm:$0xff]  ;;  %5200 = vmatprep.subr.bf16.mxu1 %v5199_v3  ;;  %v530_v13 = vld [vmem:[#allocation8 + $0x38] sm:$0xff]  ;;  %v592_v14 = vld [vmem:[#allocation8 + $0x228] sm:$0xff]  ;;  %s7467_s6 = scalar_lea.vmem %s5154_s18, 1024  ;;  %p7472_p7 = scmp.lt.s32.totalorder %s5154_s18, %s5154_s18 }
  0xeb   :  { %v5265_v12 = vpack.c.bf16 %v589_v10, %v587_v9  ;;  %v594_v15 = vld [vmem:[#allocation8 + $0x238] sm:$0xff]  ;;  %5264 = vmatprep.subr.bf16.mxu0 %v5263_v7  ;;  %v5203_v16 = vpack.c.bf16 %v530_v13, %v528_v11  ;;  %v527_v18 = vld [vmem:[#allocation8 + $0x20] sm:$0xff]  ;;  %v529_v19 = vld [vmem:[#allocation8 + $0x30] sm:$0xff]  ;;  %p7468_p6 = scmp.ne.s32.totalorder %s5154_s18, %s7467_s6  ;;  %p7473_p8 = scmp.lt.s32.totalorder %s7467_s6, %s7467_s6 }
  0xec   :  { %5202 = vmatpush1.bf16.msra.mxu1 %v5201_v8  ;;  %v5267_v17 = vpack.c.bf16 %v594_v15, %v592_v14  ;;  %v591_v20 = vld [vmem:[#allocation8 + $0x220] sm:$0xff]  ;;  %v5205_v21 = vpack.c.bf16 %v529_v19, %v527_v18  ;;  %v593_v22 = vld [vmem:[#allocation8 + $0x230] sm:$0xff]  ;;  %v532_v23 = vld [vmem:[#allocation8 + $0x48] sm:$0xff] }
  0xed   :  { %5266 = vmatpush1.bf16.msra.mxu0 %v5265_v12  ;;  %v534_v24 = vld [vmem:[#allocation8 + $0x58] sm:$0xff]  ;;  %5204 = vmatprep.subr.bf16.mxu1 %v5203_v16  ;;  %v5269_v25 = vpack.c.bf16 %v593_v22, %v591_v20  ;;  %v596_v27 = vld [vmem:[#allocation8 + $0x248] sm:$0xff]  ;;  %v531_v29 = vld [vmem:[#allocation8 + $0x40] sm:$0xff]  ;;  %p7474_p9 = por %p7473_p8, %p7472_p7 }
  0xee   :  { %5268 = vmatprep.subr.bf16.mxu0 %v5267_v17  ;;  %v5207_v26 = vpack.c.bf16 %v534_v24, %v532_v23  ;;  %v598_v28 = vld [vmem:[#allocation8 + $0x258] sm:$0xff]  ;;  %v533_v31 = vld [vmem:[#allocation8 + $0x50] sm:$0xff]  ;;  %v595_v32 = vld [vmem:[#allocation8 + $0x240] sm:$0xff] }
  0xef   :  { %v5271_v30 = vpack.c.bf16 %v598_v28, %v596_v27  ;;  %v597_v33 = vld [vmem:[#allocation8 + $0x250] sm:$0xff]  ;;  %v5209_v34 = vpack.c.bf16 %v533_v31, %v531_v29  ;;  %v536_v35 = vld [vmem:[#allocation8 + $0x68] sm:$0xff]  ;;  %v538_v36 = vld [vmem:[#allocation8 + $0x78] sm:$0xff]  ;;  %p7475_p10 = pnand %p7474_p9, %p7468_p6 }
  0xf0   :  { %5206 = vmatpush1.bf16.msra.mxu1 %v5205_v21  ;;  %v600_v37 = vld [vmem:[#allocation8 + $0x268] sm:$0xff]  ;;  %v5273_v38 = vpack.c.bf16 %v597_v33, %v595_v32  ;;  %v5211_v39 = vpack.c.bf16 %v538_v36, %v536_v35  ;;  %v602_v40 = vld [vmem:[#allocation8 + $0x278] sm:$0xff]  ;;  %v535_v41 = vld [vmem:[#allocation8 + $0x60] sm:$0xff] }
  0xf1   :  { %5270 = vmatpush1.bf16.msra.mxu0 %v5269_v25  ;;  %5208 = vmatprep.subr.bf16.mxu1 %v5207_v26  ;;  %v537_v42 = vld [vmem:[#allocation8 + $0x70] sm:$0xff]  ;;  %v5275_v43 = vpack.c.bf16 %v602_v40, %v600_v37  ;;  %v599_v44 = vld [vmem:[#allocation8 + $0x260] sm:$0xff]  ;;  %v540_v46 = vld [vmem:[#allocation8 + $0x88] sm:$0xff] }
  0xf2   :  { %5272 = vmatprep.subr.bf16.mxu0 %v5271_v30  ;;  %v601_v45 = vld [vmem:[#allocation8 + $0x270] sm:$0xff]  ;;  %v542_v47 = vld [vmem:[#allocation8 + $0x98] sm:$0xff]  ;;  %v604_v48 = vld [vmem:[#allocation8 + $0x288] sm:$0xff]  ;;  %v5213_v50 = vpack.c.bf16 %v537_v42, %v535_v41 }
  0xf3   :  { %v606_v49 = vld [vmem:[#allocation8 + $0x298] sm:$0xff]  ;;  %v5277_v51 = vpack.c.bf16 %v601_v45, %v599_v44  ;;  %v5215_v52 = vpack.c.bf16 %v542_v47, %v540_v46  ;;  %v539_v53 = vld [vmem:[#allocation8 + $0x80] sm:$0xff]  ;;  %v541_v54 = vld [vmem:[#allocation8 + $0x90] sm:$0xff]  ;;  %v255_v47 = vlaneseq }
  0xf4   :  { %5210 = vmatpush1.bf16.msra.mxu1 %v5209_v34  ;;  %v603_v55 = vld [vmem:[#allocation8 + $0x280] sm:$0xff]  ;;  %v5279_v56 = vpack.c.bf16 %v606_v49, %v604_v48  ;;  %v605_v57 = vld [vmem:[#allocation8 + $0x290] sm:$0xff]  ;;  %v544_v58 = vld [vmem:[#allocation8 + $0xa8] sm:$0xff]  ;;  %v5217_v62 = vpack.c.bf16 %v541_v54, %v539_v53 }
  0xf5   :  { %5274 = vmatpush1.bf16.msra.mxu0 %v5273_v38  ;;  %5212 = vmatprep.subr.bf16.mxu1 %v5211_v39  ;;  %v546_v59 = vld [vmem:[#allocation8 + $0xb8] sm:$0xff]  ;;  %v608_v60 = vld [vmem:[#allocation8 + $0x2a8] sm:$0xff]  ;;  %v5281_v63 = vpack.c.bf16 %v605_v57, %v603_v55  ;;  %v543_v1 = vld [vmem:[#allocation8 + $0xa0] sm:$0xff] }
  0xf6   :  { %5276 = vmatprep.subr.bf16.mxu0 %v5275_v43  ;;  %v610_v61 = vld [vmem:[#allocation8 + $0x2b8] sm:$0xff]  ;;  %v5219_v0 = vpack.c.bf16 %v546_v59, %v544_v58  ;;  %v545_v2 = vld [vmem:[#allocation8 + $0xb0] sm:$0xff]  ;;  %v607_v3 = vld [vmem:[#allocation8 + $0x2a0] sm:$0xff] }
  0xf7   :  { %v5283_v4 = vpack.c.bf16 %v610_v61, %v608_v60  ;;  %v609_v5 = vld [vmem:[#allocation8 + $0x2b0] sm:$0xff]  ;;  %v548_v6 = vld [vmem:[#allocation8 + $0xc8] sm:$0xff]  ;;  %v550_v7 = vld [vmem:[#allocation8 + $0xd8] sm:$0xff]  ;;  %v5221_v10 = vpack.c.bf16 %v545_v2, %v543_v1  ;;  %v7778_v60 = vshrl.u32 %v255_v47, 7 }
  0xf8   :  { %5214 = vmatpush1.bf16.msra.mxu1 %v5213_v50  ;;  %v612_v8 = vld [vmem:[#allocation8 + $0x2c8] sm:$0xff]  ;;  %v614_v9 = vld [vmem:[#allocation8 + $0x2d8] sm:$0xff]  ;;  %v5285_v11 = vpack.c.bf16 %v609_v5, %v607_v3  ;;  %v5223_v12 = vpack.c.bf16 %v550_v7, %v548_v6  ;;  %v547_v13 = vld [vmem:[#allocation8 + $0xc0] sm:$0xff] }
  0xf9   :  { %5278 = vmatpush1.bf16.msra.mxu0 %v5277_v51  ;;  %5216 = vmatprep.subr.bf16.mxu1 %v5215_v52  ;;  %v549_v14 = vld [vmem:[#allocation8 + $0xd0] sm:$0xff]  ;;  %v611_v15 = vld [vmem:[#allocation8 + $0x2c0] sm:$0xff]  ;;  %v5287_v16 = vpack.c.bf16 %v614_v9, %v612_v8  ;;  %v552_v18 = vld [vmem:[#allocation8 + $0xe8] sm:$0xff]  ;;  %v7816_v47 = vsub.s32 2, %v7778_v60 }
  0xfa   :  { %5280 = vmatprep.subr.bf16.mxu0 %v5279_v56  ;;  %v613_v17 = vld [vmem:[#allocation8 + $0x2d0] sm:$0xff]  ;;  %v554_v19 = vld [vmem:[#allocation8 + $0xf8] sm:$0xff]  ;;  %v616_v20 = vld [vmem:[#allocation8 + $0x2e8] sm:$0xff]  ;;  %v5225_v22 = vpack.c.bf16 %v549_v14, %v547_v13 }
  0xfb   :  { %v618_v21 = vld [vmem:[#allocation8 + $0x2f8] sm:$0xff]  ;;  %v5289_v23 = vpack.c.bf16 %v613_v17, %v611_v15  ;;  %v5227_v24 = vpack.c.bf16 %v554_v19, %v552_v18  ;;  %v551_v25 = vld [vmem:[#allocation8 + $0xe0] sm:$0xff]  ;;  %v553_v26 = vld [vmem:[#allocation8 + $0xf0] sm:$0xff]  ;;  %8806 = vst [vmem:[#allocation33_spill] sm:$0xff] %v7816_v47 }
  0xfc   :  { %5218 = vmatpush1.bf16.msra.mxu1 %v5217_v62  ;;  %v615_v27 = vld [vmem:[#allocation8 + $0x2e0] sm:$0xff]  ;;  %v5291_v28 = vpack.c.bf16 %v618_v21, %v616_v20  ;;  %v617_v29 = vld [vmem:[#allocation8 + $0x2f0] sm:$0xff]  ;;  %v556_v30 = vld [vmem:[#allocation8 + $0x108] sm:$0xff]  ;;  %v5229_v34 = vpack.c.bf16 %v553_v26, %v551_v25  ;;  %v7784_v21 = vsub.s32 3, %v7778_v60 }
  0xfd   :  { %5282 = vmatpush1.bf16.msra.mxu0 %v5281_v63  ;;  %5220 = vmatprep.subr.bf16.mxu1 %v5219_v0  ;;  %v558_v31 = vld [vmem:[#allocation8 + $0x118] sm:$0xff]  ;;  %v620_v32 = vld [vmem:[#allocation8 + $0x308] sm:$0xff]  ;;  %v5293_v35 = vpack.c.bf16 %v617_v29, %v615_v27  ;;  %v555_v37 = vld [vmem:[#allocation8 + $0x100] sm:$0xff] }
  0xfe   :  { %5284 = vmatprep.subr.bf16.mxu0 %v5283_v4  ;;  %v622_v33 = vld [vmem:[#allocation8 + $0x318] sm:$0xff]  ;;  %v5231_v36 = vpack.c.bf16 %v558_v31, %v556_v30  ;;  %v557_v38 = vld [vmem:[#allocation8 + $0x110] sm:$0xff]  ;;  %v619_v39 = vld [vmem:[#allocation8 + $0x300] sm:$0xff]  ;;  %8805 = vst [vmem:[#allocation32_spill] sm:$0xff] %v7784_v21 }
  0xff   :  { %v5295_v40 = vpack.c.bf16 %v622_v33, %v620_v32  ;;  %v621_v41 = vld [vmem:[#allocation8 + $0x310] sm:$0xff]  ;;  %v560_v42 = vld [vmem:[#allocation8 + $0x128] sm:$0xff]  ;;  %v562_v43 = vld [vmem:[#allocation8 + $0x138] sm:$0xff]  ;;  %v5233_v46 = vpack.c.bf16 %v557_v38, %v555_v37 }
 0x100   :  { %5222 = vmatpush1.bf16.msra.mxu1 %v5221_v10  ;;  %v624_v44 = vld [vmem:[#allocation8 + $0x328] sm:$0xff]  ;;  %v626_v45 = vld [vmem:[#allocation8 + $0x338] sm:$0xff]  ;;  %v5297_v48 = vpack.c.bf16 %v621_v41, %v619_v39  ;;  %v5235_v49 = vpack.c.bf16 %v562_v43, %v560_v42  ;;  %v559_v50 = vld [vmem:[#allocation8 + $0x120] sm:$0xff]  ;;  %v7807_v42 = vsub.s32 0, %v7778_v60 }
 0x101   :  { %5286 = vmatpush1.bf16.msra.mxu0 %v5285_v11  ;;  %5224 = vmatprep.subr.bf16.mxu1 %v5223_v12  ;;  %v561_v51 = vld [vmem:[#allocation8 + $0x130] sm:$0xff]  ;;  %v623_v52 = vld [vmem:[#allocation8 + $0x320] sm:$0xff]  ;;  %v5299_v53 = vpack.c.bf16 %v626_v45, %v624_v44  ;;  %v564_v55 = vld [vmem:[#allocation8 + $0x148] sm:$0xff]  ;;  %v7781_v11 = vsub.s32 1, %v7778_v60 }
 0x102   :  { %5288 = vmatprep.subr.bf16.mxu0 %v5287_v16  ;;  %v625_v54 = vld [vmem:[#allocation8 + $0x330] sm:$0xff]  ;;  %v566_v56 = vld [vmem:[#allocation8 + $0x158] sm:$0xff]  ;;  %v628_v57 = vld [vmem:[#allocation8 + $0x348] sm:$0xff]  ;;  %v5237_v59 = vpack.c.bf16 %v561_v51, %v559_v50 }
 0x103   :  { %v630_v58 = vld [vmem:[#allocation8 + $0x358] sm:$0xff]  ;;  %v5301_v61 = vpack.c.bf16 %v625_v54, %v623_v52  ;;  %v5239_v62 = vpack.c.bf16 %v566_v56, %v564_v55  ;;  %v563_v63 = vld [vmem:[#allocation8 + $0x140] sm:$0xff]  ;;  %v565_v0 = vld [vmem:[#allocation8 + $0x150] sm:$0xff] }
 0x104   :  { %5226 = vmatpush1.bf16.msra.mxu1 %v5225_v22  ;;  %v627_v1 = vld [vmem:[#allocation8 + $0x340] sm:$0xff]  ;;  %v5303_v2 = vpack.c.bf16 %v630_v58, %v628_v57  ;;  %v629_v3 = vld [vmem:[#allocation8 + $0x350] sm:$0xff]  ;;  %v568_v4 = vld [vmem:[#allocation8 + $0x168] sm:$0xff]  ;;  %v5241_v8 = vpack.c.bf16 %v565_v0, %v563_v63 }
 0x105   :  { %5290 = vmatpush1.bf16.msra.mxu0 %v5289_v23  ;;  %5228 = vmatprep.subr.bf16.mxu1 %v5227_v24  ;;  %v570_v5 = vld [vmem:[#allocation8 + $0x178] sm:$0xff]  ;;  %v632_v6 = vld [vmem:[#allocation8 + $0x368] sm:$0xff]  ;;  %v567_v9 = vld [vmem:[#allocation8 + $0x160] sm:$0xff]  ;;  %v5305_v12 = vpack.c.bf16 %v629_v3, %v627_v1 }
 0x106   :  { %5292 = vmatprep.subr.bf16.mxu0 %v5291_v28  ;;  %v634_v7 = vld [vmem:[#allocation8 + $0x378] sm:$0xff]  ;;  %v569_v10 = vld [vmem:[#allocation8 + $0x170] sm:$0xff]  ;;  %v5243_v13 = vpack.c.bf16 %v570_v5, %v568_v4  ;;  %v631_v14 = vld [vmem:[#allocation8 + $0x360] sm:$0xff] }
 0x107   :  { %v633_v15 = vld [vmem:[#allocation8 + $0x370] sm:$0xff]  ;;  %v572_v16 = vld [vmem:[#allocation8 + $0x188] sm:$0xff]  ;;  %v5307_v17 = vpack.c.bf16 %v634_v7, %v632_v6  ;;  %v574_v18 = vld [vmem:[#allocation8 + $0x198] sm:$0xff]  ;;  %v5245_v25 = vpack.c.bf16 %v569_v10, %v567_v9 }
 0x108   :  { %5230 = vmatpush1.bf16.msra.mxu1 %v5229_v34  ;;  %v636_v19 = vld [vmem:[#allocation8 + $0x388] sm:$0xff]  ;;  %v638_v20 = vld [vmem:[#allocation8 + $0x398] sm:$0xff]  ;;  %v7786_v22 = vld [vmem:[#allocation2 + $0x8] sm:$0xff]  ;;  %v5309_v29 = vpack.c.bf16 %v633_v15, %v631_v14  ;;  %v5247_v30 = vpack.c.bf16 %v574_v18, %v572_v16 }
 0x109   :  { %5294 = vmatpush1.bf16.msra.mxu0 %v5293_v35  ;;  %5232 = vmatprep.subr.bf16.mxu1 %v5231_v36  ;;  %v7788_v23 = vld [vmem:[#allocation5] sm:$0xff]  ;;  %v7790_v24 = vld [vmem:[#allocation7] sm:$0xff]  ;;  %v571_v26 = vld [vmem:[#allocation8 + $0x180] sm:$0xff]  ;;  %v5311_v34 = vpack.c.bf16 %v638_v20, %v636_v19 }
 0x10a   :  { %5296 = vmatprep.subr.bf16.mxu0 %v5295_v40  ;;  %v7794_v27 = vrot.slane %v7788_v23, %v7781_v11  ;;  %v7798_v28 = vrot.slane %v7790_v24, %v7781_v11  ;;  %v573_v31 = vld [vmem:[#allocation8 + $0x190] sm:$0xff]  ;;  %v635_v32 = vld [vmem:[#allocation8 + $0x380] sm:$0xff]  ;;  %v576_v36 = vld [vmem:[#allocation8 + $0x1a8] sm:$0xff]  ;;  %v7804_v39 = vrot.slane %v7788_v23, %v7784_v21  ;;  %v7811_v43 = vrot.slane %v7790_v24, %v7784_v21 }
 0x10b   :  { %v206_v33 = vld [vmem:[#allocation2 + $0x18] sm:$0xff]  ;;  %v637_v35 = vld [vmem:[#allocation8 + $0x390] sm:$0xff]  ;;  %v578_v37 = vld [vmem:[#allocation8 + $0x1b8] sm:$0xff]  ;;  %v5249_v44 = vpack.c.bf16 %v573_v31, %v571_v26  ;;  %v7825_v3 = vrot.slane %v7788_v23, %v7816_v47  ;;  %v7835_v20 = vrot.slane %v7790_v24, %v7816_v47 }
 0x10c   :  { %5234 = vmatpush1.bf16.msra.mxu1 %v5233_v46  ;;  %v316_v38 = vmul.f32 %v7794_v27, %v7786_v22  ;;  %v640_v40 = vld [vmem:[#allocation8 + $0x3a8] sm:$0xff]  ;;  %v642_v41 = vld [vmem:[#allocation8 + $0x3b8] sm:$0xff]  ;;  %v318_v46 = vmul.f32 %v7804_v39, %v206_v33  ;;  %v575_v50 = vld [vmem:[#allocation8 + $0x1a0] sm:$0xff] }
 0x10d   :  { %5298 = vmatpush1.bf16.msra.mxu0 %v5297_v48  ;;  %5236 = vmatprep.subr.bf16.mxu1 %v5235_v49  ;;  %v5313_v48 = vpack.c.bf16 %v637_v35, %v635_v32  ;;  %v5251_v49 = vpack.c.bf16 %v578_v37, %v576_v36  ;;  %v577_v51 = vld [vmem:[#allocation8 + $0x1b0] sm:$0xff]  ;;  %v639_v52 = vld [vmem:[#allocation8 + $0x3a0] sm:$0xff]  ;;  %v580_v55 = vld [vmem:[#allocation8 + $0x1c8] sm:$0xff] }
 0x10e   :  { %5300 = vmatprep.subr.bf16.mxu0 %v5299_v53  ;;  %v428_v45 = vadd.f32 %v7798_v28, %v316_v38  ;;  %v5315_v53 = vpack.c.bf16 %v642_v41, %v640_v40  ;;  %v641_v54 = vld [vmem:[#allocation8 + $0x3b0] sm:$0xff]  ;;  %v582_v56 = vld [vmem:[#allocation8 + $0x1d8] sm:$0xff]  ;;  %v430_v58 = vadd.f32 %v7811_v43, %v318_v46  ;;  %v5253_v63 = vpack.c.bf16 %v577_v51, %v575_v50  ;;  %v579_v0 = vld [vmem:[#allocation8 + $0x1c0] sm:$0xff] }
 0x10f   :  { %v203_v1 = vld [vmem:[#allocation2] sm:$0xff]  ;;  %v5317_v4 = vpack.c.bf16 %v641_v54, %v639_v52  ;;  %v5255_v5 = vpack.c.bf16 %v582_v56, %v580_v55  ;;  %v581_v6 = vld [vmem:[#allocation8 + $0x1d0] sm:$0xff]  ;;  %v643_v7 = vld [vmem:[#allocation8 + $0x3c0] sm:$0xff] }
 0x110   :  { %5238 = vmatpush1.bf16.msra.mxu1 %v5237_v59  ;;  %v476_v57 = vmax.f32 %v428_v45, 0.0  ;;  %v644_v59 = vld [vmem:[#allocation8 + $0x3c8] sm:$0xff]  ;;  %v645_v10 = vld [vmem:[#allocation8 + $0x3d0] sm:$0xff]  ;;  %v650_v15 = vld [vmem:[#allocation8 + $0x3f8] sm:$0xff]  ;;  %v5257_v18 = vpack.c.bf16 %v581_v6, %v579_v0 }
 0x111   :  { %5302 = vmatpush1.bf16.msra.mxu0 %v5301_v61  ;;  %5240 = vmatprep.subr.bf16.mxu1 %v5239_v62  ;;  %v646_v61 = vld [vmem:[#allocation8 + $0x3d8] sm:$0xff]  ;;  %v7821_v62 = vrot.slane %v7788_v23, %v7807_v42  ;;  %v648_v14 = vld [vmem:[#allocation8 + $0x3e8] sm:$0xff]  ;;  %v647_v31 = vld [vmem:[#allocation8 + $0x3e0] sm:$0xff] }
 0x112   :  { %5304 = vmatprep.subr.bf16.mxu0 %v5303_v2  ;;  %980 = vmatprep.mubr.f32.mxu1 %v476_v57  ;;  %v478_v2 = vmax.f32 %v430_v58, 0.0  ;;  %v5319_v9 = vpack.c.bf16 %v646_v61, %v644_v59  ;;  %v5323_v32 = vpack.c.bf16 %v650_v15, %v648_v14  ;;  %v649_v33 = vld [vmem:[#allocation8 + $0x3f0] sm:$0xff]  ;;  %v846_v35 = vld [vmem:[#allocation8 + $0xa18] sm:$0xff]  ;;  %v652_v37 = vld [vmem:[#allocation8 + $0x408] sm:$0xff] }
 0x113   :  { %v315_v16 = vmul.f32 %v7821_v62, %v203_v1  ;;  %v654_v38 = vld [vmem:[#allocation8 + $0x418] sm:$0xff]  ;;  %v651_v46 = vld [vmem:[#allocation8 + $0x400] sm:$0xff]  ;;  %v653_v51 = vld [vmem:[#allocation8 + $0x410] sm:$0xff] }
 0x114   :  { %5242 = vmatpush1.bf16.msra.mxu1 %v5241_v8  ;;  %v205_v8 = vld [vmem:[#allocation2 + $0x10] sm:$0xff]  ;;  %1069 = vmatprep.mubr.f32.mxu0 %v478_v2  ;;  %v5327_v50 = vpack.c.bf16 %v654_v38, %v652_v37  ;;  %v848_v52 = vld [vmem:[#allocation8 + $0xa28] sm:$0xff]  ;;  %v5329_v59 = vpack.c.bf16 %v653_v51, %v651_v46  ;;  %v847_v0 = vld [vmem:[#allocation8 + $0xa20] sm:$0xff] }
 0x115   :  { %5306 = vmatpush1.bf16.msra.mxu0 %v5305_v12  ;;  %5244 = vmatprep.subr.bf16.mxu1 %v5243_v13  ;;  %v584_v12 = vld [vmem:[#allocation8 + $0x1e8] sm:$0xff]  ;;  %v586_v13 = vld [vmem:[#allocation8 + $0x1f8] sm:$0xff]  ;;  %v317_v19 = vmul.f32 %v7825_v3, %v205_v8  ;;  %v849_v1 = vld [vmem:[#allocation8 + $0xa30] sm:$0xff] }
 0x116   :  { %5308 = vmatprep.subr.bf16.mxu0 %v5307_v17  ;;  %v7830_v17 = vrot.slane %v7790_v24, %v7807_v42  ;;  %v5259_v26 = vpack.c.bf16 %v586_v13, %v584_v12  ;;  %v656_v55 = vld [vmem:[#allocation8 + $0x428] sm:$0xff]  ;;  %v658_v56 = vld [vmem:[#allocation8 + $0x438] sm:$0xff]  ;;  %v851_v12 = vld [vmem:[#allocation8 + $0xa40] sm:$0xff] }
 0x117   :  { %v429_v41 = vadd.f32 %v7835_v20, %v317_v19  ;;  %v5331_v2 = vpack.c.bf16 %v658_v56, %v656_v55  ;;  %v854_v6 = vld [vmem:[#allocation8 + $0xa58] sm:$0xff]  ;;  %v853_v15 = vld [vmem:[#allocation8 + $0xa50] sm:$0xff]  ;;  %v860_v51 = vld [vmem:[#allocation8 + $0xa88] sm:$0xff] }
 0x118   :  { %5246 = vmatpush1.bf16.msra.mxu1 %v5245_v25  ;;  %v5321_v25 = vpack.c.bf16 %v645_v10, %v643_v7  ;;  %v427_v36 = vadd.f32 %v7830_v17, %v315_v16  ;;  %v660_v7 = vld [vmem:[#allocation8 + $0x448] sm:$0xff]  ;;  %v662_v8 = vld [vmem:[#allocation8 + $0x458] sm:$0xff]  ;;  %v659_v10 = vld [vmem:[#allocation8 + $0x440] sm:$0xff] }
 0x119   :  { %5310 = vmatpush1.bf16.msra.mxu0 %v5309_v29  ;;  %5248 = vmatprep.subr.bf16.mxu1 %v5247_v30  ;;  %v583_v29 = vld [vmem:[#allocation8 + $0x1e0] sm:$0xff]  ;;  %v585_v30 = vld [vmem:[#allocation8 + $0x1f0] sm:$0xff]  ;;  %v477_v57 = vmax.f32 %v429_v41, 0.0  ;;  %v5335_v19 = vpack.c.bf16 %v662_v8, %v660_v7  ;;  %v668_v56 = vld [vmem:[#allocation8 + $0x488] sm:$0xff] }
 0x11a   :  { %5312 = vmatprep.subr.bf16.mxu0 %v5311_v34  ;;  %v844_v34 = vld [vmem:[#allocation8 + $0xa08] sm:$0xff]  ;;  %v5261_v40 = vpack.c.bf16 %v585_v30, %v583_v29  ;;  %v475_v54 = vmax.f32 %v427_v36, 0.0  ;;  %v216_v16 = vld [vmem:[#allocation2 + $0x68] sm:$0xff]  ;;  %v858_v29 = vld [vmem:[#allocation8 + $0xa78] sm:$0xff] }
 0x11b   :  { %v5519_v45 = vpack.c.bf16 %v846_v35, %v844_v34  ;;  %v328_v30 = vmul.f32 %v7794_v27, %v216_v16  ;;  %v5529_v34 = vpack.c.bf16 %v853_v15, %v851_v12  ;;  %v663_v35 = vld [vmem:[#allocation8 + $0x460] sm:$0xff]  ;;  %v665_v36 = vld [vmem:[#allocation8 + $0x470] sm:$0xff]  ;;  %v866_v15 = vld [vmem:[#allocation8 + $0xab8] sm:$0xff] }
 0x11c   :  { %5250 = vmatpush1.bf16.msra.mxu1 %v5249_v44  ;;  %v5325_v44 = vpack.c.bf16 %v649_v33, %v647_v31  ;;  %v666_v33 = vld [vmem:[#allocation8 + $0x478] sm:$0xff]  ;;  %v857_v46 = vld [vmem:[#allocation8 + $0xa70] sm:$0xff] }
 0x11d   :  { %5314 = vmatpush1.bf16.msra.mxu0 %v5313_v48  ;;  %5252 = vmatprep.subr.bf16.mxu1 %v5251_v49  ;;  %v843_v48 = vld [vmem:[#allocation8 + $0xa00] sm:$0xff]  ;;  %v845_v49 = vld [vmem:[#allocation8 + $0xa10] sm:$0xff]  ;;  %v440_v37 = vadd.f32 %v7798_v28, %v328_v30  ;;  %v7857_v30 = vld [vmem:[#allocation7 + $0x8] sm:$0xf] }
 0x11e   :  { %5316 = vmatprep.subr.bf16.mxu0 %v5315_v53  ;;  %v850_v53 = vld [vmem:[#allocation8 + $0xa38] sm:$0xff]  ;;  %v5521_v58 = vpack.c.bf16 %v845_v49, %v843_v48  ;;  %v227_v49 = vld [vmem:[#allocation2 + $0xc0] sm:$0xff]  ;;  %v861_v7 = vld [vmem:[#allocation8 + $0xa90] sm:$0xff] }
 0x11f   :  { %v5523_v61 = vpack.c.bf16 %v850_v53, %v848_v52  ;;  %v862_v52 = vld [vmem:[#allocation8 + $0xa98] sm:$0xff]  ;;  %v488_v53 = vmax.f32 %v440_v37, 0.0  ;;  %v339_v55 = vmul.f32 %v7821_v62, %v227_v49  ;;  %v673_v37 = vld [vmem:[#allocation8 + $0x4b0] sm:$0xff] }
 0x120   :  { %5254 = vmatpush1.bf16.msra.mxu1 %v5253_v63  ;;  %v655_v63 = vld [vmem:[#allocation8 + $0x420] sm:$0xff] }
 0x121   :  { %5318 = vmatpush1.bf16.msra.mxu0 %v5317_v4  ;;  %5256 = vmatprep.subr.bf16.mxu1 %v5255_v5  ;;  %v657_v4 = vld [vmem:[#allocation8 + $0x430] sm:$0xff]  ;;  %v852_v5 = vld [vmem:[#allocation8 + $0xa48] sm:$0xff] }
 0x122   :  { %5320 = vmatprep.subr.bf16.mxu0 %v5319_v9  ;;  %v5525_v9 = vpack.c.bf16 %v849_v1, %v847_v0  ;;  %v5333_v13 = vpack.c.bf16 %v657_v4, %v655_v63  ;;  %v5527_v14 = vpack.c.bf16 %v854_v6, %v852_v5  ;;  %v667_v63 = vld [vmem:[#allocation8 + $0x480] sm:$0xff]  ;;  %v451_v0 = vadd.f32 %v7830_v17, %v339_v55  ;;  %v240_v1 = vld [vmem:[#allocation2 + $0x128] sm:$0xff] }
 0x123   :  { %v5535_v4 = vpack.c.bf16 %v862_v52, %v860_v51  ;;  %v669_v5 = vld [vmem:[#allocation8 + $0x490] sm:$0xff]  ;;  %v859_v6 = vld [vmem:[#allocation8 + $0xa80] sm:$0xff] }
 0x124   :  { %5258 = vmatpush1.bf16.msra.mxu1 %v5257_v18  ;;  %v215_v18 = vld [vmem:[#allocation2 + $0x60] sm:$0xff]  ;;  %v499_v16 = vmax.f32 %v451_v0, 0.0  ;;  %v7866_v51 = vld [vmem:[#allocation8 + $0x4d0] sm:$0xff]  ;;  %v874_v0 = vld [vmem:[#allocation8 + $0xaf8] sm:$0xff] }
 0x125   :  { %5322 = vmatpush1.bf16.msra.mxu0 %v5321_v25  ;;  %5260 = vmatprep.subr.bf16.mxu1 %v5259_v26  ;;  %v661_v25 = vld [vmem:[#allocation8 + $0x450] sm:$0xff]  ;;  %v856_v26 = vld [vmem:[#allocation8 + $0xa68] sm:$0xff]  ;;  %v327_v31 = vmul.f32 %v7821_v62, %v215_v18  ;;  %v674_v18 = vld [vmem:[#allocation8 + $0x4b8] sm:$0xff] }
 0x126   :  { %5324 = vmatprep.subr.bf16.mxu0 %v5323_v32  ;;  %v664_v32 = vld [vmem:[#allocation8 + $0x468] sm:$0xff]  ;;  %v5337_v41 = vpack.c.bf16 %v661_v25, %v659_v10 }
 0x127   :  { %v439_v38 = vadd.f32 %v7830_v17, %v327_v31  ;;  %v5345_v31 = vpack.c.bf16 %v669_v5, %v667_v63  ;;  %v872_v63 = vld [vmem:[#allocation8 + $0xae8] sm:$0xff]  ;;  %v230_v5 = vld [vmem:[#allocation2 + $0xd8] sm:$0xff] }
 0x128   :  { %5262 = vmatpush1.bf16.msra.mxu1 %v5261_v40  ;;  %v228_v40 = vld [vmem:[#allocation2 + $0xc8] sm:$0xff] }
 0x129   :  { %5326 = vmatpush1.bf16.msra.mxu0 %v5325_v44  ;;  %5520 = vmatprep.subr.bf16.mxu1 %v5519_v45  ;;  %v5531_v44 = vpack.c.bf16 %v858_v29, %v856_v26  ;;  %v855_v45 = vld [vmem:[#allocation8 + $0xa60] sm:$0xff]  ;;  %v340_v48 = vmul.f32 %v7794_v27, %v228_v40  ;;  %v7851_v29 = vld [vmem:[#allocation5 + $0x8] sm:$0xf]  ;;  %v870_v40 = vld [vmem:[#allocation8 + $0xad8] sm:$0xff] }
 0x12a   :  { %5328 = vmatprep.subr.bf16.mxu0 %v5327_v50  ;;  %v5339_v50 = vpack.c.bf16 %v666_v33, %v664_v32  ;;  %v214_v26 = vld [vmem:[#allocation2 + $0x58] sm:$0xff] }
 0x12b   :  { %981 = vmatmul.mubr.f32.vlgmr.msra.gmra.mrb[0].mxu1 %v475_v54  ;;  %v487_v54 = vmax.f32 %v439_v38, 0.0  ;;  %v671_v33 = vld [vmem:[#allocation8 + $0x4a0] sm:$0xff]  ;;  %v868_v38 = vld [vmem:[#allocation8 + $0xac8] sm:$0xff] }
 0x12c   :  { %1070 = vmatmul.mubr.f32.vlgmr.msra.gmra.mrb[0].mxu0 %v477_v57  ;;  %5522 = vmatpush1.bf16.msra.mxu1 %v5521_v58  ;;  %v670_v57 = vld [vmem:[#allocation8 + $0x498] sm:$0xff]  ;;  %v452_v58 = vadd.f32 %v7798_v28, %v340_v48  ;;  %v218_v48 = vld [vmem:[#allocation2 + $0x78] sm:$0xff]  ;;  %v5543_v55 = vpack.c.bf16 %v870_v40, %v868_v38  ;;  %v684_v38 = vld [vmem:[#allocation8 + $0x508] sm:$0xff] }
 0x12d   :  { %5330 = vmatpush1.bf16.msra.mxu0 %v5329_v59  ;;  %5524 = vmatprep.subr.bf16.mxu1 %v5523_v61  ;;  %v5341_v59 = vpack.c.bf16 %v665_v36, %v663_v35  ;;  %v5533_v61 = vpack.c.bf16 %v857_v46, %v855_v45  ;;  %v5343_v12 = vpack.c.bf16 %v670_v57, %v668_v56  ;;  %v676_v45 = vld [vmem:[#allocation8 + $0x4c8] sm:$0xff]  ;;  %v678_v46 = vld [vmem:[#allocation8 + $0x4d8] sm:$0xff]  ;;  %v867_v56 = vld [vmem:[#allocation8 + $0xac0] sm:$0xff] }
 0x12e   :  { %5332 = vmatprep.subr.bf16.mxu0 %v5331_v2  ;;  %986 = vmatprep.mubr.f32.mxu1 %v488_v53  ;;  %v239_v2 = vld [vmem:[#allocation2 + $0x120] sm:$0xff]  ;;  %v500_v8 = vmax.f32 %v452_v58, 0.0  ;;  %v330_v53 = vmul.f32 %v7804_v39, %v218_v48  ;;  %v869_v57 = vld [vmem:[#allocation8 + $0xad0] sm:$0xff]  ;;  %v217_v58 = vld [vmem:[#allocation2 + $0x70] sm:$0xff] }
 0x12f   :  { %v351_v10 = vmul.f32 %v7821_v62, %v239_v2  ;;  %987 = vmatmul.mubr.f32.gmra.mrb[2].mxu1 %v487_v54  ;;  %v7855_v62 = vrot.slane %v7851_v29, %v7784_v21  ;;  %v5349_v54 = vpack.c.bf16 %v673_v37, %v671_v33  ;;  %v876_v33 = vld [vmem:[#allocation8 + $0xb08] sm:$0xff]  ;;  %v686_v40 = vld [vmem:[#allocation8 + $0x518] sm:$0xff] }
 0x130   :  { %5526 = vmatpush1.bf16.msra.mxu1 %v5525_v9  ;;  %v352_v9 = vmul.f32 %v7794_v27, %v240_v1  ;;  %992 = vmatprep.mubr.f32.mxu1 %v500_v8  ;;  %v5537_v27 = vpack.c.bf16 %v861_v7, %v859_v6  ;;  %v442_v2 = vadd.f32 %v7811_v43, %v330_v53  ;;  %v680_v6 = vld [vmem:[#allocation8 + $0x4e8] sm:$0xff]  ;;  %v682_v7 = vld [vmem:[#allocation8 + $0x4f8] sm:$0xff] }
 0x131   :  { %5334 = vmatpush1.bf16.msra.mxu0 %v5333_v13  ;;  %5528 = vmatprep.subr.bf16.mxu1 %v5527_v14  ;;  %v672_v13 = vld [vmem:[#allocation8 + $0x4a8] sm:$0xff]  ;;  %v463_v25 = vadd.f32 %v7830_v17, %v351_v10  ;;  %v7861_v17 = vrot.slane %v7857_v30, %v7784_v21  ;;  %v342_v8 = vmul.f32 %v7804_v39, %v230_v5 }
 0x132   :  { %5336 = vmatprep.subr.bf16.mxu0 %v5335_v19  ;;  %v864_v14 = vld [vmem:[#allocation8 + $0xaa8] sm:$0xff]  ;;  %v464_v19 = vadd.f32 %v7798_v28, %v352_v9  ;;  %v865_v28 = vld [vmem:[#allocation8 + $0xab0] sm:$0xff]  ;;  %v5347_v36 = vpack.c.bf16 %v674_v18, %v672_v13  ;;  %v7877_v9 = vsub.s32 4, %v7778_v60  ;;  %v679_v13 = vld [vmem:[#allocation8 + $0x4e0] sm:$0xff]  ;;  %v5547_v18 = vpack.c.bf16 %v874_v0, %v872_v63 }
 0x133   :  { %v5539_v32 = vpack.c.bf16 %v866_v15, %v864_v14  ;;  %993 = vmatmul.mubr.f32.gmra.mrb[4].mxu1 %v499_v16  ;;  %v490_v14 = vmax.f32 %v442_v2, 0.0  ;;  %v229_v16 = vld [vmem:[#allocation2 + $0xd0] sm:$0xff]  ;;  %v880_v63 = vld [vmem:[#allocation8 + $0xb28] sm:$0xff] }
 0x134   :  { %5530 = vmatpush1.bf16.msra.mxu1 %v5529_v34  ;;  %v863_v34 = vld [vmem:[#allocation8 + $0xaa0] sm:$0xff]  ;;  %v512_v35 = vmax.f32 %v464_v19, 0.0  ;;  %8808 = vst [vmem:[#allocation35_spill] sm:$0xff] %v7877_v9  ;;  %v681_v19 = vld [vmem:[#allocation8 + $0x4f0] sm:$0xff]  ;;  %v7897_v48 = vrot.slane %v7788_v23, %v7877_v9  ;;  %v882_v0 = vld [vmem:[#allocation8 + $0xb38] sm:$0xff] }
 0x135   :  { %5338 = vmatpush1.bf16.msra.mxu0 %v5337_v41  ;;  %5532 = vmatprep.subr.bf16.mxu1 %v5531_v44  ;;  %v511_v41 = vmax.f32 %v463_v25, 0.0  ;;  %v326_v44 = vmul.f32 %v7855_v62, %v214_v26  ;;  %v5541_v49 = vpack.c.bf16 %v865_v28, %v863_v34  ;;  %v871_v25 = vld [vmem:[#allocation8 + $0xae0] sm:$0xff]  ;;  %v873_v26 = vld [vmem:[#allocation8 + $0xaf0] sm:$0xff]  ;;  %v878_v34 = vld [vmem:[#allocation8 + $0xb18] sm:$0xff]  ;;  %v5357_v53 = vpack.c.bf16 %v681_v19, %v679_v13 }
 0x136   :  { %5340 = vmatprep.subr.bf16.mxu0 %v5339_v50  ;;  %998 = vmatprep.mubr.f32.mxu1 %v512_v35  ;;  %v7864_v50 = vld [vmem:[#allocation8 + $0x4c0] sm:$0xff]  ;;  %v690_v2 = vld [vmem:[#allocation8 + $0x538] sm:$0xff]  ;;  %v207_v5 = vld [vmem:[#allocation2 + $0x20] sm:$0xff] }
 0x137   :  { %v438_v52 = vadd.f32 %v7861_v17, %v326_v44  ;;  %999 = vmatmul.mubr.f32.gmra.mrb[6].mxu1 %v511_v41  ;;  %v5353_v10 = vpack.c.bf16 %v7866_v51, %v7864_v50  ;;  %1075 = vmatprep.mubr.f32.mxu0 %v490_v14  ;;  %v242_v35 = vld [vmem:[#allocation2 + $0x138] sm:$0xff]  ;;  %v881_v14 = vld [vmem:[#allocation8 + $0xb30] sm:$0xff]  ;;  %v886_v19 = vld [vmem:[#allocation8 + $0xb58] sm:$0xff] }
 0x138   :  { %5534 = vmatpush1.bf16.msra.mxu1 %v5533_v61  ;;  %v5351_v61 = vpack.c.bf16 %v678_v46, %v676_v45  ;;  %v354_v45 = vmul.f32 %v7804_v39, %v242_v35  ;;  %v241_v46 = vld [vmem:[#allocation2 + $0x130] sm:$0xff]  ;;  %v683_v50 = vld [vmem:[#allocation8 + $0x500] sm:$0xff] }
 0x139   :  { %5342 = vmatpush1.bf16.msra.mxu0 %v5341_v59  ;;  %5536 = vmatprep.subr.bf16.mxu1 %v5535_v4  ;;  %v7871_v59 = vsub.s32 5, %v7778_v60  ;;  %v486_v1 = vmax.f32 %v438_v52, 0.0  ;;  %v329_v4 = vmul.f32 %v7825_v3, %v217_v58  ;;  %v353_v51 = vmul.f32 %v7825_v3, %v241_v46  ;;  %v875_v39 = vld [vmem:[#allocation8 + $0xb00] sm:$0xff]  ;;  %v888_v46 = vld [vmem:[#allocation8 + $0xb68] sm:$0xff] }
 0x13a   :  { %5344 = vmatprep.subr.bf16.mxu0 %v5343_v12  ;;  %v5545_v12 = vpack.c.bf16 %v869_v57, %v867_v56  ;;  %v7902_v52 = vrot.slane %v7790_v24, %v7877_v9  ;;  %v208_v57 = vld [vmem:[#allocation2 + $0x28] sm:$0xff]  ;;  %v5359_v58 = vpack.c.bf16 %v686_v40, %v684_v38  ;;  %v687_v13 = vld [vmem:[#allocation8 + $0x520] sm:$0xff] }
 0x13b   :  { %8807 = vst [vmem:[#allocation34_spill] sm:$0xff] %v7871_v59  ;;  %5171 = vmatprep.mubr.msk.f32.mxu1 %vm903_vm0, %v486_v1  ;;  %v441_v15 = vadd.f32 %v7835_v20, %v329_v4  ;;  %v7891_v37 = vrot.slane %v7790_v24, %v7871_v59  ;;  %v688_v1 = vld [vmem:[#allocation8 + $0x528] sm:$0xff]  ;;  %v691_v38 = vld [vmem:[#allocation8 + $0x540] sm:$0xff] }
 0x13c   :  { %5538 = vmatpush1.bf16.msra.mxu1 %v5537_v27  ;;  %v454_v27 = vadd.f32 %v7811_v43, %v342_v8  ;;  %v319_v8 = vmul.f32 %v7897_v48, %v207_v5  ;;  %v883_v40 = vld [vmem:[#allocation8 + $0xb40] sm:$0xff] }
 0x13d   :  { %5346 = vmatpush1.bf16.msra.mxu0 %v5345_v31  ;;  %5540 = vmatprep.subr.bf16.mxu1 %v5539_v32  ;;  %v341_v31 = vmul.f32 %v7825_v3, %v229_v16  ;;  %v5355_v32 = vpack.c.bf16 %v682_v7, %v680_v6  ;;  %v489_v28 = vmax.f32 %v441_v15, 0.0  ;;  %v465_v3 = vadd.f32 %v7835_v20, %v353_v51  ;;  %v689_v16 = vld [vmem:[#allocation8 + $0x530] sm:$0xff]  ;;  %v699_v5 = vld [vmem:[#allocation8 + $0x580] sm:$0xff] }
 0x13e   :  { %5348 = vmatprep.subr.bf16.mxu0 %v5347_v36  ;;  %v7887_v36 = vrot.slane %v7788_v23, %v7871_v59  ;;  %v502_v41 = vmax.f32 %v454_v27, 0.0  ;;  %v466_v23 = vadd.f32 %v7811_v43, %v354_v45  ;;  %v5363_v15 = vpack.c.bf16 %v690_v2, %v688_v1  ;;  %v692_v27 = vld [vmem:[#allocation8 + $0x548] sm:$0xff]  ;;  %v693_v45 = vld [vmem:[#allocation8 + $0x550] sm:$0xff] }
 0x13f   :  { %v453_v44 = vadd.f32 %v7835_v20, %v341_v31  ;;  %1076 = vmatmul.mubr.f32.gmra.mrb[2].mxu0 %v489_v28  ;;  %v513_v7 = vmax.f32 %v465_v3, 0.0  ;;  %v879_v20 = vld [vmem:[#allocation8 + $0xb20] sm:$0xff]  ;;  %v694_v31 = vld [vmem:[#allocation8 + $0x558] sm:$0xff]  ;;  %v5365_v28 = vpack.c.bf16 %v689_v16, %v687_v13  ;;  %v700_v3 = vld [vmem:[#allocation8 + $0x588] sm:$0xff] }
 0x140   :  { %5542 = vmatpush1.bf16.msra.mxu1 %v5541_v49  ;;  %v5549_v49 = vpack.c.bf16 %v873_v26, %v871_v25  ;;  %1081 = vmatprep.mubr.f32.mxu0 %v502_v41  ;;  %v320_v24 = vmul.f32 %v7887_v36, %v208_v57  ;;  %v514_v4 = vmax.f32 %v466_v23, 0.0  ;;  %v7910_v26 = vadd.f32 %v7902_v52, %v319_v8  ;;  %v885_v41 = vld [vmem:[#allocation8 + $0xb50] sm:$0xff]  ;;  %v887_v23 = vld [vmem:[#allocation8 + $0xb60] sm:$0xff] }
 0x141   :  { %5350 = vmatpush1.bf16.msra.mxu0 %v5349_v54  ;;  %5544 = vmatprep.subr.bf16.mxu1 %v5543_v55  ;;  %v5551_v54 = vpack.c.bf16 %v878_v34, %v876_v33  ;;  %v877_v55 = vld [vmem:[#allocation8 + $0xb10] sm:$0xff]  ;;  %v501_v56 = vmax.f32 %v453_v44, 0.0  ;;  %v5557_v33 = vpack.c.bf16 %v881_v14, %v879_v20  ;;  %v213_v34 = vld [vmem:[#allocation2 + $0x50] sm:$0xff]  ;;  %v5367_v44 = vpack.c.bf16 %v694_v31, %v692_v27  ;;  %v704_v20 = vld [vmem:[#allocation8 + $0x5a8] sm:$0xff] }
 0x142   :  { %5352 = vmatprep.subr.bf16.mxu0 %v5351_v61  ;;  %v685_v61 = vld [vmem:[#allocation8 + $0x510] sm:$0xff]  ;;  %v5553_v6 = vpack.c.bf16 %v877_v55, %v875_v39  ;;  %v432_v43 = vadd.f32 %v7891_v37, %v320_v24  ;;  %v5369_v39 = vpack.c.bf16 %v693_v45, %v691_v38  ;;  %v702_v24 = vld [vmem:[#allocation8 + $0x598] sm:$0xff] }
 0x143   :  { %1082 = vmatmul.mubr.f32.gmra.mrb[4].mxu0 %v501_v56  ;;  %v695_v56 = vld [vmem:[#allocation8 + $0x560] sm:$0xff]  ;;  %v889_v57 = vld [vmem:[#allocation8 + $0xb70] sm:$0xff]  ;;  %v706_v14 = vld [vmem:[#allocation8 + $0x5b8] sm:$0xff] }
 0x144   :  { %5546 = vmatpush1.bf16.msra.mxu1 %v5545_v12  ;;  %v5555_v12 = vpack.c.bf16 %v882_v0, %v880_v63  ;;  %1087 = vmatprep.mubr.f32.mxu0 %v514_v4  ;;  %v480_v25 = vmax.f32 %v432_v43, 0.0  ;;  %v1723_v63 = vld [vmem:[#allocation14 + $0x8] sm:$0xff]  ;;  %v1729_v0 = vld [vmem:[#allocation14 + $0x38] sm:$0xff]  ;;  %v5375_v43 = vpack.c.bf16 %v702_v24, %v700_v3  ;;  %v1740_v27 = vld [vmem:[#allocation14 + $0x90] sm:$0xff]  ;;  %v5379_v31 = vpack.c.bf16 %v706_v14, %v704_v20 }
 0x145   :  { %5354 = vmatpush1.bf16.msra.mxu0 %v5353_v10  ;;  %5548 = vmatprep.subr.bf16.mxu1 %v5547_v18  ;;  %v5361_v10 = vpack.c.bf16 %v685_v61, %v683_v50  ;;  %v884_v18 = vld [vmem:[#allocation8 + $0xb48] sm:$0xff]  ;;  %v697_v61 = vld [vmem:[#allocation8 + $0x570] sm:$0xff]  ;;  %v5567_v4 = vpack.c.bf16 %v1729_v0, %v1723_v63  ;;  %v710_v38 = vld [vmem:[#allocation8 + $0x5d8] sm:$0xff] }
 0x146   :  { %5356 = vmatprep.subr.bf16.mxu0 %v5355_v32  ;;  %v7914_v32 = vrot.slane %v7851_v29, %v7816_v47  ;;  %v5559_v35 = vpack.c.bf16 %v886_v19, %v884_v18  ;;  %v696_v50 = vld [vmem:[#allocation8 + $0x568] sm:$0xff]  ;;  %v698_v29 = vld [vmem:[#allocation8 + $0x578] sm:$0xff]  ;;  %v5373_v2 = vpack.c.bf16 %v697_v61, %v695_v56  ;;  %v701_v8 = vld [vmem:[#allocation8 + $0x590] sm:$0xff] }
 0x147   :  { %1088 = vmatmul.mubr.f32.gmra.mrb[6].mxu0 %v513_v7  ;;  %v1728_v7 = vld [vmem:[#allocation14 + $0x30] sm:$0xff]  ;;  %v5377_v16 = vpack.c.bf16 %v701_v8, %v699_v5  ;;  %v703_v19 = vld [vmem:[#allocation8 + $0x5a0] sm:$0xff]  ;;  %v225_v61 = vld [vmem:[#allocation2 + $0xb0] sm:$0xff] }
 0x148   :  { %5550 = vmatpush1.bf16.msra.mxu1 %v5549_v49  ;;  %v890_v49 = vld [vmem:[#allocation8 + $0xb78] sm:$0xff]  ;;  %1158 = vmatprep.mubr.f32.mxu0 %v480_v25  ;;  %v325_v51 = vmul.f32 %v7914_v32, %v213_v34  ;;  %v1747_v34 = vld [vmem:[#allocation14 + $0xc8] sm:$0xff]  ;;  %v7929_v63 = vld [vmem:[#allocation13] sm:$0xff] }
 0x149   :  { %5358 = vmatpush1.bf16.msra.mxu0 %v5357_v53  ;;  %5552 = vmatprep.subr.bf16.mxu1 %v5551_v54  ;;  %v7919_v53 = vrot.slane %v7857_v30, %v7816_v47  ;;  %v5561_v54 = vpack.c.bf16 %v885_v41, %v883_v40  ;;  %v5563_v55 = vpack.c.bf16 %v890_v49, %v888_v46  ;;  %v1734_v25 = vld [vmem:[#allocation14 + $0x60] sm:$0xff]  ;;  %v7922_v40 = vld [vmem:[#allocation11] sm:$0xff]  ;;  %v709_v49 = vld [vmem:[#allocation8 + $0x5d0] sm:$0xff] }
 0x14a   :  { %5360 = vmatprep.subr.bf16.mxu0 %v5359_v58  ;;  %v5371_v58 = vpack.c.bf16 %v698_v29, %v696_v50  ;;  %v5565_v30 = vpack.c.bf16 %v889_v57, %v887_v23  ;;  %v5573_v41 = vpack.c.bf16 %v1740_v27, %v1734_v25  ;;  %v1746_v50 = vld [vmem:[#allocation14 + $0xc0] sm:$0xff]  ;;  %v1752_v29 = vld [vmem:[#allocation14 + $0xf0] sm:$0xff]  ;;  %v7926_v56 = vrot.slane %v7922_v40, %v7781_v11  ;;  %v1771_v8 = vld [vmem:[#allocation14 + $0x188] sm:$0xff] }
 0x14b   :  { %v437_v1 = vadd.f32 %v7919_v53, %v325_v51  ;;  %v712_v23 = vld [vmem:[#allocation8 + $0x5e8] sm:$0xff]  ;;  %v714_v57 = vld [vmem:[#allocation8 + $0x5f8] sm:$0xff]  ;;  %v5577_v0 = vpack.c.bf16 %v1752_v29, %v1746_v50  ;;  %v711_v3 = vld [vmem:[#allocation8 + $0x5e0] sm:$0xff]  ;;  %v7940_v25 = vrot.slane %v7929_v63, %v7781_v11 }
 0x14c   :  { %5554 = vmatpush1.bf16.msra.mxu1 %v5553_v6  ;;  %v1722_v6 = vld [vmem:[#allocation14] sm:$0xff]  ;;  %v713_v24 = vld [vmem:[#allocation8 + $0x5f0] sm:$0xff]  ;;  %v1515_v14 = vmul.f32 %v7926_v56, %v7786_v22  ;;  %v1783_v29 = vld [vmem:[#allocation14 + $0x1e8] sm:$0xff] }
 0x14d   :  { %5362 = vmatpush1.bf16.msra.mxu0 %v5361_v10  ;;  %5556 = vmatprep.subr.bf16.mxu1 %v5555_v12  ;;  %v1735_v10 = vld [vmem:[#allocation14 + $0x68] sm:$0xff]  ;;  %v1741_v12 = vld [vmem:[#allocation14 + $0x98] sm:$0xff]  ;;  %v485_v13 = vmax.f32 %v437_v1, 0.0  ;;  %v337_v1 = vmul.f32 %v7914_v32, %v225_v61  ;;  %v1764_v5 = vld [vmem:[#allocation14 + $0x150] sm:$0xff]  ;;  %v5389_v27 = vpack.c.bf16 %v713_v24, %v711_v3 }
 0x14e   :  { %5364 = vmatprep.subr.bf16.mxu0 %v5363_v15  ;;  %v5569_v15 = vpack.c.bf16 %v1728_v7, %v1722_v6  ;;  %v5571_v18 = vpack.c.bf16 %v1741_v12, %v1735_v10  ;;  %v238_v7 = vld [vmem:[#allocation2 + $0x118] sm:$0xff]  ;;  %v1777_v10 = vld [vmem:[#allocation14 + $0x1b8] sm:$0xff]  ;;  %v1627_v24 = vadd.f32 %v7940_v25, %v1515_v14 }
 0x14f   :  { %v449_v12 = vadd.f32 %v7919_v53, %v337_v1  ;;  %v237_v20 = vld [vmem:[#allocation2 + $0x110] sm:$0xff]  ;;  %v5583_v22 = vpack.c.bf16 %v1777_v10, %v1771_v8  ;;  %v717_v50 = vld [vmem:[#allocation8 + $0x610] sm:$0xff] }
 0x150   :  { %5558 = vmatpush1.bf16.msra.mxu1 %v5557_v33  ;;  %v705_v33 = vld [vmem:[#allocation8 + $0x5b0] sm:$0xff]  ;;  %v726_v8 = vld [vmem:[#allocation8 + $0x658] sm:$0xff]  ;;  %v7955_v14 = vmax.f32 %v1627_v24, 0.0 }
 0x151   :  { %5366 = vmatpush1.bf16.msra.mxu0 %v5365_v28  ;;  %5560 = vmatprep.subr.bf16.mxu1 %v5559_v35  ;;  %v1753_v28 = vld [vmem:[#allocation14 + $0xf8] sm:$0xff]  ;;  %v708_v35 = vld [vmem:[#allocation8 + $0x5c8] sm:$0xff]  ;;  %v5381_v45 = vpack.c.bf16 %v705_v33, %v703_v19  ;;  %v349_v19 = vmul.f32 %v7914_v32, %v237_v20  ;;  %v715_v33 = vld [vmem:[#allocation8 + $0x600] sm:$0xff] }
 0x152   :  { %5368 = vmatprep.subr.bf16.mxu0 %v5367_v44  ;;  %v707_v44 = vld [vmem:[#allocation8 + $0x5c0] sm:$0xff]  ;;  %v5575_v46 = vpack.c.bf16 %v1753_v28, %v1747_v34  ;;  %v5383_v51 = vpack.c.bf16 %v710_v38, %v708_v35  ;;  %v497_v34 = vmax.f32 %v449_v12, 0.0  ;;  %8809 = vst [vmem:[#allocation36_spill] sm:$0xff] %v7955_v14 }
 0x153   :  { %v250_v35 = vld [vmem:[#allocation2 + $0x178] sm:$0xff] }
 0x154   :  { %5562 = vmatpush1.bf16.msra.mxu1 %v5561_v54  ;;  %v1759_v54 = vld [vmem:[#allocation14 + $0x128] sm:$0xff]  ;;  %v1770_v38 = vld [vmem:[#allocation14 + $0x180] sm:$0xff] }
 0x155   :  { %5370 = vmatpush1.bf16.msra.mxu0 %v5369_v39  ;;  %5564 = vmatprep.subr.bf16.mxu1 %v5563_v55  ;;  %v1765_v39 = vld [vmem:[#allocation14 + $0x158] sm:$0xff]  ;;  %v226_v55 = vld [vmem:[#allocation2 + $0xb8] sm:$0xff] }
 0x156   :  { %5372 = vmatprep.subr.bf16.mxu0 %v5371_v58  ;;  %v338_v58 = vmul.f32 %v7855_v62, %v226_v55  ;;  %v720_v55 = vld [vmem:[#allocation8 + $0x628] sm:$0xff]  ;;  %v7953_v20 = vld [vmem:[#allocation8 + $0x640] sm:$0xff] }
 0x158   :  { %5566 = vmatpush1.bf16.msra.mxu1 %v5565_v30  ;;  %v5385_v30 = vpack.c.bf16 %v709_v49, %v707_v44  ;;  %v450_v6 = vadd.f32 %v7861_v17, %v338_v58  ;;  %v461_v44 = vadd.f32 %v7919_v53, %v349_v19  ;;  %v725_v19 = vld [vmem:[#allocation8 + $0x650] sm:$0xff] }
 0x159   :  { %5374 = vmatpush1.bf16.msra.mxu0 %v5373_v2  ;;  %5568 = vmatprep.subr.bf16.mxu1 %v5567_v4  ;;  %v5579_v2 = vpack.c.bf16 %v1765_v39, %v1759_v54  ;;  %v1758_v4 = vld [vmem:[#allocation14 + $0x120] sm:$0xff] }
 0x15a   :  { %5376 = vmatprep.subr.bf16.mxu0 %v5375_v43  ;;  %v5387_v43 = vpack.c.bf16 %v714_v57, %v712_v23  ;;  %v722_v23 = vld [vmem:[#allocation8 + $0x638] sm:$0xff]  ;;  %v509_v57 = vmax.f32 %v461_v44, 0.0 }
 0x15b   :  { %1426 = vmatmul.mubr.f32.vlgmr.msra.gmra.mrb[8].mxu1 %v485_v13  ;;  %v350_v13 = vmul.f32 %v7855_v62, %v238_v7  ;;  %v220_v7 = vld [vmem:[#allocation2 + $0x88] sm:$0xff]  ;;  %v730_v44 = vld [vmem:[#allocation8 + $0x678] sm:$0xff] }
 0x15c   :  { %5570 = vmatpush1.bf16.msra.mxu1 %v5569_v15  ;;  %v716_v15 = vld [vmem:[#allocation8 + $0x608] sm:$0xff] }
 0x15d   :  { %5378 = vmatpush1.bf16.msra.mxu0 %v5377_v16  ;;  %5572 = vmatprep.subr.bf16.mxu1 %v5571_v18  ;;  %v718_v16 = vld [vmem:[#allocation8 + $0x618] sm:$0xff]  ;;  %v498_v18 = vmax.f32 %v450_v6, 0.0  ;;  %v462_v28 = vadd.f32 %v7861_v17, %v350_v13 }
 0x15e   :  { %5380 = vmatprep.subr.bf16.mxu0 %v5379_v31  ;;  %v5581_v31 = vpack.c.bf16 %v1764_v5, %v1758_v4  ;;  %v5391_v49 = vpack.c.bf16 %v718_v16, %v716_v15  ;;  %v1788_v4 = vld [vmem:[#allocation14 + $0x210] sm:$0xff]  ;;  %v1795_v5 = vld [vmem:[#allocation14 + $0x248] sm:$0xff]  ;;  %v1801_v6 = vld [vmem:[#allocation14 + $0x278] sm:$0xff]  ;;  %v7958_v16 = vsub.s32 7, %v7778_v60 }
 0x15f   :  { %5172 = vmatprep.mubr.msk.f32.mxu1 %vm903_vm0, %v498_v18  ;;  %v510_v54 = vmax.f32 %v462_v28, 0.0  ;;  %v219_v15 = vld [vmem:[#allocation2 + $0x80] sm:$0xff]  ;;  %v5591_v18 = vpack.c.bf16 %v1801_v6, %v1795_v5  ;;  %v734_v5 = vld [vmem:[#allocation8 + $0x698] sm:$0xff] }
 0x160   :  { %5574 = vmatpush1.bf16.msra.mxu1 %v5573_v41  ;;  %v1776_v41 = vld [vmem:[#allocation14 + $0x1b0] sm:$0xff] }
 0x161   :  { %5382 = vmatpush1.bf16.msra.mxu0 %v5381_v45  ;;  %5576 = vmatprep.subr.bf16.mxu1 %v5575_v46  ;;  %v362_v45 = vmul.f32 %v7855_v62, %v250_v35  ;;  %v249_v46 = vld [vmem:[#allocation2 + $0x170] sm:$0xff]  ;;  %v479_v62 = vmax.f32 %v7910_v26, 0.0  ;;  %v5585_v61 = vpack.c.bf16 %v1776_v41, %v1770_v38  ;;  %v1807_v35 = vld [vmem:[#allocation14 + $0x2a8] sm:$0xff]  ;;  %v232_v38 = vld [vmem:[#allocation2 + $0xe8] sm:$0xff] }
 0x162   :  { %5384 = vmatprep.subr.bf16.mxu0 %v5383_v51  ;;  %v1789_v51 = vld [vmem:[#allocation14 + $0x218] sm:$0xff]  ;;  %v361_v39 = vmul.f32 %v7914_v32, %v249_v46  ;;  %1432 = vmatmul.mubr.f32.gmra.mrb[10].mxu1 %v497_v34  ;;  %v5393_v32 = vpack.c.bf16 %v717_v50, %v715_v33  ;;  %v331_v34 = vmul.f32 %v7897_v48, %v219_v15  ;;  %v728_v41 = vld [vmem:[#allocation8 + $0x668] sm:$0xff]  ;;  %v210_v15 = vld [vmem:[#allocation2 + $0x38] sm:$0xff] }
 0x163   :  { %v474_v58 = vadd.f32 %v7861_v17, %v362_v45  ;;  %5173 = vmatprep.mubr.msk.f32.mxu1 %vm903_vm0, %v510_v54  ;;  %v5587_v1 = vpack.c.bf16 %v1789_v51, %v1783_v29  ;;  %v5395_v17 = vpack.c.bf16 %v722_v23, %v720_v55  ;;  %v231_v50 = vld [vmem:[#allocation2 + $0xe0] sm:$0xff]  ;;  %v7966_v29 = vsub.s32 6, %v7778_v60  ;;  %v7968_v54 = vld [vmem:[#allocation8 + $0x660] sm:$0xff] }
 0x164   :  { %5578 = vmatpush1.bf16.msra.mxu1 %v5577_v0  ;;  %v719_v0 = vld [vmem:[#allocation8 + $0x620] sm:$0xff]  ;;  %v473_v3 = vadd.f32 %v7919_v53, %v361_v39  ;;  %v332_v53 = vmul.f32 %v7887_v36, %v220_v7  ;;  %v443_v46 = vadd.f32 %v7902_v52, %v331_v34  ;;  %v343_v39 = vmul.f32 %v7897_v48, %v231_v50  ;;  %v7123_v55 = vld [vmem:[#allocation5] sm:$0xff]  ;;  %v7124_v7 = vld [vmem:[#allocation7] sm:$0xff] }
 0x165   :  { %5386 = vmatpush1.bf16.msra.mxu0 %v5385_v30  ;;  %5580 = vmatprep.subr.bf16.mxu1 %v5579_v2  ;;  %v721_v30 = vld [vmem:[#allocation8 + $0x630] sm:$0xff]  ;;  %v1782_v2 = vld [vmem:[#allocation14 + $0x1e0] sm:$0xff]  ;;  %v522_v26 = vmax.f32 %v474_v58, 0.0  ;;  %v7973_v23 = vrot.slane %v7123_v55, %v7958_v16  ;;  %v5403_v24 = vpack.c.bf16 %v730_v44, %v728_v41  ;;  %v736_v41 = vld [vmem:[#allocation8 + $0x6a8] sm:$0xff] }
 0x166   :  { %5388 = vmatprep.subr.bf16.mxu0 %v5387_v43  ;;  %v724_v43 = vld [vmem:[#allocation8 + $0x648] sm:$0xff]  ;;  %1438 = vmatmul.mubr.f32.gmra.mrb[12].mxu1 %v509_v57  ;;  %v521_v10 = vmax.f32 %v473_v3, 0.0  ;;  %v5397_v12 = vpack.c.bf16 %v721_v30, %v719_v0  ;;  %v5589_v13 = vpack.c.bf16 %v1788_v4, %v1782_v2  ;;  %v444_v33 = vadd.f32 %v7891_v37, %v332_v53  ;;  %v244_v3 = vld [vmem:[#allocation2 + $0x148] sm:$0xff]  ;;  %v738_v44 = vld [vmem:[#allocation8 + $0x6b8] sm:$0xff] }
 0x167   :  { %v5399_v28 = vpack.c.bf16 %v726_v8, %v724_v43  ;;  %5174 = vmatprep.mubr.msk.f32.mxu1 %vm903_vm0, %v522_v26  ;;  %v5401_v57 = vpack.c.bf16 %v725_v19, %v7953_v20  ;;  %v1812_v60 = vld [vmem:[#allocation14 + $0x2d0] sm:$0xff]  ;;  %v1825_v30 = vld [vmem:[#allocation14 + $0x338] sm:$0xff]  ;;  %v455_v2 = vadd.f32 %v7902_v52, %v343_v39  ;;  %v356_v4 = vmul.f32 %v7887_v36, %v244_v3  ;;  %v735_v39 = vld [vmem:[#allocation8 + $0x6a0] sm:$0xff] }
 0x168   :  { %5582 = vmatpush1.bf16.msra.mxu1 %v5581_v31  ;;  %v1800_v31 = vld [vmem:[#allocation14 + $0x270] sm:$0xff]  ;;  %v492_v45 = vmax.f32 %v444_v33, 0.0  ;;  %v7980_v43 = vrot.slane %v7124_v7, %v7958_v16  ;;  %v7983_v8 = vrot.slane %v7123_v55, %v7966_v29  ;;  %v322_v34 = vmul.f32 %v7973_v23, %v210_v15  ;;  %v1830_v55 = vld [vmem:[#allocation14 + $0x360] sm:$0xff] }
 0x169   :  { %5390 = vmatpush1.bf16.msra.mxu0 %v5389_v27  ;;  %5584 = vmatprep.subr.bf16.mxu1 %v5583_v22  ;;  %v1794_v27 = vld [vmem:[#allocation14 + $0x240] sm:$0xff]  ;;  %v1813_v22 = vld [vmem:[#allocation14 + $0x2d8] sm:$0xff]  ;;  %v243_v26 = vld [vmem:[#allocation2 + $0x140] sm:$0xff] }
 0x16a   :  { %5392 = vmatprep.subr.bf16.mxu0 %v5391_v49  ;;  %1444 = vmatmul.mubr.f32.gmra.mrb[14].mxu1 %v521_v10  ;;  %v344_v49 = vmul.f32 %v7887_v36, %v232_v38  ;;  %v5593_v51 = vpack.c.bf16 %v1800_v31, %v1794_v27  ;;  %v5595_v58 = vpack.c.bf16 %v1813_v22, %v1807_v35  ;;  %v733_v27 = vld [vmem:[#allocation8 + $0x690] sm:$0xff]  ;;  %v1818_v31 = vld [vmem:[#allocation14 + $0x300] sm:$0xff]  ;;  %v1831_v35 = vld [vmem:[#allocation14 + $0x368] sm:$0xff] }
 0x16b   :  { %2934 = vmatprep.mubr.f32.mxu1 %v7955_v14  ;;  %v7986_v10 = vrot.slane %v7124_v7, %v7966_v29  ;;  %v468_v36 = vadd.f32 %v7891_v37, %v356_v4  ;;  %v355_v20 = vmul.f32 %v7897_v48, %v243_v26  ;;  %v1824_v33 = vld [vmem:[#allocation14 + $0x330] sm:$0xff]  ;;  %v1837_v22 = vld [vmem:[#allocation14 + $0x398] sm:$0xff]  ;;  %v1842_v4 = vld [vmem:[#allocation14 + $0x3c0] sm:$0xff] }
 0x16c   :  { %1159 = vmatmul.mubr.f32.vlgmr.msra.gmra.mrb[0].mxu0 %v479_v62  ;;  %5586 = vmatpush1.bf16.msra.mxu1 %v5585_v61  ;;  %v1806_v62 = vld [vmem:[#allocation14 + $0x2a0] sm:$0xff]  ;;  %v491_v61 = vmax.f32 %v443_v46, 0.0  ;;  %v456_v0 = vadd.f32 %v7891_v37, %v344_v49  ;;  %v5601_v49 = vpack.c.bf16 %v1824_v33, %v1818_v31  ;;  %v740_v3 = vld [vmem:[#allocation8 + $0x6c8] sm:$0xff]  ;;  %v1861_v7 = vld [vmem:[#allocation14 + $0x458] sm:$0xff] }
 0x16d   :  { %5394 = vmatpush1.bf16.msra.mxu0 %v5393_v32  ;;  %5588 = vmatprep.subr.bf16.mxu1 %v5587_v1  ;;  %v729_v32 = vld [vmem:[#allocation8 + $0x670] sm:$0xff]  ;;  %v1819_v1 = vld [vmem:[#allocation14 + $0x308] sm:$0xff]  ;;  %v5597_v53 = vpack.c.bf16 %v1812_v60, %v1806_v62  ;;  %v516_v38 = vmax.f32 %v468_v36, 0.0  ;;  %v467_v37 = vadd.f32 %v7902_v52, %v355_v20  ;;  %v209_v48 = vld [vmem:[#allocation2 + $0x30] sm:$0xff]  ;;  %v5411_v62 = vpack.c.bf16 %v738_v44, %v736_v41 }
 0x16e   :  { %5396 = vmatprep.subr.bf16.mxu0 %v5395_v17  ;;  %1164 = vmatprep.mubr.f32.mxu0 %v492_v45  ;;  %v732_v17 = vld [vmem:[#allocation8 + $0x688] sm:$0xff]  ;;  %v504_v6 = vmax.f32 %v456_v0, 0.0  ;;  %v5599_v19 = vpack.c.bf16 %v1825_v30, %v1819_v1  ;;  %v434_v45 = vadd.f32 %v7980_v43, %v322_v34  ;;  %v321_v46 = vmul.f32 %v7983_v8, %v209_v48  ;;  %v737_v60 = vld [vmem:[#allocation8 + $0x6b0] sm:$0xff]  ;;  %v743_v15 = vld [vmem:[#allocation8 + $0x6e0] sm:$0xff] }
 0x16f   :  { %v515_v50 = vmax.f32 %v467_v37, 0.0  ;;  %v1849_v0 = vld [vmem:[#allocation14 + $0x3f8] sm:$0xff]  ;;  %v5413_v1 = vpack.c.bf16 %v737_v60, %v735_v39  ;;  %v1855_v26 = vld [vmem:[#allocation14 + $0x428] sm:$0xff]  ;;  %v1866_v41 = vld [vmem:[#allocation14 + $0x480] sm:$0xff] }
 0x170   :  { %5590 = vmatpush1.bf16.msra.mxu1 %v5589_v13  ;;  %1165 = vmatmul.mubr.f32.gmra.mrb[2].mxu0 %v491_v61  ;;  %v503_v13 = vmax.f32 %v455_v2, 0.0  ;;  %v482_v52 = vmax.f32 %v434_v45, 0.0  ;;  %v1843_v61 = vld [vmem:[#allocation14 + $0x3c8] sm:$0xff]  ;;  %v5611_v20 = vpack.c.bf16 %v1861_v7, %v1855_v26  ;;  %v745_v31 = vld [vmem:[#allocation8 + $0x6f0] sm:$0xff] }
 0x171   :  { %5398 = vmatpush1.bf16.msra.mxu0 %v5397_v12  ;;  %5592 = vmatprep.subr.bf16.mxu1 %v5591_v18  ;;  %v731_v12 = vld [vmem:[#allocation8 + $0x680] sm:$0xff]  ;;  %v5405_v18 = vpack.c.bf16 %v729_v32, %v7968_v54  ;;  %v5603_v54 = vpack.c.bf16 %v1837_v22, %v1831_v35  ;;  %v5607_v30 = vpack.c.bf16 %v1849_v0, %v1843_v61  ;;  %v1873_v34 = vld [vmem:[#allocation14 + $0x4b8] sm:$0xff]  ;;  %v1872_v44 = vld [vmem:[#allocation14 + $0x4b0] sm:$0xff] }
 0x172   :  { %5400 = vmatprep.subr.bf16.mxu0 %v5399_v28  ;;  %v5407_v28 = vpack.c.bf16 %v734_v5, %v732_v17  ;;  %1170 = vmatprep.mubr.f32.mxu0 %v504_v6  ;;  %v739_v2 = vld [vmem:[#allocation8 + $0x6c0] sm:$0xff]  ;;  %v1848_v17 = vld [vmem:[#allocation14 + $0x3f0] sm:$0xff]  ;;  %v750_v35 = vld [vmem:[#allocation8 + $0x718] sm:$0xff]  ;;  %v5617_v39 = vpack.c.bf16 %v1872_v44, %v1866_v41  ;;  %v8000_v61 = vrot.slane %v7922_v40, %v7807_v42 }
 0x173   :  { %v741_v6 = vld [vmem:[#allocation8 + $0x6d0] sm:$0xff]  ;;  %v1867_v33 = vld [vmem:[#allocation14 + $0x488] sm:$0xff] }
 0x174   :  { %5594 = vmatpush1.bf16.msra.mxu1 %v5593_v51  ;;  %1171 = vmatmul.mubr.f32.gmra.mrb[4].mxu0 %v503_v13  ;;  %v5409_v51 = vpack.c.bf16 %v733_v27, %v731_v12  ;;  %v746_v12 = vld [vmem:[#allocation8 + $0x6f8] sm:$0xff]  ;;  %v5609_v13 = vpack.c.bf16 %v1848_v17, %v1842_v4  ;;  %v5417_v36 = vpack.c.bf16 %v741_v6, %v739_v2  ;;  %v747_v48 = vld [vmem:[#allocation8 + $0x700] sm:$0xff]  ;;  %v1884_v60 = vld [vmem:[#allocation14 + $0x510] sm:$0xff] }
 0x175   :  { %5402 = vmatpush1.bf16.msra.mxu0 %v5401_v57  ;;  %5596 = vmatprep.subr.bf16.mxu1 %v5595_v58  ;;  %v1836_v57 = vld [vmem:[#allocation14 + $0x390] sm:$0xff]  ;;  %v7996_v58 = vadd.f32 %v7986_v10, %v321_v46  ;;  %v5615_v37 = vpack.c.bf16 %v1873_v34, %v1867_v33  ;;  %v1890_v6 = vld [vmem:[#allocation14 + $0x540] sm:$0xff]  ;;  %v1915_v44 = vld [vmem:[#allocation14 + $0x608] sm:$0xff] }
 0x176   :  { %5404 = vmatprep.subr.bf16.mxu0 %v5403_v24  ;;  %1176 = vmatprep.mubr.f32.mxu0 %v516_v38  ;;  %v742_v24 = vld [vmem:[#allocation8 + $0x6d8] sm:$0xff]  ;;  %v5605_v32 = vpack.c.bf16 %v1836_v57, %v1830_v55  ;;  %v5421_v38 = vpack.c.bf16 %v745_v31, %v743_v15  ;;  %v749_v46 = vld [vmem:[#allocation8 + $0x710] sm:$0xff]  ;;  %v7125_v7 = vld [vmem:[#allocation2] sm:$0xff] }
 0x177   :  { %v5415_v5 = vpack.c.bf16 %v742_v24, %v740_v3  ;;  %v5425_v55 = vpack.c.bf16 %v749_v46, %v747_v48  ;;  %v753_v3 = vld [vmem:[#allocation8 + $0x730] sm:$0xff]  ;;  %v1891_v24 = vld [vmem:[#allocation14 + $0x548] sm:$0xff] }
 0x178   :  { %5598 = vmatpush1.bf16.msra.mxu1 %v5597_v53  ;;  %1177 = vmatmul.mubr.f32.gmra.mrb[6].mxu0 %v515_v50  ;;  %v744_v53 = vld [vmem:[#allocation8 + $0x6e8] sm:$0xff]  ;;  %v1885_v50 = vld [vmem:[#allocation14 + $0x518] sm:$0xff] }
 0x179   :  { %5406 = vmatpush1.bf16.msra.mxu0 %v5405_v18  ;;  %5600 = vmatprep.subr.bf16.mxu1 %v5599_v19  ;;  %v1854_v18 = vld [vmem:[#allocation14 + $0x420] sm:$0xff]  ;;  %v1860_v19 = vld [vmem:[#allocation14 + $0x450] sm:$0xff]  ;;  %v5419_v27 = vpack.c.bf16 %v746_v12, %v744_v53  ;;  %v1514_v53 = vmul.f32 %v7125_v7, %v8000_v61  ;;  %v8005_v12 = vrot.slane %v7929_v63, %v7807_v42  ;;  %v1909_v15 = vld [vmem:[#allocation14 + $0x5d8] sm:$0xff] }
 0x17a   :  { %5408 = vmatprep.subr.bf16.mxu0 %v5407_v28  ;;  %1247 = vmatprep.mubr.f32.mxu0 %v482_v52  ;;  %v748_v28 = vld [vmem:[#allocation8 + $0x708] sm:$0xff]  ;;  %v5613_v22 = vpack.c.bf16 %v1860_v19, %v1854_v18  ;;  %v751_v52 = vld [vmem:[#allocation8 + $0x720] sm:$0xff]  ;;  %v762_v19 = vld [vmem:[#allocation8 + $0x778] sm:$0xff] }
 0x17b   :  { %v5423_v45 = vpack.c.bf16 %v750_v35, %v748_v28  ;;  %v5429_v4 = vpack.c.bf16 %v753_v3, %v751_v52  ;;  %v1896_v26 = vld [vmem:[#allocation14 + $0x570] sm:$0xff]  ;;  %v759_v35 = vld [vmem:[#allocation8 + $0x760] sm:$0xff] }
 0x17c   :  { %5602 = vmatpush1.bf16.msra.mxu1 %v5601_v49  ;;  %v1879_v49 = vld [vmem:[#allocation14 + $0x4e8] sm:$0xff]  ;;  %v5625_v33 = vpack.c.bf16 %v1896_v26, %v1890_v6  ;;  %v761_v41 = vld [vmem:[#allocation8 + $0x770] sm:$0xff]  ;;  %v770_v26 = vld [vmem:[#allocation8 + $0x7b8] sm:$0xff] }
 0x17d   :  { %5410 = vmatpush1.bf16.msra.mxu0 %v5409_v51  ;;  %5604 = vmatprep.subr.bf16.mxu1 %v5603_v54  ;;  %v752_v51 = vld [vmem:[#allocation8 + $0x728] sm:$0xff]  ;;  %v754_v54 = vld [vmem:[#allocation8 + $0x738] sm:$0xff]  ;;  %v5619_v57 = vpack.c.bf16 %v1885_v50, %v1879_v49  ;;  %v8012_v52 = vld [vmem:[#allocation8 + $0x780] sm:$0xff] }
 0x17e   :  { %5412 = vmatprep.subr.bf16.mxu0 %v5411_v62  ;;  %v1878_v62 = vld [vmem:[#allocation14 + $0x4e0] sm:$0xff]  ;;  %v5427_v0 = vpack.c.bf16 %v754_v54, %v752_v51  ;;  %v760_v18 = vld [vmem:[#allocation8 + $0x768] sm:$0xff] }
 0x17f   :  { %v5621_v2 = vpack.c.bf16 %v1884_v60, %v1878_v62  ;;  %v5435_v48 = vpack.c.bf16 %v762_v19, %v760_v18  ;;  %v764_v46 = vld [vmem:[#allocation8 + $0x788] sm:$0xff]  ;;  %v766_v49 = vld [vmem:[#allocation8 + $0x798] sm:$0xff]  ;;  %v8027_v18 = vld [vmem:[#allocation8 + $0x7a0] sm:$0xff] }
 0x180   :  { %5606 = vmatpush1.bf16.msra.mxu1 %v5605_v32  ;;  %v1897_v32 = vld [vmem:[#allocation14 + $0x578] sm:$0xff]  ;;  %v7127_v51 = vld [vmem:[#allocation2 + $0x60] sm:$0xff] }
 0x181   :  { %5414 = vmatpush1.bf16.msra.mxu0 %v5413_v1  ;;  %5608 = vmatprep.subr.bf16.mxu1 %v5607_v30  ;;  %v756_v1 = vld [vmem:[#allocation8 + $0x748] sm:$0xff]  ;;  %v758_v30 = vld [vmem:[#allocation8 + $0x758] sm:$0xff]  ;;  %v5623_v17 = vpack.c.bf16 %v1897_v32, %v1891_v24  ;;  %v1526_v54 = vmul.f32 %v7127_v51, %v8000_v61  ;;  %v765_v24 = vld [vmem:[#allocation8 + $0x790] sm:$0xff] }
 0x182   :  { %5416 = vmatprep.subr.bf16.mxu0 %v5415_v5  ;;  %v755_v5 = vld [vmem:[#allocation8 + $0x740] sm:$0xff]  ;;  %v7129_v62 = vld [vmem:[#allocation2 + $0xc0] sm:$0xff] }
 0x183   :  { %v1538_v60 = vmul.f32 %v7129_v62, %v8000_v61  ;;  %v1914_v32 = vld [vmem:[#allocation14 + $0x600] sm:$0xff]  ;;  %v768_v6 = vld [vmem:[#allocation8 + $0x7a8] sm:$0xff] }
 0x184   :  { %5610 = vmatpush1.bf16.msra.mxu1 %v5609_v13  ;;  %v5431_v13 = vpack.c.bf16 %v758_v30, %v756_v1  ;;  %v1920_v1 = vld [vmem:[#allocation14 + $0x630] sm:$0xff] }
 0x185   :  { %5418 = vmatpush1.bf16.msra.mxu0 %v5417_v36  ;;  %5612 = vmatprep.subr.bf16.mxu1 %v5611_v20  ;;  %v757_v36 = vld [vmem:[#allocation8 + $0x750] sm:$0xff]  ;;  %v1903_v20 = vld [vmem:[#allocation14 + $0x5a8] sm:$0xff]  ;;  %v1650_v19 = vadd.f32 %v8005_v12, %v1538_v60 }
 0x186   :  { %5420 = vmatprep.subr.bf16.mxu0 %v5419_v27  ;;  %v7126_v27 = vld [vmem:[#allocation2 + $0x68] sm:$0xff]  ;;  %v5433_v34 = vpack.c.bf16 %v757_v36, %v755_v5  ;;  %v5627_v28 = vpack.c.bf16 %v1909_v15, %v1903_v20  ;;  %v5441_v15 = vpack.c.bf16 %v765_v24, %v8012_v52  ;;  %v233_v52 = vld [vmem:[#allocation2 + $0xf0] sm:$0xff]  ;;  %v8050_v60 = vld [vmem:[#allocation8 + $0x7c0] sm:$0xff] }
 0x187   :  { %v1527_v31 = vmul.f32 %v7126_v27, %v7926_v56  ;;  %v1933_v5 = vld [vmem:[#allocation14 + $0x698] sm:$0xff]  ;;  %v7131_v27 = vld [vmem:[#allocation2 + $0x120] sm:$0xff] }
 0x188   :  { %5614 = vmatpush1.bf16.msra.mxu1 %v5613_v22  ;;  %v1902_v22 = vld [vmem:[#allocation14 + $0x5a0] sm:$0xff]  ;;  %v7130_v36 = vld [vmem:[#allocation2 + $0x128] sm:$0xff] }
 0x189   :  { %5422 = vmatpush1.bf16.msra.mxu0 %v5421_v38  ;;  %5616 = vmatprep.subr.bf16.mxu1 %v5615_v37  ;;  %v1908_v38 = vld [vmem:[#allocation14 + $0x5d0] sm:$0xff]  ;;  %v1626_v37 = vadd.f32 %v8005_v12, %v1514_v53  ;;  %v1639_v50 = vadd.f32 %v7940_v25, %v1527_v31  ;;  %v1638_v53 = vadd.f32 %v8005_v12, %v1526_v54 }
 0x18a   :  { %5424 = vmatprep.subr.bf16.mxu0 %v5423_v45  ;;  %v1921_v45 = vld [vmem:[#allocation14 + $0x638] sm:$0xff]  ;;  %v1551_v20 = vmul.f32 %v7130_v36, %v7926_v56  ;;  %v1550_v31 = vmul.f32 %v7131_v27, %v8000_v61  ;;  %v1939_v61 = vld [vmem:[#allocation14 + $0x6c8] sm:$0xff] }
 0x18b   :  { %v5631_v3 = vpack.c.bf16 %v1921_v45, %v1915_v44  ;;  %v8015_v30 = vmax.f32 %v1626_v37, 0.0  ;;  %v8021_v7 = vmax.f32 %v1639_v50, 0.0  ;;  %v5443_v44 = vpack.c.bf16 %v770_v26, %v768_v6  ;;  %v772_v45 = vld [vmem:[#allocation8 + $0x7c8] sm:$0xff]  ;;  %v774_v50 = vld [vmem:[#allocation8 + $0x7d8] sm:$0xff]  ;;  %v7133_v27 = vld [vmem:[#allocation5 + $0x8] sm:$0xf] }
 0x18c   :  { %5618 = vmatpush1.bf16.msra.mxu1 %v5617_v39  ;;  %v7128_v39 = vld [vmem:[#allocation2 + $0xc8] sm:$0xff]  ;;  %v8041_v51 = vmax.f32 %v1638_v53, 0.0  ;;  %v1663_v54 = vadd.f32 %v7940_v25, %v1551_v20  ;;  %v5447_v6 = vpack.c.bf16 %v774_v50, %v772_v45  ;;  %v1951_v26 = vld [vmem:[#allocation14 + $0x728] sm:$0xff] }
 0x18d   :  { %5426 = vmatpush1.bf16.msra.mxu0 %v5425_v55  ;;  %5620 = vmatprep.subr.bf16.mxu1 %v5619_v57  ;;  %v1539_v55 = vmul.f32 %v7128_v39, %v7926_v56  ;;  %v5629_v57 = vpack.c.bf16 %v1908_v38, %v1902_v22  ;;  %8810 = vst [vmem:[#allocation37_spill] sm:$0xff] %v8015_v30  ;;  %8811 = vst [vmem:[#allocation38_spill] sm:$0xff] %v8021_v7  ;;  %v1926_v22 = vld [vmem:[#allocation14 + $0x660] sm:$0xff]  ;;  %v1932_v56 = vld [vmem:[#allocation14 + $0x690] sm:$0xff] }
 0x18e   :  { %5428 = vmatprep.subr.bf16.mxu0 %v5427_v0  ;;  %v5437_v0 = vpack.c.bf16 %v761_v41, %v759_v35  ;;  %v8031_v35 = vld [vmem:[#allocation8 + $0x7b0] sm:$0xff]  ;;  %8812 = vst [vmem:[#allocation39_spill] sm:$0xff] %v8041_v51  ;;  %v5637_v62 = vpack.c.bf16 %v1932_v56, %v1926_v22  ;;  %v775_v22 = vld [vmem:[#allocation8 + $0x7e0] sm:$0xff] }
 0x18f   :  { %v1957_v53 = vld [vmem:[#allocation14 + $0x758] sm:$0xff]  ;;  %v1956_v45 = vld [vmem:[#allocation14 + $0x750] sm:$0xff] }
 0x190   :  { %5622 = vmatpush1.bf16.msra.mxu1 %v5621_v2  ;;  %v8019_v2 = vrot.slane %v7922_v40, %v7784_v21  ;;  %v5633_v40 = vpack.c.bf16 %v1920_v1, %v1914_v32  ;;  %v773_v32 = vld [vmem:[#allocation8 + $0x7d0] sm:$0xff]  ;;  %v1938_v1 = vld [vmem:[#allocation14 + $0x6c0] sm:$0xff] }
 0x191   :  { %5430 = vmatpush1.bf16.msra.mxu0 %v5429_v4  ;;  %5624 = vmatprep.subr.bf16.mxu1 %v5623_v17  ;;  %v5439_v4 = vpack.c.bf16 %v766_v49, %v764_v46  ;;  %v1927_v17 = vld [vmem:[#allocation14 + $0x668] sm:$0xff]  ;;  %v1945_v46 = vld [vmem:[#allocation14 + $0x6f8] sm:$0xff]  ;;  %v8038_v49 = vrot.slane %v7929_v63, %v7784_v21 }
 0x192   :  { %5432 = vmatprep.subr.bf16.mxu0 %v5431_v13  ;;  %v1651_v13 = vadd.f32 %v7940_v25, %v1539_v55  ;;  %v345_v25 = vmul.f32 %v7983_v8, %v233_v52  ;;  %v5639_v24 = vpack.c.bf16 %v1945_v46, %v1939_v61  ;;  %v777_v56 = vld [vmem:[#allocation8 + $0x7f0] sm:$0xff]  ;;  %v1963_v61 = vld [vmem:[#allocation14 + $0x788] sm:$0xff] }
 0x193   :  { %v211_v52 = vld [vmem:[#allocation2 + $0x40] sm:$0xff] }
 0x194   :  { %5626 = vmatpush1.bf16.msra.mxu1 %v5625_v33  ;;  %v222_v33 = vld [vmem:[#allocation2 + $0x98] sm:$0xff]  ;;  %v8053_v63 = vmax.f32 %v1651_v13, 0.0  ;;  %v8067_v20 = vadd.f32 %v7986_v10, %v345_v25 }
 0x195   :  { %5434 = vmatpush1.bf16.msra.mxu0 %v5433_v34  ;;  %5628 = vmatprep.subr.bf16.mxu1 %v5627_v28  ;;  %v221_v34 = vld [vmem:[#allocation2 + $0x90] sm:$0xff]  ;;  %v5635_v28 = vpack.c.bf16 %v1933_v5, %v1927_v17  ;;  %v334_v38 = vmul.f32 %v7973_v23, %v222_v33  ;;  %v8059_v17 = vmax.f32 %v1650_v19, 0.0  ;;  %v1662_v5 = vadd.f32 %v8005_v12, %v1550_v31 }
 0x196   :  { %5436 = vmatprep.subr.bf16.mxu0 %v5435_v48  ;;  %v333_v37 = vmul.f32 %v7983_v8, %v221_v34  ;;  %v7132_v48 = vld [vmem:[#allocation2 + $0x18] sm:$0xff]  ;;  %8813 = vst [vmem:[#allocation40_spill] sm:$0xff] %v8053_v63  ;;  %v245_v12 = vld [vmem:[#allocation2 + $0x150] sm:$0xff]  ;;  %v8072_v31 = vrot.slane %v7133_v27, %v7781_v11 }
 0x197   :  { %v1517_v41 = vmul.f32 %v7132_v48, %v8019_v2  ;;  %v8045_v39 = vadd.f32 %v7980_v43, %v334_v38  ;;  %8814 = vst [vmem:[#allocation41_spill] sm:$0xff] %v8059_v17  ;;  %v7134_v33 = vld [vmem:[#allocation7 + $0x8] sm:$0xf]  ;;  %v8081_v38 = vmax.f32 %v1663_v54, 0.0  ;;  %v5449_v48 = vpack.c.bf16 %v773_v32, %v8050_v60  ;;  %v1969_v54 = vld [vmem:[#allocation14 + $0x7b8] sm:$0xff]  ;;  %v779_v32 = vld [vmem:[#allocation8 + $0x800] sm:$0xff] }
 0x198   :  { %5630 = vmatpush1.bf16.msra.mxu1 %v5629_v57  ;;  %v8048_v55 = vadd.f32 %v7986_v10, %v333_v37  ;;  %v234_v57 = vld [vmem:[#allocation2 + $0xf8] sm:$0xff]  ;;  %v8075_v34 = vrot.slane %v7134_v33, %v7781_v11  ;;  %v8085_v37 = vrot.slane %v7134_v33, %v7807_v42  ;;  %v8095_v60 = vmax.f32 %v1662_v5, 0.0  ;;  %v784_v33 = vld [vmem:[#allocation8 + $0x828] sm:$0xff] }
 0x199   :  { %5438 = vmatpush1.bf16.msra.mxu0 %v5437_v0  ;;  %5632 = vmatprep.subr.bf16.mxu1 %v5631_v3  ;;  %v346_v0 = vmul.f32 %v7973_v23, %v234_v57  ;;  %v5445_v3 = vpack.c.bf16 %v8031_v35, %v8027_v18  ;;  %v1629_v13 = vadd.f32 %v8038_v49, %v1517_v41  ;;  %v778_v18 = vld [vmem:[#allocation8 + $0x7f8] sm:$0xff] }
 0x19a   :  { %5440 = vmatprep.subr.bf16.mxu0 %v5439_v4  ;;  %v1944_v4 = vld [vmem:[#allocation14 + $0x6f0] sm:$0xff]  ;;  %8815 = vst [vmem:[#allocation42_spill] sm:$0xff] %v8081_v38  ;;  %v5643_v41 = vpack.c.bf16 %v1957_v53, %v1951_v26  ;;  %8816 = vst [vmem:[#allocation43_spill] sm:$0xff] %v8095_v60 }
 0x19b   :  { %2935 = vmatmul.mubr.f32.vlgmr.msra.gmra.mrb[16].mxu1 %v8015_v30  ;;  %v8064_v36 = vadd.f32 %v7980_v43, %v346_v0  ;;  %v5641_v35 = vpack.c.bf16 %v1944_v4, %v1938_v1  ;;  %v782_v0 = vld [vmem:[#allocation8 + $0x818] sm:$0xff]  ;;  %v5647_v4 = vpack.c.bf16 %v1969_v54, %v1963_v61  ;;  %v224_v53 = vld [vmem:[#allocation2 + $0xa8] sm:$0xff] }
 0x19c   :  { %5634 = vmatpush1.bf16.msra.mxu1 %v5633_v40  ;;  %2940 = vmatprep.mubr.f32.mxu1 %v8021_v7  ;;  %v776_v40 = vld [vmem:[#allocation8 + $0x7e8] sm:$0xff]  ;;  %v1962_v1 = vld [vmem:[#allocation14 + $0x780] sm:$0xff] }
 0x19d   :  { %5442 = vmatpush1.bf16.msra.mxu0 %v5441_v15  ;;  %5636 = vmatprep.subr.bf16.mxu1 %v5635_v28  ;;  %v246_v15 = vld [vmem:[#allocation2 + $0x158] sm:$0xff]  ;;  %v8078_v28 = vrot.slane %v7133_v27, %v7807_v42  ;;  %v5451_v50 = vpack.c.bf16 %v778_v18, %v776_v40  ;;  %v781_v18 = vld [vmem:[#allocation8 + $0x810] sm:$0xff] }
 0x19e   :  { %5444 = vmatprep.subr.bf16.mxu0 %v5443_v44  ;;  %v358_v19 = vmul.f32 %v7973_v23, %v246_v15  ;;  %v357_v23 = vmul.f32 %v7983_v8, %v245_v12  ;;  %v1950_v44 = vld [vmem:[#allocation14 + $0x720] sm:$0xff]  ;;  %v212_v8 = vld [vmem:[#allocation2 + $0x48] sm:$0xff]  ;;  %v223_v15 = vld [vmem:[#allocation2 + $0xa0] sm:$0xff]  ;;  %v5457_v61 = vpack.c.bf16 %v781_v18, %v779_v32 }
 0x19f   :  { %2941 = vmatmul.mubr.f32.gmra.mrb[18].mxu1 %v8041_v51  ;;  %v324_v25 = vmul.f32 %v8072_v31, %v212_v8  ;;  %v1981_v12 = vld [vmem:[#allocation14 + $0x818] sm:$0xff]  ;;  %v335_v27 = vmul.f32 %v8078_v28, %v223_v15  ;;  %v1974_v54 = vld [vmem:[#allocation14 + $0x7e0] sm:$0xff]  ;;  %v1980_v8 = vld [vmem:[#allocation14 + $0x810] sm:$0xff] }
 0x1a0   :  { %5638 = vmatpush1.bf16.msra.mxu1 %v5637_v62  ;;  %2946 = vmatprep.mubr.f32.mxu1 %v8053_v63  ;;  %v8089_v46 = vadd.f32 %v7980_v43, %v358_v19  ;;  %v8092_v57 = vadd.f32 %v7986_v10, %v357_v23  ;;  %v780_v62 = vld [vmem:[#allocation8 + $0x808] sm:$0xff]  ;;  %v5453_v43 = vpack.c.bf16 %v777_v56, %v775_v22  ;;  %v8100_v10 = vmax.f32 %v1629_v13, 0.0  ;;  %v783_v23 = vld [vmem:[#allocation8 + $0x820] sm:$0xff] }
 0x1a1   :  { %5446 = vmatpush1.bf16.msra.mxu0 %v5445_v3  ;;  %5640 = vmatprep.subr.bf16.mxu1 %v5639_v24  ;;  %v323_v3 = vmul.f32 %v8078_v28, %v211_v52  ;;  %v5645_v24 = vpack.c.bf16 %v1956_v45, %v1950_v44  ;;  %v8103_v5 = vadd.f32 %v8075_v34, %v324_v25  ;;  %v1975_v19 = vld [vmem:[#allocation14 + $0x7e8] sm:$0xff]  ;;  %v481_v22 = vmax.f32 %v7996_v58, 0.0  ;;  %v236_v45 = vld [vmem:[#allocation2 + $0x108] sm:$0xff] }
 0x1a2   :  { %5448 = vmatprep.subr.bf16.mxu0 %v5447_v6  ;;  %8817 = vst [vmem:[#allocation44_spill] sm:$0xff] %v8100_v10  ;;  %v1968_v6 = vld [vmem:[#allocation14 + $0x7b0] sm:$0xff]  ;;  %v5455_v40 = vpack.c.bf16 %v782_v0, %v780_v62  ;;  %v336_v13 = vmul.f32 %v8072_v31, %v224_v53  ;;  %v8117_v44 = vadd.f32 %v8085_v37, %v335_v27  ;;  %v1987_v0 = vld [vmem:[#allocation14 + $0x848] sm:$0xff]  ;;  %v1993_v25 = vld [vmem:[#allocation14 + $0x878] sm:$0xff]  ;;  %v493_v53 = vmax.f32 %v8048_v55, 0.0 }
 0x1a3   :  { %2947 = vmatmul.mubr.f32.gmra.mrb[20].mxu1 %v8059_v17  ;;  %v8106_v26 = vadd.f32 %v8085_v37, %v323_v3  ;;  %v5649_v56 = vpack.c.bf16 %v1968_v6, %v1962_v1  ;;  %v348_v58 = vmul.f32 %v8072_v31, %v236_v45  ;;  %v235_v52 = vld [vmem:[#allocation2 + $0x100] sm:$0xff]  ;;  %v494_v3 = vmax.f32 %v8045_v39, 0.0  ;;  %v790_v6 = vld [vmem:[#allocation8 + $0x858] sm:$0xff] }
 0x1a4   :  { %5642 = vmatpush1.bf16.msra.mxu1 %v5641_v35  ;;  %2952 = vmatprep.mubr.f32.mxu1 %v8081_v38  ;;  %v786_v35 = vld [vmem:[#allocation8 + $0x838] sm:$0xff]  ;;  %v788_v1 = vld [vmem:[#allocation8 + $0x848] sm:$0xff]  ;;  %v5655_v39 = vpack.c.bf16 %v1993_v25, %v1987_v0  ;;  %v793_v0 = vld [vmem:[#allocation8 + $0x870] sm:$0xff] }
 0x1a5   :  { %5450 = vmatpush1.bf16.msra.mxu0 %v5449_v48  ;;  %5644 = vmatprep.subr.bf16.mxu1 %v5643_v41  ;;  %v785_v48 = vld [vmem:[#allocation8 + $0x830] sm:$0xff]  ;;  %v8114_v41 = vadd.f32 %v8075_v34, %v336_v13  ;;  %v5459_v62 = vpack.c.bf16 %v786_v35, %v784_v33  ;;  %v247_v18 = vld [vmem:[#allocation2 + $0x160] sm:$0xff]  ;;  %v5463_v35 = vpack.c.bf16 %v790_v6, %v788_v1  ;;  %v794_v45 = vld [vmem:[#allocation8 + $0x878] sm:$0xff] }
 0x1a6   :  { %5452 = vmatprep.subr.bf16.mxu0 %v5451_v50  ;;  %v5651_v50 = vpack.c.bf16 %v1981_v12, %v1975_v19  ;;  %v5461_v32 = vpack.c.bf16 %v785_v48, %v783_v23  ;;  %v787_v19 = vld [vmem:[#allocation8 + $0x840] sm:$0xff]  ;;  %v1992_v13 = vld [vmem:[#allocation14 + $0x870] sm:$0xff]  ;;  %v359_v33 = vmul.f32 %v8078_v28, %v247_v18  ;;  %v2005_v55 = vld [vmem:[#allocation14 + $0x8d8] sm:$0xff]  ;;  %v506_v23 = vmax.f32 %v8064_v36, 0.0 }
 0x1a7   :  { %2953 = vmatmul.mubr.f32.gmra.mrb[22].mxu1 %v8095_v60  ;;  %v1986_v12 = vld [vmem:[#allocation14 + $0x840] sm:$0xff]  ;;  %v792_v48 = vld [vmem:[#allocation8 + $0x868] sm:$0xff]  ;;  %v2017_v25 = vld [vmem:[#allocation14 + $0x938] sm:$0xff] }
 0x1a8   :  { %5646 = vmatpush1.bf16.msra.mxu1 %v5645_v24  ;;  %3023 = vmatprep.mubr.f32.mxu1 %v8100_v10  ;;  %v347_v24 = vmul.f32 %v8078_v28, %v235_v52  ;;  %v505_v28 = vmax.f32 %v8067_v20, 0.0  ;;  %v1998_v52 = vld [vmem:[#allocation14 + $0x8a0] sm:$0xff]  ;;  %v2004_v36 = vld [vmem:[#allocation14 + $0x8d0] sm:$0xff]  ;;  %v517_v20 = vmax.f32 %v8092_v57, 0.0 }
 0x1a9   :  { %5454 = vmatpush1.bf16.msra.mxu0 %v5453_v43  ;;  %5648 = vmatprep.subr.bf16.mxu1 %v5647_v4  ;;  %v8123_v43 = vadd.f32 %v8075_v34, %v348_v58  ;;  %v5653_v4 = vpack.c.bf16 %v1980_v8, %v1974_v54  ;;  %v791_v58 = vld [vmem:[#allocation8 + $0x860] sm:$0xff]  ;;  %v5661_v1 = vpack.c.bf16 %v2004_v36, %v1998_v52 }
 0x1aa   :  { %5456 = vmatprep.subr.bf16.mxu0 %v5455_v40  ;;  %v8127_v15 = vadd.f32 %v8085_v37, %v347_v24  ;;  %v248_v40 = vld [vmem:[#allocation2 + $0x168] sm:$0xff]  ;;  %v798_v24 = vld [vmem:[#allocation8 + $0x898] sm:$0xff]  ;;  %v5469_v6 = vpack.c.bf16 %v793_v0, %v791_v58  ;;  %v803_v52 = vld [vmem:[#allocation8 + $0x8c0] sm:$0xff] }
 0x1ab   :  { %v360_v27 = vmul.f32 %v8072_v31, %v248_v40  ;;  %v5657_v31 = vpack.c.bf16 %v1992_v13, %v1986_v12  ;;  %v2016_v40 = vld [vmem:[#allocation14 + $0x930] sm:$0xff]  ;;  %v2029_v12 = vld [vmem:[#allocation14 + $0x998] sm:$0xff]  ;;  %v2034_v36 = vld [vmem:[#allocation14 + $0x9c0] sm:$0xff] }
 0x1ac   :  { %1248 = vmatmul.mubr.f32.vlgmr.msra.gmra.mrb[0].mxu0 %v481_v22  ;;  %5650 = vmatpush1.bf16.msra.mxu1 %v5649_v56  ;;  %v789_v22 = vld [vmem:[#allocation8 + $0x850] sm:$0xff]  ;;  %v1999_v56 = vld [vmem:[#allocation14 + $0x8a8] sm:$0xff] }
 0x1ad   :  { %5458 = vmatpush1.bf16.msra.mxu0 %v5457_v61  ;;  %5652 = vmatprep.subr.bf16.mxu1 %v5651_v50  ;;  %v8133_v61 = vadd.f32 %v8075_v34, %v360_v27  ;;  %v8136_v50 = vadd.f32 %v8085_v37, %v359_v33  ;;  %v5465_v54 = vpack.c.bf16 %v789_v22, %v787_v19  ;;  %v2011_v34 = vld [vmem:[#allocation14 + $0x908] sm:$0xff]  ;;  %v518_v37 = vmax.f32 %v8089_v46, 0.0  ;;  %v802_v27 = vld [vmem:[#allocation8 + $0x8b8] sm:$0xff] }
 0x1ae   :  { %5460 = vmatprep.subr.bf16.mxu0 %v5459_v62  ;;  %1253 = vmatprep.mubr.f32.mxu0 %v494_v3  ;;  %v5659_v8 = vpack.c.bf16 %v2005_v55, %v1999_v56  ;;  %v5467_v62 = vpack.c.bf16 %v794_v45, %v792_v48  ;;  %v796_v3 = vld [vmem:[#allocation8 + $0x888] sm:$0xff]  ;;  %v484_v46 = vmax.f32 %v8103_v5, 0.0  ;;  %v799_v22 = vld [vmem:[#allocation8 + $0x8a0] sm:$0xff]  ;;  %v801_v48 = vld [vmem:[#allocation8 + $0x8b0] sm:$0xff] }
 0x1af   :  { %v5471_v18 = vpack.c.bf16 %v798_v24, %v796_v3  ;;  %v2023_v19 = vld [vmem:[#allocation14 + $0x968] sm:$0xff]  ;;  %v2022_v56 = vld [vmem:[#allocation14 + $0x960] sm:$0xff]  ;;  %v2028_v55 = vld [vmem:[#allocation14 + $0x990] sm:$0xff] }
 0x1b0   :  { %5654 = vmatpush1.bf16.msra.mxu1 %v5653_v4  ;;  %1254 = vmatmul.mubr.f32.gmra.mrb[2].mxu0 %v493_v53  ;;  %v795_v4 = vld [vmem:[#allocation8 + $0x880] sm:$0xff]  ;;  %v800_v13 = vld [vmem:[#allocation8 + $0x8a8] sm:$0xff]  ;;  %v806_v5 = vld [vmem:[#allocation8 + $0x8d8] sm:$0xff] }
 0x1b1   :  { %5462 = vmatpush1.bf16.msra.mxu0 %v5461_v32  ;;  %5656 = vmatprep.subr.bf16.mxu1 %v5655_v39  ;;  %v5663_v32 = vpack.c.bf16 %v2017_v25, %v2011_v34  ;;  %v2010_v53 = vld [vmem:[#allocation14 + $0x900] sm:$0xff]  ;;  %v797_v39 = vld [vmem:[#allocation8 + $0x890] sm:$0xff]  ;;  %v2035_v45 = vld [vmem:[#allocation14 + $0x9c8] sm:$0xff] }
 0x1b2   :  { %5464 = vmatprep.subr.bf16.mxu0 %v5463_v35  ;;  %1259 = vmatprep.mubr.f32.mxu0 %v506_v23  ;;  %v5665_v33 = vpack.c.bf16 %v2016_v40, %v2010_v53  ;;  %v5473_v57 = vpack.c.bf16 %v797_v39, %v795_v4  ;;  %v5667_v35 = vpack.c.bf16 %v2029_v12, %v2023_v19  ;;  %v805_v34 = vld [vmem:[#allocation8 + $0x8d0] sm:$0xff]  ;;  %v2047_v25 = vld [vmem:[#allocation14 + $0xa28] sm:$0xff]  ;;  %v810_v24 = vld [vmem:[#allocation8 + $0x8f8] sm:$0xff] }
 0x1b3   :  { %v5475_v23 = vpack.c.bf16 %v802_v27, %v800_v13  ;;  %v808_v3 = vld [vmem:[#allocation8 + $0x8e8] sm:$0xff]  ;;  %v2046_v4 = vld [vmem:[#allocation14 + $0xa20] sm:$0xff]  ;;  %v2065_v19 = vld [vmem:[#allocation14 + $0xab8] sm:$0xff] }
 0x1b4   :  { %5658 = vmatpush1.bf16.msra.mxu1 %v5657_v31  ;;  %1260 = vmatmul.mubr.f32.gmra.mrb[4].mxu0 %v505_v28  ;;  %v2041_v31 = vld [vmem:[#allocation14 + $0x9f8] sm:$0xff]  ;;  %v804_v28 = vld [vmem:[#allocation8 + $0x8c8] sm:$0xff]  ;;  %v5483_v40 = vpack.c.bf16 %v810_v24, %v808_v3 }
 0x1b5   :  { %5466 = vmatpush1.bf16.msra.mxu0 %v5465_v54  ;;  %5660 = vmatprep.subr.bf16.mxu1 %v5659_v8  ;;  %v5669_v54 = vpack.c.bf16 %v2028_v55, %v2022_v56  ;;  %v5477_v8 = vpack.c.bf16 %v801_v48, %v799_v22  ;;  %v5671_v58 = vpack.c.bf16 %v2041_v31, %v2035_v45  ;;  %v2052_v53 = vld [vmem:[#allocation14 + $0xa50] sm:$0xff]  ;;  %v2059_v39 = vld [vmem:[#allocation14 + $0xa88] sm:$0xff]  ;;  %v2077_v48 = vld [vmem:[#allocation14 + $0xb18] sm:$0xff] }
 0x1b6   :  { %5468 = vmatprep.subr.bf16.mxu0 %v5467_v62  ;;  %1265 = vmatprep.mubr.f32.mxu0 %v518_v37  ;;  %v2040_v62 = vld [vmem:[#allocation14 + $0x9f0] sm:$0xff]  ;;  %v5479_v0 = vpack.c.bf16 %v806_v5, %v804_v28  ;;  %v2053_v37 = vld [vmem:[#allocation14 + $0xa58] sm:$0xff]  ;;  %v5677_v13 = vpack.c.bf16 %v2052_v53, %v2046_v4  ;;  %v2082_v4 = vld [vmem:[#allocation14 + $0xb40] sm:$0xff] }
 0x1b7   :  { %v812_v12 = vld [vmem:[#allocation8 + $0x908] sm:$0xff]  ;;  %v813_v55 = vld [vmem:[#allocation8 + $0x910] sm:$0xff]  ;;  %v818_v31 = vld [vmem:[#allocation8 + $0x938] sm:$0xff] }
 0x1b8   :  { %5662 = vmatpush1.bf16.msra.mxu1 %v5661_v1  ;;  %1266 = vmatmul.mubr.f32.gmra.mrb[6].mxu0 %v517_v20  ;;  %v5673_v1 = vpack.c.bf16 %v2040_v62, %v2034_v36  ;;  %v5481_v20 = vpack.c.bf16 %v805_v34, %v803_v52  ;;  %v2064_v22 = vld [vmem:[#allocation14 + $0xab0] sm:$0xff]  ;;  %v2089_v34 = vld [vmem:[#allocation14 + $0xb78] sm:$0xff] }
 0x1b9   :  { %5470 = vmatpush1.bf16.msra.mxu0 %v5469_v6  ;;  %5664 = vmatprep.subr.bf16.mxu1 %v5663_v32  ;;  %v5675_v6 = vpack.c.bf16 %v2053_v37, %v2047_v25  ;;  %v807_v32 = vld [vmem:[#allocation8 + $0x8e0] sm:$0xff]  ;;  %v816_v45 = vld [vmem:[#allocation8 + $0x928] sm:$0xff]  ;;  %v817_v62 = vld [vmem:[#allocation8 + $0x930] sm:$0xff] }
 0x1ba   :  { %5472 = vmatprep.subr.bf16.mxu0 %v5471_v18  ;;  %1336 = vmatprep.mubr.f32.mxu0 %v484_v46  ;;  %v809_v18 = vld [vmem:[#allocation8 + $0x8f0] sm:$0xff]  ;;  %v814_v46 = vld [vmem:[#allocation8 + $0x918] sm:$0xff]  ;;  %v5491_v36 = vpack.c.bf16 %v818_v31, %v816_v45  ;;  %v8142_v25 = vld [vmem:[#allocation11] sm:$0xff] }
 0x1bb   :  { %v5485_v27 = vpack.c.bf16 %v809_v18, %v807_v32  ;;  %v5487_v56 = vpack.c.bf16 %v814_v46, %v812_v12  ;;  %v2076_v52 = vld [vmem:[#allocation14 + $0xb10] sm:$0xff]  ;;  %v8146_v37 = vrot.slane %v8142_v25, %v7816_v47  ;;  %v822_v24 = vld [vmem:[#allocation8 + $0x958] sm:$0xff]  ;;  %v819_v32 = vld [vmem:[#allocation8 + $0x940] sm:$0xff] }
 0x1bc   :  { %5666 = vmatpush1.bf16.msra.mxu1 %v5665_v33  ;;  %v5679_v33 = vpack.c.bf16 %v2065_v19, %v2059_v39  ;;  %v820_v3 = vld [vmem:[#allocation8 + $0x948] sm:$0xff]  ;;  %v821_v18 = vld [vmem:[#allocation8 + $0x950] sm:$0xff]  ;;  %v7136_v12 = vld [vmem:[#allocation2 + $0x10] sm:$0xff] }
 0x1bd   :  { %5474 = vmatpush1.bf16.msra.mxu0 %v5473_v57  ;;  %5668 = vmatprep.subr.bf16.mxu1 %v5667_v35  ;;  %v811_v57 = vld [vmem:[#allocation8 + $0x900] sm:$0xff]  ;;  %v2088_v53 = vld [vmem:[#allocation14 + $0xb70] sm:$0xff]  ;;  %v2101_v19 = vld [vmem:[#allocation14 + $0xbd8] sm:$0xff]  ;;  %v1516_v46 = vmul.f32 %v7136_v12, %v8146_v37 }
 0x1be   :  { %5476 = vmatprep.subr.bf16.mxu0 %v5475_v23  ;;  %v2058_v35 = vld [vmem:[#allocation14 + $0xa80] sm:$0xff]  ;;  %v2071_v23 = vld [vmem:[#allocation14 + $0xae8] sm:$0xff]  ;;  %v5489_v5 = vpack.c.bf16 %v813_v55, %v811_v57  ;;  %v5497_v55 = vpack.c.bf16 %v821_v18, %v819_v32  ;;  %v2100_v31 = vld [vmem:[#allocation14 + $0xbd0] sm:$0xff] }
 0x1bf   :  { %v5681_v28 = vpack.c.bf16 %v2064_v22, %v2058_v35  ;;  %v2095_v39 = vld [vmem:[#allocation14 + $0xba8] sm:$0xff]  ;;  %v826_v57 = vld [vmem:[#allocation8 + $0x978] sm:$0xff]  ;;  %v5689_v35 = vpack.c.bf16 %v2088_v53, %v2082_v4  ;;  %v2112_v53 = vld [vmem:[#allocation14 + $0xc30] sm:$0xff] }
 0x1c0   :  { %5670 = vmatpush1.bf16.msra.mxu1 %v5669_v54  ;;  %v5683_v54 = vpack.c.bf16 %v2077_v48, %v2071_v23  ;;  %v7138_v22 = vld [vmem:[#allocation2 + $0x78] sm:$0xff]  ;;  %v5691_v23 = vpack.c.bf16 %v2101_v19, %v2095_v39  ;;  %v829_v18 = vld [vmem:[#allocation8 + $0x990] sm:$0xff] }
 0x1c1   :  { %5478 = vmatpush1.bf16.msra.mxu0 %v5477_v8  ;;  %5672 = vmatprep.subr.bf16.mxu1 %v5671_v58  ;;  %v815_v8 = vld [vmem:[#allocation8 + $0x920] sm:$0xff]  ;;  %v2125_v19 = vld [vmem:[#allocation14 + $0xc98] sm:$0xff] }
 0x1c2   :  { %5480 = vmatprep.subr.bf16.mxu0 %v5479_v0  ;;  %v2070_v58 = vld [vmem:[#allocation14 + $0xae0] sm:$0xff]  ;;  %v2083_v0 = vld [vmem:[#allocation14 + $0xb48] sm:$0xff] }
 0x1c3   :  { %v823_v48 = vld [vmem:[#allocation8 + $0x960] sm:$0xff] }
 0x1c4   :  { %5674 = vmatpush1.bf16.msra.mxu1 %v5673_v1  ;;  %v5685_v1 = vpack.c.bf16 %v2076_v52, %v2070_v58  ;;  %v2094_v45 = vld [vmem:[#allocation14 + $0xba0] sm:$0xff]  ;;  %v828_v52 = vld [vmem:[#allocation8 + $0x988] sm:$0xff] }
 0x1c5   :  { %5482 = vmatpush1.bf16.msra.mxu0 %v5481_v20  ;;  %5676 = vmatprep.subr.bf16.mxu1 %v5675_v6  ;;  %v5493_v20 = vpack.c.bf16 %v817_v62, %v815_v8  ;;  %v5687_v6 = vpack.c.bf16 %v2089_v34, %v2083_v0  ;;  %v2113_v8 = vld [vmem:[#allocation14 + $0xc38] sm:$0xff]  ;;  %v5693_v34 = vpack.c.bf16 %v2100_v31, %v2094_v45  ;;  %v827_v32 = vld [vmem:[#allocation8 + $0x980] sm:$0xff] }
 0x1c6   :  { %5484 = vmatprep.subr.bf16.mxu0 %v5483_v40  ;;  %v5495_v40 = vpack.c.bf16 %v822_v24, %v820_v3  ;;  %v7139_v62 = vld [vmem:[#allocation2 + $0x70] sm:$0xff]  ;;  %v7140_v24 = vld [vmem:[#allocation2 + $0xd8] sm:$0xff]  ;;  %v8170_v31 = vrot.slane %v8142_v25, %v7871_v59 }
 0x1c7   :  { %v1528_v0 = vmul.f32 %v7139_v62, %v8146_v37  ;;  %v2106_v4 = vld [vmem:[#allocation14 + $0xc00] sm:$0xff]  ;;  %v2119_v39 = vld [vmem:[#allocation14 + $0xc68] sm:$0xff]  ;;  %v2137_v62 = vld [vmem:[#allocation14 + $0xcf8] sm:$0xff] }
 0x1c8   :  { %5678 = vmatpush1.bf16.msra.mxu1 %v5677_v13  ;;  %v8149_v13 = vld [vmem:[#allocation13] sm:$0xff] }
 0x1c9   :  { %5486 = vmatpush1.bf16.msra.mxu0 %v5485_v27  ;;  %5680 = vmatprep.subr.bf16.mxu1 %v5679_v33  ;;  %v8153_v27 = vrot.slane %v8149_v13, %v7816_v47  ;;  %v824_v33 = vld [vmem:[#allocation8 + $0x968] sm:$0xff] }
 0x1ca   :  { %5488 = vmatprep.subr.bf16.mxu0 %v5487_v56  ;;  %v1529_v56 = vmul.f32 %v7138_v22, %v8019_v2 }
 0x1cb   :  { %v1628_v58 = vadd.f32 %v8153_v27, %v1516_v46  ;;  %v832_v46 = vld [vmem:[#allocation8 + $0x9a8] sm:$0xff] }
 0x1cc   :  { %5682 = vmatpush1.bf16.msra.mxu1 %v5681_v28  ;;  %v5499_v28 = vpack.c.bf16 %v826_v57, %v824_v33  ;;  %v1641_v3 = vadd.f32 %v8038_v49, %v1529_v56  ;;  %v834_v33 = vld [vmem:[#allocation8 + $0x9b8] sm:$0xff]  ;;  %v1640_v57 = vadd.f32 %v8153_v27, %v1528_v0  ;;  %v7142_v56 = vld [vmem:[#allocation2 + $0x138] sm:$0xff]  ;;  %v836_v0 = vld [vmem:[#allocation8 + $0x9c8] sm:$0xff] }
 0x1cd   :  { %5490 = vmatpush1.bf16.msra.mxu0 %v5489_v5  ;;  %5684 = vmatprep.subr.bf16.mxu1 %v5683_v54  ;;  %v825_v5 = vld [vmem:[#allocation8 + $0x970] sm:$0xff]  ;;  %v2107_v54 = vld [vmem:[#allocation14 + $0xc08] sm:$0xff]  ;;  %v8160_v12 = vmax.f32 %v1628_v58, 0.0 }
 0x1ce   :  { %5492 = vmatprep.subr.bf16.mxu0 %v5491_v36  ;;  %v830_v36 = vld [vmem:[#allocation8 + $0x998] sm:$0xff]  ;;  %v2124_v58 = vld [vmem:[#allocation14 + $0xc90] sm:$0xff] }
 0x1d0   :  { %5686 = vmatpush1.bf16.msra.mxu1 %v5685_v1  ;;  %v1541_v1 = vmul.f32 %v7140_v24, %v8019_v2 }
 0x1d1   :  { %5494 = vmatpush1.bf16.msra.mxu0 %v5493_v20  ;;  %5688 = vmatprep.subr.bf16.mxu1 %v5687_v6  ;;  %v5501_v20 = vpack.c.bf16 %v825_v5, %v823_v48  ;;  %v5695_v6 = vpack.c.bf16 %v2113_v8, %v2107_v54  ;;  %v8165_v48 = vmax.f32 %v1641_v3, 0.0  ;;  %v5699_v5 = vpack.c.bf16 %v2125_v19, %v2119_v39  ;;  %v831_v54 = vld [vmem:[#allocation8 + $0x9a0] sm:$0xff] }
 0x1d2   :  { %5496 = vmatprep.subr.bf16.mxu0 %v5495_v40  ;;  %v5503_v40 = vpack.c.bf16 %v830_v36, %v828_v52  ;;  %v1653_v45 = vadd.f32 %v8038_v49, %v1541_v1  ;;  %v2118_v8 = vld [vmem:[#allocation14 + $0xc60] sm:$0xff]  ;;  %v5507_v52 = vpack.c.bf16 %v834_v33, %v832_v46  ;;  %v2131_v36 = vld [vmem:[#allocation14 + $0xcc8] sm:$0xff]  ;;  %v8173_v3 = vmax.f32 %v1640_v57, 0.0  ;;  %v837_v57 = vld [vmem:[#allocation8 + $0x9d0] sm:$0xff] }
 0x1d3   :  { %v835_v19 = vld [vmem:[#allocation8 + $0x9c0] sm:$0xff] }
 0x1d4   :  { %5690 = vmatpush1.bf16.msra.mxu1 %v5689_v35  ;;  %v7141_v35 = vld [vmem:[#allocation2 + $0xd0] sm:$0xff] }
 0x1d5   :  { %5498 = vmatpush1.bf16.msra.mxu0 %v5497_v55  ;;  %5692 = vmatprep.subr.bf16.mxu1 %v5691_v23  ;;  %v1540_v22 = vmul.f32 %v7141_v35, %v8146_v37  ;;  %v1553_v55 = vmul.f32 %v7142_v56, %v8019_v2  ;;  %v5697_v23 = vpack.c.bf16 %v2112_v53, %v2106_v4  ;;  %v833_v2 = vld [vmem:[#allocation8 + $0x9b0] sm:$0xff]  ;;  %v8179_v4 = vmax.f32 %v1653_v45, 0.0  ;;  %v2130_v46 = vld [vmem:[#allocation14 + $0xcc0] sm:$0xff]  ;;  %v2143_v35 = vld [vmem:[#allocation14 + $0xd28] sm:$0xff] }
 0x1d6   :  { %5500 = vmatprep.subr.bf16.mxu0 %v5499_v28  ;;  %v5505_v28 = vpack.c.bf16 %v829_v18, %v827_v32  ;;  %v5701_v32 = vpack.c.bf16 %v2124_v58, %v2118_v8  ;;  %v7144_v53 = vld [vmem:[#allocation2 + $0x28] sm:$0xff]  ;;  %v8184_v18 = vrot.slane %v8149_v13, %v7871_v59  ;;  %v5509_v39 = vpack.c.bf16 %v833_v2, %v831_v54  ;;  %v840_v56 = vld [vmem:[#allocation8 + $0x9e8] sm:$0xff]  ;;  %v2142_v2 = vld [vmem:[#allocation14 + $0xd20] sm:$0xff] }
 0x1d7   :  { %v1652_v24 = vadd.f32 %v8153_v27, %v1540_v22  ;;  %v1665_v1 = vadd.f32 %v8038_v49, %v1553_v55  ;;  %8818 = vst [vmem:[#allocation45_spill] sm:$0xff] %v8179_v4  ;;  %v5703_v49 = vpack.c.bf16 %v2137_v62, %v2131_v36  ;;  %v2149_v22 = vld [vmem:[#allocation14 + $0xd58] sm:$0xff]  ;;  %v5513_v8 = vpack.c.bf16 %v837_v57, %v835_v19  ;;  %v2148_v36 = vld [vmem:[#allocation14 + $0xd50] sm:$0xff] }
 0x1d8   :  { %5694 = vmatpush1.bf16.msra.mxu1 %v5693_v34  ;;  %v838_v34 = vld [vmem:[#allocation8 + $0x9d8] sm:$0xff]  ;;  %v5707_v58 = vpack.c.bf16 %v2149_v22, %v2143_v35  ;;  %v1743_v22 = vld [vmem:[#allocation14 + $0xa8] sm:$0xff]  ;;  %v1868_v59 = vld [vmem:[#allocation14 + $0x490] sm:$0xff] }
 0x1d9   :  { %5502 = vmatpush1.bf16.msra.mxu0 %v5501_v20  ;;  %5696 = vmatprep.subr.bf16.mxu1 %v5695_v6  ;;  %v7143_v20 = vld [vmem:[#allocation2 + $0x130] sm:$0xff]  ;;  %v5511_v33 = vpack.c.bf16 %v838_v34, %v836_v0  ;;  %v841_v0 = vld [vmem:[#allocation8 + $0x9f0] sm:$0xff]  ;;  %v2155_v34 = vld [vmem:[#allocation14 + $0xd88] sm:$0xff] }
 0x1da   :  { %5504 = vmatprep.subr.bf16.mxu0 %v5503_v40  ;;  %v1552_v6 = vmul.f32 %v7143_v20, %v8146_v37  ;;  %v1519_v40 = vmul.f32 %v7144_v53, %v8170_v31  ;;  %v2136_v37 = vld [vmem:[#allocation14 + $0xcf0] sm:$0xff]  ;;  %v842_v55 = vld [vmem:[#allocation8 + $0x9f8] sm:$0xff]  ;;  %v1731_v20 = vld [vmem:[#allocation14 + $0x48] sm:$0xff] }
 0x1db   :  { %3024 = vmatmul.mubr.f32.vlgmr.msra.gmra.mrb[16].mxu1 %v8160_v12  ;;  %v5515_v62 = vpack.c.bf16 %v842_v55, %v840_v56  ;;  %v2173_v57 = vld [vmem:[#allocation14 + $0xe18] sm:$0xff]  ;;  %v483_v56 = vmax.f32 %v8106_v26, 0.0  ;;  %v495_v26 = vmax.f32 %v8117_v44, 0.0  ;;  %v507_v44 = vmax.f32 %v8127_v15, 0.0 }
 0x1dc   :  { %5698 = vmatpush1.bf16.msra.mxu1 %v5697_v23  ;;  %3029 = vmatprep.mubr.f32.mxu1 %v8165_v48  ;;  %v8187_v23 = vmax.f32 %v1652_v24, 0.0  ;;  %v1664_v45 = vadd.f32 %v8153_v27, %v1552_v6  ;;  %v1631_v54 = vadd.f32 %v8184_v18, %v1519_v40  ;;  %v2161_v27 = vld [vmem:[#allocation14 + $0xdb8] sm:$0xff]  ;;  %v5709_v6 = vpack.c.bf16 %v2148_v36, %v2142_v2  ;;  %v1736_v2 = vld [vmem:[#allocation14 + $0x70] sm:$0xff]  ;;  %v1742_v36 = vld [vmem:[#allocation14 + $0xa0] sm:$0xff] }
 0x1dd   :  { %5506 = vmatpush1.bf16.msra.mxu0 %v5505_v28  ;;  %5700 = vmatprep.subr.bf16.mxu1 %v5699_v5  ;;  %v5705_v28 = vpack.c.bf16 %v2136_v37, %v2130_v46  ;;  %v8191_v5 = vmax.f32 %v1665_v1, 0.0  ;;  %v1725_v24 = vld [vmem:[#allocation14 + $0x18] sm:$0xff]  ;;  %v5711_v40 = vpack.c.bf16 %v2161_v27, %v2155_v34  ;;  %v1724_v46 = vld [vmem:[#allocation14 + $0x10] sm:$0xff]  ;;  %v1730_v37 = vld [vmem:[#allocation14 + $0x40] sm:$0xff]  ;;  %v519_v15 = vmax.f32 %v8136_v50, 0.0 }
 0x1de   :  { %5508 = vmatprep.subr.bf16.mxu0 %v5507_v52  ;;  %8819 = vst [vmem:[#allocation46_spill] sm:$0xff] %v8187_v23  ;;  %v839_v52 = vld [vmem:[#allocation8 + $0x9e0] sm:$0xff]  ;;  %v8195_v1 = vmax.f32 %v1664_v45, 0.0  ;;  %v5935_v19 = vpack.c.bf16 %v1731_v20, %v1725_v24  ;;  %v1737_v35 = vld [vmem:[#allocation14 + $0x78] sm:$0xff]  ;;  %v5937_v45 = vpack.c.bf16 %v1730_v37, %v1724_v46  ;;  %v5941_v20 = vpack.c.bf16 %v1742_v36, %v1736_v2 }
 0x1df   :  { %3030 = vmatmul.mubr.f32.gmra.mrb[18].mxu1 %v8173_v3  ;;  %8820 = vst [vmem:[#allocation47_spill] sm:$0xff] %v8191_v5  ;;  %v5517_v53 = vpack.c.bf16 %v841_v0, %v839_v52  ;;  %v5939_v52 = vpack.c.bf16 %v1743_v22, %v1737_v35  ;;  %v2185_v0 = vld [vmem:[#allocation14 + $0xe78] sm:$0xff]  ;;  %v1755_v27 = vld [vmem:[#allocation14 + $0x108] sm:$0xff]  ;;  %v520_v22 = vmax.f32 %v8133_v61, 0.0 }
 0x1e0   :  { %5702 = vmatpush1.bf16.msra.mxu1 %v5701_v32  ;;  %3035 = vmatprep.mubr.f32.mxu1 %v8179_v4  ;;  %8821 = vst [vmem:[#allocation48_spill] sm:$0xff] %v8195_v1  ;;  %v8198_v32 = vmax.f32 %v1631_v54, 0.0  ;;  %v2166_v54 = vld [vmem:[#allocation14 + $0xde0] sm:$0xff]  ;;  %v1749_v34 = vld [vmem:[#allocation14 + $0xd8] sm:$0xff]  ;;  %v2191_v46 = vld [vmem:[#allocation14 + $0xea8] sm:$0xff] }
 0x1e1   :  { %5510 = vmatpush1.bf16.msra.mxu0 %v5509_v39  ;;  %5704 = vmatprep.subr.bf16.mxu1 %v5703_v49  ;;  %v2154_v39 = vld [vmem:[#allocation14 + $0xd80] sm:$0xff]  ;;  %v2160_v49 = vld [vmem:[#allocation14 + $0xdb0] sm:$0xff]  ;;  %v2197_v37 = vld [vmem:[#allocation14 + $0xed8] sm:$0xff] }
 0x1e2   :  { %5512 = vmatprep.subr.bf16.mxu0 %v5511_v33  ;;  %8822 = vst [vmem:[#allocation49_spill] sm:$0xff] %v8198_v32  ;;  %v2167_v33 = vld [vmem:[#allocation14 + $0xde8] sm:$0xff]  ;;  %v5713_v55 = vpack.c.bf16 %v2160_v49, %v2154_v39  ;;  %v5943_v39 = vpack.c.bf16 %v1755_v27, %v1749_v34  ;;  %v1748_v49 = vld [vmem:[#allocation14 + $0xd0] sm:$0xff]  ;;  %v1773_v2 = vld [vmem:[#allocation14 + $0x198] sm:$0xff] }
 0x1e3   :  { %3036 = vmatmul.mubr.f32.gmra.mrb[20].mxu1 %v8187_v23  ;;  %v1779_v36 = vld [vmem:[#allocation14 + $0x1c8] sm:$0xff]  ;;  %v2202_v34 = vld [vmem:[#allocation14 + $0xf00] sm:$0xff]  ;;  %v2208_v27 = vld [vmem:[#allocation14 + $0xf30] sm:$0xff] }
 0x1e4   :  { %5706 = vmatpush1.bf16.msra.mxu1 %v5705_v28  ;;  %3041 = vmatprep.mubr.f32.mxu1 %v8191_v5  ;;  %v496_v28 = vmax.f32 %v8114_v41, 0.0  ;;  %v508_v41 = vmax.f32 %v8123_v43, 0.0 }
 0x1e5   :  { %5514 = vmatpush1.bf16.msra.mxu0 %v5513_v8  ;;  %5708 = vmatprep.subr.bf16.mxu1 %v5707_v58  ;;  %v2172_v8 = vld [vmem:[#allocation14 + $0xe10] sm:$0xff]  ;;  %v5715_v58 = vpack.c.bf16 %v2173_v57, %v2167_v33  ;;  %v1761_v33 = vld [vmem:[#allocation14 + $0x138] sm:$0xff]  ;;  %v1767_v57 = vld [vmem:[#allocation14 + $0x168] sm:$0xff] }
 0x1e6   :  { %5516 = vmatprep.subr.bf16.mxu0 %v5515_v62  ;;  %v2179_v62 = vld [vmem:[#allocation14 + $0xe48] sm:$0xff]  ;;  %v5717_v24 = vpack.c.bf16 %v2172_v8, %v2166_v54  ;;  %v5947_v54 = vpack.c.bf16 %v1767_v57, %v1761_v33  ;;  %v1766_v8 = vld [vmem:[#allocation14 + $0x160] sm:$0xff] }
 0x1e7   :  { %3042 = vmatmul.mubr.f32.gmra.mrb[22].mxu1 %v8195_v1  ;;  %v1790_v57 = vld [vmem:[#allocation14 + $0x220] sm:$0xff] }
 0x1e8   :  { %5710 = vmatpush1.bf16.msra.mxu1 %v5709_v6  ;;  %3112 = vmatprep.mubr.f32.mxu1 %v8198_v32  ;;  %v2178_v6 = vld [vmem:[#allocation14 + $0xe40] sm:$0xff] }
 0x1e9   :  { %5518 = vmatpush1.bf16.msra.mxu0 %v5517_v53  ;;  %5712 = vmatprep.subr.bf16.mxu1 %v5711_v40  ;;  %v2184_v53 = vld [vmem:[#allocation14 + $0xe70] sm:$0xff]  ;;  %v5719_v40 = vpack.c.bf16 %v2185_v0, %v2179_v62 }
 0x1ea   :  { %5936 = vmatprep.subr.bf16.mxu0 %v5935_v19  ;;  %v1754_v19 = vld [vmem:[#allocation14 + $0x100] sm:$0xff]  ;;  %v5721_v35 = vpack.c.bf16 %v2184_v53, %v2178_v6  ;;  %v2221_v6 = vld [vmem:[#allocation14 + $0xf98] sm:$0xff] }
 0x1eb   :  { %v5945_v43 = vpack.c.bf16 %v1754_v19, %v1748_v49  ;;  %v1785_v53 = vld [vmem:[#allocation14 + $0x1f8] sm:$0xff]  ;;  %v2214_v19 = vld [vmem:[#allocation14 + $0xf60] sm:$0xff] }
 0x1ec   :  { %1337 = vmatmul.mubr.f32.vlgmr.msra.gmra.mrb[0].mxu0 %v483_v56  ;;  %5714 = vmatpush1.bf16.msra.mxu1 %v5713_v55  ;;  %v2190_v56 = vld [vmem:[#allocation14 + $0xea0] sm:$0xff]  ;;  %v2196_v55 = vld [vmem:[#allocation14 + $0xed0] sm:$0xff] }
 0x1ed   :  { %5938 = vmatpush1.bf16.msra.mxu0 %v5937_v45  ;;  %1342 = vmatprep.mubr.f32.mxu0 %v496_v28  ;;  %v1760_v45 = vld [vmem:[#allocation14 + $0x130] sm:$0xff]  ;;  %v5723_v28 = vpack.c.bf16 %v2197_v37, %v2191_v46  ;;  %v5725_v62 = vpack.c.bf16 %v2196_v55, %v2190_v56 }
 0x1ee   :  { %5716 = vmatprep.subr.bf16.mxu1 %v5715_v58  ;;  %5940 = vmatprep.subr.bf16.mxu0 %v5939_v52  ;;  %v2203_v58 = vld [vmem:[#allocation14 + $0xf08] sm:$0xff]  ;;  %v2209_v52 = vld [vmem:[#allocation14 + $0xf38] sm:$0xff]  ;;  %v5949_v61 = vpack.c.bf16 %v1766_v8, %v1760_v45  ;;  %v2220_v46 = vld [vmem:[#allocation14 + $0xf90] sm:$0xff] }
 0x1ef   :  { %v5727_v0 = vpack.c.bf16 %v2209_v52, %v2203_v58  ;;  %v1784_v37 = vld [vmem:[#allocation14 + $0x1f0] sm:$0xff]  ;;  %v5733_v56 = vpack.c.bf16 %v2220_v46, %v2214_v19 }
 0x1f0   :  { %1343 = vmatmul.mubr.f32.gmra.mrb[2].mxu0 %v495_v26  ;;  %5718 = vmatpush1.bf16.msra.mxu1 %v5717_v24  ;;  %v1772_v26 = vld [vmem:[#allocation14 + $0x190] sm:$0xff]  ;;  %v5951_v24 = vpack.c.bf16 %v1779_v36, %v1773_v2  ;;  %v5957_v55 = vpack.c.bf16 %v1790_v57, %v1784_v37  ;;  %v1802_v2 = vld [vmem:[#allocation14 + $0x280] sm:$0xff]  ;;  %v2239_v36 = vld [vmem:[#allocation14 + $0x1028] sm:$0xff] }
 0x1f1   :  { %5942 = vmatpush1.bf16.msra.mxu0 %v5941_v20  ;;  %1348 = vmatprep.mubr.f32.mxu0 %v508_v41  ;;  %v1778_v20 = vld [vmem:[#allocation14 + $0x1c0] sm:$0xff]  ;;  %v2215_v41 = vld [vmem:[#allocation14 + $0xf68] sm:$0xff]  ;;  %v1796_v8 = vld [vmem:[#allocation14 + $0x250] sm:$0xff] }
 0x1f2   :  { %5720 = vmatprep.subr.bf16.mxu1 %v5719_v40  ;;  %5944 = vmatprep.subr.bf16.mxu0 %v5943_v39  ;;  %v1791_v40 = vld [vmem:[#allocation14 + $0x228] sm:$0xff]  ;;  %v5729_v39 = vpack.c.bf16 %v2208_v27, %v2202_v34  ;;  %v5953_v50 = vpack.c.bf16 %v1778_v20, %v1772_v26  ;;  %v5731_v49 = vpack.c.bf16 %v2221_v6, %v2215_v41  ;;  %v2244_v20 = vld [vmem:[#allocation14 + $0x1050] sm:$0xff] }
 0x1f3   :  { %v5955_v33 = vpack.c.bf16 %v1791_v40, %v1785_v53  ;;  %v5961_v27 = vpack.c.bf16 %v1802_v2, %v1796_v8  ;;  %v1808_v41 = vld [vmem:[#allocation14 + $0x2b0] sm:$0xff]  ;;  %v1814_v53 = vld [vmem:[#allocation14 + $0x2e0] sm:$0xff]  ;;  %v2251_v40 = vld [vmem:[#allocation14 + $0x1088] sm:$0xff] }
 0x1f4   :  { %1349 = vmatmul.mubr.f32.gmra.mrb[4].mxu0 %v507_v44  ;;  %5722 = vmatpush1.bf16.msra.mxu1 %v5721_v35  ;;  %v2227_v44 = vld [vmem:[#allocation14 + $0xfc8] sm:$0xff]  ;;  %v2233_v35 = vld [vmem:[#allocation14 + $0xff8] sm:$0xff]  ;;  %v5965_v46 = vpack.c.bf16 %v1814_v53, %v1808_v41  ;;  %v2256_v57 = vld [vmem:[#allocation14 + $0x10b0] sm:$0xff]  ;;  %v8220_v41 = vrot.slane %v8142_v25, %v7877_v9 }
 0x1f5   :  { %5946 = vmatpush1.bf16.msra.mxu0 %v5945_v43  ;;  %1354 = vmatprep.mubr.f32.mxu0 %v520_v22  ;;  %v1797_v43 = vld [vmem:[#allocation14 + $0x258] sm:$0xff]  ;;  %v1803_v22 = vld [vmem:[#allocation14 + $0x288] sm:$0xff]  ;;  %v5735_v45 = vpack.c.bf16 %v2233_v35, %v2227_v44  ;;  %v1820_v44 = vld [vmem:[#allocation14 + $0x310] sm:$0xff] }
 0x1f6   :  { %5724 = vmatprep.subr.bf16.mxu1 %v5723_v28  ;;  %5948 = vmatprep.subr.bf16.mxu0 %v5947_v54  ;;  %v2226_v28 = vld [vmem:[#allocation14 + $0xfc0] sm:$0xff]  ;;  %v2232_v54 = vld [vmem:[#allocation14 + $0xff0] sm:$0xff]  ;;  %v5959_v52 = vpack.c.bf16 %v1803_v22, %v1797_v43  ;;  %v2263_v22 = vld [vmem:[#allocation14 + $0x10e8] sm:$0xff] }
 0x1f7   :  { %v5737_v34 = vpack.c.bf16 %v2232_v54, %v2226_v28  ;;  %v1826_v43 = vld [vmem:[#allocation14 + $0x340] sm:$0xff]  ;;  %v2268_v2 = vld [vmem:[#allocation14 + $0x1110] sm:$0xff] }
 0x1f8   :  { %1355 = vmatmul.mubr.f32.gmra.mrb[6].mxu0 %v519_v15  ;;  %5726 = vmatpush1.bf16.msra.mxu1 %v5725_v62  ;;  %v2245_v15 = vld [vmem:[#allocation14 + $0x1058] sm:$0xff]  ;;  %v5969_v54 = vpack.c.bf16 %v1826_v43, %v1820_v44  ;;  %v1863_v43 = vld [vmem:[#allocation14 + $0x468] sm:$0xff] }
 0x1f9   :  { %5950 = vmatpush1.bf16.msra.mxu0 %v5949_v61  ;;  %5728 = vmatprep.subr.bf16.mxu1 %v5727_v0  ;;  %v1809_v61 = vld [vmem:[#allocation14 + $0x2b8] sm:$0xff]  ;;  %v1815_v0 = vld [vmem:[#allocation14 + $0x2e8] sm:$0xff]  ;;  %v5739_v26 = vpack.c.bf16 %v2245_v15, %v2239_v36  ;;  %v1832_v36 = vld [vmem:[#allocation14 + $0x370] sm:$0xff] }
 0x1fa   :  { %5952 = vmatprep.subr.bf16.mxu0 %v5951_v24  ;;  %3468 = vmatprep.mubr.f32.mxu0 %v7955_v14  ;;  %v2238_v24 = vld [vmem:[#allocation14 + $0x1020] sm:$0xff]  ;;  %v5963_v6 = vpack.c.bf16 %v1815_v0, %v1809_v61  ;;  %v2311_v14 = vld [vmem:[#allocation14 + $0x1268] sm:$0xff] }
 0x1fb   :  { %v5741_v19 = vpack.c.bf16 %v2244_v20, %v2238_v24  ;;  %v1838_v0 = vld [vmem:[#allocation14 + $0x3a0] sm:$0xff]  ;;  %v1845_v24 = vld [vmem:[#allocation14 + $0x3d8] sm:$0xff]  ;;  %v1851_v20 = vld [vmem:[#allocation14 + $0x408] sm:$0xff] }
 0x1fc   :  { %5730 = vmatpush1.bf16.msra.mxu1 %v5729_v39  ;;  %v2257_v39 = vld [vmem:[#allocation14 + $0x10b8] sm:$0xff]  ;;  %v5973_v53 = vpack.c.bf16 %v1838_v0, %v1832_v36  ;;  %v2292_v36 = vld [vmem:[#allocation14 + $0x11d0] sm:$0xff] }
 0x1fd   :  { %5954 = vmatpush1.bf16.msra.mxu0 %v5953_v50  ;;  %5732 = vmatprep.subr.bf16.mxu1 %v5731_v49  ;;  %v1821_v50 = vld [vmem:[#allocation14 + $0x318] sm:$0xff]  ;;  %v1827_v49 = vld [vmem:[#allocation14 + $0x348] sm:$0xff]  ;;  %v5743_v37 = vpack.c.bf16 %v2257_v39, %v2251_v40  ;;  %v2274_v39 = vld [vmem:[#allocation14 + $0x1140] sm:$0xff] }
 0x1fe   :  { %v8210_v58 = vpop.f32.mrb[0].mxu1  ;;  %5956 = vmatprep.subr.bf16.mxu0 %v5955_v33  ;;  %v2250_v33 = vld [vmem:[#allocation14 + $0x1080] sm:$0xff]  ;;  %v5967_v35 = vpack.c.bf16 %v1827_v49, %v1821_v50  ;;  %v2280_v50 = vld [vmem:[#allocation14 + $0x1170] sm:$0xff] }
 0x1ff   :  { %v8212_v62 = vpop.f32.mrb[1].mxu1  ;;  %v5745_v28 = vpack.c.bf16 %v2256_v57, %v2250_v33  ;;  %v1844_v49 = vld [vmem:[#allocation14 + $0x3d0] sm:$0xff]  ;;  %v2287_v33 = vld [vmem:[#allocation14 + $0x11a8] sm:$0xff]  ;;  %v2293_v57 = vld [vmem:[#allocation14 + $0x11d8] sm:$0xff] }
 0x200   :  { %5734 = vmatpush1.bf16.msra.mxu1 %v5733_v56  ;;  %v2269_v56 = vld [vmem:[#allocation14 + $0x1118] sm:$0xff] }
 0x201   :  { %5958 = vmatpush1.bf16.msra.mxu0 %v5957_v55  ;;  %5736 = vmatprep.subr.bf16.mxu1 %v5735_v45  ;;  %v1833_v55 = vld [vmem:[#allocation14 + $0x378] sm:$0xff]  ;;  %v1839_v45 = vld [vmem:[#allocation14 + $0x3a8] sm:$0xff]  ;;  %v5747_v8 = vpack.c.bf16 %v2269_v56, %v2263_v22 }
 0x202   :  { %5960 = vmatprep.subr.bf16.mxu0 %v5959_v52  ;;  %v2262_v52 = vld [vmem:[#allocation14 + $0x10e0] sm:$0xff]  ;;  %v8214_v15 = vpop.f32.mrb[2].mxu1  ;;  %v5971_v61 = vpack.c.bf16 %v1839_v45, %v1833_v55  ;;  %v7145_v22 = vld [vmem:[#allocation2 + $0x20] sm:$0xff]  ;;  %v8229_v55 = vrot.slane %v8149_v13, %v7877_v9  ;;  %v5753_v45 = vpack.c.bf16 %v2280_v50, %v2274_v39 }
 0x203   :  { %v1518_v56 = vmul.f32 %v7145_v22, %v8220_v41  ;;  %v1875_v39 = vld [vmem:[#allocation14 + $0x4c8] sm:$0xff] }
 0x204   :  { %5738 = vmatpush1.bf16.msra.mxu1 %v5737_v34  ;;  %v2275_v34 = vld [vmem:[#allocation14 + $0x1148] sm:$0xff] }
 0x205   :  { %5962 = vmatpush1.bf16.msra.mxu0 %v5961_v27  ;;  %5740 = vmatprep.subr.bf16.mxu1 %v5739_v26  ;;  %v2281_v27 = vld [vmem:[#allocation14 + $0x1178] sm:$0xff]  ;;  %v8216_v26 = vpop.f32.mrb[3].mxu1  ;;  %v1630_v50 = vadd.f32 %v8229_v55, %v1518_v56  ;;  %v1874_v56 = vld [vmem:[#allocation14 + $0x4c0] sm:$0xff] }
 0x206   :  { %5964 = vmatprep.subr.bf16.mxu0 %v5963_v6  ;;  %v5749_v6 = vpack.c.bf16 %v2268_v2, %v2262_v52  ;;  %v5751_v40 = vpack.c.bf16 %v2281_v27, %v2275_v34  ;;  %v5755_v52 = vpack.c.bf16 %v2293_v57, %v2287_v33  ;;  %v2286_v2 = vld [vmem:[#allocation14 + $0x11a0] sm:$0xff]  ;;  %v2304_v33 = vld [vmem:[#allocation14 + $0x1230] sm:$0xff] }
 0x207   :  { %v1862_v27 = vld [vmem:[#allocation14 + $0x460] sm:$0xff] }
 0x208   :  { %5742 = vmatpush1.bf16.msra.mxu1 %v5741_v19  ;;  %v8222_v19 = vpop.f32.mrb[4].mxu1 }
 0x209   :  { %5966 = vmatpush1.bf16.msra.mxu0 %v5965_v46  ;;  %5744 = vmatprep.subr.bf16.mxu1 %v5743_v37  ;;  %v5975_v46 = vpack.c.bf16 %v1851_v20, %v1845_v24  ;;  %v1850_v37 = vld [vmem:[#allocation14 + $0x400] sm:$0xff]  ;;  %v8224_v44 = vpop.f32.mrb[5].mxu1  ;;  %v2299_v24 = vld [vmem:[#allocation14 + $0x1208] sm:$0xff]  ;;  %v2305_v20 = vld [vmem:[#allocation14 + $0x1238] sm:$0xff] }
 0x20a   :  { %5968 = vmatprep.subr.bf16.mxu0 %v5967_v35  ;;  %8823 = vst [vmem:[#allocation50_spill] sm:$0xff] %v8224_v44  ;;  %v1857_v35 = vld [vmem:[#allocation14 + $0x438] sm:$0xff]  ;;  %v8232_v0 = vpop.f32.mrb[6].mxu1  ;;  %v2048_v44 = vld [vmem:[#allocation14 + $0xa30] sm:$0xff] }
 0x20b   :  { %8824 = vst [vmem:[#allocation51_spill] sm:$0xff] %v8232_v0  ;;  %v5979_v34 = vpack.c.bf16 %v1863_v43, %v1857_v35  ;;  %v8234_v22 = vpop.f32.mrb[7].mxu1  ;;  %v7149_v0 = vld [vmem:[#allocation2 + $0xe0] sm:$0xff] }
 0x20c   :  { %5746 = vmatpush1.bf16.msra.mxu1 %v5745_v28  ;;  %v7146_v28 = vld [vmem:[#allocation2 + $0x88] sm:$0xff]  ;;  %8825 = vst [vmem:[#allocation52_spill] sm:$0xff] %v8234_v22 }
 0x20d   :  { %5970 = vmatpush1.bf16.msra.mxu0 %v5969_v54  ;;  %5748 = vmatprep.subr.bf16.mxu1 %v5747_v8  ;;  %v1531_v54 = vmul.f32 %v7146_v28, %v8170_v31  ;;  %v5977_v8 = vpack.c.bf16 %v1850_v37, %v1844_v49  ;;  %v5757_v49 = vpack.c.bf16 %v2292_v36, %v2286_v2  ;;  %v2298_v37 = vld [vmem:[#allocation14 + $0x1200] sm:$0xff]  ;;  %v2317_v22 = vld [vmem:[#allocation14 + $0x1298] sm:$0xff]  ;;  %v1887_v36 = vld [vmem:[#allocation14 + $0x528] sm:$0xff] }
 0x20e   :  { %5972 = vmatprep.subr.bf16.mxu0 %v5971_v61  ;;  %v1856_v61 = vld [vmem:[#allocation14 + $0x430] sm:$0xff]  ;;  %v5759_v28 = vpack.c.bf16 %v2305_v20, %v2299_v24  ;;  %v1881_v2 = vld [vmem:[#allocation14 + $0x4f8] sm:$0xff]  ;;  %v8250_v20 = vrot.slane %v8142_v25, %v7958_v16 }
 0x20f   :  { %v1643_v57 = vadd.f32 %v8184_v18, %v1531_v54  ;;  %v5981_v43 = vpack.c.bf16 %v1862_v27, %v1856_v61  ;;  %v7150_v27 = vld [vmem:[#allocation2 + $0x148] sm:$0xff] }
 0x210   :  { %5750 = vmatpush1.bf16.msra.mxu1 %v5749_v6  ;;  %v1869_v6 = vld [vmem:[#allocation14 + $0x498] sm:$0xff]  ;;  %v1555_v24 = vmul.f32 %v7150_v27, %v8170_v31  ;;  %v7151_v27 = vld [vmem:[#allocation2 + $0x140] sm:$0xff] }
 0x211   :  { %5974 = vmatpush1.bf16.msra.mxu0 %v5973_v53  ;;  %5752 = vmatprep.subr.bf16.mxu1 %v5751_v40  ;;  %v7147_v53 = vld [vmem:[#allocation2 + $0x80] sm:$0xff]  ;;  %v5983_v9 = vpack.c.bf16 %v1875_v39, %v1869_v6  ;;  %v8244_v61 = vmax.f32 %v1643_v57, 0.0  ;;  %v5985_v6 = vpack.c.bf16 %v1874_v56, %v1868_v59  ;;  %v5763_v39 = vpack.c.bf16 %v2317_v22, %v2311_v14  ;;  %v1893_v57 = vld [vmem:[#allocation14 + $0x558] sm:$0xff]  ;;  %v7152_v14 = vld [vmem:[#allocation2 + $0x38] sm:$0xff] }
 0x212   :  { %5976 = vmatprep.subr.bf16.mxu0 %v5975_v46  ;;  %v1530_v40 = vmul.f32 %v7147_v53, %v8220_v41  ;;  %v7148_v46 = vld [vmem:[#allocation2 + $0xe8] sm:$0xff]  ;;  %v8240_v53 = vmax.f32 %v1630_v50, 0.0  ;;  %v1521_v22 = vmul.f32 %v7152_v14, %v8250_v20 }
 0x213   :  { %v1543_v35 = vmul.f32 %v7148_v46, %v8170_v31  ;;  %v1542_v46 = vmul.f32 %v7149_v0, %v8220_v41  ;;  %v1880_v50 = vld [vmem:[#allocation14 + $0x4f0] sm:$0xff]  ;;  %v5987_v0 = vpack.c.bf16 %v1887_v36, %v1881_v2  ;;  %v2322_v36 = vld [vmem:[#allocation14 + $0x12c0] sm:$0xff] }
 0x214   :  { %5754 = vmatpush1.bf16.msra.mxu1 %v5753_v45  ;;  %v5761_v45 = vpack.c.bf16 %v2304_v33, %v2298_v37  ;;  %v1642_v54 = vadd.f32 %v8229_v55, %v1530_v40  ;;  %v1886_v40 = vld [vmem:[#allocation14 + $0x520] sm:$0xff]  ;;  %v2329_v37 = vld [vmem:[#allocation14 + $0x12f8] sm:$0xff] }
 0x215   :  { %5978 = vmatpush1.bf16.msra.mxu0 %v5977_v8  ;;  %5756 = vmatprep.subr.bf16.mxu1 %v5755_v52  ;;  %v2310_v8 = vld [vmem:[#allocation14 + $0x1260] sm:$0xff]  ;;  %v2316_v52 = vld [vmem:[#allocation14 + $0x1290] sm:$0xff]  ;;  %v1654_v25 = vadd.f32 %v8229_v55, %v1542_v46  ;;  %v5989_v56 = vpack.c.bf16 %v1886_v40, %v1880_v50 }
 0x216   :  { %5980 = vmatprep.subr.bf16.mxu0 %v5979_v34  ;;  %v1655_v34 = vadd.f32 %v8184_v18, %v1543_v35  ;;  %v5765_v33 = vpack.c.bf16 %v2316_v52, %v2310_v8  ;;  %v1899_v35 = vld [vmem:[#allocation14 + $0x588] sm:$0xff]  ;;  %v8253_v31 = vmax.f32 %v1642_v54, 0.0  ;;  %v1898_v46 = vld [vmem:[#allocation14 + $0x580] sm:$0xff]  ;;  %v2341_v52 = vld [vmem:[#allocation14 + $0x1358] sm:$0xff] }
 0x217   :  { %v5991_v54 = vpack.c.bf16 %v1899_v35, %v1893_v57  ;;  %v2335_v8 = vld [vmem:[#allocation14 + $0x1328] sm:$0xff]  ;;  %v2334_v40 = vld [vmem:[#allocation14 + $0x1320] sm:$0xff] }
 0x218   :  { %5758 = vmatpush1.bf16.msra.mxu1 %v5757_v49  ;;  %v2323_v49 = vld [vmem:[#allocation14 + $0x12c8] sm:$0xff]  ;;  %v8258_v59 = vmax.f32 %v1655_v34, 0.0  ;;  %v1910_v35 = vld [vmem:[#allocation14 + $0x5e0] sm:$0xff] }
 0x219   :  { %5982 = vmatpush1.bf16.msra.mxu0 %v5981_v43  ;;  %5760 = vmatprep.subr.bf16.mxu1 %v5759_v28  ;;  %v1554_v43 = vmul.f32 %v7151_v27, %v8220_v41  ;;  %v8264_v28 = vrot.slane %v8149_v13, %v7958_v16  ;;  %v5767_v2 = vpack.c.bf16 %v2329_v37, %v2323_v49  ;;  %v2328_v41 = vld [vmem:[#allocation14 + $0x12f0] sm:$0xff]  ;;  %v1911_v34 = vld [vmem:[#allocation14 + $0x5e8] sm:$0xff] }
 0x21a   :  { %5984 = vmatprep.subr.bf16.mxu0 %v5983_v9  ;;  %v1667_v9 = vadd.f32 %v8184_v18, %v1555_v24  ;;  %v1905_v18 = vld [vmem:[#allocation14 + $0x5b8] sm:$0xff]  ;;  %v8267_v24 = vmax.f32 %v1654_v25, 0.0  ;;  %v5769_v13 = vpack.c.bf16 %v2328_v41, %v2322_v36  ;;  %v2340_v49 = vld [vmem:[#allocation14 + $0x1350] sm:$0xff]  ;;  %v2347_v25 = vld [vmem:[#allocation14 + $0x1388] sm:$0xff] }
 0x21b   :  { %3113 = vmatmul.mubr.f32.vlgmr.msra.gmra.mrb[16].mxu1 %v8240_v53  ;;  %v1666_v16 = vadd.f32 %v8229_v55, %v1554_v43  ;;  %v1904_v37 = vld [vmem:[#allocation14 + $0x5b0] sm:$0xff]  ;;  %v5995_v57 = vpack.c.bf16 %v1911_v34, %v1905_v18  ;;  %v2353_v55 = vld [vmem:[#allocation14 + $0x13b8] sm:$0xff]  ;;  %v1923_v27 = vld [vmem:[#allocation14 + $0x648] sm:$0xff] }
 0x21c   :  { %5762 = vmatpush1.bf16.msra.mxu1 %v5761_v45  ;;  %3118 = vmatprep.mubr.f32.mxu1 %v8244_v61  ;;  %v1892_v45 = vld [vmem:[#allocation14 + $0x550] sm:$0xff]  ;;  %v1935_v18 = vld [vmem:[#allocation14 + $0x6a8] sm:$0xff] }
 0x21d   :  { %5986 = vmatpush1.bf16.msra.mxu0 %v5985_v6  ;;  %5764 = vmatprep.subr.bf16.mxu1 %v5763_v39  ;;  %v8271_v6 = vmax.f32 %v1667_v9, 0.0  ;;  %v1633_v39 = vadd.f32 %v8264_v28, %v1521_v22  ;;  %v5993_v50 = vpack.c.bf16 %v1898_v46, %v1892_v45  ;;  %v8275_v43 = vmax.f32 %v1666_v16, 0.0  ;;  %v2352_v36 = vld [vmem:[#allocation14 + $0x13b0] sm:$0xff]  ;;  %v2359_v46 = vld [vmem:[#allocation14 + $0x13e8] sm:$0xff] }
 0x21e   :  { %5988 = vmatprep.subr.bf16.mxu0 %v5987_v0  ;;  %v5771_v0 = vpack.c.bf16 %v2341_v52, %v2335_v8  ;;  %v5773_v9 = vpack.c.bf16 %v2340_v49, %v2334_v40  ;;  %v5997_v22 = vpack.c.bf16 %v1910_v35, %v1904_v37  ;;  %v1916_v41 = vld [vmem:[#allocation14 + $0x610] sm:$0xff]  ;;  %v2365_v8 = vld [vmem:[#allocation14 + $0x1418] sm:$0xff]  ;;  %v1934_v49 = vld [vmem:[#allocation14 + $0x6a0] sm:$0xff] }
 0x21f   :  { %3119 = vmatmul.mubr.f32.gmra.mrb[18].mxu1 %v8253_v31  ;;  %v8278_v14 = vmax.f32 %v1633_v39, 0.0  ;;  %v1929_v52 = vld [vmem:[#allocation14 + $0x678] sm:$0xff]  ;;  %v2358_v39 = vld [vmem:[#allocation14 + $0x13e0] sm:$0xff]  ;;  %v2371_v37 = vld [vmem:[#allocation14 + $0x1448] sm:$0xff] }
 0x220   :  { %5766 = vmatpush1.bf16.msra.mxu1 %v5765_v33  ;;  %3124 = vmatprep.mubr.f32.mxu1 %v8258_v59  ;;  %v1917_v33 = vld [vmem:[#allocation14 + $0x618] sm:$0xff]  ;;  %v6003_v40 = vpack.c.bf16 %v1935_v18, %v1929_v52  ;;  %v1959_v52 = vld [vmem:[#allocation14 + $0x768] sm:$0xff] }
 0x221   :  { %5990 = vmatpush1.bf16.msra.mxu0 %v5989_v56  ;;  %5768 = vmatprep.subr.bf16.mxu1 %v5767_v2  ;;  %v5775_v56 = vpack.c.bf16 %v2353_v55, %v2347_v25  ;;  %v2346_v2 = vld [vmem:[#allocation14 + $0x1380] sm:$0xff]  ;;  %v5999_v45 = vpack.c.bf16 %v1923_v27, %v1917_v33  ;;  %v1941_v35 = vld [vmem:[#allocation14 + $0x6d8] sm:$0xff]  ;;  %v1947_v25 = vld [vmem:[#allocation14 + $0x708] sm:$0xff] }
 0x222   :  { %5992 = vmatprep.subr.bf16.mxu0 %v5991_v54  ;;  %v1922_v54 = vld [vmem:[#allocation14 + $0x640] sm:$0xff]  ;;  %v5777_v34 = vpack.c.bf16 %v2352_v36, %v2346_v2  ;;  %v6007_v36 = vpack.c.bf16 %v1947_v25, %v1941_v35  ;;  %v1971_v35 = vld [vmem:[#allocation14 + $0x7c8] sm:$0xff] }
 0x223   :  { %3125 = vmatmul.mubr.f32.gmra.mrb[20].mxu1 %v8267_v24  ;;  %v6001_v16 = vpack.c.bf16 %v1922_v54, %v1916_v41  ;;  %v1946_v41 = vld [vmem:[#allocation14 + $0x700] sm:$0xff]  ;;  %v2389_v54 = vld [vmem:[#allocation14 + $0x14d8] sm:$0xff] }
 0x224   :  { %5770 = vmatpush1.bf16.msra.mxu1 %v5769_v13  ;;  %3130 = vmatprep.mubr.f32.mxu1 %v8271_v6  ;;  %v5779_v13 = vpack.c.bf16 %v2365_v8, %v2359_v46  ;;  %v1953_v8 = vld [vmem:[#allocation14 + $0x738] sm:$0xff] }
 0x225   :  { %5994 = vmatpush1.bf16.msra.mxu0 %v5993_v50  ;;  %5772 = vmatprep.subr.bf16.mxu1 %v5771_v0  ;;  %v2364_v50 = vld [vmem:[#allocation14 + $0x1410] sm:$0xff] }
 0x226   :  { %5996 = vmatprep.subr.bf16.mxu0 %v5995_v57  ;;  %v1928_v0 = vld [vmem:[#allocation14 + $0x670] sm:$0xff]  ;;  %v2377_v57 = vld [vmem:[#allocation14 + $0x1478] sm:$0xff]  ;;  %v5781_v55 = vpack.c.bf16 %v2364_v50, %v2358_v39 }
 0x227   :  { %3131 = vmatmul.mubr.f32.gmra.mrb[22].mxu1 %v8275_v43  ;;  %v6005_v33 = vpack.c.bf16 %v1934_v49, %v1928_v0  ;;  %v5783_v27 = vpack.c.bf16 %v2377_v57, %v2371_v37  ;;  %v2388_v39 = vld [vmem:[#allocation14 + $0x14d0] sm:$0xff]  ;;  %v6011_v0 = vpack.c.bf16 %v1959_v52, %v1953_v8  ;;  %v2395_v49 = vld [vmem:[#allocation14 + $0x1508] sm:$0xff]  ;;  %v2401_v37 = vld [vmem:[#allocation14 + $0x1538] sm:$0xff] }
 0x228   :  { %5774 = vmatpush1.bf16.msra.mxu1 %v5773_v9  ;;  %3201 = vmatprep.mubr.f32.mxu1 %v8278_v14  ;;  %v2370_v9 = vld [vmem:[#allocation14 + $0x1440] sm:$0xff]  ;;  %v1952_v50 = vld [vmem:[#allocation14 + $0x730] sm:$0xff]  ;;  %v1965_v57 = vld [vmem:[#allocation14 + $0x798] sm:$0xff] }
 0x229   :  { %5998 = vmatpush1.bf16.msra.mxu0 %v5997_v22  ;;  %5776 = vmatprep.subr.bf16.mxu1 %v5775_v56  ;;  %v2376_v22 = vld [vmem:[#allocation14 + $0x1470] sm:$0xff]  ;;  %v1983_v8 = vld [vmem:[#allocation14 + $0x828] sm:$0xff] }
 0x22a   :  { %6000 = vmatprep.subr.bf16.mxu0 %v5999_v45  ;;  %v1940_v56 = vld [vmem:[#allocation14 + $0x6d0] sm:$0xff]  ;;  %v2383_v45 = vld [vmem:[#allocation14 + $0x14a8] sm:$0xff]  ;;  %v5785_v18 = vpack.c.bf16 %v2376_v22, %v2370_v9 }
 0x22b   :  { %v2400_v9 = vld [vmem:[#allocation14 + $0x1530] sm:$0xff] }
 0x22c   :  { %5778 = vmatpush1.bf16.msra.mxu1 %v5777_v34  ;;  %3469 = vmatmul.mubr.f32.vlgmr.msra.gmra.mrb[8].mxu0 %v8015_v30  ;;  %v6009_v34 = vpack.c.bf16 %v1946_v41, %v1940_v56  ;;  %v1964_v22 = vld [vmem:[#allocation14 + $0x790] sm:$0xff]  ;;  %v6015_v56 = vpack.c.bf16 %v1971_v35, %v1965_v57  ;;  %v2407_v41 = vld [vmem:[#allocation14 + $0x1568] sm:$0xff]  ;;  %v1989_v57 = vld [vmem:[#allocation14 + $0x858] sm:$0xff] }
 0x22d   :  { %6002 = vmatpush1.bf16.msra.mxu0 %v6001_v16  ;;  %5780 = vmatprep.subr.bf16.mxu1 %v5779_v13  ;;  %v5787_v16 = vpack.c.bf16 %v2389_v54, %v2383_v45  ;;  %v2382_v13 = vld [vmem:[#allocation14 + $0x14a0] sm:$0xff]  ;;  %v2413_v45 = vld [vmem:[#allocation14 + $0x1598] sm:$0xff]  ;;  %v1995_v35 = vld [vmem:[#allocation14 + $0x888] sm:$0xff] }
 0x22e   :  { %v8283_v2 = vpop.f32.mrb[8].mxu1  ;;  %6004 = vmatprep.subr.bf16.mxu0 %v6003_v40  ;;  %3474 = vmatprep.mubr.f32.mxu0 %v8021_v7  ;;  %v1958_v40 = vld [vmem:[#allocation14 + $0x760] sm:$0xff]  ;;  %v5789_v25 = vpack.c.bf16 %v2388_v39, %v2382_v13  ;;  %v1977_v54 = vld [vmem:[#allocation14 + $0x7f8] sm:$0xff]  ;;  %v2412_v13 = vld [vmem:[#allocation14 + $0x1590] sm:$0xff] }
 0x22f   :  { %v8286_v46 = vpop.f32.mrb[9].mxu1  ;;  %v1976_v39 = vld [vmem:[#allocation14 + $0x7f0] sm:$0xff]  ;;  %v2454_v7 = vld [vmem:[#allocation14 + $0x16e0] sm:$0xff] }
 0x230   :  { %5782 = vmatpush1.bf16.msra.mxu1 %v5781_v55  ;;  %3475 = vmatmul.mubr.f32.gmra.mrb[10].mxu0 %v8041_v51  ;;  %v6013_v55 = vpack.c.bf16 %v1958_v40, %v1952_v50  ;;  %v6019_v50 = vpack.c.bf16 %v1983_v8, %v1977_v54  ;;  %v2419_v40 = vld [vmem:[#allocation14 + $0x15c8] sm:$0xff]  ;;  %v2437_v54 = vld [vmem:[#allocation14 + $0x1658] sm:$0xff]  ;;  %v2024_v30 = vld [vmem:[#allocation14 + $0x970] sm:$0xff] }
 0x231   :  { %6006 = vmatpush1.bf16.msra.mxu0 %v6005_v33  ;;  %5784 = vmatprep.subr.bf16.mxu1 %v5783_v27  ;;  %v5791_v33 = vpack.c.bf16 %v2401_v37, %v2395_v49  ;;  %v2394_v27 = vld [vmem:[#allocation14 + $0x1500] sm:$0xff]  ;;  %v2425_v49 = vld [vmem:[#allocation14 + $0x15f8] sm:$0xff] }
 0x232   :  { %6008 = vmatprep.subr.bf16.mxu0 %v6007_v36  ;;  %3480 = vmatprep.mubr.f32.mxu0 %v8053_v63  ;;  %v1970_v36 = vld [vmem:[#allocation14 + $0x7c0] sm:$0xff]  ;;  %v5793_v52 = vpack.c.bf16 %v2400_v9, %v2394_v27  ;;  %v5799_v27 = vpack.c.bf16 %v2425_v49, %v2419_v40  ;;  %v2443_v40 = vld [vmem:[#allocation14 + $0x1688] sm:$0xff]  ;;  %v2449_v49 = vld [vmem:[#allocation14 + $0x16b8] sm:$0xff] }
 0x233   :  { %v2418_v9 = vld [vmem:[#allocation14 + $0x15c0] sm:$0xff]  ;;  %v2019_v63 = vld [vmem:[#allocation14 + $0x948] sm:$0xff] }
 0x234   :  { %5786 = vmatpush1.bf16.msra.mxu1 %v5785_v18  ;;  %3481 = vmatmul.mubr.f32.gmra.mrb[12].mxu0 %v8059_v17  ;;  %v6017_v18 = vpack.c.bf16 %v1970_v36, %v1964_v22  ;;  %v2424_v22 = vld [vmem:[#allocation14 + $0x15f0] sm:$0xff]  ;;  %v6023_v36 = vpack.c.bf16 %v1995_v35, %v1989_v57  ;;  %v2013_v17 = vld [vmem:[#allocation14 + $0x918] sm:$0xff] }
 0x235   :  { %6010 = vmatpush1.bf16.msra.mxu0 %v6009_v34  ;;  %5788 = vmatprep.subr.bf16.mxu1 %v5787_v16  ;;  %v5795_v34 = vpack.c.bf16 %v2413_v45, %v2407_v41  ;;  %v2406_v16 = vld [vmem:[#allocation14 + $0x1560] sm:$0xff]  ;;  %v8293_v37 = vpop.f32.mrb[10].mxu1  ;;  %v2431_v45 = vld [vmem:[#allocation14 + $0x1628] sm:$0xff]  ;;  %v8304_v35 = vld [vmem:[#allocation11 + $0x8] sm:$0xf] }
 0x236   :  { %6012 = vmatprep.subr.bf16.mxu0 %v6011_v0  ;;  %3486 = vmatprep.mubr.f32.mxu0 %v8081_v38  ;;  %v1982_v0 = vld [vmem:[#allocation14 + $0x820] sm:$0xff]  ;;  %8826 = vst [vmem:[#allocation53_spill] sm:$0xff] %v8293_v37 }
 0x237   :  { %v1994_v41 = vld [vmem:[#allocation14 + $0x880] sm:$0xff] }
 0x238   :  { %5790 = vmatpush1.bf16.msra.mxu1 %v5789_v25  ;;  %3487 = vmatmul.mubr.f32.gmra.mrb[14].mxu0 %v8095_v60  ;;  %v8296_v25 = vpop.f32.mrb[11].mxu1  ;;  %v2007_v60 = vld [vmem:[#allocation14 + $0x8e8] sm:$0xff]  ;;  %v7154_v51 = vld [vmem:[#allocation2 + $0x50] sm:$0xff] }
 0x239   :  { %6014 = vmatpush1.bf16.msra.mxu0 %v6013_v55  ;;  %5792 = vmatprep.subr.bf16.mxu1 %v5791_v33  ;;  %8827 = vst [vmem:[#allocation54_spill] sm:$0xff] %v8296_v25  ;;  %v5797_v55 = vpack.c.bf16 %v2412_v13, %v2406_v16  ;;  %v6021_v33 = vpack.c.bf16 %v1982_v0, %v1976_v39  ;;  %v8298_v8 = vpop.f32.mrb[12].mxu1  ;;  %v2436_v13 = vld [vmem:[#allocation14 + $0x1650] sm:$0xff]  ;;  %v2042_v25 = vld [vmem:[#allocation14 + $0xa00] sm:$0xff] }
 0x23a   :  { %6016 = vmatprep.subr.bf16.mxu0 %v6015_v56  ;;  %3557 = vmatprep.mubr.f32.mxu0 %v8100_v10  ;;  %v1988_v56 = vld [vmem:[#allocation14 + $0x850] sm:$0xff]  ;;  %8828 = vst [vmem:[#allocation55_spill] sm:$0xff] %v8298_v8  ;;  %v2001_v10 = vld [vmem:[#allocation14 + $0x8b8] sm:$0xff]  ;;  %v8300_v38 = vpop.f32.mrb[13].mxu1  ;;  %v5803_v16 = vpack.c.bf16 %v2437_v54, %v2431_v45  ;;  %v7153_v45 = vld [vmem:[#allocation2 + $0x58] sm:$0xff] }
 0x23b   :  { %8829 = vst [vmem:[#allocation56_spill] sm:$0xff] %v8300_v38  ;;  %v2000_v39 = vld [vmem:[#allocation14 + $0x8b0] sm:$0xff]  ;;  %v6027_v0 = vpack.c.bf16 %v2007_v60, %v2001_v10  ;;  %v8316_v60 = vrot.slane %v8304_v35, %v7816_v47  ;;  %v5807_v10 = vpack.c.bf16 %v2449_v49, %v2443_v40  ;;  %v2025_v40 = vld [vmem:[#allocation14 + $0x978] sm:$0xff]  ;;  %v2031_v49 = vld [vmem:[#allocation14 + $0x9a8] sm:$0xff] }
 0x23c   :  { %5794 = vmatpush1.bf16.msra.mxu1 %v5793_v52  ;;  %v5801_v52 = vpack.c.bf16 %v2424_v22, %v2418_v9  ;;  %v8312_v22 = vld [vmem:[#allocation13 + $0x8] sm:$0xf]  ;;  %v2030_v38 = vld [vmem:[#allocation14 + $0x9a0] sm:$0xff] }
 0x23d   :  { %6018 = vmatpush1.bf16.msra.mxu0 %v6017_v18  ;;  %5796 = vmatprep.subr.bf16.mxu1 %v5795_v34  ;;  %v2430_v18 = vld [vmem:[#allocation14 + $0x1620] sm:$0xff]  ;;  %v6025_v34 = vpack.c.bf16 %v1994_v41, %v1988_v56  ;;  %v8302_v57 = vpop.f32.mrb[14].mxu1  ;;  %v2012_v41 = vld [vmem:[#allocation14 + $0x910] sm:$0xff]  ;;  %v2473_v8 = vld [vmem:[#allocation14 + $0x1778] sm:$0xff] }
 0x23e   :  { %6020 = vmatprep.subr.bf16.mxu0 %v6019_v50  ;;  %v2006_v50 = vld [vmem:[#allocation14 + $0x8e0] sm:$0xff]  ;;  %8830 = vst [vmem:[#allocation57_spill] sm:$0xff] %v8302_v57  ;;  %v6035_v57 = vpack.c.bf16 %v2031_v49, %v2025_v40  ;;  %v2472_v40 = vld [vmem:[#allocation14 + $0x1770] sm:$0xff] }
 0x23f   :  { %v6029_v9 = vpack.c.bf16 %v2006_v50, %v2000_v39  ;;  %v2442_v56 = vld [vmem:[#allocation14 + $0x1680] sm:$0xff]  ;;  %v2455_v39 = vld [vmem:[#allocation14 + $0x16e8] sm:$0xff]  ;;  %v2461_v50 = vld [vmem:[#allocation14 + $0x1718] sm:$0xff] }
 0x240   :  { %5798 = vmatpush1.bf16.msra.mxu1 %v5797_v55  ;;  %v8306_v55 = vpop.f32.mrb[15].mxu1  ;;  %v2036_v49 = vld [vmem:[#allocation14 + $0x9d0] sm:$0xff]  ;;  %v7167_v37 = vld [vmem:[#allocation2 + $0xf0] sm:$0xff] }
 0x241   :  { %6022 = vmatpush1.bf16.msra.mxu0 %v6021_v33  ;;  %5800 = vmatprep.subr.bf16.mxu1 %v5799_v27  ;;  %8831 = vst [vmem:[#allocation58_spill] sm:$0xff] %v8306_v55  ;;  %v8310_v33 = vrot.slane %v8304_v35, %v7784_v21  ;;  %v5805_v27 = vpack.c.bf16 %v2436_v13, %v2430_v18  ;;  %v2018_v13 = vld [vmem:[#allocation14 + $0x940] sm:$0xff] }
 0x242   :  { %6024 = vmatprep.subr.bf16.mxu0 %v6023_v36  ;;  %v2448_v36 = vld [vmem:[#allocation14 + $0x16b0] sm:$0xff]  ;;  %v6031_v18 = vpack.c.bf16 %v2019_v63, %v2013_v17  ;;  %v6033_v63 = vpack.c.bf16 %v2018_v13, %v2012_v41  ;;  %v5811_v17 = vpack.c.bf16 %v2461_v50, %v2455_v39  ;;  %v7155_v55 = vld [vmem:[#allocation2 + $0xb8] sm:$0xff] }
 0x243   :  { %v1525_v54 = vmul.f32 %v7153_v45, %v8310_v33  ;;  %v2466_v50 = vld [vmem:[#allocation14 + $0x1740] sm:$0xff] }
 0x244   :  { %5802 = vmatpush1.bf16.msra.mxu1 %v5801_v52  ;;  %v8321_v52 = vrot.slane %v8312_v22, %v7784_v21  ;;  %v5809_v21 = vpack.c.bf16 %v2448_v36, %v2442_v56  ;;  %v2037_v36 = vld [vmem:[#allocation14 + $0x9d8] sm:$0xff] }
 0x245   :  { %6026 = vmatpush1.bf16.msra.mxu0 %v6025_v34  ;;  %5804 = vmatprep.subr.bf16.mxu1 %v5803_v16  ;;  %v1524_v34 = vmul.f32 %v7154_v51, %v8316_v60  ;;  %v8326_v16 = vrot.slane %v8312_v22, %v7816_v47  ;;  %v2460_v51 = vld [vmem:[#allocation14 + $0x1710] sm:$0xff]  ;;  %v1537_v47 = vmul.f32 %v7155_v55, %v8310_v33 }
 0x246   :  { %6028 = vmatprep.subr.bf16.mxu0 %v6027_v0  ;;  %v8329_v45 = vadd.f32 %v8321_v52, %v1525_v54  ;;  %v2467_v54 = vld [vmem:[#allocation14 + $0x1748] sm:$0xff]  ;;  %v5813_v13 = vpack.c.bf16 %v2460_v51, %v2454_v7  ;;  %v2049_v51 = vld [vmem:[#allocation14 + $0xa38] sm:$0xff] }
 0x247   :  { %v8332_v0 = vadd.f32 %v8326_v16, %v1524_v34  ;;  %v2043_v34 = vld [vmem:[#allocation14 + $0xa08] sm:$0xff]  ;;  %v8340_v41 = vadd.f32 %v8321_v52, %v1537_v47  ;;  %v5815_v39 = vpack.c.bf16 %v2473_v8, %v2467_v54 }
 0x248   :  { %5806 = vmatpush1.bf16.msra.mxu1 %v5805_v27  ;;  %v7156_v27 = vld [vmem:[#allocation2 + $0xb0] sm:$0xff]  ;;  %v2479_v47 = vld [vmem:[#allocation14 + $0x17a8] sm:$0xff] }
 0x249   :  { %8832 = vst [vmem:[#allocation59_spill] sm:$0xff] %v8332_v0  ;;  %6030 = vmatpush1.bf16.msra.mxu0 %v6029_v9  ;;  %5808 = vmatprep.subr.bf16.mxu1 %v5807_v10  ;;  %v1536_v56 = vmul.f32 %v7156_v27, %v8316_v60  ;;  %v7157_v9 = vld [vmem:[#allocation11] sm:$0xff]  ;;  %8833 = vst [vmem:[#allocation60_spill] sm:$0xff] %v8340_v41  ;;  %v2485_v41 = vld [vmem:[#allocation14 + $0x17d8] sm:$0xff] }
 0x24a   :  { %6032 = vmatprep.subr.bf16.mxu0 %v6031_v18  ;;  %v8337_v10 = vrot.slane %v7157_v9, %v7966_v29  ;;  %v6037_v18 = vpack.c.bf16 %v2030_v38, %v2024_v30  ;;  %v7158_v27 = vld [vmem:[#allocation2 + $0x118] sm:$0xff]  ;;  %v6039_v9 = vpack.c.bf16 %v2043_v34, %v2037_v36  ;;  %v7161_v38 = vld [vmem:[#allocation13] sm:$0xff] }
 0x24b   :  { %v8343_v55 = vadd.f32 %v8326_v16, %v1536_v56  ;;  %v1549_v0 = vmul.f32 %v7158_v27, %v8310_v33  ;;  %v2055_v56 = vld [vmem:[#allocation14 + $0xa68] sm:$0xff]  ;;  %v8349_v8 = vrot.slane %v7161_v38, %v7966_v29  ;;  %v6041_v27 = vpack.c.bf16 %v2042_v25, %v2036_v49  ;;  %v7165_v25 = vld [vmem:[#allocation2 + $0x90] sm:$0xff] }
 0x24c   :  { %5810 = vmatpush1.bf16.msra.mxu1 %v5809_v21  ;;  %v7159_v21 = vld [vmem:[#allocation2 + $0x110] sm:$0xff]  ;;  %v7162_v54 = vld [vmem:[#allocation2 + $0x98] sm:$0xff] }
 0x24d   :  { %8834 = vst [vmem:[#allocation61_spill] sm:$0xff] %v8343_v55  ;;  %6034 = vmatpush1.bf16.msra.mxu0 %v6033_v63  ;;  %5812 = vmatprep.subr.bf16.mxu1 %v5811_v17  ;;  %v1548_v7 = vmul.f32 %v7159_v21, %v8316_v60  ;;  %v7160_v63 = vld [vmem:[#allocation2 + $0x30] sm:$0xff]  ;;  %v8352_v17 = vadd.f32 %v8321_v52, %v1549_v0  ;;  %v2484_v55 = vld [vmem:[#allocation14 + $0x17d0] sm:$0xff]  ;;  %v7163_v29 = vld [vmem:[#allocation2 + $0x178] sm:$0xff] }
 0x24e   :  { %6036 = vmatprep.subr.bf16.mxu0 %v6035_v57  ;;  %v1520_v30 = vmul.f32 %v7160_v63, %v8337_v10  ;;  %v5817_v57 = vpack.c.bf16 %v2472_v40, %v2466_v50  ;;  %v1533_v36 = vmul.f32 %v7162_v54, %v8250_v20  ;;  %v5819_v21 = vpack.c.bf16 %v2485_v41, %v2479_v47  ;;  %v2478_v63 = vld [vmem:[#allocation14 + $0x17a0] sm:$0xff]  ;;  %v2491_v50 = vld [vmem:[#allocation14 + $0x1808] sm:$0xff]  ;;  %v2497_v40 = vld [vmem:[#allocation14 + $0x1838] sm:$0xff] }
 0x24f   :  { %8835 = vst [vmem:[#allocation62_spill] sm:$0xff] %v8352_v17  ;;  %v8356_v34 = vadd.f32 %v8326_v16, %v1548_v7  ;;  %v1561_v38 = vmul.f32 %v7163_v29, %v8310_v33  ;;  %v6043_v0 = vpack.c.bf16 %v2055_v56, %v2049_v51  ;;  %v7164_v17 = vld [vmem:[#allocation2 + $0x170] sm:$0xff]  ;;  %v1532_v41 = vmul.f32 %v7165_v25, %v8337_v10  ;;  %v7166_v51 = vld [vmem:[#allocation2 + $0xf8] sm:$0xff]  ;;  %v2060_v29 = vld [vmem:[#allocation14 + $0xa90] sm:$0xff] }
 0x250   :  { %5814 = vmatpush1.bf16.msra.mxu1 %v5813_v13  ;;  %v2054_v13 = vld [vmem:[#allocation14 + $0xa60] sm:$0xff]  ;;  %v1560_v54 = vmul.f32 %v7164_v17, %v8316_v60  ;;  %v2061_v7 = vld [vmem:[#allocation14 + $0xa98] sm:$0xff]  ;;  %v5821_v33 = vpack.c.bf16 %v2484_v55, %v2478_v63  ;;  %v1645_v47 = vadd.f32 %v8264_v28, %v1533_v36  ;;  %v1545_v56 = vmul.f32 %v7166_v51, %v8250_v20 }
 0x251   :  { %8836 = vst [vmem:[#allocation63_spill] sm:$0xff] %v8356_v34  ;;  %6038 = vmatpush1.bf16.msra.mxu0 %v6037_v18  ;;  %5816 = vmatprep.subr.bf16.mxu1 %v5815_v39  ;;  %v2067_v34 = vld [vmem:[#allocation14 + $0xac8] sm:$0xff]  ;;  %v1632_v18 = vadd.f32 %v8349_v8, %v1520_v30  ;;  %v8363_v39 = vadd.f32 %v8321_v52, %v1561_v38  ;;  %v2490_v49 = vld [vmem:[#allocation14 + $0x1800] sm:$0xff]  ;;  %v2509_v55 = vld [vmem:[#allocation14 + $0x1898] sm:$0xff] }
 0x252   :  { %6040 = vmatprep.subr.bf16.mxu0 %v6039_v9  ;;  %v2496_v9 = vld [vmem:[#allocation14 + $0x1830] sm:$0xff]  ;;  %v8368_v60 = vadd.f32 %v8326_v16, %v1560_v54  ;;  %v6045_v30 = vpack.c.bf16 %v2054_v13, %v2048_v44  ;;  %v5823_v17 = vpack.c.bf16 %v2497_v40, %v2491_v50  ;;  %v6047_v52 = vpack.c.bf16 %v2067_v34, %v2061_v7  ;;  %v2066_v38 = vld [vmem:[#allocation14 + $0xac0] sm:$0xff]  ;;  %v2073_v36 = vld [vmem:[#allocation14 + $0xaf8] sm:$0xff] }
 0x253   :  { %8837 = vst [vmem:[#allocation64_spill] sm:$0xff] %v8363_v39  ;;  %v8370_v63 = vmax.f32 %v1632_v18, 0.0  ;;  %v5825_v25 = vpack.c.bf16 %v2496_v9, %v2490_v49  ;;  %v2079_v39 = vld [vmem:[#allocation14 + $0xb28] sm:$0xff]  ;;  %v1644_v51 = vadd.f32 %v8349_v8, %v1532_v41  ;;  %v1544_v16 = vmul.f32 %v7167_v37, %v8337_v10  ;;  %v2508_v44 = vld [vmem:[#allocation14 + $0x1890] sm:$0xff]  ;;  %v2078_v18 = vld [vmem:[#allocation14 + $0xb20] sm:$0xff] }
 0x254   :  { %5818 = vmatpush1.bf16.msra.mxu1 %v5817_v57  ;;  %v2503_v57 = vld [vmem:[#allocation14 + $0x1868] sm:$0xff]  ;;  %v1657_v34 = vadd.f32 %v8264_v28, %v1545_v56  ;;  %v8380_v50 = vrot.slane %v8304_v35, %v7781_v11  ;;  %v6049_v40 = vpack.c.bf16 %v2066_v38, %v2060_v29  ;;  %v2072_v7 = vld [vmem:[#allocation14 + $0xaf0] sm:$0xff]  ;;  %v6051_v37 = vpack.c.bf16 %v2079_v39, %v2073_v36  ;;  %v2085_v9 = vld [vmem:[#allocation14 + $0xb58] sm:$0xff] }
 0x255   :  { %6042 = vmatpush1.bf16.msra.mxu0 %v6041_v27  ;;  %5820 = vmatprep.subr.bf16.mxu1 %v5819_v21  ;;  %v2502_v27 = vld [vmem:[#allocation14 + $0x1860] sm:$0xff]  ;;  %v8374_v21 = vmax.f32 %v1645_v47, 0.0  ;;  %v5827_v54 = vpack.c.bf16 %v2509_v55, %v2503_v57  ;;  %v2515_v41 = vld [vmem:[#allocation14 + $0x18c8] sm:$0xff]  ;;  %v1656_v56 = vadd.f32 %v8349_v8, %v1544_v16  ;;  %v7170_v29 = vld [vmem:[#allocation2 + $0x48] sm:$0xff]  ;;  %v8394_v38 = vrot.slane %v8312_v22, %v7781_v11 }
 0x256   :  { %6044 = vmatprep.subr.bf16.mxu0 %v6043_v0  ;;  %v7168_v0 = vld [vmem:[#allocation2 + $0x158] sm:$0xff]  ;;  %v5829_v49 = vpack.c.bf16 %v2508_v44, %v2502_v27  ;;  %v6053_v57 = vpack.c.bf16 %v2078_v18, %v2072_v7  ;;  %v2533_v44 = vld [vmem:[#allocation14 + $0x1958] sm:$0xff] }
 0x257   :  { %v1557_v13 = vmul.f32 %v7168_v0, %v8250_v20  ;;  %v2091_v47 = vld [vmem:[#allocation14 + $0xb88] sm:$0xff]  ;;  %v8383_v20 = vmax.f32 %v1644_v51, 0.0  ;;  %v7169_v0 = vld [vmem:[#allocation2 + $0x150] sm:$0xff] }
 0x258   :  { %5822 = vmatpush1.bf16.msra.mxu1 %v5821_v33  ;;  %v2521_v33 = vld [vmem:[#allocation14 + $0x18f8] sm:$0xff]  ;;  %v2514_v36 = vld [vmem:[#allocation14 + $0x18c0] sm:$0xff]  ;;  %v6055_v51 = vpack.c.bf16 %v2091_v47, %v2085_v9  ;;  %v2527_v27 = vld [vmem:[#allocation14 + $0x1928] sm:$0xff] }
 0x259   :  { %6046 = vmatpush1.bf16.msra.mxu0 %v6045_v30  ;;  %5824 = vmatprep.subr.bf16.mxu1 %v5823_v17  ;;  %v1556_v30 = vmul.f32 %v7169_v0, %v8337_v10  ;;  %v8388_v17 = vmax.f32 %v1657_v34, 0.0  ;;  %v1669_v39 = vadd.f32 %v8264_v28, %v1557_v13  ;;  %v5831_v55 = vpack.c.bf16 %v2521_v33, %v2515_v41  ;;  %v2520_v10 = vld [vmem:[#allocation14 + $0x18f0] sm:$0xff]  ;;  %v2090_v16 = vld [vmem:[#allocation14 + $0xb80] sm:$0xff]  ;;  %v2097_v28 = vld [vmem:[#allocation14 + $0xbb8] sm:$0xff] }
 0x25a   :  { %6048 = vmatprep.subr.bf16.mxu0 %v6047_v52  ;;  %v1523_v52 = vmul.f32 %v7170_v29, %v8380_v50  ;;  %v2103_v34 = vld [vmem:[#allocation14 + $0xbe8] sm:$0xff]  ;;  %v8397_v13 = vmax.f32 %v1656_v56, 0.0  ;;  %v5835_v18 = vpack.c.bf16 %v2533_v44, %v2527_v27  ;;  %v2526_v41 = vld [vmem:[#allocation14 + $0x1920] sm:$0xff]  ;;  %v2532_v33 = vld [vmem:[#allocation14 + $0x1950] sm:$0xff] }
 0x25b   :  { %3202 = vmatmul.mubr.f32.vlgmr.msra.gmra.mrb[16].mxu1 %v8370_v63  ;;  %v1668_v0 = vadd.f32 %v8349_v8, %v1556_v30  ;;  %v2096_v9 = vld [vmem:[#allocation14 + $0xbb0] sm:$0xff]  ;;  %v6059_v47 = vpack.c.bf16 %v2103_v34, %v2097_v28  ;;  %v2102_v56 = vld [vmem:[#allocation14 + $0xbe0] sm:$0xff]  ;;  %v2539_v29 = vld [vmem:[#allocation14 + $0x1988] sm:$0xff] }
 0x25c   :  { %5826 = vmatpush1.bf16.msra.mxu1 %v5825_v25  ;;  %3207 = vmatprep.mubr.f32.mxu1 %v8374_v21  ;;  %v2084_v25 = vld [vmem:[#allocation14 + $0xb50] sm:$0xff]  ;;  %v1635_v7 = vadd.f32 %v8394_v38, %v1523_v52  ;;  %v2545_v8 = vld [vmem:[#allocation14 + $0x19b8] sm:$0xff]  ;;  %v2115_v30 = vld [vmem:[#allocation14 + $0xc48] sm:$0xff]  ;;  %v5837_v52 = vpack.c.bf16 %v2532_v33, %v2526_v41 }
 0x25d   :  { %6050 = vmatpush1.bf16.msra.mxu0 %v6049_v40  ;;  %5828 = vmatprep.subr.bf16.mxu1 %v5827_v54  ;;  %v5833_v40 = vpack.c.bf16 %v2520_v10, %v2514_v36  ;;  %v8401_v54 = vmax.f32 %v1669_v39, 0.0  ;;  %v8405_v39 = vmax.f32 %v1668_v0, 0.0  ;;  %v5839_v36 = vpack.c.bf16 %v2545_v8, %v2539_v29  ;;  %v2538_v10 = vld [vmem:[#allocation14 + $0x1980] sm:$0xff]  ;;  %v2551_v44 = vld [vmem:[#allocation14 + $0x19e8] sm:$0xff]  ;;  %v2557_v28 = vld [vmem:[#allocation14 + $0x1a18] sm:$0xff] }
 0x25e   :  { %6052 = vmatprep.subr.bf16.mxu0 %v6051_v37  ;;  %v6057_v37 = vpack.c.bf16 %v2090_v16, %v2084_v25  ;;  %v2544_v25 = vld [vmem:[#allocation14 + $0x19b0] sm:$0xff]  ;;  %v2114_v27 = vld [vmem:[#allocation14 + $0xc40] sm:$0xff]  ;;  %v2121_v34 = vld [vmem:[#allocation14 + $0xc78] sm:$0xff] }
 0x25f   :  { %3208 = vmatmul.mubr.f32.gmra.mrb[18].mxu1 %v8383_v20  ;;  %v2127_v0 = vld [vmem:[#allocation14 + $0xca8] sm:$0xff]  ;;  %v2556_v41 = vld [vmem:[#allocation14 + $0x1a10] sm:$0xff]  ;;  %v2569_v29 = vld [vmem:[#allocation14 + $0x1a78] sm:$0xff] }
 0x260   :  { %5830 = vmatpush1.bf16.msra.mxu1 %v5829_v49  ;;  %3213 = vmatprep.mubr.f32.mxu1 %v8388_v17  ;;  %v2109_v49 = vld [vmem:[#allocation14 + $0xc18] sm:$0xff]  ;;  %v2120_v33 = vld [vmem:[#allocation14 + $0xc70] sm:$0xff] }
 0x261   :  { %6054 = vmatpush1.bf16.msra.mxu0 %v6053_v57  ;;  %5832 = vmatprep.subr.bf16.mxu1 %v5831_v55  ;;  %v8408_v57 = vmax.f32 %v1635_v7, 0.0  ;;  %v6061_v55 = vpack.c.bf16 %v2102_v56, %v2096_v9  ;;  %v6063_v16 = vpack.c.bf16 %v2115_v30, %v2109_v49  ;;  %v6067_v9 = vpack.c.bf16 %v2127_v0, %v2121_v34  ;;  %v2563_v56 = vld [vmem:[#allocation14 + $0x1a48] sm:$0xff]  ;;  %v2133_v8 = vld [vmem:[#allocation14 + $0xcd8] sm:$0xff] }
 0x262   :  { %6056 = vmatprep.subr.bf16.mxu0 %v6055_v51  ;;  %v2108_v51 = vld [vmem:[#allocation14 + $0xc10] sm:$0xff]  ;;  %v2139_v49 = vld [vmem:[#allocation14 + $0xd08] sm:$0xff] }
 0x263   :  { %3214 = vmatmul.mubr.f32.gmra.mrb[20].mxu1 %v8397_v13  ;;  %v6065_v7 = vpack.c.bf16 %v2114_v27, %v2108_v51  ;;  %v6071_v51 = vpack.c.bf16 %v2139_v49, %v2133_v8  ;;  %v2575_v27 = vld [vmem:[#allocation14 + $0x1aa8] sm:$0xff] }
 0x264   :  { %5834 = vmatpush1.bf16.msra.mxu1 %v5833_v40  ;;  %3219 = vmatprep.mubr.f32.mxu1 %v8401_v54  ;;  %v5841_v40 = vpack.c.bf16 %v2544_v25, %v2538_v10  ;;  %v2568_v10 = vld [vmem:[#allocation14 + $0x1a70] sm:$0xff]  ;;  %v2151_v34 = vld [vmem:[#allocation14 + $0xd68] sm:$0xff] }
 0x265   :  { %6058 = vmatpush1.bf16.msra.mxu0 %v6057_v37  ;;  %5836 = vmatprep.subr.bf16.mxu1 %v5835_v18  ;;  %v5843_v37 = vpack.c.bf16 %v2557_v28, %v2551_v44  ;;  %v2550_v18 = vld [vmem:[#allocation14 + $0x19e0] sm:$0xff]  ;;  %v2132_v25 = vld [vmem:[#allocation14 + $0xcd0] sm:$0xff]  ;;  %v2581_v44 = vld [vmem:[#allocation14 + $0x1ad8] sm:$0xff] }
 0x266   :  { %6060 = vmatprep.subr.bf16.mxu0 %v6059_v47  ;;  %v2126_v47 = vld [vmem:[#allocation14 + $0xca0] sm:$0xff]  ;;  %v5845_v30 = vpack.c.bf16 %v2556_v41, %v2550_v18  ;;  %v2145_v28 = vld [vmem:[#allocation14 + $0xd38] sm:$0xff]  ;;  %v2580_v18 = vld [vmem:[#allocation14 + $0x1ad0] sm:$0xff] }
 0x267   :  { %3220 = vmatmul.mubr.f32.gmra.mrb[22].mxu1 %v8405_v39  ;;  %v2144_v41 = vld [vmem:[#allocation14 + $0xd30] sm:$0xff]  ;;  %v2163_v8 = vld [vmem:[#allocation14 + $0xdc8] sm:$0xff] }
 0x268   :  { %5838 = vmatpush1.bf16.msra.mxu1 %v5837_v52  ;;  %3290 = vmatprep.mubr.f32.mxu1 %v8408_v57  ;;  %v6069_v52 = vpack.c.bf16 %v2126_v47, %v2120_v33  ;;  %v6075_v33 = vpack.c.bf16 %v2151_v34, %v2145_v28  ;;  %v2587_v47 = vld [vmem:[#allocation14 + $0x1b08] sm:$0xff] }
 0x269   :  { %6062 = vmatpush1.bf16.msra.mxu0 %v6061_v55  ;;  %5840 = vmatprep.subr.bf16.mxu1 %v5839_v36  ;;  %v5847_v55 = vpack.c.bf16 %v2569_v29, %v2563_v56  ;;  %v2562_v36 = vld [vmem:[#allocation14 + $0x1a40] sm:$0xff]  ;;  %v2593_v56 = vld [vmem:[#allocation14 + $0x1b38] sm:$0xff]  ;;  %v2175_v28 = vld [vmem:[#allocation14 + $0xe28] sm:$0xff] }
 0x26a   :  { %6064 = vmatprep.subr.bf16.mxu0 %v6063_v16  ;;  %v2138_v16 = vld [vmem:[#allocation14 + $0xd00] sm:$0xff]  ;;  %v5849_v0 = vpack.c.bf16 %v2568_v10, %v2562_v36  ;;  %v2157_v29 = vld [vmem:[#allocation14 + $0xd98] sm:$0xff]  ;;  %v2592_v36 = vld [vmem:[#allocation14 + $0x1b30] sm:$0xff] }
 0x26b   :  { %v2156_v10 = vld [vmem:[#allocation14 + $0xd90] sm:$0xff] }
 0x26c   :  { %5842 = vmatpush1.bf16.msra.mxu1 %v5841_v40  ;;  %3558 = vmatmul.mubr.f32.vlgmr.msra.gmra.mrb[8].mxu0 %v8160_v12  ;;  %v6073_v40 = vpack.c.bf16 %v2138_v16, %v2132_v25  ;;  %v6079_v25 = vpack.c.bf16 %v2163_v8, %v2157_v29  ;;  %v2599_v16 = vld [vmem:[#allocation14 + $0x1b68] sm:$0xff] }
 0x26d   :  { %6066 = vmatpush1.bf16.msra.mxu0 %v6065_v7  ;;  %5844 = vmatprep.subr.bf16.mxu1 %v5843_v37  ;;  %v5851_v7 = vpack.c.bf16 %v2581_v44, %v2575_v27  ;;  %v2574_v37 = vld [vmem:[#allocation14 + $0x1aa0] sm:$0xff]  ;;  %v2605_v27 = vld [vmem:[#allocation14 + $0x1b98] sm:$0xff]  ;;  %v2187_v29 = vld [vmem:[#allocation14 + $0xe88] sm:$0xff] }
 0x26e   :  { %6068 = vmatprep.subr.bf16.mxu0 %v6067_v9  ;;  %3563 = vmatprep.mubr.f32.mxu0 %v8165_v48  ;;  %v2150_v9 = vld [vmem:[#allocation14 + $0xd60] sm:$0xff]  ;;  %v5853_v49 = vpack.c.bf16 %v2580_v18, %v2574_v37  ;;  %v2169_v44 = vld [vmem:[#allocation14 + $0xdf8] sm:$0xff]  ;;  %v2604_v37 = vld [vmem:[#allocation14 + $0x1b90] sm:$0xff] }
 0x26f   :  { %v2168_v18 = vld [vmem:[#allocation14 + $0xdf0] sm:$0xff] }
 0x270   :  { %5846 = vmatpush1.bf16.msra.mxu1 %v5845_v30  ;;  %3564 = vmatmul.mubr.f32.gmra.mrb[10].mxu0 %v8173_v3  ;;  %v6077_v30 = vpack.c.bf16 %v2150_v9, %v2144_v41  ;;  %v6083_v41 = vpack.c.bf16 %v2175_v28, %v2169_v44  ;;  %v2611_v9 = vld [vmem:[#allocation14 + $0x1bc8] sm:$0xff] }
 0x271   :  { %6070 = vmatpush1.bf16.msra.mxu0 %v6069_v52  ;;  %5848 = vmatprep.subr.bf16.mxu1 %v5847_v55  ;;  %v5855_v52 = vpack.c.bf16 %v2593_v56, %v2587_v47  ;;  %v2586_v55 = vld [vmem:[#allocation14 + $0x1b00] sm:$0xff]  ;;  %v2617_v47 = vld [vmem:[#allocation14 + $0x1bf8] sm:$0xff]  ;;  %v2199_v44 = vld [vmem:[#allocation14 + $0xee8] sm:$0xff] }
 0x272   :  { %6072 = vmatprep.subr.bf16.mxu0 %v6071_v51  ;;  %3569 = vmatprep.mubr.f32.mxu0 %v8179_v4  ;;  %v2162_v51 = vld [vmem:[#allocation14 + $0xdc0] sm:$0xff]  ;;  %v5857_v34 = vpack.c.bf16 %v2592_v36, %v2586_v55  ;;  %v2181_v56 = vld [vmem:[#allocation14 + $0xe58] sm:$0xff]  ;;  %v2616_v55 = vld [vmem:[#allocation14 + $0x1bf0] sm:$0xff] }
 0x273   :  { %v2180_v36 = vld [vmem:[#allocation14 + $0xe50] sm:$0xff]  ;;  %v2270_v4 = vld [vmem:[#allocation14 + $0x1120] sm:$0xff] }
 0x274   :  { %5850 = vmatpush1.bf16.msra.mxu1 %v5849_v0  ;;  %3570 = vmatmul.mubr.f32.gmra.mrb[12].mxu0 %v8187_v23  ;;  %v6081_v0 = vpack.c.bf16 %v2162_v51, %v2156_v10  ;;  %v6087_v10 = vpack.c.bf16 %v2187_v29, %v2181_v56  ;;  %v2623_v51 = vld [vmem:[#allocation14 + $0x1c28] sm:$0xff]  ;;  %v2701_v23 = vld [vmem:[#allocation14 + $0x1e98] sm:$0xff] }
 0x275   :  { %6074 = vmatpush1.bf16.msra.mxu0 %v6073_v40  ;;  %5852 = vmatprep.subr.bf16.mxu1 %v5851_v7  ;;  %v5859_v40 = vpack.c.bf16 %v2605_v27, %v2599_v16  ;;  %v2598_v7 = vld [vmem:[#allocation14 + $0x1b60] sm:$0xff]  ;;  %v2629_v16 = vld [vmem:[#allocation14 + $0x1c58] sm:$0xff]  ;;  %v2211_v56 = vld [vmem:[#allocation14 + $0xf48] sm:$0xff] }
 0x276   :  { %6076 = vmatprep.subr.bf16.mxu0 %v6075_v33  ;;  %3575 = vmatprep.mubr.f32.mxu0 %v8191_v5  ;;  %v2174_v33 = vld [vmem:[#allocation14 + $0xe20] sm:$0xff]  ;;  %v5861_v8 = vpack.c.bf16 %v2604_v37, %v2598_v7  ;;  %v2193_v27 = vld [vmem:[#allocation14 + $0xeb8] sm:$0xff]  ;;  %v5867_v7 = vpack.c.bf16 %v2629_v16, %v2623_v51  ;;  %v2192_v37 = vld [vmem:[#allocation14 + $0xeb0] sm:$0xff] }
 0x277   :  { %v2647_v51 = vld [vmem:[#allocation14 + $0x1ce8] sm:$0xff]  ;;  %v2217_v16 = vld [vmem:[#allocation14 + $0xf78] sm:$0xff] }
 0x278   :  { %5854 = vmatpush1.bf16.msra.mxu1 %v5853_v49  ;;  %3576 = vmatmul.mubr.f32.gmra.mrb[14].mxu0 %v8195_v1  ;;  %v6085_v49 = vpack.c.bf16 %v2174_v33, %v2168_v18  ;;  %v6091_v18 = vpack.c.bf16 %v2199_v44, %v2193_v27  ;;  %v2198_v33 = vld [vmem:[#allocation14 + $0xee0] sm:$0xff]  ;;  %v2223_v27 = vld [vmem:[#allocation14 + $0xfa8] sm:$0xff]  ;;  %v2253_v1 = vld [vmem:[#allocation14 + $0x1098] sm:$0xff] }
 0x279   :  { %6078 = vmatpush1.bf16.msra.mxu0 %v6077_v30  ;;  %5856 = vmatprep.subr.bf16.mxu1 %v5855_v52  ;;  %v5863_v30 = vpack.c.bf16 %v2617_v47, %v2611_v9  ;;  %v2610_v52 = vld [vmem:[#allocation14 + $0x1bc0] sm:$0xff]  ;;  %v2635_v9 = vld [vmem:[#allocation14 + $0x1c88] sm:$0xff]  ;;  %v2205_v47 = vld [vmem:[#allocation14 + $0xf18] sm:$0xff] }
 0x27a   :  { %6080 = vmatprep.subr.bf16.mxu0 %v6079_v25  ;;  %3646 = vmatprep.mubr.f32.mxu0 %v8198_v32  ;;  %v2186_v25 = vld [vmem:[#allocation14 + $0xe80] sm:$0xff]  ;;  %v5865_v28 = vpack.c.bf16 %v2616_v55, %v2610_v52  ;;  %v2204_v55 = vld [vmem:[#allocation14 + $0xf10] sm:$0xff]  ;;  %v2695_v5 = vld [vmem:[#allocation14 + $0x1e68] sm:$0xff] }
 0x27b   :  { %v7171_v32 = vld [vmem:[#allocation2 + $0x40] sm:$0xff] }
 0x27c   :  { %5858 = vmatpush1.bf16.msra.mxu1 %v5857_v34  ;;  %v6089_v34 = vpack.c.bf16 %v2186_v25, %v2180_v36  ;;  %v6095_v36 = vpack.c.bf16 %v2211_v56, %v2205_v47  ;;  %v2210_v25 = vld [vmem:[#allocation14 + $0xf40] sm:$0xff]  ;;  %v2235_v47 = vld [vmem:[#allocation14 + $0x1008] sm:$0xff]  ;;  %v8422_v56 = vrot.slane %v8304_v35, %v7807_v42 }
 0x27d   :  { %6082 = vmatpush1.bf16.msra.mxu0 %v6081_v0  ;;  %5860 = vmatprep.subr.bf16.mxu1 %v5859_v40  ;;  %v2622_v0 = vld [vmem:[#allocation14 + $0x1c20] sm:$0xff]  ;;  %v2628_v40 = vld [vmem:[#allocation14 + $0x1c50] sm:$0xff] }
 0x27e   :  { %6084 = vmatprep.subr.bf16.mxu0 %v6083_v41  ;;  %v2641_v41 = vld [vmem:[#allocation14 + $0x1cb8] sm:$0xff]  ;;  %v5869_v29 = vpack.c.bf16 %v2628_v40, %v2622_v0  ;;  %v2216_v40 = vld [vmem:[#allocation14 + $0xf70] sm:$0xff]  ;;  %v1522_v35 = vmul.f32 %v7171_v32, %v8422_v56  ;;  %v2683_v32 = vld [vmem:[#allocation14 + $0x1e08] sm:$0xff] }
 0x27f   :  { %v5871_v52 = vpack.c.bf16 %v2641_v41, %v2635_v9  ;;  %v2659_v9 = vld [vmem:[#allocation14 + $0x1d48] sm:$0xff]  ;;  %v2229_v41 = vld [vmem:[#allocation14 + $0xfd8] sm:$0xff] }
 0x280   :  { %5862 = vmatpush1.bf16.msra.mxu1 %v5861_v8  ;;  %v6093_v8 = vpack.c.bf16 %v2198_v33, %v2192_v37  ;;  %v6099_v37 = vpack.c.bf16 %v2223_v27, %v2217_v16  ;;  %v2222_v33 = vld [vmem:[#allocation14 + $0xfa0] sm:$0xff]  ;;  %v2241_v16 = vld [vmem:[#allocation14 + $0x1038] sm:$0xff]  ;;  %v2247_v27 = vld [vmem:[#allocation14 + $0x1068] sm:$0xff] }
 0x281   :  { %6086 = vmatpush1.bf16.msra.mxu0 %v6085_v49  ;;  %5864 = vmatprep.subr.bf16.mxu1 %v5863_v30  ;;  %v2634_v49 = vld [vmem:[#allocation14 + $0x1c80] sm:$0xff]  ;;  %v2640_v30 = vld [vmem:[#allocation14 + $0x1cb0] sm:$0xff] }
 0x282   :  { %6088 = vmatprep.subr.bf16.mxu0 %v6087_v10  ;;  %v2653_v10 = vld [vmem:[#allocation14 + $0x1d18] sm:$0xff]  ;;  %v5873_v44 = vpack.c.bf16 %v2640_v30, %v2634_v49  ;;  %v2658_v49 = vld [vmem:[#allocation14 + $0x1d40] sm:$0xff]  ;;  %v2664_v30 = vld [vmem:[#allocation14 + $0x1d70] sm:$0xff] }
 0x283   :  { %v5875_v0 = vpack.c.bf16 %v2653_v10, %v2647_v51  ;;  %v2671_v51 = vld [vmem:[#allocation14 + $0x1da8] sm:$0xff]  ;;  %v2677_v10 = vld [vmem:[#allocation14 + $0x1dd8] sm:$0xff] }
 0x284   :  { %5866 = vmatpush1.bf16.msra.mxu1 %v5865_v28  ;;  %v6097_v28 = vpack.c.bf16 %v2210_v25, %v2204_v55  ;;  %v2228_v55 = vld [vmem:[#allocation14 + $0xfd0] sm:$0xff]  ;;  %v2234_v25 = vld [vmem:[#allocation14 + $0x1000] sm:$0xff] }
 0x285   :  { %6090 = vmatpush1.bf16.msra.mxu0 %v6089_v34  ;;  %5868 = vmatprep.subr.bf16.mxu1 %v5867_v7  ;;  %v2646_v34 = vld [vmem:[#allocation14 + $0x1ce0] sm:$0xff]  ;;  %v2652_v7 = vld [vmem:[#allocation14 + $0x1d10] sm:$0xff] }
 0x286   :  { %6092 = vmatprep.subr.bf16.mxu0 %v6091_v18  ;;  %v2665_v18 = vld [vmem:[#allocation14 + $0x1d78] sm:$0xff] }
 0x288   :  { %5870 = vmatpush1.bf16.msra.mxu1 %v5869_v29  ;;  %v5877_v29 = vpack.c.bf16 %v2652_v7, %v2646_v34  ;;  %v6105_v7 = vpack.c.bf16 %v2234_v25, %v2228_v55  ;;  %v7174_v55 = vld [vmem:[#allocation2 + $0x108] sm:$0xff] }
 0x289   :  { %6094 = vmatpush1.bf16.msra.mxu0 %v6093_v8  ;;  %5872 = vmatprep.subr.bf16.mxu1 %v5871_v52  ;;  %v6101_v8 = vpack.c.bf16 %v2222_v33, %v2216_v40  ;;  %v5879_v52 = vpack.c.bf16 %v2665_v18, %v2659_v9  ;;  %v5883_v40 = vpack.c.bf16 %v2677_v10, %v2671_v51  ;;  %v2676_v33 = vld [vmem:[#allocation14 + $0x1dd0] sm:$0xff]  ;;  %v2682_v10 = vld [vmem:[#allocation14 + $0x1e00] sm:$0xff] }
 0x28a   :  { %6096 = vmatprep.subr.bf16.mxu0 %v6095_v36  ;;  %v6103_v36 = vpack.c.bf16 %v2235_v47, %v2229_v41  ;;  %v2240_v9 = vld [vmem:[#allocation14 + $0x1030] sm:$0xff]  ;;  %v6107_v18 = vpack.c.bf16 %v2247_v27, %v2241_v16  ;;  %v2246_v41 = vld [vmem:[#allocation14 + $0x1060] sm:$0xff]  ;;  %v2689_v47 = vld [vmem:[#allocation14 + $0x1e38] sm:$0xff]  ;;  %v1547_v25 = vmul.f32 %v7174_v55, %v8380_v50 }
 0x28b   :  { %v5887_v51 = vpack.c.bf16 %v2689_v47, %v2683_v32  ;;  %v2688_v16 = vld [vmem:[#allocation14 + $0x1e30] sm:$0xff]  ;;  %v5891_v47 = vpack.c.bf16 %v2701_v23, %v2695_v5 }
 0x28c   :  { %5874 = vmatpush1.bf16.msra.mxu1 %v5873_v44  ;;  %v8427_v44 = vrot.slane %v8312_v22, %v7807_v42  ;;  %v2259_v22 = vld [vmem:[#allocation14 + $0x10c8] sm:$0xff]  ;;  %v2252_v27 = vld [vmem:[#allocation14 + $0x1090] sm:$0xff] }
 0x28d   :  { %6098 = vmatpush1.bf16.msra.mxu0 %v6097_v28  ;;  %5876 = vmatprep.subr.bf16.mxu1 %v5875_v0  ;;  %v5881_v28 = vpack.c.bf16 %v2664_v30, %v2658_v49  ;;  %v7172_v0 = vld [vmem:[#allocation2 + $0xa8] sm:$0xff]  ;;  %v7173_v49 = vld [vmem:[#allocation2 + $0xa0] sm:$0xff] }
 0x28e   :  { %6100 = vmatprep.subr.bf16.mxu0 %v6099_v37  ;;  %v1535_v34 = vmul.f32 %v7172_v0, %v8380_v50  ;;  %v2670_v37 = vld [vmem:[#allocation14 + $0x1da0] sm:$0xff]  ;;  %v1534_v30 = vmul.f32 %v7173_v49, %v8422_v56  ;;  %v6111_v0 = vpack.c.bf16 %v2259_v22, %v2253_v1  ;;  %v2264_v55 = vld [vmem:[#allocation14 + $0x10f0] sm:$0xff] }
 0x28f   :  { %v2694_v22 = vld [vmem:[#allocation14 + $0x1e60] sm:$0xff] }
 0x290   :  { %5878 = vmatpush1.bf16.msra.mxu1 %v5877_v29  ;;  %v1634_v29 = vadd.f32 %v8427_v44, %v1522_v35  ;;  %v2258_v35 = vld [vmem:[#allocation14 + $0x10c0] sm:$0xff] }
 0x291   :  { %6102 = vmatpush1.bf16.msra.mxu0 %v6101_v8  ;;  %5880 = vmatprep.subr.bf16.mxu1 %v5879_v52  ;;  %v5885_v8 = vpack.c.bf16 %v2676_v33, %v2670_v37  ;;  %v1647_v52 = vadd.f32 %v8394_v38, %v1535_v34  ;;  %v2271_v37 = vld [vmem:[#allocation14 + $0x1128] sm:$0xff]  ;;  %v1646_v34 = vadd.f32 %v8427_v44, %v1534_v30 }
 0x292   :  { %6104 = vmatprep.subr.bf16.mxu0 %v6103_v36  ;;  %v6109_v36 = vpack.c.bf16 %v2246_v41, %v2240_v9  ;;  %v8434_v49 = vmax.f32 %v1634_v29, 0.0  ;;  %v7175_v33 = vld [vmem:[#allocation2 + $0x100] sm:$0xff]  ;;  %v1659_v41 = vadd.f32 %v8394_v38, %v1547_v25  ;;  %v6113_v32 = vpack.c.bf16 %v2258_v35, %v2252_v27  ;;  %v2706_v35 = vld [vmem:[#allocation14 + $0x1ec0] sm:$0xff] }
 0x293   :  { %v8438_v9 = vmax.f32 %v1647_v52, 0.0  ;;  %v2700_v29 = vld [vmem:[#allocation14 + $0x1e90] sm:$0xff]  ;;  %v2277_v52 = vld [vmem:[#allocation14 + $0x1158] sm:$0xff]  ;;  %v8443_v25 = vmax.f32 %v1646_v34, 0.0  ;;  %v6117_v27 = vpack.c.bf16 %v2270_v4, %v2264_v55 }
 0x294   :  { %5882 = vmatpush1.bf16.msra.mxu1 %v5881_v28  ;;  %v2265_v28 = vld [vmem:[#allocation14 + $0x10f8] sm:$0xff]  ;;  %v5893_v23 = vpack.c.bf16 %v2700_v29, %v2694_v22  ;;  %v8448_v5 = vmax.f32 %v1659_v41, 0.0  ;;  %v2295_v22 = vld [vmem:[#allocation14 + $0x11e8] sm:$0xff]  ;;  %v2718_v29 = vld [vmem:[#allocation14 + $0x1f20] sm:$0xff] }
 0x295   :  { %6106 = vmatpush1.bf16.msra.mxu0 %v6105_v7  ;;  %5884 = vmatprep.subr.bf16.mxu1 %v5883_v40  ;;  %v1546_v7 = vmul.f32 %v7175_v33, %v8422_v56  ;;  %v5889_v40 = vpack.c.bf16 %v2688_v16, %v2682_v10  ;;  %v6115_v30 = vpack.c.bf16 %v2271_v37, %v2265_v28  ;;  %v2707_v33 = vld [vmem:[#allocation14 + $0x1ec8] sm:$0xff]  ;;  %v2712_v28 = vld [vmem:[#allocation14 + $0x1ef0] sm:$0xff] }
 0x296   :  { %6108 = vmatprep.subr.bf16.mxu0 %v6107_v18  ;;  %v7176_v18 = vld [vmem:[#allocation2 + $0x168] sm:$0xff]  ;;  %v2283_v10 = vld [vmem:[#allocation14 + $0x1188] sm:$0xff] }
 0x297   :  { %v1559_v1 = vmul.f32 %v7176_v18, %v8380_v50  ;;  %v1658_v50 = vadd.f32 %v8427_v44, %v1546_v7  ;;  %v2276_v37 = vld [vmem:[#allocation14 + $0x1150] sm:$0xff]  ;;  %v6119_v34 = vpack.c.bf16 %v2283_v10, %v2277_v52  ;;  %v2282_v7 = vld [vmem:[#allocation14 + $0x1180] sm:$0xff]  ;;  %v2719_v18 = vld [vmem:[#allocation14 + $0x1f28] sm:$0xff] }
 0x298   :  { %5886 = vmatpush1.bf16.msra.mxu1 %v5885_v8  ;;  %v2713_v8 = vld [vmem:[#allocation14 + $0x1ef8] sm:$0xff]  ;;  %v2724_v55 = vld [vmem:[#allocation14 + $0x1f50] sm:$0xff]  ;;  %v2731_v52 = vld [vmem:[#allocation14 + $0x1f88] sm:$0xff] }
 0x299   :  { %6110 = vmatpush1.bf16.msra.mxu0 %v6109_v36  ;;  %5888 = vmatprep.subr.bf16.mxu1 %v5887_v51  ;;  %v7177_v36 = vld [vmem:[#allocation2 + $0x160] sm:$0xff]  ;;  %v1671_v16 = vadd.f32 %v8394_v38, %v1559_v1  ;;  %v8452_v41 = vmax.f32 %v1658_v50, 0.0  ;;  %v5897_v1 = vpack.c.bf16 %v2712_v28, %v2706_v35  ;;  %v2737_v10 = vld [vmem:[#allocation14 + $0x1fb8] sm:$0xff] }
 0x29a   :  { %6112 = vmatprep.subr.bf16.mxu0 %v6111_v0  ;;  %v1558_v51 = vmul.f32 %v7177_v36, %v8422_v56  ;;  %v5895_v0 = vpack.c.bf16 %v2713_v8, %v2707_v33  ;;  %v2725_v56 = vld [vmem:[#allocation14 + $0x1f58] sm:$0xff]  ;;  %v2294_v8 = vld [vmem:[#allocation14 + $0x11e0] sm:$0xff]  ;;  %v2736_v35 = vld [vmem:[#allocation14 + $0x1fb0] sm:$0xff] }
 0x29b   :  { %3291 = vmatmul.mubr.f32.vlgmr.msra.gmra.mrb[16].mxu1 %v8434_v49  ;;  %v8456_v4 = vmax.f32 %v1671_v16, 0.0  ;;  %v2301_v50 = vld [vmem:[#allocation14 + $0x1218] sm:$0xff]  ;;  %v2300_v28 = vld [vmem:[#allocation14 + $0x1210] sm:$0xff] }
 0x29c   :  { %5890 = vmatpush1.bf16.msra.mxu1 %v5889_v40  ;;  %3296 = vmatprep.mubr.f32.mxu1 %v8438_v9  ;;  %v2289_v40 = vld [vmem:[#allocation14 + $0x11b8] sm:$0xff]  ;;  %v1670_v38 = vadd.f32 %v8427_v44, %v1558_v51  ;;  %v2307_v44 = vld [vmem:[#allocation14 + $0x1248] sm:$0xff]  ;;  %v5901_v51 = vpack.c.bf16 %v2724_v55, %v2718_v29  ;;  %v2318_v55 = vld [vmem:[#allocation14 + $0x12a0] sm:$0xff] }
 0x29d   :  { %6114 = vmatpush1.bf16.msra.mxu0 %v6113_v32  ;;  %5892 = vmatprep.subr.bf16.mxu1 %v5891_v47  ;;  %v6121_v32 = vpack.c.bf16 %v2282_v7, %v2276_v37  ;;  %v5899_v47 = vpack.c.bf16 %v2725_v56, %v2719_v18  ;;  %v6123_v33 = vpack.c.bf16 %v2295_v22, %v2289_v40  ;;  %v2743_v7 = vld [vmem:[#allocation14 + $0x1fe8] sm:$0xff]  ;;  %v2749_v18 = vld [vmem:[#allocation14 + $0x2018] sm:$0xff] }
 0x29e   :  { %6116 = vmatprep.subr.bf16.mxu0 %v6115_v30  ;;  %v2288_v30 = vld [vmem:[#allocation14 + $0x11b0] sm:$0xff]  ;;  %v8459_v36 = vmax.f32 %v1670_v38, 0.0  ;;  %v6127_v37 = vpack.c.bf16 %v2307_v44, %v2301_v50  ;;  %v2313_v56 = vld [vmem:[#allocation14 + $0x1278] sm:$0xff]  ;;  %v2319_v40 = vld [vmem:[#allocation14 + $0x12a8] sm:$0xff]  ;;  %v5907_v38 = vpack.c.bf16 %v2749_v18, %v2743_v7 }
 0x29f   :  { %3297 = vmatmul.mubr.f32.gmra.mrb[18].mxu1 %v8443_v25  ;;  %v6125_v16 = vpack.c.bf16 %v2294_v8, %v2288_v30  ;;  %v6131_v29 = vpack.c.bf16 %v2319_v40, %v2313_v56  ;;  %v2755_v30 = vld [vmem:[#allocation14 + $0x2048] sm:$0xff]  ;;  %v2325_v8 = vld [vmem:[#allocation14 + $0x12d8] sm:$0xff] }
 0x2a0   :  { %5894 = vmatpush1.bf16.msra.mxu1 %v5893_v23  ;;  %3302 = vmatprep.mubr.f32.mxu1 %v8448_v5  ;;  %v8463_v23 = vmax.f32 %v8329_v45, 0.0  ;;  %v2343_v7 = vld [vmem:[#allocation14 + $0x1368] sm:$0xff] }
 0x2a1   :  { %6118 = vmatpush1.bf16.msra.mxu0 %v6117_v27  ;;  %5896 = vmatprep.subr.bf16.mxu1 %v5895_v0  ;;  %v5903_v27 = vpack.c.bf16 %v2737_v10, %v2731_v52  ;;  %v2730_v0 = vld [vmem:[#allocation14 + $0x1f80] sm:$0xff]  ;;  %v2331_v52 = vld [vmem:[#allocation14 + $0x1308] sm:$0xff] }
 0x2a2   :  { %6120 = vmatprep.subr.bf16.mxu0 %v6119_v34  ;;  %v2306_v34 = vld [vmem:[#allocation14 + $0x1240] sm:$0xff]  ;;  %v5905_v22 = vpack.c.bf16 %v2736_v35, %v2730_v0  ;;  %v6135_v0 = vpack.c.bf16 %v2331_v52, %v2325_v8 }
 0x2a3   :  { %3303 = vmatmul.mubr.f32.gmra.mrb[20].mxu1 %v8452_v41  ;;  %v6129_v45 = vpack.c.bf16 %v2306_v34, %v2300_v28  ;;  %v2330_v35 = vld [vmem:[#allocation14 + $0x1300] sm:$0xff]  ;;  %v2767_v28 = vld [vmem:[#allocation14 + $0x20a8] sm:$0xff]  ;;  %v2337_v34 = vld [vmem:[#allocation14 + $0x1338] sm:$0xff] }
 0x2a4   :  { %5898 = vmatpush1.bf16.msra.mxu1 %v5897_v1  ;;  %3308 = vmatprep.mubr.f32.mxu1 %v8456_v4  ;;  %v2742_v1 = vld [vmem:[#allocation14 + $0x1fe0] sm:$0xff] }
 0x2a5   :  { %6122 = vmatpush1.bf16.msra.mxu0 %v6121_v32  ;;  %5900 = vmatprep.subr.bf16.mxu1 %v5899_v47  ;;  %v2748_v32 = vld [vmem:[#allocation14 + $0x2010] sm:$0xff] }
 0x2a6   :  { %6124 = vmatprep.subr.bf16.mxu0 %v6123_v33  ;;  %v2312_v47 = vld [vmem:[#allocation14 + $0x1270] sm:$0xff]  ;;  %v2761_v33 = vld [vmem:[#allocation14 + $0x2078] sm:$0xff]  ;;  %v5909_v10 = vpack.c.bf16 %v2748_v32, %v2742_v1  ;;  %v6139_v1 = vpack.c.bf16 %v2343_v7, %v2337_v34  ;;  %v2342_v32 = vld [vmem:[#allocation14 + $0x1360] sm:$0xff] }
 0x2a7   :  { %3309 = vmatmul.mubr.f32.gmra.mrb[22].mxu1 %v8459_v36  ;;  %v6133_v50 = vpack.c.bf16 %v2318_v55, %v2312_v47  ;;  %v5911_v44 = vpack.c.bf16 %v2761_v33, %v2755_v30  ;;  %v2779_v47 = vld [vmem:[#allocation14 + $0x2108] sm:$0xff]  ;;  %v2349_v55 = vld [vmem:[#allocation14 + $0x1398] sm:$0xff] }
 0x2a8   :  { %5902 = vmatpush1.bf16.msra.mxu1 %v5901_v51  ;;  %5175 = vmatprep.mubr.msk.f32.mxu1 %vm903_vm0, %v8463_v23  ;;  %v2754_v51 = vld [vmem:[#allocation14 + $0x2040] sm:$0xff]  ;;  %v2355_v30 = vld [vmem:[#allocation14 + $0x13c8] sm:$0xff] }
 0x2a9   :  { %6126 = vmatpush1.bf16.msra.mxu0 %v6125_v16  ;;  %5904 = vmatprep.subr.bf16.mxu1 %v5903_v27  ;;  %v2760_v16 = vld [vmem:[#allocation14 + $0x2070] sm:$0xff] }
 0x2aa   :  { %6128 = vmatprep.subr.bf16.mxu0 %v6127_v37  ;;  %v2324_v27 = vld [vmem:[#allocation14 + $0x12d0] sm:$0xff]  ;;  %v2773_v37 = vld [vmem:[#allocation14 + $0x20d8] sm:$0xff]  ;;  %v5913_v18 = vpack.c.bf16 %v2760_v16, %v2754_v51  ;;  %v6143_v51 = vpack.c.bf16 %v2355_v30, %v2349_v55  ;;  %v2354_v16 = vld [vmem:[#allocation14 + $0x13c0] sm:$0xff] }
 0x2ab   :  { %v6137_v56 = vpack.c.bf16 %v2330_v35, %v2324_v27  ;;  %v5915_v40 = vpack.c.bf16 %v2773_v37, %v2767_v28  ;;  %v2791_v27 = vld [vmem:[#allocation14 + $0x2168] sm:$0xff]  ;;  %v891_v35 = vld [vmem:[#allocation10] sm:$0x3]  ;;  %v2361_v28 = vld [vmem:[#allocation14 + $0x13f8] sm:$0xff] }
 0x2ac   :  { %5906 = vmatpush1.bf16.msra.mxu1 %v5905_v22  ;;  %3647 = vmatmul.mubr.f32.vlgmr.msra.gmra.mrb[8].mxu0 %v8240_v53  ;;  %v2766_v22 = vld [vmem:[#allocation14 + $0x20a0] sm:$0xff]  ;;  %v2367_v37 = vld [vmem:[#allocation14 + $0x1428] sm:$0xff]  ;;  %v2373_v55 = vld [vmem:[#allocation14 + $0x1458] sm:$0xff] }
 0x2ad   :  { %6130 = vmatpush1.bf16.msra.mxu0 %v6129_v45  ;;  %5908 = vmatprep.subr.bf16.mxu1 %v5907_v38  ;;  %v2772_v45 = vld [vmem:[#allocation14 + $0x20d0] sm:$0xff]  ;;  %v2379_v30 = vld [vmem:[#allocation14 + $0x1488] sm:$0xff] }
 0x2ae   :  { %6132 = vmatprep.subr.bf16.mxu0 %v6131_v29  ;;  %3652 = vmatprep.mubr.f32.mxu0 %v8244_v61  ;;  %v2336_v38 = vld [vmem:[#allocation14 + $0x1330] sm:$0xff]  ;;  %v2785_v29 = vld [vmem:[#allocation14 + $0x2138] sm:$0xff]  ;;  %v5917_v33 = vpack.c.bf16 %v2772_v45, %v2766_v22  ;;  %v8476_v45 = vrot.slane %v891_v35, %v7807_v42 }
 0x2af   :  { %v6141_v8 = vpack.c.bf16 %v2342_v32, %v2336_v38  ;;  %v5919_v52 = vpack.c.bf16 %v2785_v29, %v2779_v47  ;;  %v2360_v22 = vld [vmem:[#allocation14 + $0x13f0] sm:$0xff]  ;;  %v6147_v38 = vpack.c.bf16 %v2367_v37, %v2361_v28  ;;  %v2803_v32 = vld [vmem:[#allocation14 + $0x21c8] sm:$0xff]  ;;  %v2809_v47 = vld [vmem:[#allocation14 + $0x21f8] sm:$0xff]  ;;  %v8480_v29 = vrot.slane %v891_v35, %v7781_v11 }
 0x2b0   :  { %5910 = vmatpush1.bf16.msra.mxu1 %v5909_v10  ;;  %3653 = vmatmul.mubr.f32.gmra.mrb[10].mxu0 %v8253_v31  ;;  %v2778_v10 = vld [vmem:[#allocation14 + $0x2100] sm:$0xff]  ;;  %v2821_v35 = vld [vmem:[#allocation14 + $0x2258] sm:$0xff] }
 0x2b1   :  { %6134 = vmatpush1.bf16.msra.mxu0 %v6133_v50  ;;  %5912 = vmatprep.subr.bf16.mxu1 %v5911_v44  ;;  %v2784_v50 = vld [vmem:[#allocation14 + $0x2130] sm:$0xff]  ;;  %v985_v28 = vadd.f32 %v8212_v62, %v8480_v29 }
 0x2b2   :  { %6136 = vmatprep.subr.bf16.mxu0 %v6135_v0  ;;  %3658 = vmatprep.mubr.f32.mxu0 %v8258_v59  ;;  %v2348_v44 = vld [vmem:[#allocation14 + $0x1390] sm:$0xff]  ;;  %v2797_v0 = vld [vmem:[#allocation14 + $0x2198] sm:$0xff]  ;;  %v5921_v34 = vpack.c.bf16 %v2784_v50, %v2778_v10  ;;  %v2802_v10 = vld [vmem:[#allocation14 + $0x21c0] sm:$0xff] }
 0x2b3   :  { %v6145_v7 = vpack.c.bf16 %v2354_v16, %v2348_v44  ;;  %v2808_v50 = vld [vmem:[#allocation14 + $0x21f0] sm:$0xff]  ;;  %v6151_v16 = vpack.c.bf16 %v2379_v30, %v2373_v55  ;;  %v989_v55 = vadd.f32 %v8214_v15, %v8476_v45 }
 0x2b4   :  { %5914 = vmatpush1.bf16.msra.mxu1 %v5913_v18  ;;  %3659 = vmatmul.mubr.f32.gmra.mrb[12].mxu0 %v8267_v24  ;;  %v5923_v18 = vpack.c.bf16 %v2797_v0, %v2791_v27  ;;  %v2372_v44 = vld [vmem:[#allocation14 + $0x1450] sm:$0xff]  ;;  %v2378_v27 = vld [vmem:[#allocation14 + $0x1480] sm:$0xff]  ;;  %v2815_v0 = vld [vmem:[#allocation14 + $0x2228] sm:$0xff] }
 0x2b5   :  { %6138 = vmatpush1.bf16.msra.mxu0 %v6137_v56  ;;  %5916 = vmatprep.subr.bf16.mxu1 %v5915_v40  ;;  %v2790_v56 = vld [vmem:[#allocation14 + $0x2160] sm:$0xff]  ;;  %v2796_v40 = vld [vmem:[#allocation14 + $0x2190] sm:$0xff] }
 0x2b6   :  { %6140 = vmatprep.subr.bf16.mxu0 %v6139_v1  ;;  %3664 = vmatprep.mubr.f32.mxu0 %v8271_v6  ;;  %v2366_v1 = vld [vmem:[#allocation14 + $0x1420] sm:$0xff] }
 0x2b8   :  { %5918 = vmatpush1.bf16.msra.mxu1 %v5917_v33  ;;  %3665 = vmatmul.mubr.f32.gmra.mrb[14].mxu0 %v8275_v43  ;;  %v5925_v33 = vpack.c.bf16 %v2796_v40, %v2790_v56  ;;  %v5929_v40 = vpack.c.bf16 %v2808_v50, %v2802_v10  ;;  %v2397_v50 = vld [vmem:[#allocation14 + $0x1518] sm:$0xff] }
 0x2b9   :  { %6142 = vmatpush1.bf16.msra.mxu0 %v6141_v8  ;;  %5920 = vmatprep.subr.bf16.mxu1 %v5919_v52  ;;  %v6149_v8 = vpack.c.bf16 %v2366_v1, %v2360_v22  ;;  %v5927_v52 = vpack.c.bf16 %v2809_v47, %v2803_v32  ;;  %v6153_v1 = vpack.c.bf16 %v2378_v27, %v2372_v44  ;;  %v2820_v32 = vld [vmem:[#allocation14 + $0x2250] sm:$0xff]  ;;  %v2403_v44 = vld [vmem:[#allocation14 + $0x1548] sm:$0xff] }
 0x2ba   :  { %6144 = vmatprep.subr.bf16.mxu0 %v6143_v51  ;;  %3735 = vmatprep.mubr.f32.mxu0 %v8278_v14  ;;  %v983_v51 = vadd.f32 %v8210_v58, %v8476_v45  ;;  %v5931_v58 = vpack.c.bf16 %v2821_v35, %v2815_v0  ;;  %v2384_v47 = vld [vmem:[#allocation14 + $0x14b0] sm:$0xff] }
 0x2bc   :  { %5922 = vmatpush1.bf16.msra.mxu1 %v5921_v34  ;;  %v2385_v34 = vld [vmem:[#allocation14 + $0x14b8] sm:$0xff] }
 0x2bd   :  { %6146 = vmatpush1.bf16.msra.mxu0 %v6145_v7  ;;  %5924 = vmatprep.subr.bf16.mxu1 %v5923_v18  ;;  %v2391_v7 = vld [vmem:[#allocation14 + $0x14e8] sm:$0xff] }
 0x2be   :  { %6148 = vmatprep.subr.bf16.mxu0 %v6147_v38  ;;  %v2814_v38 = vld [vmem:[#allocation14 + $0x2220] sm:$0xff]  ;;  %v6155_v30 = vpack.c.bf16 %v2391_v7, %v2385_v34  ;;  %v1732_v7 = vld [vmem:[#allocation14 + $0x50] sm:$0xff] }
 0x2bf   :  { %v1338_v37 = vpop.f32.mrb[0].mxu0  ;;  %v5933_v15 = vpack.c.bf16 %v2820_v32, %v2814_v38  ;;  %v1726_v34 = vld [vmem:[#allocation14 + $0x20] sm:$0xff] }
 0x2c0   :  { %v6856_v18 = vadd.f32 %v1338_v37, %v983_v51  ;;  %v1340_v56 = vpop.f32.mrb[1].mxu0  ;;  %5926 = vmatpush1.bf16.msra.mxu1 %v5925_v33  ;;  %v2390_v51 = vld [vmem:[#allocation14 + $0x14e0] sm:$0xff]  ;;  %v1727_v37 = vld [vmem:[#allocation14 + $0x28] sm:$0xff]  ;;  %v1733_v33 = vld [vmem:[#allocation14 + $0x58] sm:$0xff] }
 0x2c1   :  { %v6859_v22 = vadd.f32 %v1340_v56, %v985_v28  ;;  %6150 = vmatpush1.bf16.msra.mxu0 %v6149_v8  ;;  %5928 = vmatprep.subr.bf16.mxu1 %v5927_v52  ;;  %v991_v8 = vadd.f32 %v8216_v26, %v8480_v29  ;;  %v6303_v35 = vpack.c.bf16 %v1733_v33, %v1727_v37  ;;  %v2396_v28 = vld [vmem:[#allocation14 + $0x1510] sm:$0xff]  ;;  %v8841_v38 = vld [vmem:[#allocation50_spill] sm:$0xff]  ;;  %v2409_v33 = vld [vmem:[#allocation14 + $0x1578] sm:$0xff] }
 0x2c2   :  { %v8489_v62 = vadd.f32 %v6856_v18, %v8283_v2  ;;  %6152 = vmatprep.subr.bf16.mxu0 %v6151_v16  ;;  %v6157_v16 = vpack.c.bf16 %v2390_v51, %v2384_v47  ;;  %v995_v26 = vadd.f32 %v8222_v19, %v8476_v45  ;;  %v6159_v56 = vpack.c.bf16 %v2403_v44, %v2397_v50  ;;  %v8844_v51 = vld [vmem:[#allocation59_spill] sm:$0xff]  ;;  %v8845_v50 = vld [vmem:[#allocation60_spill] sm:$0xff] }
 0x2c3   :  { %v8494_v52 = vadd.f32 %v6859_v22, %v8286_v46  ;;  %v1344_v10 = vpop.f32.mrb[2].mxu0  ;;  %v8839_v46 = vld [vmem:[#allocation53_spill] sm:$0xff]  ;;  %v8507_v37 = vmax.f32 %v8844_v51, 0.0  ;;  %v2415_v19 = vld [vmem:[#allocation14 + $0x15a8] sm:$0xff]  ;;  %v8510_v44 = vmax.f32 %v8845_v50, 0.0 }
 0x2c4   :  { %v6862_v27 = vadd.f32 %v1344_v10, %v989_v55  ;;  %v1346_v0 = vpop.f32.mrb[3].mxu0  ;;  %5930 = vmatpush1.bf16.msra.mxu1 %v5929_v40  ;;  %v2402_v22 = vld [vmem:[#allocation14 + $0x1540] sm:$0xff]  ;;  %v1739_v55 = vld [vmem:[#allocation14 + $0x88] sm:$0xff]  ;;  %v1745_v40 = vld [vmem:[#allocation14 + $0xb8] sm:$0xff] }
 0x2c5   :  { %8838 = vst [vmem:[#allocation65_spill] sm:$0xff] %v8494_v52  ;;  %v6865_v2 = vadd.f32 %v1346_v0, %v991_v8  ;;  %6154 = vmatpush1.bf16.msra.mxu0 %v6153_v1  ;;  %5932 = vmatprep.subr.bf16.mxu1 %v5931_v58  ;;  %v997_v1 = vadd.f32 %v8841_v38, %v8480_v29  ;;  %v8842_v58 = vld [vmem:[#allocation54_spill] sm:$0xff]  ;;  %v8846_v51 = vld [vmem:[#allocation51_spill] sm:$0xff] }
 0x2c6   :  { %v8499_v18 = vadd.f32 %v6862_v27, %v8839_v46  ;;  %6156 = vmatprep.subr.bf16.mxu0 %v6155_v30  ;;  %v6305_v30 = vpack.c.bf16 %v1732_v7, %v1726_v34  ;;  %v6161_v0 = vpack.c.bf16 %v2402_v22, %v2396_v28  ;;  %v6307_v46 = vpack.c.bf16 %v1745_v40, %v1739_v55  ;;  %v1738_v38 = vld [vmem:[#allocation14 + $0x80] sm:$0xff]  ;;  %v1751_v7 = vld [vmem:[#allocation14 + $0xe8] sm:$0xff] }
 0x2c7   :  { %v8504_v32 = vadd.f32 %v6865_v2, %v8842_v58  ;;  %v1350_v47 = vpop.f32.mrb[4].mxu0  ;;  %v2408_v2 = vld [vmem:[#allocation14 + $0x1570] sm:$0xff]  ;;  %v2414_v34 = vld [vmem:[#allocation14 + $0x15a0] sm:$0xff] }
 0x2c8   :  { %8840 = vst [vmem:[#allocation53_spill] sm:$0xff] %v8499_v18  ;;  %v6868_v8 = vadd.f32 %v1350_v47, %v995_v26  ;;  %v1352_v10 = vpop.f32.mrb[5].mxu0  ;;  %5934 = vmatpush1.bf16.msra.mxu1 %v5933_v15  ;;  %v1744_v58 = vld [vmem:[#allocation14 + $0xb0] sm:$0xff]  ;;  %v6163_v15 = vpack.c.bf16 %v2415_v19, %v2409_v33  ;;  %v1757_v26 = vld [vmem:[#allocation14 + $0x118] sm:$0xff]  ;;  %v8853_v19 = vld [vmem:[#allocation62_spill] sm:$0xff] }
 0x2c9   :  { %8843 = vst [vmem:[#allocation50_spill] sm:$0xff] %v8504_v32  ;;  %v6871_v27 = vadd.f32 %v1352_v10, %v997_v1  ;;  %6158 = vmatpush1.bf16.msra.mxu0 %v6157_v16  ;;  %6304 = vmatprep.subr.bf16.mxu1 %v6303_v35  ;;  %v1001_v32 = vadd.f32 %v8846_v51, %v8476_v45  ;;  %v8847_v18 = vld [vmem:[#allocation55_spill] sm:$0xff]  ;;  %v8849_v1 = vld [vmem:[#allocation52_spill] sm:$0xff]  ;;  %v8852_v55 = vld [vmem:[#allocation61_spill] sm:$0xff] }
 0x2ca   :  { %v8515_v52 = vadd.f32 %v6868_v8, %v8847_v18  ;;  %6160 = vmatprep.subr.bf16.mxu0 %v6159_v56  ;;  %v1003_v16 = vadd.f32 %v8849_v1, %v8480_v29  ;;  %v8850_v35 = vld [vmem:[#allocation56_spill] sm:$0xff]  ;;  %v8524_v40 = vmax.f32 %v8852_v55, 0.0  ;;  %v2427_v18 = vld [vmem:[#allocation14 + $0x1608] sm:$0xff]  ;;  %v6309_v33 = vpack.c.bf16 %v1744_v58, %v1738_v38  ;;  %v1750_v51 = vld [vmem:[#allocation14 + $0xe0] sm:$0xff] }
 0x2cb   :  { %v8520_v28 = vadd.f32 %v6871_v27, %v8850_v35  ;;  %v1356_v22 = vpop.f32.mrb[6].mxu0  ;;  %3380 = vmatmul.mubr.f32.vlgmr.msra.gmra.mrb[16].mxu1 %v8507_v37  ;;  %v2421_v45 = vld [vmem:[#allocation14 + $0x15d8] sm:$0xff]  ;;  %v8529_v29 = vmax.f32 %v8853_v19, 0.0  ;;  %v6165_v10 = vpack.c.bf16 %v2414_v34, %v2408_v2  ;;  %v6311_v50 = vpack.c.bf16 %v1757_v26, %v1751_v7  ;;  %v2420_v27 = vld [vmem:[#allocation14 + $0x15d0] sm:$0xff]  ;;  %v8856_v38 = vld [vmem:[#allocation58_spill] sm:$0xff] }
 0x2cc   :  { %8848 = vst [vmem:[#allocation54_spill] sm:$0xff] %v8515_v52  ;;  %v6874_v47 = vadd.f32 %v1356_v22, %v1001_v32  ;;  %v1358_v56 = vpop.f32.mrb[7].mxu0  ;;  %6306 = vmatpush1.bf16.msra.mxu1 %v6305_v30  ;;  %5176 = vmatprep.mubr.msk.f32.mxu1 %vm903_vm0, %v8510_v44  ;;  %v1756_v1 = vld [vmem:[#allocation14 + $0x110] sm:$0xff]  ;;  %v8854_v35 = vld [vmem:[#allocation57_spill] sm:$0xff]  ;;  %v6167_v32 = vpack.c.bf16 %v2427_v18, %v2421_v45  ;;  %v1763_v22 = vld [vmem:[#allocation14 + $0x148] sm:$0xff] }
 0x2cd   :  { %8851 = vst [vmem:[#allocation59_spill] sm:$0xff] %v8520_v28  ;;  %v6877_v8 = vadd.f32 %v1358_v56, %v1003_v16  ;;  %6162 = vmatpush1.bf16.msra.mxu0 %v6161_v0  ;;  %6308 = vmatprep.subr.bf16.mxu1 %v6307_v46  ;;  %v2426_v30 = vld [vmem:[#allocation14 + $0x1600] sm:$0xff]  ;;  %v1769_v28 = vld [vmem:[#allocation14 + $0x178] sm:$0xff]  ;;  %v8858_v0 = vld [vmem:[#allocation63_spill] sm:$0xff]  ;;  %v6313_v7 = vpack.c.bf16 %v1756_v1, %v1750_v51 }
 0x2ce   :  { %v8532_v55 = vadd.f32 %v6874_v47, %v8854_v35  ;;  %6164 = vmatprep.subr.bf16.mxu0 %v6163_v15  ;;  %v8539_v46 = vmax.f32 %v8858_v0, 0.0  ;;  %v2433_v2 = vld [vmem:[#allocation14 + $0x1638] sm:$0xff]  ;;  %v2439_v34 = vld [vmem:[#allocation14 + $0x1668] sm:$0xff]  ;;  %v6169_v16 = vpack.c.bf16 %v2426_v30, %v2420_v27  ;;  %v6315_v45 = vpack.c.bf16 %v1769_v28, %v1763_v22  ;;  %v2432_v18 = vld [vmem:[#allocation14 + $0x1630] sm:$0xff] }
 0x2cf   :  { %v8535_v58 = vadd.f32 %v6877_v8, %v8856_v38  ;;  %3386 = vmatmul.mubr.f32.gmra.mrb[18].mxu1 %v8524_v40  ;;  %v8859_v15 = vld [vmem:[#allocation64_spill] sm:$0xff]  ;;  %v1762_v47 = vld [vmem:[#allocation14 + $0x140] sm:$0xff]  ;;  %v6171_v19 = vpack.c.bf16 %v2439_v34, %v2433_v2  ;;  %v1775_v35 = vld [vmem:[#allocation14 + $0x1a8] sm:$0xff] }
 0x2d0   :  { %8855 = vst [vmem:[#allocation60_spill] sm:$0xff] %v8532_v55  ;;  %6310 = vmatpush1.bf16.msra.mxu1 %v6309_v33  ;;  %5177 = vmatprep.mubr.msk.f32.mxu1 %vm903_vm0, %v8529_v29  ;;  %v8544_v26 = vmax.f32 %v8859_v15, 0.0  ;;  %v1768_v56 = vld [vmem:[#allocation14 + $0x170] sm:$0xff]  ;;  %v2438_v8 = vld [vmem:[#allocation14 + $0x1660] sm:$0xff]  ;;  %v1781_v38 = vld [vmem:[#allocation14 + $0x1d8] sm:$0xff]  ;;  %v8548_v33 = vmax.f32 %v8368_v60, 0.0 }
 0x2d1   :  { %8857 = vst [vmem:[#allocation51_spill] sm:$0xff] %v8535_v58  ;;  %6166 = vmatpush1.bf16.msra.mxu0 %v6165_v10  ;;  %6312 = vmatprep.subr.bf16.mxu1 %v6311_v50  ;;  %v2445_v51 = vld [vmem:[#allocation14 + $0x1698] sm:$0xff]  ;;  %v2451_v1 = vld [vmem:[#allocation14 + $0x16c8] sm:$0xff]  ;;  %v6317_v28 = vpack.c.bf16 %v1768_v56, %v1762_v47  ;;  %v6173_v10 = vpack.c.bf16 %v2438_v8, %v2432_v18  ;;  %v2444_v27 = vld [vmem:[#allocation14 + $0x1690] sm:$0xff] }
 0x2d2   :  { %6168 = vmatprep.subr.bf16.mxu0 %v6167_v32  ;;  %v6319_v50 = vpack.c.bf16 %v1781_v38, %v1775_v35  ;;  %v1774_v32 = vld [vmem:[#allocation14 + $0x1a0] sm:$0xff]  ;;  %v1780_v30 = vld [vmem:[#allocation14 + $0x1d0] sm:$0xff]  ;;  %v6175_v22 = vpack.c.bf16 %v2451_v1, %v2445_v51  ;;  %v1787_v2 = vld [vmem:[#allocation14 + $0x208] sm:$0xff] }
 0x2d3   :  { %3392 = vmatmul.mubr.f32.gmra.mrb[20].mxu1 %v8539_v46  ;;  %v2450_v0 = vld [vmem:[#allocation14 + $0x16c0] sm:$0xff]  ;;  %v1793_v60 = vld [vmem:[#allocation14 + $0x238] sm:$0xff]  ;;  %v6321_v15 = vpack.c.bf16 %v1780_v30, %v1774_v32  ;;  %v2456_v18 = vld [vmem:[#allocation14 + $0x16f0] sm:$0xff] }
 0x2d4   :  { %6314 = vmatpush1.bf16.msra.mxu1 %v6313_v7  ;;  %5178 = vmatprep.mubr.msk.f32.mxu1 %vm903_vm0, %v8544_v26  ;;  %v2457_v34 = vld [vmem:[#allocation14 + $0x16f8] sm:$0xff]  ;;  %v2463_v7 = vld [vmem:[#allocation14 + $0x1728] sm:$0xff]  ;;  %v1786_v47 = vld [vmem:[#allocation14 + $0x200] sm:$0xff] }
 0x2d5   :  { %6170 = vmatpush1.bf16.msra.mxu0 %v6169_v16  ;;  %6316 = vmatprep.subr.bf16.mxu1 %v6315_v45  ;;  %v8860_v58 = vld [vmem:[#allocation36_spill] sm:$0xff]  ;;  %v6177_v16 = vpack.c.bf16 %v2450_v0, %v2444_v27  ;;  %v6323_v45 = vpack.c.bf16 %v1793_v60, %v1787_v2  ;;  %v2462_v8 = vld [vmem:[#allocation14 + $0x1720] sm:$0xff]  ;;  %v1799_v35 = vld [vmem:[#allocation14 + $0x268] sm:$0xff] }
 0x2d6   :  { %6172 = vmatprep.subr.bf16.mxu0 %v6171_v19  ;;  %v1792_v56 = vld [vmem:[#allocation14 + $0x230] sm:$0xff]  ;;  %v6179_v19 = vpack.c.bf16 %v2463_v7, %v2457_v34  ;;  %v1805_v38 = vld [vmem:[#allocation14 + $0x298] sm:$0xff]  ;;  %v2475_v1 = vld [vmem:[#allocation14 + $0x1788] sm:$0xff] }
 0x2d7   :  { %3398 = vmatmul.mubr.f32.gmra.mrb[22].mxu1 %v8548_v33  ;;  %v2469_v51 = vld [vmem:[#allocation14 + $0x1758] sm:$0xff]  ;;  %v6325_v55 = vpack.c.bf16 %v1792_v56, %v1786_v47  ;;  %v1804_v27 = vld [vmem:[#allocation14 + $0x290] sm:$0xff]  ;;  %v2474_v30 = vld [vmem:[#allocation14 + $0x1780] sm:$0xff] }
 0x2d8   :  { %6318 = vmatpush1.bf16.msra.mxu1 %v6317_v28  ;;  %4002 = vmatprep.mubr.f32.mxu1 %v8860_v58  ;;  %v6181_v28 = vpack.c.bf16 %v2462_v8, %v2456_v18  ;;  %v6327_v58 = vpack.c.bf16 %v1805_v38, %v1799_v35  ;;  %v6183_v32 = vpack.c.bf16 %v2475_v1, %v2469_v51  ;;  %v1811_v0 = vld [vmem:[#allocation14 + $0x2c8] sm:$0xff]  ;;  %v2481_v2 = vld [vmem:[#allocation14 + $0x17b8] sm:$0xff]  ;;  %v1816_v18 = vld [vmem:[#allocation14 + $0x2f0] sm:$0xff] }
 0x2d9   :  { %6174 = vmatpush1.bf16.msra.mxu0 %v6173_v10  ;;  %6320 = vmatprep.subr.bf16.mxu1 %v6319_v50  ;;  %v2468_v10 = vld [vmem:[#allocation14 + $0x1750] sm:$0xff]  ;;  %v1798_v50 = vld [vmem:[#allocation14 + $0x260] sm:$0xff]  ;;  %v2487_v60 = vld [vmem:[#allocation14 + $0x17e8] sm:$0xff] }
 0x2da   :  { %6176 = vmatprep.subr.bf16.mxu0 %v6175_v22  ;;  %v1817_v22 = vld [vmem:[#allocation14 + $0x2f8] sm:$0xff]  ;;  %v6329_v34 = vpack.c.bf16 %v1804_v27, %v1798_v50  ;;  %v6185_v7 = vpack.c.bf16 %v2474_v30, %v2468_v10  ;;  %v6187_v47 = vpack.c.bf16 %v2487_v60, %v2481_v2  ;;  %v2486_v56 = vld [vmem:[#allocation14 + $0x17e0] sm:$0xff]  ;;  %v1823_v8 = vld [vmem:[#allocation14 + $0x328] sm:$0xff] }
 0x2db   :  { %v2493_v35 = vld [vmem:[#allocation14 + $0x1818] sm:$0xff]  ;;  %v2499_v38 = vld [vmem:[#allocation14 + $0x1848] sm:$0xff]  ;;  %v1828_v10 = vld [vmem:[#allocation14 + $0x350] sm:$0xff] }
 0x2dc   :  { %6322 = vmatpush1.bf16.msra.mxu1 %v6321_v15  ;;  %v6331_v15 = vpack.c.bf16 %v1817_v22, %v1811_v0  ;;  %v6191_v50 = vpack.c.bf16 %v2499_v38, %v2493_v35  ;;  %v2498_v27 = vld [vmem:[#allocation14 + $0x1840] sm:$0xff]  ;;  %v1835_v30 = vld [vmem:[#allocation14 + $0x388] sm:$0xff]  ;;  %v2505_v0 = vld [vmem:[#allocation14 + $0x1878] sm:$0xff] }
 0x2dd   :  { %6178 = vmatpush1.bf16.msra.mxu0 %v6177_v16  ;;  %6324 = vmatprep.subr.bf16.mxu1 %v6323_v45  ;;  %v2480_v16 = vld [vmem:[#allocation14 + $0x17b0] sm:$0xff]  ;;  %v1810_v45 = vld [vmem:[#allocation14 + $0x2c0] sm:$0xff]  ;;  %v2511_v22 = vld [vmem:[#allocation14 + $0x18a8] sm:$0xff] }
 0x2de   :  { %6180 = vmatprep.subr.bf16.mxu0 %v6179_v19  ;;  %v1829_v19 = vld [vmem:[#allocation14 + $0x358] sm:$0xff]  ;;  %v6333_v51 = vpack.c.bf16 %v1816_v18, %v1810_v45  ;;  %v6195_v45 = vpack.c.bf16 %v2511_v22, %v2505_v0  ;;  %v2510_v18 = vld [vmem:[#allocation14 + $0x18a0] sm:$0xff] }
 0x2df   :  { %v6335_v1 = vpack.c.bf16 %v1829_v19, %v1823_v8  ;;  %v2517_v8 = vld [vmem:[#allocation14 + $0x18d8] sm:$0xff]  ;;  %v2523_v19 = vld [vmem:[#allocation14 + $0x1908] sm:$0xff] }
 0x2e0   :  { %6326 = vmatpush1.bf16.msra.mxu1 %v6325_v55  ;;  %v6189_v55 = vpack.c.bf16 %v2486_v56, %v2480_v16  ;;  %v1840_v16 = vld [vmem:[#allocation14 + $0x3b0] sm:$0xff]  ;;  %v1847_v56 = vld [vmem:[#allocation14 + $0x3e8] sm:$0xff]  ;;  %v8865_v52 = vld [vmem:[#allocation41_spill] sm:$0xff] }
 0x2e1   :  { %6182 = vmatpush1.bf16.msra.mxu0 %v6181_v28  ;;  %6328 = vmatprep.subr.bf16.mxu1 %v6327_v58  ;;  %v2492_v28 = vld [vmem:[#allocation14 + $0x1810] sm:$0xff]  ;;  %v1822_v58 = vld [vmem:[#allocation14 + $0x320] sm:$0xff] }
 0x2e2   :  { %6184 = vmatprep.subr.bf16.mxu0 %v6183_v32  ;;  %v1841_v32 = vld [vmem:[#allocation14 + $0x3b8] sm:$0xff]  ;;  %v6337_v2 = vpack.c.bf16 %v1828_v10, %v1822_v58  ;;  %v6193_v60 = vpack.c.bf16 %v2498_v27, %v2492_v28  ;;  %v1852_v28 = vld [vmem:[#allocation14 + $0x410] sm:$0xff]  ;;  %v6199_v58 = vpack.c.bf16 %v2523_v19, %v2517_v8  ;;  %v2522_v10 = vld [vmem:[#allocation14 + $0x1900] sm:$0xff] }
 0x2e3   :  { %v1865_v27 = vld [vmem:[#allocation14 + $0x478] sm:$0xff] }
 0x2e4   :  { %6330 = vmatpush1.bf16.msra.mxu1 %v6329_v34  ;;  %v6339_v34 = vpack.c.bf16 %v1841_v32, %v1835_v30  ;;  %v2529_v30 = vld [vmem:[#allocation14 + $0x1938] sm:$0xff]  ;;  %v2535_v32 = vld [vmem:[#allocation14 + $0x1968] sm:$0xff] }
 0x2e5   :  { %6186 = vmatpush1.bf16.msra.mxu0 %v6185_v7  ;;  %6332 = vmatprep.subr.bf16.mxu1 %v6331_v15  ;;  %v2504_v7 = vld [vmem:[#allocation14 + $0x1870] sm:$0xff]  ;;  %v1834_v15 = vld [vmem:[#allocation14 + $0x380] sm:$0xff] }
 0x2e6   :  { %6188 = vmatprep.subr.bf16.mxu0 %v6187_v47  ;;  %v1853_v47 = vld [vmem:[#allocation14 + $0x418] sm:$0xff]  ;;  %v6341_v35 = vpack.c.bf16 %v1840_v16, %v1834_v15  ;;  %v6197_v38 = vpack.c.bf16 %v2510_v18, %v2504_v7  ;;  %v1864_v7 = vld [vmem:[#allocation14 + $0x470] sm:$0xff]  ;;  %v6203_v15 = vpack.c.bf16 %v2535_v32, %v2529_v30  ;;  %v2534_v16 = vld [vmem:[#allocation14 + $0x1960] sm:$0xff] }
 0x2e7   :  { %v1877_v18 = vld [vmem:[#allocation14 + $0x4d8] sm:$0xff] }
 0x2e8   :  { %6334 = vmatpush1.bf16.msra.mxu1 %v6333_v51  ;;  %v6343_v51 = vpack.c.bf16 %v1853_v47, %v1847_v56  ;;  %v2541_v56 = vld [vmem:[#allocation14 + $0x1998] sm:$0xff]  ;;  %v2547_v47 = vld [vmem:[#allocation14 + $0x19c8] sm:$0xff] }
 0x2e9   :  { %6190 = vmatpush1.bf16.msra.mxu0 %v6189_v55  ;;  %6336 = vmatprep.subr.bf16.mxu1 %v6335_v1  ;;  %v2516_v55 = vld [vmem:[#allocation14 + $0x18d0] sm:$0xff]  ;;  %v1846_v1 = vld [vmem:[#allocation14 + $0x3e0] sm:$0xff] }
 0x2ea   :  { %6192 = vmatprep.subr.bf16.mxu0 %v6191_v50  ;;  %v1859_v50 = vld [vmem:[#allocation14 + $0x448] sm:$0xff]  ;;  %v6345_v0 = vpack.c.bf16 %v1852_v28, %v1846_v1  ;;  %v6201_v22 = vpack.c.bf16 %v2522_v10, %v2516_v55  ;;  %v1876_v55 = vld [vmem:[#allocation14 + $0x4d0] sm:$0xff]  ;;  %v6207_v1 = vpack.c.bf16 %v2547_v47, %v2541_v56  ;;  %v2546_v28 = vld [vmem:[#allocation14 + $0x19c0] sm:$0xff] }
 0x2eb   :  { %v1889_v10 = vld [vmem:[#allocation14 + $0x538] sm:$0xff] }
 0x2ec   :  { %3736 = vmatmul.mubr.f32.vlgmr.msra.gmra.mrb[8].mxu0 %v8370_v63  ;;  %6338 = vmatpush1.bf16.msra.mxu1 %v6337_v2  ;;  %v6347_v2 = vpack.c.bf16 %v1865_v27, %v1859_v50  ;;  %v2553_v50 = vld [vmem:[#allocation14 + $0x19f8] sm:$0xff]  ;;  %v2559_v27 = vld [vmem:[#allocation14 + $0x1a28] sm:$0xff] }
 0x2ed   :  { %6194 = vmatpush1.bf16.msra.mxu0 %v6193_v60  ;;  %6340 = vmatprep.subr.bf16.mxu1 %v6339_v34  ;;  %v2528_v60 = vld [vmem:[#allocation14 + $0x1930] sm:$0xff]  ;;  %v1858_v34 = vld [vmem:[#allocation14 + $0x440] sm:$0xff] }
 0x2ee   :  { %6196 = vmatprep.subr.bf16.mxu0 %v6195_v45  ;;  %3741 = vmatprep.mubr.f32.mxu0 %v8374_v21  ;;  %v1871_v45 = vld [vmem:[#allocation14 + $0x4a8] sm:$0xff]  ;;  %v6349_v8 = vpack.c.bf16 %v1864_v7, %v1858_v34  ;;  %v6205_v19 = vpack.c.bf16 %v2534_v16, %v2528_v60  ;;  %v1888_v60 = vld [vmem:[#allocation14 + $0x530] sm:$0xff]  ;;  %v6211_v34 = vpack.c.bf16 %v2559_v27, %v2553_v50  ;;  %v2558_v7 = vld [vmem:[#allocation14 + $0x1a20] sm:$0xff] }
 0x2ef   :  { %v1901_v16 = vld [vmem:[#allocation14 + $0x598] sm:$0xff] }
 0x2f0   :  { %6342 = vmatpush1.bf16.msra.mxu1 %v6341_v35  ;;  %3742 = vmatmul.mubr.f32.gmra.mrb[10].mxu0 %v8383_v20  ;;  %v6351_v35 = vpack.c.bf16 %v1877_v18, %v1871_v45  ;;  %v2565_v45 = vld [vmem:[#allocation14 + $0x1a58] sm:$0xff]  ;;  %v2571_v18 = vld [vmem:[#allocation14 + $0x1a88] sm:$0xff] }
 0x2f1   :  { %6198 = vmatpush1.bf16.msra.mxu0 %v6197_v38  ;;  %6344 = vmatprep.subr.bf16.mxu1 %v6343_v51  ;;  %v2540_v38 = vld [vmem:[#allocation14 + $0x1990] sm:$0xff]  ;;  %v1870_v51 = vld [vmem:[#allocation14 + $0x4a0] sm:$0xff] }
 0x2f2   :  { %6200 = vmatprep.subr.bf16.mxu0 %v6199_v58  ;;  %3747 = vmatprep.mubr.f32.mxu0 %v8388_v17  ;;  %v1883_v58 = vld [vmem:[#allocation14 + $0x508] sm:$0xff]  ;;  %v6353_v30 = vpack.c.bf16 %v1876_v55, %v1870_v51  ;;  %v6209_v32 = vpack.c.bf16 %v2546_v28, %v2540_v38  ;;  %v1900_v38 = vld [vmem:[#allocation14 + $0x590] sm:$0xff]  ;;  %v6215_v51 = vpack.c.bf16 %v2571_v18, %v2565_v45  ;;  %v2570_v55 = vld [vmem:[#allocation14 + $0x1a80] sm:$0xff] }
 0x2f3   :  { %v1913_v28 = vld [vmem:[#allocation14 + $0x5f8] sm:$0xff] }
 0x2f4   :  { %6346 = vmatpush1.bf16.msra.mxu1 %v6345_v0  ;;  %3748 = vmatmul.mubr.f32.gmra.mrb[12].mxu0 %v8397_v13  ;;  %v6355_v0 = vpack.c.bf16 %v1889_v10, %v1883_v58  ;;  %v2577_v58 = vld [vmem:[#allocation14 + $0x1ab8] sm:$0xff]  ;;  %v2583_v10 = vld [vmem:[#allocation14 + $0x1ae8] sm:$0xff] }
 0x2f5   :  { %6202 = vmatpush1.bf16.msra.mxu0 %v6201_v22  ;;  %6348 = vmatprep.subr.bf16.mxu1 %v6347_v2  ;;  %v2552_v22 = vld [vmem:[#allocation14 + $0x19f0] sm:$0xff]  ;;  %v1882_v2 = vld [vmem:[#allocation14 + $0x500] sm:$0xff] }
 0x2f6   :  { %6204 = vmatprep.subr.bf16.mxu0 %v6203_v15  ;;  %3753 = vmatprep.mubr.f32.mxu0 %v8401_v54  ;;  %v1895_v15 = vld [vmem:[#allocation14 + $0x568] sm:$0xff]  ;;  %v6357_v56 = vpack.c.bf16 %v1888_v60, %v1882_v2  ;;  %v6213_v47 = vpack.c.bf16 %v2558_v7, %v2552_v22  ;;  %v1912_v22 = vld [vmem:[#allocation14 + $0x5f0] sm:$0xff]  ;;  %v6219_v2 = vpack.c.bf16 %v2583_v10, %v2577_v58  ;;  %v2582_v60 = vld [vmem:[#allocation14 + $0x1ae0] sm:$0xff] }
 0x2f7   :  { %v1919_v7 = vld [vmem:[#allocation14 + $0x628] sm:$0xff] }
 0x2f8   :  { %6350 = vmatpush1.bf16.msra.mxu1 %v6349_v8  ;;  %3754 = vmatmul.mubr.f32.gmra.mrb[14].mxu0 %v8405_v39  ;;  %v6359_v8 = vpack.c.bf16 %v1901_v16, %v1895_v15  ;;  %v2589_v15 = vld [vmem:[#allocation14 + $0x1b18] sm:$0xff]  ;;  %v2595_v16 = vld [vmem:[#allocation14 + $0x1b48] sm:$0xff] }
 0x2f9   :  { %6206 = vmatpush1.bf16.msra.mxu0 %v6205_v19  ;;  %6352 = vmatprep.subr.bf16.mxu1 %v6351_v35  ;;  %v2564_v19 = vld [vmem:[#allocation14 + $0x1a50] sm:$0xff]  ;;  %v1894_v35 = vld [vmem:[#allocation14 + $0x560] sm:$0xff] }
 0x2fa   :  { %6208 = vmatprep.subr.bf16.mxu0 %v6207_v1  ;;  %3824 = vmatprep.mubr.f32.mxu0 %v8408_v57  ;;  %v1907_v1 = vld [vmem:[#allocation14 + $0x5c8] sm:$0xff]  ;;  %v6361_v50 = vpack.c.bf16 %v1900_v38, %v1894_v35  ;;  %v6217_v27 = vpack.c.bf16 %v2570_v55, %v2564_v19  ;;  %v1924_v19 = vld [vmem:[#allocation14 + $0x650] sm:$0xff]  ;;  %v6223_v35 = vpack.c.bf16 %v2595_v16, %v2589_v15  ;;  %v2594_v38 = vld [vmem:[#allocation14 + $0x1b40] sm:$0xff] }
 0x2fb   :  { %v1931_v55 = vld [vmem:[#allocation14 + $0x688] sm:$0xff] }
 0x2fc   :  { %6354 = vmatpush1.bf16.msra.mxu1 %v6353_v30  ;;  %v6363_v30 = vpack.c.bf16 %v1913_v28, %v1907_v1  ;;  %v2601_v1 = vld [vmem:[#allocation14 + $0x1b78] sm:$0xff]  ;;  %v2607_v28 = vld [vmem:[#allocation14 + $0x1ba8] sm:$0xff] }
 0x2fd   :  { %6210 = vmatpush1.bf16.msra.mxu0 %v6209_v32  ;;  %6356 = vmatprep.subr.bf16.mxu1 %v6355_v0  ;;  %v2576_v32 = vld [vmem:[#allocation14 + $0x1ab0] sm:$0xff]  ;;  %v1906_v0 = vld [vmem:[#allocation14 + $0x5c0] sm:$0xff]  ;;  %v2619_v15 = vld [vmem:[#allocation14 + $0x1c08] sm:$0xff] }
 0x2fe   :  { %6212 = vmatprep.subr.bf16.mxu0 %v6211_v34  ;;  %v1925_v34 = vld [vmem:[#allocation14 + $0x658] sm:$0xff]  ;;  %v6365_v45 = vpack.c.bf16 %v1912_v22, %v1906_v0  ;;  %v6221_v18 = vpack.c.bf16 %v2582_v60, %v2576_v32  ;;  %v1936_v32 = vld [vmem:[#allocation14 + $0x6b0] sm:$0xff]  ;;  %v6227_v0 = vpack.c.bf16 %v2607_v28, %v2601_v1  ;;  %v2606_v22 = vld [vmem:[#allocation14 + $0x1ba0] sm:$0xff] }
 0x2ff   :  { %v1943_v60 = vld [vmem:[#allocation14 + $0x6e8] sm:$0xff]  ;;  %v2625_v1 = vld [vmem:[#allocation14 + $0x1c38] sm:$0xff] }
 0x300   :  { %6358 = vmatpush1.bf16.msra.mxu1 %v6357_v56  ;;  %v6367_v56 = vpack.c.bf16 %v1925_v34, %v1919_v7  ;;  %v8861_v7 = vld [vmem:[#allocation37_spill] sm:$0xff]  ;;  %v2631_v28 = vld [vmem:[#allocation14 + $0x1c68] sm:$0xff] }
 0x301   :  { %6214 = vmatpush1.bf16.msra.mxu0 %v6213_v47  ;;  %6360 = vmatprep.subr.bf16.mxu1 %v6359_v8  ;;  %v2588_v47 = vld [vmem:[#allocation14 + $0x1b10] sm:$0xff]  ;;  %v1918_v8 = vld [vmem:[#allocation14 + $0x620] sm:$0xff]  ;;  %v2613_v34 = vld [vmem:[#allocation14 + $0x1bd8] sm:$0xff] }
 0x302   :  { %6216 = vmatprep.subr.bf16.mxu0 %v6215_v51  ;;  %v1937_v51 = vld [vmem:[#allocation14 + $0x6b8] sm:$0xff]  ;;  %v6369_v58 = vpack.c.bf16 %v1924_v19, %v1918_v8  ;;  %v6225_v10 = vpack.c.bf16 %v2594_v38, %v2588_v47  ;;  %v2612_v47 = vld [vmem:[#allocation14 + $0x1bd0] sm:$0xff]  ;;  %v1942_v8 = vld [vmem:[#allocation14 + $0x6e0] sm:$0xff] }
 0x303   :  { %v1948_v19 = vld [vmem:[#allocation14 + $0x710] sm:$0xff]  ;;  %v2618_v38 = vld [vmem:[#allocation14 + $0x1c00] sm:$0xff] }
 0x304   :  { %6362 = vmatpush1.bf16.msra.mxu1 %v6361_v50  ;;  %v6371_v50 = vpack.c.bf16 %v1937_v51, %v1931_v55  ;;  %v1955_v55 = vld [vmem:[#allocation14 + $0x748] sm:$0xff]  ;;  %v1961_v51 = vld [vmem:[#allocation14 + $0x778] sm:$0xff] }
 0x305   :  { %6218 = vmatpush1.bf16.msra.mxu0 %v6217_v27  ;;  %6364 = vmatprep.subr.bf16.mxu1 %v6363_v30  ;;  %v2600_v27 = vld [vmem:[#allocation14 + $0x1b70] sm:$0xff]  ;;  %v1930_v30 = vld [vmem:[#allocation14 + $0x680] sm:$0xff] }
 0x306   :  { %6220 = vmatprep.subr.bf16.mxu0 %v6219_v2  ;;  %v1949_v2 = vld [vmem:[#allocation14 + $0x718] sm:$0xff]  ;;  %v6373_v16 = vpack.c.bf16 %v1936_v32, %v1930_v30  ;;  %v1954_v32 = vld [vmem:[#allocation14 + $0x740] sm:$0xff] }
 0x307   :  { %v8864_v30 = vld [vmem:[#allocation40_spill] sm:$0xff] }
 0x308   :  { %6366 = vmatpush1.bf16.msra.mxu1 %v6365_v45  ;;  %v8862_v45 = vld [vmem:[#allocation38_spill] sm:$0xff] }
 0x309   :  { %6222 = vmatpush1.bf16.msra.mxu0 %v6221_v18  ;;  %6368 = vmatprep.subr.bf16.mxu1 %v6367_v56  ;;  %v6229_v18 = vpack.c.bf16 %v2606_v22, %v2600_v27  ;;  %v6375_v56 = vpack.c.bf16 %v1949_v2, %v1943_v60  ;;  %v2624_v27 = vld [vmem:[#allocation14 + $0x1c30] sm:$0xff]  ;;  %v2630_v60 = vld [vmem:[#allocation14 + $0x1c60] sm:$0xff]  ;;  %v1967_v2 = vld [vmem:[#allocation14 + $0x7a8] sm:$0xff] }
 0x30a   :  { %6224 = vmatprep.subr.bf16.mxu0 %v6223_v35  ;;  %v6231_v35 = vpack.c.bf16 %v2619_v15, %v2613_v34  ;;  %v1960_v22 = vld [vmem:[#allocation14 + $0x770] sm:$0xff]  ;;  %v1973_v34 = vld [vmem:[#allocation14 + $0x7d8] sm:$0xff] }
 0x30b   :  { %4003 = vmatmul.mubr.f32.vlgmr.msra.gmra.mrb[24].mxu1 %v8861_v7  ;;  %v8863_v7 = vld [vmem:[#allocation39_spill] sm:$0xff]  ;;  %v2637_v15 = vld [vmem:[#allocation14 + $0x1c98] sm:$0xff] }
 0x30c   :  { %6370 = vmatpush1.bf16.msra.mxu1 %v6369_v58  ;;  %4008 = vmatprep.mubr.f32.mxu1 %v8862_v45  ;;  %v6377_v58 = vpack.c.bf16 %v1948_v19, %v1942_v8  ;;  %v2643_v45 = vld [vmem:[#allocation14 + $0x1cc8] sm:$0xff]  ;;  %v1966_v19 = vld [vmem:[#allocation14 + $0x7a0] sm:$0xff] }
 0x30d   :  { %6226 = vmatpush1.bf16.msra.mxu0 %v6225_v10  ;;  %6372 = vmatprep.subr.bf16.mxu1 %v6371_v50  ;;  %v6233_v10 = vpack.c.bf16 %v2618_v38, %v2612_v47  ;;  %v6379_v50 = vpack.c.bf16 %v1961_v51, %v1955_v55  ;;  %v8866_v8 = vld [vmem:[#allocation42_spill] sm:$0xff]  ;;  %v2636_v47 = vld [vmem:[#allocation14 + $0x1c90] sm:$0xff] }
 0x30e   :  { %6228 = vmatprep.subr.bf16.mxu0 %v6227_v0  ;;  %v6235_v0 = vpack.c.bf16 %v2631_v28, %v2625_v1  ;;  %v1972_v38 = vld [vmem:[#allocation14 + $0x7d0] sm:$0xff]  ;;  %v2642_v55 = vld [vmem:[#allocation14 + $0x1cc0] sm:$0xff]  ;;  %v1979_v51 = vld [vmem:[#allocation14 + $0x808] sm:$0xff] }
 0x30f   :  { %4009 = vmatmul.mubr.f32.gmra.mrb[26].mxu1 %v8863_v7  ;;  %v1985_v1 = vld [vmem:[#allocation14 + $0x838] sm:$0xff]  ;;  %v2655_v7 = vld [vmem:[#allocation14 + $0x1d28] sm:$0xff] }
 0x310   :  { %6374 = vmatpush1.bf16.msra.mxu1 %v6373_v16  ;;  %4014 = vmatprep.mubr.f32.mxu1 %v8864_v30  ;;  %v6381_v16 = vpack.c.bf16 %v1960_v22, %v1954_v32  ;;  %v2649_v28 = vld [vmem:[#allocation14 + $0x1cf8] sm:$0xff]  ;;  %v8867_v30 = vld [vmem:[#allocation43_spill] sm:$0xff]  ;;  %v1978_v32 = vld [vmem:[#allocation14 + $0x800] sm:$0xff] }
 0x311   :  { %6230 = vmatpush1.bf16.msra.mxu0 %v6229_v18  ;;  %6376 = vmatprep.subr.bf16.mxu1 %v6375_v56  ;;  %v6237_v18 = vpack.c.bf16 %v2630_v60, %v2624_v27  ;;  %v6383_v56 = vpack.c.bf16 %v1973_v34, %v1967_v2  ;;  %v2648_v27 = vld [vmem:[#allocation14 + $0x1cf0] sm:$0xff]  ;;  %v2654_v60 = vld [vmem:[#allocation14 + $0x1d20] sm:$0xff]  ;;  %v1991_v2 = vld [vmem:[#allocation14 + $0x868] sm:$0xff] }
 0x312   :  { %6232 = vmatprep.subr.bf16.mxu0 %v6231_v35  ;;  %v6239_v35 = vpack.c.bf16 %v2643_v45, %v2637_v15  ;;  %v1984_v22 = vld [vmem:[#allocation14 + $0x830] sm:$0xff]  ;;  %v1997_v34 = vld [vmem:[#allocation14 + $0x898] sm:$0xff]  ;;  %v2667_v45 = vld [vmem:[#allocation14 + $0x1d88] sm:$0xff] }
 0x313   :  { %4015 = vmatmul.mubr.f32.gmra.mrb[28].mxu1 %v8865_v52  ;;  %v6385_v52 = vpack.c.bf16 %v1972_v38, %v1966_v19  ;;  %v2661_v15 = vld [vmem:[#allocation14 + $0x1d58] sm:$0xff]  ;;  %v6391_v19 = vpack.c.bf16 %v1997_v34, %v1991_v2  ;;  %v2691_v2 = vld [vmem:[#allocation14 + $0x1e48] sm:$0xff] }
 0x314   :  { %6378 = vmatpush1.bf16.msra.mxu1 %v6377_v58  ;;  %4020 = vmatprep.mubr.f32.mxu1 %v8866_v8  ;;  %v8868_v58 = vld [vmem:[#allocation44_spill] sm:$0xff]  ;;  %v6389_v8 = vpack.c.bf16 %v1984_v22, %v1978_v32  ;;  %v6247_v38 = vpack.c.bf16 %v2667_v45, %v2661_v15  ;;  %v2678_v32 = vld [vmem:[#allocation14 + $0x1de0] sm:$0xff]  ;;  %v2015_v22 = vld [vmem:[#allocation14 + $0x928] sm:$0xff] }
 0x315   :  { %6234 = vmatpush1.bf16.msra.mxu0 %v6233_v10  ;;  %6380 = vmatprep.subr.bf16.mxu1 %v6379_v50  ;;  %v6241_v10 = vpack.c.bf16 %v2642_v55, %v2636_v47  ;;  %v6387_v50 = vpack.c.bf16 %v1985_v1, %v1979_v51  ;;  %v1996_v47 = vld [vmem:[#allocation14 + $0x890] sm:$0xff]  ;;  %v2666_v55 = vld [vmem:[#allocation14 + $0x1d80] sm:$0xff]  ;;  %v2003_v51 = vld [vmem:[#allocation14 + $0x8c8] sm:$0xff] }
 0x316   :  { %6236 = vmatprep.subr.bf16.mxu0 %v6235_v0  ;;  %v6243_v0 = vpack.c.bf16 %v2655_v7, %v2649_v28  ;;  %v2673_v1 = vld [vmem:[#allocation14 + $0x1db8] sm:$0xff]  ;;  %v2679_v28 = vld [vmem:[#allocation14 + $0x1de8] sm:$0xff] }
 0x317   :  { %4021 = vmatmul.mubr.f32.gmra.mrb[30].mxu1 %v8867_v30 }
 0x318   :  { %6382 = vmatpush1.bf16.msra.mxu1 %v6381_v16  ;;  %4091 = vmatprep.mubr.f32.mxu1 %v8868_v58  ;;  %v6245_v16 = vpack.c.bf16 %v2654_v60, %v2648_v27  ;;  %v2672_v58 = vld [vmem:[#allocation14 + $0x1db0] sm:$0xff]  ;;  %v6251_v27 = vpack.c.bf16 %v2679_v28, %v2673_v1  ;;  %v2685_v60 = vld [vmem:[#allocation14 + $0x1e18] sm:$0xff] }
 0x319   :  { %6238 = vmatpush1.bf16.msra.mxu0 %v6237_v18  ;;  %6384 = vmatprep.subr.bf16.mxu1 %v6383_v56  ;;  %v2660_v18 = vld [vmem:[#allocation14 + $0x1d50] sm:$0xff]  ;;  %v1990_v56 = vld [vmem:[#allocation14 + $0x860] sm:$0xff]  ;;  %v6253_v15 = vpack.c.bf16 %v2678_v32, %v2672_v58  ;;  %v2709_v32 = vld [vmem:[#allocation14 + $0x1ed8] sm:$0xff] }
 0x31a   :  { %6240 = vmatprep.subr.bf16.mxu0 %v6239_v35  ;;  %v2009_v35 = vld [vmem:[#allocation14 + $0x8f8] sm:$0xff]  ;;  %v6393_v7 = vpack.c.bf16 %v1996_v47, %v1990_v56  ;;  %v6249_v30 = vpack.c.bf16 %v2666_v55, %v2660_v18  ;;  %v6255_v18 = vpack.c.bf16 %v2691_v2, %v2685_v60  ;;  %v2690_v56 = vld [vmem:[#allocation14 + $0x1e40] sm:$0xff]  ;;  %v2027_v47 = vld [vmem:[#allocation14 + $0x988] sm:$0xff] }
 0x31b   :  { %v2697_v55 = vld [vmem:[#allocation14 + $0x1e78] sm:$0xff] }
 0x31c   :  { %6386 = vmatpush1.bf16.msra.mxu1 %v6385_v52  ;;  %v6395_v52 = vpack.c.bf16 %v2009_v35, %v2003_v51  ;;  %v2703_v51 = vld [vmem:[#allocation14 + $0x1ea8] sm:$0xff] }
 0x31d   :  { %6242 = vmatpush1.bf16.msra.mxu0 %v6241_v10  ;;  %6388 = vmatprep.subr.bf16.mxu1 %v6387_v50  ;;  %v2002_v10 = vld [vmem:[#allocation14 + $0x8c0] sm:$0xff]  ;;  %v2008_v50 = vld [vmem:[#allocation14 + $0x8f0] sm:$0xff]  ;;  %v6259_v58 = vpack.c.bf16 %v2703_v51, %v2697_v55 }
 0x31e   :  { %6244 = vmatprep.subr.bf16.mxu0 %v6243_v0  ;;  %v2021_v0 = vld [vmem:[#allocation14 + $0x958] sm:$0xff]  ;;  %v6397_v34 = vpack.c.bf16 %v2008_v50, %v2002_v10  ;;  %v2702_v10 = vld [vmem:[#allocation14 + $0x1ea0] sm:$0xff]  ;;  %v2039_v50 = vld [vmem:[#allocation14 + $0x9e8] sm:$0xff] }
 0x31f   :  { %v6399_v45 = vpack.c.bf16 %v2021_v0, %v2015_v22  ;;  %v2715_v22 = vld [vmem:[#allocation14 + $0x1f08] sm:$0xff] }
 0x320   :  { %6390 = vmatpush1.bf16.msra.mxu1 %v6389_v8  ;;  %v2684_v8 = vld [vmem:[#allocation14 + $0x1e10] sm:$0xff] }
 0x321   :  { %6246 = vmatpush1.bf16.msra.mxu0 %v6245_v16  ;;  %6392 = vmatprep.subr.bf16.mxu1 %v6391_v19  ;;  %v2014_v16 = vld [vmem:[#allocation14 + $0x920] sm:$0xff]  ;;  %v2020_v19 = vld [vmem:[#allocation14 + $0x950] sm:$0xff]  ;;  %v6257_v1 = vpack.c.bf16 %v2690_v56, %v2684_v8  ;;  %v6263_v8 = vpack.c.bf16 %v2715_v22, %v2709_v32  ;;  %v2721_v56 = vld [vmem:[#allocation14 + $0x1f38] sm:$0xff] }
 0x322   :  { %6248 = vmatprep.subr.bf16.mxu0 %v6247_v38  ;;  %v2033_v38 = vld [vmem:[#allocation14 + $0x9b8] sm:$0xff]  ;;  %v6401_v35 = vpack.c.bf16 %v2020_v19, %v2014_v16  ;;  %v2714_v16 = vld [vmem:[#allocation14 + $0x1f00] sm:$0xff]  ;;  %v2051_v19 = vld [vmem:[#allocation14 + $0xa48] sm:$0xff] }
 0x323   :  { %v6403_v28 = vpack.c.bf16 %v2033_v38, %v2027_v47  ;;  %v2727_v47 = vld [vmem:[#allocation14 + $0x1f68] sm:$0xff] }
 0x324   :  { %6394 = vmatpush1.bf16.msra.mxu1 %v6393_v7  ;;  %v2696_v7 = vld [vmem:[#allocation14 + $0x1e70] sm:$0xff] }
 0x325   :  { %6250 = vmatpush1.bf16.msra.mxu0 %v6249_v30  ;;  %6396 = vmatprep.subr.bf16.mxu1 %v6395_v52  ;;  %v2026_v30 = vld [vmem:[#allocation14 + $0x980] sm:$0xff]  ;;  %v2032_v52 = vld [vmem:[#allocation14 + $0x9b0] sm:$0xff]  ;;  %v6261_v60 = vpack.c.bf16 %v2702_v10, %v2696_v7  ;;  %v6267_v7 = vpack.c.bf16 %v2727_v47, %v2721_v56  ;;  %v2733_v10 = vld [vmem:[#allocation14 + $0x1f98] sm:$0xff] }
 0x326   :  { %6252 = vmatprep.subr.bf16.mxu0 %v6251_v27  ;;  %v2045_v27 = vld [vmem:[#allocation14 + $0xa18] sm:$0xff]  ;;  %v6405_v0 = vpack.c.bf16 %v2032_v52, %v2026_v30  ;;  %v2726_v30 = vld [vmem:[#allocation14 + $0x1f60] sm:$0xff]  ;;  %v2063_v52 = vld [vmem:[#allocation14 + $0xaa8] sm:$0xff] }
 0x327   :  { %v6407_v2 = vpack.c.bf16 %v2045_v27, %v2039_v50  ;;  %v2739_v50 = vld [vmem:[#allocation14 + $0x1fc8] sm:$0xff] }
 0x328   :  { %6398 = vmatpush1.bf16.msra.mxu1 %v6397_v34  ;;  %v2708_v34 = vld [vmem:[#allocation14 + $0x1ed0] sm:$0xff] }
 0x329   :  { %6254 = vmatpush1.bf16.msra.mxu0 %v6253_v15  ;;  %6400 = vmatprep.subr.bf16.mxu1 %v6399_v45  ;;  %v2038_v15 = vld [vmem:[#allocation14 + $0x9e0] sm:$0xff]  ;;  %v2044_v45 = vld [vmem:[#allocation14 + $0xa10] sm:$0xff]  ;;  %v6265_v55 = vpack.c.bf16 %v2714_v16, %v2708_v34  ;;  %v6271_v34 = vpack.c.bf16 %v2739_v50, %v2733_v10  ;;  %v2745_v16 = vld [vmem:[#allocation14 + $0x1ff8] sm:$0xff] }
 0x32a   :  { %6256 = vmatprep.subr.bf16.mxu0 %v6255_v18  ;;  %v2057_v18 = vld [vmem:[#allocation14 + $0xa78] sm:$0xff]  ;;  %v6409_v38 = vpack.c.bf16 %v2044_v45, %v2038_v15  ;;  %v2738_v15 = vld [vmem:[#allocation14 + $0x1fc0] sm:$0xff]  ;;  %v2075_v45 = vld [vmem:[#allocation14 + $0xb08] sm:$0xff] }
 0x32b   :  { %v6411_v51 = vpack.c.bf16 %v2057_v18, %v2051_v19  ;;  %v2751_v19 = vld [vmem:[#allocation14 + $0x2028] sm:$0xff] }
 0x32c   :  { %3825 = vmatmul.mubr.f32.vlgmr.msra.gmra.mrb[8].mxu0 %v8434_v49  ;;  %6402 = vmatpush1.bf16.msra.mxu1 %v6401_v35  ;;  %v2720_v35 = vld [vmem:[#allocation14 + $0x1f30] sm:$0xff] }
 0x32d   :  { %6258 = vmatpush1.bf16.msra.mxu0 %v6257_v1  ;;  %6404 = vmatprep.subr.bf16.mxu1 %v6403_v28  ;;  %v2050_v1 = vld [vmem:[#allocation14 + $0xa40] sm:$0xff]  ;;  %v2056_v28 = vld [vmem:[#allocation14 + $0xa70] sm:$0xff]  ;;  %v6269_v32 = vpack.c.bf16 %v2726_v30, %v2720_v35  ;;  %v6275_v35 = vpack.c.bf16 %v2751_v19, %v2745_v16  ;;  %v2757_v30 = vld [vmem:[#allocation14 + $0x2058] sm:$0xff] }
 0x32e   :  { %6260 = vmatprep.subr.bf16.mxu0 %v6259_v58  ;;  %3830 = vmatprep.mubr.f32.mxu0 %v8438_v9  ;;  %v2069_v58 = vld [vmem:[#allocation14 + $0xad8] sm:$0xff]  ;;  %v6413_v27 = vpack.c.bf16 %v2056_v28, %v2050_v1  ;;  %v2750_v1 = vld [vmem:[#allocation14 + $0x2020] sm:$0xff]  ;;  %v2087_v28 = vld [vmem:[#allocation14 + $0xb68] sm:$0xff] }
 0x32f   :  { %v6415_v22 = vpack.c.bf16 %v2069_v58, %v2063_v52  ;;  %v2763_v52 = vld [vmem:[#allocation14 + $0x2088] sm:$0xff] }
 0x330   :  { %6406 = vmatpush1.bf16.msra.mxu1 %v6405_v0  ;;  %3831 = vmatmul.mubr.f32.gmra.mrb[10].mxu0 %v8443_v25  ;;  %v2732_v0 = vld [vmem:[#allocation14 + $0x1f90] sm:$0xff] }
 0x331   :  { %6262 = vmatpush1.bf16.msra.mxu0 %v6261_v60  ;;  %6408 = vmatprep.subr.bf16.mxu1 %v6407_v2  ;;  %v2062_v60 = vld [vmem:[#allocation14 + $0xaa0] sm:$0xff]  ;;  %v2068_v2 = vld [vmem:[#allocation14 + $0xad0] sm:$0xff]  ;;  %v6273_v56 = vpack.c.bf16 %v2738_v15, %v2732_v0  ;;  %v6279_v0 = vpack.c.bf16 %v2763_v52, %v2757_v30  ;;  %v2769_v15 = vld [vmem:[#allocation14 + $0x20b8] sm:$0xff] }
 0x332   :  { %6264 = vmatprep.subr.bf16.mxu0 %v6263_v8  ;;  %3836 = vmatprep.mubr.f32.mxu0 %v8448_v5  ;;  %v2081_v8 = vld [vmem:[#allocation14 + $0xb38] sm:$0xff]  ;;  %v6417_v18 = vpack.c.bf16 %v2068_v2, %v2062_v60  ;;  %v2762_v60 = vld [vmem:[#allocation14 + $0x2080] sm:$0xff]  ;;  %v2099_v2 = vld [vmem:[#allocation14 + $0xbc8] sm:$0xff] }
 0x333   :  { %v6419_v47 = vpack.c.bf16 %v2081_v8, %v2075_v45  ;;  %v2775_v45 = vld [vmem:[#allocation14 + $0x20e8] sm:$0xff] }
 0x334   :  { %6410 = vmatpush1.bf16.msra.mxu1 %v6409_v38  ;;  %3837 = vmatmul.mubr.f32.gmra.mrb[12].mxu0 %v8452_v41  ;;  %v2744_v38 = vld [vmem:[#allocation14 + $0x1ff0] sm:$0xff] }
 0x335   :  { %6266 = vmatpush1.bf16.msra.mxu0 %v6265_v55  ;;  %6412 = vmatprep.subr.bf16.mxu1 %v6411_v51  ;;  %v2074_v55 = vld [vmem:[#allocation14 + $0xb00] sm:$0xff]  ;;  %v2080_v51 = vld [vmem:[#allocation14 + $0xb30] sm:$0xff]  ;;  %v6277_v10 = vpack.c.bf16 %v2750_v1, %v2744_v38  ;;  %v6283_v38 = vpack.c.bf16 %v2775_v45, %v2769_v15  ;;  %v2781_v1 = vld [vmem:[#allocation14 + $0x2118] sm:$0xff] }
 0x336   :  { %6268 = vmatprep.subr.bf16.mxu0 %v6267_v7  ;;  %3842 = vmatprep.mubr.f32.mxu0 %v8456_v4  ;;  %v2093_v7 = vld [vmem:[#allocation14 + $0xb98] sm:$0xff]  ;;  %v6421_v58 = vpack.c.bf16 %v2080_v51, %v2074_v55  ;;  %v2774_v55 = vld [vmem:[#allocation14 + $0x20e0] sm:$0xff]  ;;  %v2111_v51 = vld [vmem:[#allocation14 + $0xc28] sm:$0xff] }
 0x337   :  { %v6423_v50 = vpack.c.bf16 %v2093_v7, %v2087_v28  ;;  %v2787_v28 = vld [vmem:[#allocation14 + $0x2148] sm:$0xff] }
 0x338   :  { %6414 = vmatpush1.bf16.msra.mxu1 %v6413_v27  ;;  %3843 = vmatmul.mubr.f32.gmra.mrb[14].mxu0 %v8459_v36  ;;  %v2756_v27 = vld [vmem:[#allocation14 + $0x2050] sm:$0xff] }
 0x339   :  { %6270 = vmatpush1.bf16.msra.mxu0 %v6269_v32  ;;  %6416 = vmatprep.subr.bf16.mxu1 %v6415_v22  ;;  %v2086_v32 = vld [vmem:[#allocation14 + $0xb60] sm:$0xff]  ;;  %v2092_v22 = vld [vmem:[#allocation14 + $0xb90] sm:$0xff]  ;;  %v6281_v16 = vpack.c.bf16 %v2762_v60, %v2756_v27  ;;  %v6287_v27 = vpack.c.bf16 %v2787_v28, %v2781_v1  ;;  %v2793_v60 = vld [vmem:[#allocation14 + $0x2178] sm:$0xff] }
 0x33a   :  { %6272 = vmatprep.subr.bf16.mxu0 %v6271_v34  ;;  %5179 = vmatprep.mubr.msk.f32.mxu0 %vm903_vm0, %v8463_v23  ;;  %v2105_v34 = vld [vmem:[#allocation14 + $0xbf8] sm:$0xff]  ;;  %v6425_v8 = vpack.c.bf16 %v2092_v22, %v2086_v32  ;;  %v2786_v32 = vld [vmem:[#allocation14 + $0x2140] sm:$0xff]  ;;  %v2123_v22 = vld [vmem:[#allocation14 + $0xc88] sm:$0xff] }
 0x33b   :  { %v6427_v19 = vpack.c.bf16 %v2105_v34, %v2099_v2  ;;  %v2799_v2 = vld [vmem:[#allocation14 + $0x21a8] sm:$0xff] }
 0x33c   :  { %6418 = vmatpush1.bf16.msra.mxu1 %v6417_v18  ;;  %v2768_v18 = vld [vmem:[#allocation14 + $0x20b0] sm:$0xff] }
 0x33d   :  { %6274 = vmatpush1.bf16.msra.mxu0 %v6273_v56  ;;  %6420 = vmatprep.subr.bf16.mxu1 %v6419_v47  ;;  %v2098_v56 = vld [vmem:[#allocation14 + $0xbc0] sm:$0xff]  ;;  %v2104_v47 = vld [vmem:[#allocation14 + $0xbf0] sm:$0xff]  ;;  %v6285_v30 = vpack.c.bf16 %v2774_v55, %v2768_v18  ;;  %v6291_v18 = vpack.c.bf16 %v2799_v2, %v2793_v60  ;;  %v2805_v55 = vld [vmem:[#allocation14 + $0x21d8] sm:$0xff] }
 0x33e   :  { %6276 = vmatprep.subr.bf16.mxu0 %v6275_v35  ;;  %v2117_v35 = vld [vmem:[#allocation14 + $0xc58] sm:$0xff]  ;;  %v6429_v7 = vpack.c.bf16 %v2104_v47, %v2098_v56  ;;  %v2798_v56 = vld [vmem:[#allocation14 + $0x21a0] sm:$0xff]  ;;  %v2135_v47 = vld [vmem:[#allocation14 + $0xce8] sm:$0xff] }
 0x33f   :  { %v6431_v52 = vpack.c.bf16 %v2117_v35, %v2111_v51  ;;  %v2811_v51 = vld [vmem:[#allocation14 + $0x2208] sm:$0xff]  ;;  %v2816_v2 = vld [vmem:[#allocation14 + $0x2230] sm:$0xff] }
 0x340   :  { %6422 = vmatpush1.bf16.msra.mxu1 %v6421_v58  ;;  %v2780_v58 = vld [vmem:[#allocation14 + $0x2110] sm:$0xff] }
 0x341   :  { %6278 = vmatpush1.bf16.msra.mxu0 %v6277_v10  ;;  %6424 = vmatprep.subr.bf16.mxu1 %v6423_v50  ;;  %v2110_v10 = vld [vmem:[#allocation14 + $0xc20] sm:$0xff]  ;;  %v2116_v50 = vld [vmem:[#allocation14 + $0xc50] sm:$0xff]  ;;  %v6289_v15 = vpack.c.bf16 %v2786_v32, %v2780_v58  ;;  %v6295_v58 = vpack.c.bf16 %v2811_v51, %v2805_v55  ;;  %v2817_v32 = vld [vmem:[#allocation14 + $0x2238] sm:$0xff] }
 0x342   :  { %6280 = vmatprep.subr.bf16.mxu0 %v6279_v0  ;;  %v2129_v0 = vld [vmem:[#allocation14 + $0xcb8] sm:$0xff]  ;;  %v6433_v34 = vpack.c.bf16 %v2116_v50, %v2110_v10  ;;  %v2810_v10 = vld [vmem:[#allocation14 + $0x2200] sm:$0xff]  ;;  %v2147_v50 = vld [vmem:[#allocation14 + $0xd48] sm:$0xff] }
 0x343   :  { %v6435_v45 = vpack.c.bf16 %v2129_v0, %v2123_v22  ;;  %v8869_v0 = vld [vmem:[#allocation45_spill] sm:$0xff] }
 0x344   :  { %6426 = vmatpush1.bf16.msra.mxu1 %v6425_v8  ;;  %v2792_v8 = vld [vmem:[#allocation14 + $0x2170] sm:$0xff] }
 0x345   :  { %6282 = vmatpush1.bf16.msra.mxu0 %v6281_v16  ;;  %6428 = vmatprep.subr.bf16.mxu1 %v6427_v19  ;;  %v2122_v16 = vld [vmem:[#allocation14 + $0xc80] sm:$0xff]  ;;  %v2128_v19 = vld [vmem:[#allocation14 + $0xcb0] sm:$0xff]  ;;  %v6293_v1 = vpack.c.bf16 %v2798_v56, %v2792_v8 }
 0x346   :  { %6284 = vmatprep.subr.bf16.mxu0 %v6283_v38  ;;  %v2141_v38 = vld [vmem:[#allocation14 + $0xd18] sm:$0xff]  ;;  %v6437_v35 = vpack.c.bf16 %v2128_v19, %v2122_v16  ;;  %v2822_v8 = vld [vmem:[#allocation14 + $0x2260] sm:$0xff]  ;;  %v2159_v16 = vld [vmem:[#allocation14 + $0xda8] sm:$0xff] }
 0x347   :  { %v6439_v28 = vpack.c.bf16 %v2141_v38, %v2135_v47  ;;  %v2165_v19 = vld [vmem:[#allocation14 + $0xdd8] sm:$0xff]  ;;  %v4611_v56 = vld [vmem:[#allocation20 + $0x18] sm:$0xff]  ;;  %v6301_v55 = vpack.c.bf16 %v2822_v8, %v2816_v2  ;;  %v4614_v8 = vld [vmem:[#allocation20 + $0x30] sm:$0xff] }
 0x348   :  { %6430 = vmatpush1.bf16.msra.mxu1 %v6429_v7  ;;  %v2804_v7 = vld [vmem:[#allocation14 + $0x21d0] sm:$0xff]  ;;  %v8870_v47 = vld [vmem:[#allocation46_spill] sm:$0xff]  ;;  %v6447_v51 = vpack.c.bf16 %v2165_v19, %v2159_v16  ;;  %v2189_v2 = vld [vmem:[#allocation14 + $0xe98] sm:$0xff] }
 0x349   :  { %6286 = vmatpush1.bf16.msra.mxu0 %v6285_v30  ;;  %6432 = vmatprep.subr.bf16.mxu1 %v6431_v52  ;;  %v2134_v30 = vld [vmem:[#allocation14 + $0xce0] sm:$0xff]  ;;  %v2140_v52 = vld [vmem:[#allocation14 + $0xd10] sm:$0xff] }
 0x34a   :  { %6288 = vmatprep.subr.bf16.mxu0 %v6287_v27  ;;  %v2153_v27 = vld [vmem:[#allocation14 + $0xd78] sm:$0xff]  ;;  %v6441_v22 = vpack.c.bf16 %v2140_v52, %v2134_v30  ;;  %v8871_v38 = vld [vmem:[#allocation47_spill] sm:$0xff] }
 0x34b   :  { %4092 = vmatmul.mubr.f32.vlgmr.msra.gmra.mrb[24].mxu1 %v8160_v12  ;;  %v2823_v12 = vld [vmem:[#allocation14 + $0x2268] sm:$0xff]  ;;  %v6443_v60 = vpack.c.bf16 %v2153_v27, %v2147_v50  ;;  %v4608_v52 = vld [vmem:[#allocation20] sm:$0xff]  ;;  %v4613_v27 = vld [vmem:[#allocation20 + $0x28] sm:$0xff] }
 0x34c   :  { %6434 = vmatpush1.bf16.msra.mxu1 %v6433_v34  ;;  %4097 = vmatprep.mubr.f32.mxu1 %v8165_v48  ;;  %v6297_v48 = vpack.c.bf16 %v2810_v10, %v2804_v7  ;;  %v2146_v34 = vld [vmem:[#allocation14 + $0xd40] sm:$0xff]  ;;  %v2177_v7 = vld [vmem:[#allocation14 + $0xe38] sm:$0xff] }
 0x34d   :  { %6290 = vmatpush1.bf16.msra.mxu0 %v6289_v15  ;;  %6436 = vmatprep.subr.bf16.mxu1 %v6435_v45  ;;  %v2152_v15 = vld [vmem:[#allocation14 + $0xd70] sm:$0xff]  ;;  %v6299_v45 = vpack.c.bf16 %v2823_v12, %v2817_v32  ;;  %v8873_v12 = vld [vmem:[#allocation49_spill] sm:$0xff] }
 0x34e   :  { %6292 = vmatprep.subr.bf16.mxu0 %v6291_v18  ;;  %v4609_v18 = vld [vmem:[#allocation20 + $0x8] sm:$0xff]  ;;  %v4615_v32 = vld [vmem:[#allocation20 + $0x38] sm:$0xff] }
 0x34f   :  { %4098 = vmatmul.mubr.f32.gmra.mrb[26].mxu1 %v8173_v3  ;;  %v6445_v3 = vpack.c.bf16 %v2152_v15, %v2146_v34  ;;  %v6671_v30 = vpack.c.bf16 %v4611_v56, %v4609_v18  ;;  %v8872_v10 = vld [vmem:[#allocation48_spill] sm:$0xff]  ;;  %v6675_v15 = vpack.c.bf16 %v4615_v32, %v4613_v27  ;;  %v4619_v18 = vld [vmem:[#allocation20 + $0x58] sm:$0xff] }
 0x350   :  { %6438 = vmatpush1.bf16.msra.mxu1 %v6437_v35  ;;  %4103 = vmatprep.mubr.f32.mxu1 %v8869_v0  ;;  %v2158_v35 = vld [vmem:[#allocation14 + $0xda0] sm:$0xff]  ;;  %v2207_v27 = vld [vmem:[#allocation14 + $0xf28] sm:$0xff]  ;;  %v2213_v32 = vld [vmem:[#allocation14 + $0xf58] sm:$0xff] }
 0x351   :  { %6294 = vmatpush1.bf16.msra.mxu0 %v6293_v1  ;;  %6440 = vmatprep.subr.bf16.mxu1 %v6439_v28  ;;  %v2164_v1 = vld [vmem:[#allocation14 + $0xdd0] sm:$0xff]  ;;  %v2171_v28 = vld [vmem:[#allocation14 + $0xe08] sm:$0xff]  ;;  %v2170_v0 = vld [vmem:[#allocation14 + $0xe00] sm:$0xff] }
 0x352   :  { %6296 = vmatprep.subr.bf16.mxu0 %v6295_v58  ;;  %v4610_v58 = vld [vmem:[#allocation20 + $0x10] sm:$0xff]  ;;  %v6449_v50 = vpack.c.bf16 %v2164_v1, %v2158_v35  ;;  %v4617_v19 = vld [vmem:[#allocation20 + $0x48] sm:$0xff]  ;;  %v4616_v1 = vld [vmem:[#allocation20 + $0x40] sm:$0xff] }
 0x353   :  { %4104 = vmatmul.mubr.f32.gmra.mrb[28].mxu1 %v8870_v47  ;;  %v6673_v34 = vpack.c.bf16 %v4610_v58, %v4608_v52  ;;  %v2182_v47 = vld [vmem:[#allocation14 + $0xe60] sm:$0xff]  ;;  %v6679_v35 = vpack.c.bf16 %v4619_v18, %v4617_v19  ;;  %v4623_v52 = vld [vmem:[#allocation20 + $0x78] sm:$0xff]  ;;  %v2225_v19 = vld [vmem:[#allocation14 + $0xfb8] sm:$0xff] }
 0x354   :  { %6442 = vmatpush1.bf16.msra.mxu1 %v6441_v22  ;;  %4109 = vmatprep.mubr.f32.mxu1 %v8871_v38  ;;  %v6451_v22 = vpack.c.bf16 %v2177_v7, %v2171_v28  ;;  %v2195_v38 = vld [vmem:[#allocation14 + $0xec8] sm:$0xff] }
 0x355   :  { %6298 = vmatpush1.bf16.msra.mxu0 %v6297_v48  ;;  %6444 = vmatprep.subr.bf16.mxu1 %v6443_v60  ;;  %v2176_v48 = vld [vmem:[#allocation14 + $0xe30] sm:$0xff]  ;;  %v2183_v60 = vld [vmem:[#allocation14 + $0xe68] sm:$0xff] }
 0x356   :  { %6300 = vmatprep.subr.bf16.mxu0 %v6299_v45  ;;  %v4612_v45 = vld [vmem:[#allocation20 + $0x20] sm:$0xff]  ;;  %v6453_v16 = vpack.c.bf16 %v2176_v48, %v2170_v0  ;;  %v6455_v56 = vpack.c.bf16 %v2189_v2, %v2183_v60  ;;  %v4618_v28 = vld [vmem:[#allocation20 + $0x50] sm:$0xff]  ;;  %v4625_v2 = vld [vmem:[#allocation20 + $0x88] sm:$0xff] }
 0x357   :  { %4110 = vmatmul.mubr.f32.gmra.mrb[30].mxu1 %v8872_v10  ;;  %v2194_v10 = vld [vmem:[#allocation14 + $0xec0] sm:$0xff]  ;;  %v4620_v0 = vld [vmem:[#allocation20 + $0x60] sm:$0xff] }
 0x358   :  { %6446 = vmatpush1.bf16.msra.mxu1 %v6445_v3  ;;  %4180 = vmatprep.mubr.f32.mxu1 %v8873_v12  ;;  %v2188_v3 = vld [vmem:[#allocation14 + $0xe90] sm:$0xff]  ;;  %v6681_v12 = vpack.c.bf16 %v4618_v28, %v4616_v1  ;;  %v4622_v48 = vld [vmem:[#allocation20 + $0x70] sm:$0xff] }
 0x359   :  { %6302 = vmatpush1.bf16.msra.mxu0 %v6301_v55  ;;  %6448 = vmatprep.subr.bf16.mxu1 %v6447_v51  ;;  %v2201_v55 = vld [vmem:[#allocation14 + $0xef8] sm:$0xff]  ;;  %v6677_v51 = vpack.c.bf16 %v4614_v8, %v4612_v45  ;;  %v6457_v7 = vpack.c.bf16 %v2188_v3, %v2182_v47  ;;  %v2206_v45 = vld [vmem:[#allocation14 + $0xf20] sm:$0xff]  ;;  %v2212_v8 = vld [vmem:[#allocation14 + $0xf50] sm:$0xff]  ;;  %v6685_v18 = vpack.c.bf16 %v4622_v48, %v4620_v0 }
 0x35a   :  { %6672 = vmatprep.subr.bf16.mxu0 %v6671_v30  ;;  %v4621_v30 = vld [vmem:[#allocation20 + $0x68] sm:$0xff]  ;;  %v6459_v58 = vpack.c.bf16 %v2201_v55, %v2195_v38  ;;  %v4624_v47 = vld [vmem:[#allocation20 + $0x80] sm:$0xff]  ;;  %v4626_v3 = vld [vmem:[#allocation20 + $0x90] sm:$0xff]  ;;  %v6465_v38 = vpack.c.bf16 %v2212_v8, %v2206_v45 }
 0x35b   :  { %v4629_v55 = vld [vmem:[#allocation20 + $0xa8] sm:$0xff]  ;;  %v2224_v28 = vld [vmem:[#allocation14 + $0xfb0] sm:$0xff]  ;;  %v4634_v8 = vld [vmem:[#allocation20 + $0xd0] sm:$0xff] }
 0x35c   :  { %3914 = vmatmul.mubr.f32.vlgmr.msra.gmra.mrb[8].mxu0 %v8507_v37  ;;  %6450 = vmatpush1.bf16.msra.mxu1 %v6449_v50  ;;  %v2200_v50 = vld [vmem:[#allocation14 + $0xef0] sm:$0xff]  ;;  %v2218_v1 = vld [vmem:[#allocation14 + $0xf80] sm:$0xff] }
 0x35d   :  { %5180 = vmatprep.mubr.msk.f32.mxu0 %vm903_vm0, %v8510_v44  ;;  %6452 = vmatprep.subr.bf16.mxu1 %v6451_v22  ;;  %v6683_v22 = vpack.c.bf16 %v4623_v52, %v4621_v30  ;;  %v6461_v60 = vpack.c.bf16 %v2200_v50, %v2194_v10  ;;  %v2237_v30 = vld [vmem:[#allocation14 + $0x1018] sm:$0xff]  ;;  %v6689_v52 = vpack.c.bf16 %v4626_v3, %v4624_v47  ;;  %v4630_v50 = vld [vmem:[#allocation20 + $0xb0] sm:$0xff]  ;;  %v2236_v48 = vld [vmem:[#allocation14 + $0x1010] sm:$0xff] }
 0x35e   :  { %6674 = vmatpush1.bf16.msra.mxu0 %v6673_v34  ;;  %v4627_v34 = vld [vmem:[#allocation20 + $0x98] sm:$0xff]  ;;  %v4628_v10 = vld [vmem:[#allocation20 + $0xa0] sm:$0xff]  ;;  %v2230_v0 = vld [vmem:[#allocation14 + $0xfe0] sm:$0xff] }
 0x35f   :  { %6676 = vmatprep.subr.bf16.mxu0 %v6675_v15  ;;  %v6463_v15 = vpack.c.bf16 %v2213_v32, %v2207_v27  ;;  %v6469_v27 = vpack.c.bf16 %v2224_v28, %v2218_v1  ;;  %v4633_v32 = vld [vmem:[#allocation20 + $0xc8] sm:$0xff]  ;;  %v4632_v45 = vld [vmem:[#allocation20 + $0xc0] sm:$0xff]  ;;  %v4638_v28 = vld [vmem:[#allocation20 + $0xf0] sm:$0xff] }
 0x360   :  { %3920 = vmatmul.mubr.f32.gmra.mrb[10].mxu0 %v8524_v40  ;;  %6454 = vmatpush1.bf16.msra.mxu1 %v6453_v16  ;;  %v2219_v16 = vld [vmem:[#allocation14 + $0xf88] sm:$0xff]  ;;  %v2242_v47 = vld [vmem:[#allocation14 + $0x1040] sm:$0xff]  ;;  %v2248_v3 = vld [vmem:[#allocation14 + $0x1070] sm:$0xff] }
 0x361   :  { %5181 = vmatprep.mubr.msk.f32.mxu0 %vm903_vm0, %v8529_v29  ;;  %6456 = vmatprep.subr.bf16.mxu1 %v6455_v56  ;;  %v6687_v56 = vpack.c.bf16 %v4627_v34, %v4625_v2  ;;  %v2249_v2 = vld [vmem:[#allocation14 + $0x1078] sm:$0xff]  ;;  %v6693_v34 = vpack.c.bf16 %v4630_v50, %v4628_v10  ;;  %v2254_v10 = vld [vmem:[#allocation14 + $0x10a0] sm:$0xff]  ;;  %v2260_v50 = vld [vmem:[#allocation14 + $0x10d0] sm:$0xff] }
 0x362   :  { %6678 = vmatpush1.bf16.msra.mxu0 %v6677_v51  ;;  %v4631_v51 = vld [vmem:[#allocation20 + $0xb8] sm:$0xff]  ;;  %v4636_v1 = vld [vmem:[#allocation20 + $0xe0] sm:$0xff] }
 0x363   :  { %6680 = vmatprep.subr.bf16.mxu0 %v6679_v35  ;;  %v6467_v35 = vpack.c.bf16 %v2225_v19, %v2219_v16  ;;  %v6473_v16 = vpack.c.bf16 %v2236_v48, %v2230_v0  ;;  %v4637_v19 = vld [vmem:[#allocation20 + $0xe8] sm:$0xff]  ;;  %v4640_v0 = vld [vmem:[#allocation20 + $0x100] sm:$0xff]  ;;  %v4642_v48 = vld [vmem:[#allocation20 + $0x110] sm:$0xff] }
 0x364   :  { %3926 = vmatmul.mubr.f32.gmra.mrb[12].mxu0 %v8539_v46  ;;  %6458 = vmatpush1.bf16.msra.mxu1 %v6457_v7  ;;  %v2231_v7 = vld [vmem:[#allocation14 + $0xfe8] sm:$0xff] }
 0x365   :  { %5182 = vmatprep.mubr.msk.f32.mxu0 %vm903_vm0, %v8544_v26  ;;  %6460 = vmatprep.subr.bf16.mxu1 %v6459_v58  ;;  %v6691_v58 = vpack.c.bf16 %v4631_v51, %v4629_v55  ;;  %v2261_v55 = vld [vmem:[#allocation14 + $0x10d8] sm:$0xff]  ;;  %v6697_v51 = vpack.c.bf16 %v4634_v8, %v4632_v45  ;;  %v2266_v45 = vld [vmem:[#allocation14 + $0x1100] sm:$0xff]  ;;  %v2272_v8 = vld [vmem:[#allocation14 + $0x1130] sm:$0xff] }
 0x366   :  { %6682 = vmatpush1.bf16.msra.mxu0 %v6681_v12  ;;  %v4635_v12 = vld [vmem:[#allocation20 + $0xd8] sm:$0xff] }
 0x367   :  { %6684 = vmatprep.subr.bf16.mxu0 %v6683_v22  ;;  %v6471_v22 = vpack.c.bf16 %v2237_v30, %v2231_v7  ;;  %v6477_v7 = vpack.c.bf16 %v2248_v3, %v2242_v47  ;;  %v4641_v30 = vld [vmem:[#allocation20 + $0x108] sm:$0xff]  ;;  %v4644_v47 = vld [vmem:[#allocation20 + $0x120] sm:$0xff]  ;;  %v4646_v3 = vld [vmem:[#allocation20 + $0x130] sm:$0xff] }
 0x368   :  { %3932 = vmatmul.mubr.f32.gmra.mrb[14].mxu0 %v8548_v33  ;;  %6462 = vmatpush1.bf16.msra.mxu1 %v6461_v60  ;;  %v2243_v60 = vld [vmem:[#allocation14 + $0x1048] sm:$0xff] }
 0x369   :  { %6464 = vmatprep.subr.bf16.mxu1 %v6463_v15  ;;  %v6695_v15 = vpack.c.bf16 %v4635_v12, %v4633_v32  ;;  %v2273_v32 = vld [vmem:[#allocation14 + $0x1138] sm:$0xff]  ;;  %v6701_v12 = vpack.c.bf16 %v4638_v28, %v4636_v1  ;;  %v2278_v1 = vld [vmem:[#allocation14 + $0x1160] sm:$0xff]  ;;  %v2284_v28 = vld [vmem:[#allocation14 + $0x1190] sm:$0xff] }
 0x36a   :  { %6686 = vmatpush1.bf16.msra.mxu0 %v6685_v18  ;;  %v4639_v18 = vld [vmem:[#allocation20 + $0xf8] sm:$0xff] }
 0x36b   :  { %6688 = vmatprep.subr.bf16.mxu0 %v6687_v56  ;;  %v6475_v56 = vpack.c.bf16 %v2249_v2, %v2243_v60  ;;  %v6481_v60 = vpack.c.bf16 %v2260_v50, %v2254_v10  ;;  %v4645_v2 = vld [vmem:[#allocation20 + $0x128] sm:$0xff]  ;;  %v4648_v10 = vld [vmem:[#allocation20 + $0x140] sm:$0xff]  ;;  %v4650_v50 = vld [vmem:[#allocation20 + $0x150] sm:$0xff] }
 0x36c   :  { %6466 = vmatpush1.bf16.msra.mxu1 %v6465_v38  ;;  %v2255_v38 = vld [vmem:[#allocation14 + $0x10a8] sm:$0xff] }
 0x36d   :  { %6468 = vmatprep.subr.bf16.mxu1 %v6467_v35  ;;  %v6699_v35 = vpack.c.bf16 %v4639_v18, %v4637_v19  ;;  %v2285_v19 = vld [vmem:[#allocation14 + $0x1198] sm:$0xff]  ;;  %v6705_v18 = vpack.c.bf16 %v4642_v48, %v4640_v0  ;;  %v2290_v0 = vld [vmem:[#allocation14 + $0x11c0] sm:$0xff]  ;;  %v2296_v48 = vld [vmem:[#allocation14 + $0x11f0] sm:$0xff] }
 0x36e   :  { %6690 = vmatpush1.bf16.msra.mxu0 %v6689_v52  ;;  %v4643_v52 = vld [vmem:[#allocation20 + $0x118] sm:$0xff] }
 0x36f   :  { %6692 = vmatprep.subr.bf16.mxu0 %v6691_v58  ;;  %v6479_v58 = vpack.c.bf16 %v2261_v55, %v2255_v38  ;;  %v6485_v38 = vpack.c.bf16 %v2272_v8, %v2266_v45  ;;  %v4649_v55 = vld [vmem:[#allocation20 + $0x148] sm:$0xff]  ;;  %v4652_v45 = vld [vmem:[#allocation20 + $0x160] sm:$0xff]  ;;  %v4654_v8 = vld [vmem:[#allocation20 + $0x170] sm:$0xff] }
 0x370   :  { %6470 = vmatpush1.bf16.msra.mxu1 %v6469_v27  ;;  %v2267_v27 = vld [vmem:[#allocation14 + $0x1108] sm:$0xff] }
 0x371   :  { %6472 = vmatprep.subr.bf16.mxu1 %v6471_v22  ;;  %v6703_v22 = vpack.c.bf16 %v4643_v52, %v4641_v30  ;;  %v2297_v30 = vld [vmem:[#allocation14 + $0x11f8] sm:$0xff]  ;;  %v6709_v52 = vpack.c.bf16 %v4646_v3, %v4644_v47  ;;  %v2302_v47 = vld [vmem:[#allocation14 + $0x1220] sm:$0xff]  ;;  %v2308_v3 = vld [vmem:[#allocation14 + $0x1250] sm:$0xff] }
 0x372   :  { %6694 = vmatpush1.bf16.msra.mxu0 %v6693_v34  ;;  %v4647_v34 = vld [vmem:[#allocation20 + $0x138] sm:$0xff] }
 0x373   :  { %6696 = vmatprep.subr.bf16.mxu0 %v6695_v15  ;;  %v6483_v15 = vpack.c.bf16 %v2273_v32, %v2267_v27  ;;  %v6489_v27 = vpack.c.bf16 %v2284_v28, %v2278_v1  ;;  %v4653_v32 = vld [vmem:[#allocation20 + $0x168] sm:$0xff]  ;;  %v4656_v1 = vld [vmem:[#allocation20 + $0x180] sm:$0xff]  ;;  %v4658_v28 = vld [vmem:[#allocation20 + $0x190] sm:$0xff] }
 0x374   :  { %6474 = vmatpush1.bf16.msra.mxu1 %v6473_v16  ;;  %v2279_v16 = vld [vmem:[#allocation14 + $0x1168] sm:$0xff] }
 0x375   :  { %6476 = vmatprep.subr.bf16.mxu1 %v6475_v56  ;;  %v6707_v56 = vpack.c.bf16 %v4647_v34, %v4645_v2  ;;  %v2309_v2 = vld [vmem:[#allocation14 + $0x1258] sm:$0xff]  ;;  %v6713_v34 = vpack.c.bf16 %v4650_v50, %v4648_v10  ;;  %v2314_v10 = vld [vmem:[#allocation14 + $0x1280] sm:$0xff]  ;;  %v2320_v50 = vld [vmem:[#allocation14 + $0x12b0] sm:$0xff] }
 0x376   :  { %6698 = vmatpush1.bf16.msra.mxu0 %v6697_v51  ;;  %v4651_v51 = vld [vmem:[#allocation20 + $0x158] sm:$0xff] }
 0x377   :  { %6700 = vmatprep.subr.bf16.mxu0 %v6699_v35  ;;  %v6487_v35 = vpack.c.bf16 %v2285_v19, %v2279_v16  ;;  %v6493_v16 = vpack.c.bf16 %v2296_v48, %v2290_v0  ;;  %v4657_v19 = vld [vmem:[#allocation20 + $0x188] sm:$0xff]  ;;  %v4660_v0 = vld [vmem:[#allocation20 + $0x1a0] sm:$0xff]  ;;  %v4662_v48 = vld [vmem:[#allocation20 + $0x1b0] sm:$0xff] }
 0x378   :  { %6478 = vmatpush1.bf16.msra.mxu1 %v6477_v7  ;;  %v2291_v7 = vld [vmem:[#allocation14 + $0x11c8] sm:$0xff] }
 0x379   :  { %6480 = vmatprep.subr.bf16.mxu1 %v6479_v58  ;;  %v6711_v58 = vpack.c.bf16 %v4651_v51, %v4649_v55  ;;  %v2321_v55 = vld [vmem:[#allocation14 + $0x12b8] sm:$0xff]  ;;  %v6717_v51 = vpack.c.bf16 %v4654_v8, %v4652_v45  ;;  %v2326_v45 = vld [vmem:[#allocation14 + $0x12e0] sm:$0xff]  ;;  %v2332_v8 = vld [vmem:[#allocation14 + $0x1310] sm:$0xff] }
 0x37a   :  { %6702 = vmatpush1.bf16.msra.mxu0 %v6701_v12  ;;  %v4655_v12 = vld [vmem:[#allocation20 + $0x178] sm:$0xff] }
 0x37b   :  { %6704 = vmatprep.subr.bf16.mxu0 %v6703_v22  ;;  %v6491_v22 = vpack.c.bf16 %v2297_v30, %v2291_v7  ;;  %v6497_v7 = vpack.c.bf16 %v2308_v3, %v2302_v47  ;;  %v4661_v30 = vld [vmem:[#allocation20 + $0x1a8] sm:$0xff]  ;;  %v4666_v47 = vld [vmem:[#allocation20 + $0x1d0] sm:$0xff]  ;;  %v6505_v3 = vpack.c.bf16 %v2332_v8, %v2326_v45 }
 0x37c   :  { %6482 = vmatpush1.bf16.msra.mxu1 %v6481_v60  ;;  %v2303_v60 = vld [vmem:[#allocation14 + $0x1228] sm:$0xff]  ;;  %v2381_v8 = vld [vmem:[#allocation14 + $0x1498] sm:$0xff] }
 0x37d   :  { %6484 = vmatprep.subr.bf16.mxu1 %v6483_v15  ;;  %v6715_v15 = vpack.c.bf16 %v4655_v12, %v4653_v32  ;;  %v2333_v32 = vld [vmem:[#allocation14 + $0x1318] sm:$0xff]  ;;  %v6721_v12 = vpack.c.bf16 %v4658_v28, %v4656_v1  ;;  %v2351_v1 = vld [vmem:[#allocation14 + $0x13a8] sm:$0xff] }
 0x37e   :  { %6706 = vmatpush1.bf16.msra.mxu0 %v6705_v18  ;;  %v4659_v18 = vld [vmem:[#allocation20 + $0x198] sm:$0xff]  ;;  %v2357_v28 = vld [vmem:[#allocation14 + $0x13d8] sm:$0xff] }
 0x37f   :  { %6708 = vmatprep.subr.bf16.mxu0 %v6707_v56  ;;  %v6495_v56 = vpack.c.bf16 %v2309_v2, %v2303_v60  ;;  %v6501_v60 = vpack.c.bf16 %v2320_v50, %v2314_v10  ;;  %v4665_v2 = vld [vmem:[#allocation20 + $0x1c8] sm:$0xff]  ;;  %v6511_v50 = vpack.c.bf16 %v2357_v28, %v2351_v1  ;;  %v2375_v45 = vld [vmem:[#allocation14 + $0x1468] sm:$0xff] }
 0x380   :  { %6486 = vmatpush1.bf16.msra.mxu1 %v6485_v38  ;;  %v2315_v38 = vld [vmem:[#allocation14 + $0x1288] sm:$0xff]  ;;  %v4673_v10 = vld [vmem:[#allocation20 + $0x208] sm:$0xff] }
 0x381   :  { %6488 = vmatprep.subr.bf16.mxu1 %v6487_v35  ;;  %v6719_v35 = vpack.c.bf16 %v4659_v18, %v4657_v19  ;;  %v2345_v19 = vld [vmem:[#allocation14 + $0x1378] sm:$0xff]  ;;  %v6725_v18 = vpack.c.bf16 %v4662_v48, %v4660_v0 }
 0x382   :  { %6710 = vmatpush1.bf16.msra.mxu0 %v6709_v52  ;;  %v4663_v52 = vld [vmem:[#allocation20 + $0x1b8] sm:$0xff] }
 0x383   :  { %6712 = vmatprep.subr.bf16.mxu0 %v6711_v58  ;;  %v6499_v58 = vpack.c.bf16 %v2321_v55, %v2315_v38  ;;  %v4669_v38 = vld [vmem:[#allocation20 + $0x1e8] sm:$0xff]  ;;  %v4671_v55 = vld [vmem:[#allocation20 + $0x1f8] sm:$0xff] }
 0x384   :  { %6490 = vmatpush1.bf16.msra.mxu1 %v6489_v27  ;;  %v2327_v27 = vld [vmem:[#allocation14 + $0x12e8] sm:$0xff] }
 0x385   :  { %6492 = vmatprep.subr.bf16.mxu1 %v6491_v22  ;;  %v6723_v22 = vpack.c.bf16 %v4663_v52, %v4661_v30  ;;  %v6731_v30 = vpack.c.bf16 %v4671_v55, %v4669_v38  ;;  %v4668_v52 = vld [vmem:[#allocation20 + $0x1e0] sm:$0xff]  ;;  %v2387_v55 = vld [vmem:[#allocation14 + $0x14c8] sm:$0xff] }
 0x386   :  { %6714 = vmatpush1.bf16.msra.mxu0 %v6713_v34  ;;  %v4667_v34 = vld [vmem:[#allocation20 + $0x1d8] sm:$0xff] }
 0x387   :  { %6716 = vmatprep.subr.bf16.mxu0 %v6715_v15  ;;  %v6503_v15 = vpack.c.bf16 %v2333_v32, %v2327_v27  ;;  %v2350_v27 = vld [vmem:[#allocation14 + $0x13a0] sm:$0xff]  ;;  %v2356_v32 = vld [vmem:[#allocation14 + $0x13d0] sm:$0xff] }
 0x388   :  { %6494 = vmatpush1.bf16.msra.mxu1 %v6493_v16  ;;  %v2339_v16 = vld [vmem:[#allocation14 + $0x1348] sm:$0xff] }
 0x389   :  { %6496 = vmatprep.subr.bf16.mxu1 %v6495_v56  ;;  %v4664_v56 = vld [vmem:[#allocation20 + $0x1c0] sm:$0xff] }
 0x38a   :  { %6718 = vmatpush1.bf16.msra.mxu0 %v6717_v51  ;;  %v2338_v51 = vld [vmem:[#allocation14 + $0x1340] sm:$0xff] }
 0x38b   :  { %4181 = vmatmul.mubr.f32.vlgmr.msra.gmra.mrb[24].mxu1 %v8240_v53  ;;  %6720 = vmatprep.subr.bf16.mxu0 %v6719_v35  ;;  %v6727_v53 = vpack.c.bf16 %v4667_v34, %v4665_v2  ;;  %v2344_v35 = vld [vmem:[#allocation14 + $0x1370] sm:$0xff]  ;;  %v2362_v2 = vld [vmem:[#allocation14 + $0x1400] sm:$0xff] }
 0x38c   :  { %6498 = vmatpush1.bf16.msra.mxu1 %v6497_v7  ;;  %4186 = vmatprep.mubr.f32.mxu1 %v8244_v61  ;;  %v6507_v61 = vpack.c.bf16 %v2345_v19, %v2339_v16  ;;  %v6729_v7 = vpack.c.bf16 %v4666_v47, %v4664_v56  ;;  %v2368_v34 = vld [vmem:[#allocation14 + $0x1430] sm:$0xff]  ;;  %v2374_v56 = vld [vmem:[#allocation14 + $0x1460] sm:$0xff] }
 0x38d   :  { %6500 = vmatprep.subr.bf16.mxu1 %v6499_v58  ;;  %v4670_v58 = vld [vmem:[#allocation20 + $0x1f0] sm:$0xff]  ;;  %v6517_v19 = vpack.c.bf16 %v2368_v34, %v2362_v2  ;;  %v2380_v47 = vld [vmem:[#allocation14 + $0x1490] sm:$0xff] }
 0x38e   :  { %6722 = vmatpush1.bf16.msra.mxu0 %v6721_v12  ;;  %v2363_v12 = vld [vmem:[#allocation14 + $0x1408] sm:$0xff]  ;;  %v6733_v0 = vpack.c.bf16 %v4670_v58, %v4668_v52 }
 0x38f   :  { %6724 = vmatprep.subr.bf16.mxu0 %v6723_v22  ;;  %4187 = vmatmul.mubr.f32.gmra.mrb[26].mxu1 %v8253_v31  ;;  %v6509_v31 = vpack.c.bf16 %v2344_v35, %v2338_v51  ;;  %v2369_v22 = vld [vmem:[#allocation14 + $0x1438] sm:$0xff] }
 0x390   :  { %6502 = vmatpush1.bf16.msra.mxu1 %v6501_v60  ;;  %4192 = vmatprep.mubr.f32.mxu1 %v8258_v59  ;;  %v4675_v59 = vld [vmem:[#allocation20 + $0x218] sm:$0xff]  ;;  %v8604_v60 = vld [vmem:[#allocation16] sm:$0x3f] }
 0x391   :  { %6504 = vmatprep.subr.bf16.mxu1 %v6503_v15  ;;  %v6735_v48 = vpack.c.bf16 %v4675_v59, %v4673_v10  ;;  %v8607_v15 = vld [vmem:[#allocation17] sm:$0x3f]  ;;  %v8611_v16 = vrot.slane %v8604_v60, %v7807_v42  ;;  %v2392_v10 = vld [vmem:[#allocation14 + $0x14f0] sm:$0xff] }
 0x392   :  { %6726 = vmatpush1.bf16.msra.mxu0 %v6725_v18  ;;  %v8621_v18 = vrot.slane %v8607_v15, %v7807_v42  ;;  %v8625_v38 = vrot.slane %v8607_v15, %v7781_v11 }
 0x393   :  { %6728 = vmatprep.subr.bf16.mxu0 %v6727_v53  ;;  %4193 = vmatmul.mubr.f32.gmra.mrb[28].mxu1 %v8267_v24  ;;  %v6513_v24 = vpack.c.bf16 %v2356_v32, %v2350_v27  ;;  %v6519_v53 = vpack.c.bf16 %v2381_v8, %v2375_v45  ;;  %v2399_v27 = vld [vmem:[#allocation14 + $0x1528] sm:$0xff]  ;;  %v2405_v32 = vld [vmem:[#allocation14 + $0x1558] sm:$0xff] }
 0x394   :  { %6506 = vmatpush1.bf16.msra.mxu1 %v6505_v3  ;;  %4198 = vmatprep.mubr.f32.mxu1 %v8271_v6  ;;  %v6515_v6 = vpack.c.bf16 %v2369_v22, %v2363_v12  ;;  %v4677_v45 = vld [vmem:[#allocation20 + $0x228] sm:$0xff]  ;;  %v4679_v8 = vld [vmem:[#allocation20 + $0x238] sm:$0xff] }
 0x395   :  { %6508 = vmatprep.subr.bf16.mxu1 %v6507_v61  ;;  %v2393_v61 = vld [vmem:[#allocation14 + $0x14f8] sm:$0xff] }
 0x396   :  { %6730 = vmatpush1.bf16.msra.mxu0 %v6729_v7  ;;  %v6521_v7 = vpack.c.bf16 %v2380_v47, %v2374_v56  ;;  %v6523_v58 = vpack.c.bf16 %v2393_v61, %v2387_v55  ;;  %v2398_v56 = vld [vmem:[#allocation14 + $0x1520] sm:$0xff]  ;;  %v2404_v47 = vld [vmem:[#allocation14 + $0x1550] sm:$0xff] }
 0x397   :  { %6732 = vmatprep.subr.bf16.mxu0 %v6731_v30  ;;  %4199 = vmatmul.mubr.f32.gmra.mrb[30].mxu1 %v8275_v43  ;;  %v8613_v43 = vld [vmem:[#allocation19] sm:$0x3f] }
 0x398   :  { %6510 = vmatpush1.bf16.msra.mxu1 %v6509_v31  ;;  %4269 = vmatprep.mubr.f32.mxu1 %v8278_v14  ;;  %v8617_v14 = vrot.slane %v8604_v60, %v7781_v11  ;;  %v8630_v35 = vrot.slane %v8613_v43, %v7807_v42  ;;  %v8635_v30 = vrot.slane %v8613_v43, %v7781_v11  ;;  %v2386_v31 = vld [vmem:[#allocation14 + $0x14c0] sm:$0xff] }
 0x399   :  { %6512 = vmatprep.subr.bf16.mxu1 %v6511_v50  ;;  %v6525_v2 = vpack.c.bf16 %v2392_v10, %v2386_v31 }
 0x39a   :  { %6734 = vmatpush1.bf16.msra.mxu0 %v6733_v0 }
 0x39b   :  { %6736 = vmatprep.subr.bf16.mxu0 %v6735_v48  ;;  %v4672_v48 = vld [vmem:[#allocation20 + $0x200] sm:$0xff] }
 0x39c   :  { %6514 = vmatpush1.bf16.msra.mxu1 %v6513_v24  ;;  %v4674_v24 = vld [vmem:[#allocation20 + $0x210] sm:$0xff] }
 0x39d   :  { %6516 = vmatprep.subr.bf16.mxu1 %v6515_v6 }
 0x39e   :  { %v3381_v3 = vpop.f32.mrb[16].mxu1 }
 0x39f   :  { %v6879_v51 = vadd.f32 %v3381_v3, %v8611_v16  ;;  %v3383_v1 = vpop.f32.mrb[17].mxu1 }
 0x3a0   :  { %v6880_v28 = vadd.f32 %v3383_v1, %v8617_v14  ;;  %6518 = vmatpush1.bf16.msra.mxu1 %v6517_v19  ;;  %v2417_v1 = vld [vmem:[#allocation14 + $0x15b8] sm:$0xff] }
 0x3a1   :  { %v4504_v52 = vmul.f32 %v6879_v51, %v8621_v18  ;;  %6520 = vmatprep.subr.bf16.mxu1 %v6519_v53  ;;  %v6527_v53 = vpack.c.bf16 %v2405_v32, %v2399_v27  ;;  %v2411_v51 = vld [vmem:[#allocation14 + $0x1588] sm:$0xff]  ;;  %v6529_v27 = vpack.c.bf16 %v2404_v47, %v2398_v56 }
 0x3a2   :  { %v4505_v59 = vmul.f32 %v6880_v28, %v8625_v38  ;;  %v3387_v50 = vpop.f32.mrb[18].mxu1  ;;  %v6737_v28 = vpack.c.bf16 %v4674_v24, %v4672_v48  ;;  %v2410_v24 = vld [vmem:[#allocation14 + $0x1580] sm:$0xff] }
 0x3a3   :  { %v4560_v12 = vadd.f32 %v8630_v35, %v4504_v52  ;;  %v6881_v22 = vadd.f32 %v3387_v50, %v8611_v16  ;;  %v3389_v0 = vpop.f32.mrb[19].mxu1  ;;  %v4676_v50 = vld [vmem:[#allocation20 + $0x220] sm:$0xff] }
 0x3a4   :  { %v6882_v6 = vadd.f32 %v3389_v0, %v8617_v14  ;;  %6522 = vmatpush1.bf16.msra.mxu1 %v6521_v7  ;;  %v4561_v34 = vadd.f32 %v8635_v30, %v4505_v59  ;;  %v6739_v59 = vpack.c.bf16 %v4679_v8, %v4677_v45  ;;  %v4681_v0 = vld [vmem:[#allocation20 + $0x248] sm:$0xff] }
 0x3a5   :  { %v4510_v19 = vmul.f32 %v6881_v22, %v8621_v18  ;;  %6524 = vmatprep.subr.bf16.mxu1 %v6523_v58  ;;  %v4584_v52 = vmax.f32 %v4560_v12, 0.0  ;;  %v4678_v22 = vld [vmem:[#allocation20 + $0x230] sm:$0xff]  ;;  %v6531_v12 = vpack.c.bf16 %v2417_v1, %v2411_v51 }
 0x3a6   :  { %v4511_v3 = vmul.f32 %v6882_v6, %v8625_v38  ;;  %v3393_v55 = vpop.f32.mrb[20].mxu1  ;;  %v4585_v61 = vmax.f32 %v4561_v34, 0.0  ;;  %v4683_v6 = vld [vmem:[#allocation20 + $0x258] sm:$0xff]  ;;  %v4682_v51 = vld [vmem:[#allocation20 + $0x250] sm:$0xff] }
 0x3a7   :  { %v6883_v7 = vadd.f32 %v3393_v55, %v8611_v16  ;;  %v3395_v31 = vpop.f32.mrb[21].mxu1  ;;  %v4566_v10 = vadd.f32 %v8630_v35, %v4510_v19  ;;  %v2416_v34 = vld [vmem:[#allocation14 + $0x15b0] sm:$0xff]  ;;  %v2423_v55 = vld [vmem:[#allocation14 + $0x15e8] sm:$0xff] }
 0x3a8   :  { %v6884_v58 = vadd.f32 %v3395_v31, %v8617_v14  ;;  %6526 = vmatpush1.bf16.msra.mxu1 %v6525_v2  ;;  %4881 = vmatprep.mubr.f32.mxu0 %v4585_v61  ;;  %v4567_v32 = vadd.f32 %v8635_v30, %v4511_v3  ;;  %v2429_v31 = vld [vmem:[#allocation14 + $0x1618] sm:$0xff]  ;;  %v6741_v2 = vpack.c.bf16 %v4678_v22, %v4676_v50  ;;  %v2428_v22 = vld [vmem:[#allocation14 + $0x1610] sm:$0xff] }
 0x3a9   :  { %v4516_v48 = vmul.f32 %v6883_v7, %v8621_v18  ;;  %4882 = vmatmul.mubr.f32.vlgmr.msra.gmra.mrb[16].mxu0 %v4584_v52  ;;  %6528 = vmatprep.subr.bf16.mxu1 %v6527_v53  ;;  %v4590_v3 = vmax.f32 %v4566_v10, 0.0  ;;  %v6743_v52 = vpack.c.bf16 %v4683_v6, %v4681_v0  ;;  %v4680_v53 = vld [vmem:[#allocation20 + $0x240] sm:$0xff]  ;;  %v6533_v7 = vpack.c.bf16 %v2416_v34, %v2410_v24  ;;  %v2422_v10 = vld [vmem:[#allocation14 + $0x15e0] sm:$0xff]  ;;  %v2435_v6 = vld [vmem:[#allocation14 + $0x1648] sm:$0xff] }
 0x3aa   :  { %v4517_v45 = vmul.f32 %v6884_v58, %v8625_v38  ;;  %v3399_v8 = vpop.f32.mrb[22].mxu1  ;;  %v4591_v19 = vmax.f32 %v4567_v32, 0.0  ;;  %6738 = vmatpush1.bf16.msra.mxu0 %v6737_v28  ;;  %v4685_v32 = vld [vmem:[#allocation20 + $0x268] sm:$0xff]  ;;  %v4687_v28 = vld [vmem:[#allocation20 + $0x278] sm:$0xff] }
 0x3ab   :  { %v6885_v56 = vadd.f32 %v3399_v8, %v8611_v16  ;;  %v3401_v47 = vpop.f32.mrb[23].mxu1  ;;  %v4572_v61 = vadd.f32 %v8630_v35, %v4516_v48  ;;  %6740 = vmatprep.subr.bf16.mxu0 %v6739_v59  ;;  %v6535_v16 = vpack.c.bf16 %v2429_v31, %v2423_v55  ;;  %v2441_v48 = vld [vmem:[#allocation14 + $0x1678] sm:$0xff]  ;;  %v6747_v34 = vpack.c.bf16 %v4687_v28, %v4685_v32  ;;  %v4686_v8 = vld [vmem:[#allocation20 + $0x270] sm:$0xff]  ;;  %v4691_v55 = vld [vmem:[#allocation20 + $0x298] sm:$0xff] }
 0x3ac   :  { %v6886_v1 = vadd.f32 %v3401_v47, %v8617_v14  ;;  %6530 = vmatpush1.bf16.msra.mxu1 %v6529_v27  ;;  %4887 = vmatprep.mubr.f32.mxu0 %v4591_v19  ;;  %v4573_v58 = vadd.f32 %v8635_v30, %v4517_v45  ;;  %v6745_v14 = vpack.c.bf16 %v4682_v51, %v4680_v53  ;;  %v4684_v45 = vld [vmem:[#allocation20 + $0x260] sm:$0xff]  ;;  %v4689_v19 = vld [vmem:[#allocation20 + $0x288] sm:$0xff]  ;;  %v2447_v47 = vld [vmem:[#allocation14 + $0x16a8] sm:$0xff] }
 0x3ad   :  { %v4522_v50 = vmul.f32 %v6885_v56, %v8621_v18  ;;  %4888 = vmatmul.mubr.f32.gmra.mrb[18].mxu0 %v4590_v3  ;;  %6532 = vmatprep.subr.bf16.mxu1 %v6531_v12  ;;  %v4596_v27 = vmax.f32 %v4572_v61, 0.0  ;;  %v6537_v18 = vpack.c.bf16 %v2428_v22, %v2422_v10  ;;  %v2434_v31 = vld [vmem:[#allocation14 + $0x1640] sm:$0xff]  ;;  %v2453_v3 = vld [vmem:[#allocation14 + $0x16d8] sm:$0xff]  ;;  %v2452_v28 = vld [vmem:[#allocation14 + $0x16d0] sm:$0xff] }
 0x3ae   :  { %v4523_v59 = vmul.f32 %v6886_v1, %v8625_v38  ;;  %v4597_v0 = vmax.f32 %v4573_v58, 0.0  ;;  %6742 = vmatpush1.bf16.msra.mxu0 %v6741_v2  ;;  %v6539_v38 = vpack.c.bf16 %v2441_v48, %v2435_v6  ;;  %v2440_v2 = vld [vmem:[#allocation14 + $0x1670] sm:$0xff]  ;;  %v4690_v51 = vld [vmem:[#allocation20 + $0x290] sm:$0xff]  ;;  %v4693_v1 = vld [vmem:[#allocation20 + $0x2a8] sm:$0xff]  ;;  %v6543_v58 = vpack.c.bf16 %v2453_v3, %v2447_v47 }
 0x3af   :  { %v4578_v24 = vadd.f32 %v8630_v35, %v4522_v50  ;;  %6744 = vmatprep.subr.bf16.mxu0 %v6743_v52  ;;  %v6749_v35 = vpack.c.bf16 %v4686_v8, %v4684_v45  ;;  %v6751_v52 = vpack.c.bf16 %v4691_v55, %v4689_v19  ;;  %v4688_v53 = vld [vmem:[#allocation20 + $0x280] sm:$0xff]  ;;  %v2446_v32 = vld [vmem:[#allocation14 + $0x16a0] sm:$0xff]  ;;  %v2459_v50 = vld [vmem:[#allocation14 + $0x1708] sm:$0xff] }
 0x3b0   :  { %6534 = vmatpush1.bf16.msra.mxu1 %v6533_v7  ;;  %4893 = vmatprep.mubr.f32.mxu0 %v4597_v0  ;;  %v4579_v12 = vadd.f32 %v8635_v30, %v4523_v59  ;;  %v6541_v30 = vpack.c.bf16 %v2440_v2, %v2434_v31  ;;  %v4695_v7 = vld [vmem:[#allocation20 + $0x2b8] sm:$0xff]  ;;  %v6753_v10 = vpack.c.bf16 %v4690_v51, %v4688_v53  ;;  %v4692_v59 = vld [vmem:[#allocation20 + $0x2a0] sm:$0xff]  ;;  %v4694_v0 = vld [vmem:[#allocation20 + $0x2b0] sm:$0xff] }
 0x3b1   :  { %4894 = vmatmul.mubr.f32.gmra.mrb[20].mxu0 %v4596_v27  ;;  %6536 = vmatprep.subr.bf16.mxu1 %v6535_v16  ;;  %v4602_v61 = vmax.f32 %v4578_v24, 0.0  ;;  %v2465_v16 = vld [vmem:[#allocation14 + $0x1738] sm:$0xff]  ;;  %v6755_v22 = vpack.c.bf16 %v4695_v7, %v4693_v1  ;;  %v6545_v6 = vpack.c.bf16 %v2452_v28, %v2446_v32  ;;  %v2458_v24 = vld [vmem:[#allocation14 + $0x1700] sm:$0xff]  ;;  %v2471_v45 = vld [vmem:[#allocation14 + $0x1768] sm:$0xff] }
 0x3b2   :  { %v4603_v56 = vmax.f32 %v4579_v12, 0.0  ;;  %6746 = vmatpush1.bf16.msra.mxu0 %v6745_v14  ;;  %v4697_v48 = vld [vmem:[#allocation20 + $0x2c8] sm:$0xff]  ;;  %v4699_v14 = vld [vmem:[#allocation20 + $0x2d8] sm:$0xff]  ;;  %v6547_v27 = vpack.c.bf16 %v2465_v16, %v2459_v50  ;;  %v4696_v19 = vld [vmem:[#allocation20 + $0x2c0] sm:$0xff] }
 0x3b3   :  { %6748 = vmatprep.subr.bf16.mxu0 %v6747_v34  ;;  %v2464_v34 = vld [vmem:[#allocation14 + $0x1730] sm:$0xff]  ;;  %v2477_v8 = vld [vmem:[#allocation14 + $0x1798] sm:$0xff]  ;;  %v6759_v12 = vpack.c.bf16 %v4699_v14, %v4697_v48  ;;  %v4698_v55 = vld [vmem:[#allocation20 + $0x2d0] sm:$0xff] }
 0x3b4   :  { %6538 = vmatpush1.bf16.msra.mxu1 %v6537_v18  ;;  %4899 = vmatprep.mubr.f32.mxu0 %v4603_v56  ;;  %v6757_v18 = vpack.c.bf16 %v4694_v0, %v4692_v59  ;;  %v4701_v31 = vld [vmem:[#allocation20 + $0x2e8] sm:$0xff]  ;;  %v4703_v2 = vld [vmem:[#allocation20 + $0x2f8] sm:$0xff]  ;;  %v6551_v56 = vpack.c.bf16 %v2477_v8, %v2471_v45  ;;  %v4700_v51 = vld [vmem:[#allocation20 + $0x2e0] sm:$0xff] }
 0x3b5   :  { %4900 = vmatmul.mubr.f32.gmra.mrb[22].mxu0 %v4602_v61  ;;  %6540 = vmatprep.subr.bf16.mxu1 %v6539_v38  ;;  %v6549_v38 = vpack.c.bf16 %v2464_v34, %v2458_v24  ;;  %v2470_v47 = vld [vmem:[#allocation14 + $0x1760] sm:$0xff]  ;;  %v2476_v3 = vld [vmem:[#allocation14 + $0x1790] sm:$0xff]  ;;  %v2489_v61 = vld [vmem:[#allocation14 + $0x17f8] sm:$0xff]  ;;  %v6763_v53 = vpack.c.bf16 %v4703_v2, %v4701_v31 }
 0x3b6   :  { %6750 = vmatpush1.bf16.msra.mxu0 %v6749_v35  ;;  %v2483_v35 = vld [vmem:[#allocation14 + $0x17c8] sm:$0xff]  ;;  %v6553_v1 = vpack.c.bf16 %v2476_v3, %v2470_v47  ;;  %v4705_v7 = vld [vmem:[#allocation20 + $0x308] sm:$0xff]  ;;  %v2488_v50 = vld [vmem:[#allocation14 + $0x17f0] sm:$0xff] }
 0x3b7   :  { %6752 = vmatprep.subr.bf16.mxu0 %v6751_v52  ;;  %v6761_v52 = vpack.c.bf16 %v4698_v55, %v4696_v19  ;;  %v6555_v32 = vpack.c.bf16 %v2489_v61, %v2483_v35  ;;  %v2482_v28 = vld [vmem:[#allocation14 + $0x17c0] sm:$0xff]  ;;  %v2495_v16 = vld [vmem:[#allocation14 + $0x1828] sm:$0xff]  ;;  %v4704_v0 = vld [vmem:[#allocation20 + $0x300] sm:$0xff] }
 0x3b8   :  { %6542 = vmatpush1.bf16.msra.mxu1 %v6541_v30  ;;  %v4702_v30 = vld [vmem:[#allocation20 + $0x2f0] sm:$0xff]  ;;  %v6557_v48 = vpack.c.bf16 %v2488_v50, %v2482_v28  ;;  %v4709_v14 = vld [vmem:[#allocation20 + $0x328] sm:$0xff]  ;;  %v2500_v45 = vld [vmem:[#allocation14 + $0x1850] sm:$0xff] }
 0x3b9   :  { %6544 = vmatprep.subr.bf16.mxu1 %v6543_v58  ;;  %v4707_v58 = vld [vmem:[#allocation20 + $0x318] sm:$0xff]  ;;  %v2494_v34 = vld [vmem:[#allocation14 + $0x1820] sm:$0xff]  ;;  %v4708_v55 = vld [vmem:[#allocation20 + $0x320] sm:$0xff] }
 0x3ba   :  { %6754 = vmatpush1.bf16.msra.mxu0 %v6753_v10  ;;  %v2501_v10 = vld [vmem:[#allocation14 + $0x1858] sm:$0xff]  ;;  %v6767_v59 = vpack.c.bf16 %v4707_v58, %v4705_v7  ;;  %v2507_v8 = vld [vmem:[#allocation14 + $0x1888] sm:$0xff]  ;;  %v6561_v31 = vpack.c.bf16 %v2500_v45, %v2494_v34  ;;  %v2506_v3 = vld [vmem:[#allocation14 + $0x1880] sm:$0xff] }
 0x3bb   :  { %6756 = vmatprep.subr.bf16.mxu0 %v6755_v22  ;;  %v6765_v22 = vpack.c.bf16 %v4702_v30, %v4700_v51  ;;  %v6559_v24 = vpack.c.bf16 %v2501_v10, %v2495_v16  ;;  %v4713_v2 = vld [vmem:[#allocation20 + $0x348] sm:$0xff]  ;;  %v2512_v35 = vld [vmem:[#allocation14 + $0x18b0] sm:$0xff]  ;;  %v2519_v61 = vld [vmem:[#allocation14 + $0x18e8] sm:$0xff] }
 0x3bc   :  { %6546 = vmatpush1.bf16.msra.mxu1 %v6545_v6  ;;  %v4706_v6 = vld [vmem:[#allocation20 + $0x310] sm:$0xff]  ;;  %v4712_v30 = vld [vmem:[#allocation20 + $0x340] sm:$0xff]  ;;  %v6565_v7 = vpack.c.bf16 %v2512_v35, %v2506_v3  ;;  %v4717_v58 = vld [vmem:[#allocation20 + $0x368] sm:$0xff] }
 0x3bd   :  { %6548 = vmatprep.subr.bf16.mxu1 %v6547_v27  ;;  %v4711_v27 = vld [vmem:[#allocation20 + $0x338] sm:$0xff]  ;;  %v2518_v50 = vld [vmem:[#allocation14 + $0x18e0] sm:$0xff]  ;;  %v2561_v3 = vld [vmem:[#allocation14 + $0x1a38] sm:$0xff] }
 0x3be   :  { %6758 = vmatpush1.bf16.msra.mxu0 %v6757_v18  ;;  %v2513_v18 = vld [vmem:[#allocation14 + $0x18b8] sm:$0xff]  ;;  %v6771_v19 = vpack.c.bf16 %v4711_v27, %v4709_v14  ;;  %v2524_v16 = vld [vmem:[#allocation14 + $0x1910] sm:$0xff]  ;;  %v2531_v10 = vld [vmem:[#allocation14 + $0x1948] sm:$0xff] }
 0x3bf   :  { %6760 = vmatprep.subr.bf16.mxu0 %v6759_v12  ;;  %v6769_v12 = vpack.c.bf16 %v4706_v6, %v4704_v0  ;;  %v6563_v47 = vpack.c.bf16 %v2513_v18, %v2507_v8  ;;  %v4716_v0 = vld [vmem:[#allocation20 + $0x360] sm:$0xff]  ;;  %v4718_v6 = vld [vmem:[#allocation20 + $0x370] sm:$0xff]  ;;  %v4723_v14 = vld [vmem:[#allocation20 + $0x398] sm:$0xff] }
 0x3c0   :  { %6550 = vmatpush1.bf16.msra.mxu1 %v6549_v38  ;;  %v4710_v38 = vld [vmem:[#allocation20 + $0x330] sm:$0xff]  ;;  %v2536_v34 = vld [vmem:[#allocation14 + $0x1970] sm:$0xff]  ;;  %v2549_v8 = vld [vmem:[#allocation14 + $0x19d8] sm:$0xff]  ;;  %v6781_v18 = vpack.c.bf16 %v4718_v6, %v4716_v0 }
 0x3c1   :  { %6552 = vmatprep.subr.bf16.mxu1 %v6551_v56  ;;  %v4715_v56 = vld [vmem:[#allocation20 + $0x358] sm:$0xff] }
 0x3c2   :  { %6762 = vmatpush1.bf16.msra.mxu0 %v6761_v52  ;;  %v2525_v52 = vld [vmem:[#allocation14 + $0x1918] sm:$0xff]  ;;  %v6775_v51 = vpack.c.bf16 %v4715_v56, %v4713_v2  ;;  %v2543_v45 = vld [vmem:[#allocation14 + $0x19a8] sm:$0xff]  ;;  %v2542_v2 = vld [vmem:[#allocation14 + $0x19a0] sm:$0xff] }
 0x3c3   :  { %6764 = vmatprep.subr.bf16.mxu0 %v6763_v53  ;;  %v6773_v53 = vpack.c.bf16 %v4710_v38, %v4708_v55  ;;  %v6567_v28 = vpack.c.bf16 %v2525_v52, %v2519_v61  ;;  %v4727_v38 = vld [vmem:[#allocation20 + $0x3b8] sm:$0xff]  ;;  %v4724_v61 = vld [vmem:[#allocation20 + $0x3a0] sm:$0xff]  ;;  %v4726_v52 = vld [vmem:[#allocation20 + $0x3b0] sm:$0xff] }
 0x3c4   :  { %6554 = vmatpush1.bf16.msra.mxu1 %v6553_v1  ;;  %v4714_v1 = vld [vmem:[#allocation20 + $0x350] sm:$0xff]  ;;  %v2548_v56 = vld [vmem:[#allocation14 + $0x19d0] sm:$0xff] }
 0x3c5   :  { %6556 = vmatprep.subr.bf16.mxu1 %v6555_v32  ;;  %v4719_v32 = vld [vmem:[#allocation20 + $0x378] sm:$0xff] }
 0x3c6   :  { %6766 = vmatpush1.bf16.msra.mxu0 %v6765_v22  ;;  %v2537_v22 = vld [vmem:[#allocation14 + $0x1978] sm:$0xff]  ;;  %v2572_v0 = vld [vmem:[#allocation14 + $0x1a90] sm:$0xff]  ;;  %v2579_v6 = vld [vmem:[#allocation14 + $0x1ac8] sm:$0xff] }
 0x3c7   :  { %6768 = vmatprep.subr.bf16.mxu0 %v6767_v59  ;;  %v6777_v59 = vpack.c.bf16 %v4714_v1, %v4712_v30  ;;  %v6571_v27 = vpack.c.bf16 %v2537_v22, %v2531_v10  ;;  %v2554_v1 = vld [vmem:[#allocation14 + $0x1a00] sm:$0xff] }
 0x3c8   :  { %6558 = vmatpush1.bf16.msra.mxu1 %v6557_v48  ;;  %v6569_v48 = vpack.c.bf16 %v2524_v16, %v2518_v50  ;;  %v4728_v50 = vld [vmem:[#allocation20 + $0x3c0] sm:$0xff]  ;;  %v4730_v16 = vld [vmem:[#allocation20 + $0x3d0] sm:$0xff]  ;;  %v4733_v22 = vld [vmem:[#allocation20 + $0x3e8] sm:$0xff] }
 0x3c9   :  { %6560 = vmatprep.subr.bf16.mxu1 %v6559_v24  ;;  %v2530_v24 = vld [vmem:[#allocation14 + $0x1940] sm:$0xff] }
 0x3ca   :  { %6770 = vmatpush1.bf16.msra.mxu0 %v6769_v12  ;;  %v4720_v12 = vld [vmem:[#allocation20 + $0x380] sm:$0xff]  ;;  %v6573_v55 = vpack.c.bf16 %v2536_v34, %v2530_v24  ;;  %v4734_v24 = vld [vmem:[#allocation20 + $0x3f0] sm:$0xff] }
 0x3cb   :  { %4270 = vmatmul.mubr.f32.vlgmr.msra.gmra.mrb[24].mxu1 %v8370_v63  ;;  %6772 = vmatprep.subr.bf16.mxu0 %v6771_v19  ;;  %v6779_v63 = vpack.c.bf16 %v4719_v32, %v4717_v58  ;;  %v4722_v19 = vld [vmem:[#allocation20 + $0x390] sm:$0xff]  ;;  %v2573_v32 = vld [vmem:[#allocation14 + $0x1a98] sm:$0xff] }
 0x3cc   :  { %6562 = vmatpush1.bf16.msra.mxu1 %v6561_v31  ;;  %4275 = vmatprep.mubr.f32.mxu1 %v8374_v21  ;;  %v4721_v21 = vld [vmem:[#allocation20 + $0x388] sm:$0xff]  ;;  %v6575_v31 = vpack.c.bf16 %v2549_v8, %v2543_v45  ;;  %v6785_v35 = vpack.c.bf16 %v4722_v19, %v4720_v12  ;;  %v2567_v58 = vld [vmem:[#allocation14 + $0x1a68] sm:$0xff]  ;;  %v2584_v12 = vld [vmem:[#allocation14 + $0x1af0] sm:$0xff] }
 0x3cd   :  { %6564 = vmatprep.subr.bf16.mxu1 %v6563_v47  ;;  %v2555_v47 = vld [vmem:[#allocation14 + $0x1a08] sm:$0xff]  ;;  %v4737_v45 = vld [vmem:[#allocation20 + $0x408] sm:$0xff] }
 0x3ce   :  { %6774 = vmatpush1.bf16.msra.mxu0 %v6773_v53  ;;  %v6577_v53 = vpack.c.bf16 %v2548_v56, %v2542_v2  ;;  %v6579_v30 = vpack.c.bf16 %v2561_v3, %v2555_v47  ;;  %v4739_v8 = vld [vmem:[#allocation20 + $0x418] sm:$0xff]  ;;  %v2590_v56 = vld [vmem:[#allocation14 + $0x1b20] sm:$0xff] }
 0x3cf   :  { %4276 = vmatmul.mubr.f32.gmra.mrb[26].mxu1 %v8383_v20  ;;  %6776 = vmatprep.subr.bf16.mxu0 %v6775_v51  ;;  %v6783_v20 = vpack.c.bf16 %v4723_v14, %v4721_v21  ;;  %v4731_v51 = vld [vmem:[#allocation20 + $0x3d8] sm:$0xff]  ;;  %v6793_v21 = vpack.c.bf16 %v4730_v16, %v4728_v50  ;;  %v2626_v16 = vld [vmem:[#allocation14 + $0x1c40] sm:$0xff] }
 0x3d0   :  { %6566 = vmatpush1.bf16.msra.mxu1 %v6565_v7  ;;  %4281 = vmatprep.mubr.f32.mxu1 %v8388_v17  ;;  %v4725_v17 = vld [vmem:[#allocation20 + $0x3a8] sm:$0xff]  ;;  %v2560_v7 = vld [vmem:[#allocation14 + $0x1a30] sm:$0xff]  ;;  %v2591_v19 = vld [vmem:[#allocation14 + $0x1b28] sm:$0xff] }
 0x3d1   :  { %6568 = vmatprep.subr.bf16.mxu1 %v6567_v28  ;;  %v6789_v28 = vpack.c.bf16 %v4726_v52, %v4724_v61  ;;  %v6581_v10 = vpack.c.bf16 %v2560_v7, %v2554_v1  ;;  %v2596_v47 = vld [vmem:[#allocation14 + $0x1b50] sm:$0xff]  ;;  %v2603_v3 = vld [vmem:[#allocation14 + $0x1b88] sm:$0xff]  ;;  %v2602_v52 = vld [vmem:[#allocation14 + $0x1b80] sm:$0xff] }
 0x3d2   :  { %6778 = vmatpush1.bf16.msra.mxu0 %v6777_v59  ;;  %v4735_v59 = vld [vmem:[#allocation20 + $0x3f8] sm:$0xff]  ;;  %v2614_v7 = vld [vmem:[#allocation14 + $0x1be0] sm:$0xff] }
 0x3d3   :  { %4282 = vmatmul.mubr.f32.gmra.mrb[28].mxu1 %v8397_v13  ;;  %6780 = vmatprep.subr.bf16.mxu0 %v6779_v63  ;;  %v6787_v13 = vpack.c.bf16 %v4727_v38, %v4725_v17  ;;  %v2566_v63 = vld [vmem:[#allocation14 + $0x1a60] sm:$0xff]  ;;  %v6795_v14 = vpack.c.bf16 %v4735_v59, %v4733_v22  ;;  %v6799_v38 = vpack.c.bf16 %v4739_v8, %v4737_v45  ;;  %v2639_v22 = vld [vmem:[#allocation14 + $0x1ca8] sm:$0xff]  ;;  %v2645_v59 = vld [vmem:[#allocation14 + $0x1cd8] sm:$0xff] }
 0x3d4   :  { %6570 = vmatpush1.bf16.msra.mxu1 %v6569_v48  ;;  %4287 = vmatprep.mubr.f32.mxu1 %v8401_v54  ;;  %v4729_v54 = vld [vmem:[#allocation20 + $0x3c8] sm:$0xff]  ;;  %v6585_v34 = vpack.c.bf16 %v2572_v0, %v2566_v63  ;;  %v6607_v63 = vpack.c.bf16 %v2645_v59, %v2639_v22  ;;  %v2663_v45 = vld [vmem:[#allocation14 + $0x1d68] sm:$0xff] }
 0x3d5   :  { %6572 = vmatprep.subr.bf16.mxu1 %v6571_v27  ;;  %v2585_v48 = vld [vmem:[#allocation14 + $0x1af8] sm:$0xff]  ;;  %v2638_v0 = vld [vmem:[#allocation14 + $0x1ca0] sm:$0xff] }
 0x3d6   :  { %6782 = vmatpush1.bf16.msra.mxu0 %v6781_v18  ;;  %v4732_v27 = vld [vmem:[#allocation20 + $0x3e0] sm:$0xff]  ;;  %v6587_v18 = vpack.c.bf16 %v2585_v48, %v2579_v6  ;;  %v2651_v48 = vld [vmem:[#allocation14 + $0x1d08] sm:$0xff] }
 0x3d7   :  { %4288 = vmatmul.mubr.f32.gmra.mrb[30].mxu1 %v8405_v39  ;;  %6784 = vmatprep.subr.bf16.mxu0 %v6783_v20  ;;  %v6791_v39 = vpack.c.bf16 %v4731_v51, %v4729_v54  ;;  %v2578_v20 = vld [vmem:[#allocation14 + $0x1ac0] sm:$0xff]  ;;  %v6797_v17 = vpack.c.bf16 %v4734_v24, %v4732_v27  ;;  %v2615_v54 = vld [vmem:[#allocation14 + $0x1be8] sm:$0xff]  ;;  %v2621_v51 = vld [vmem:[#allocation14 + $0x1c18] sm:$0xff] }
 0x3d8   :  { %6574 = vmatpush1.bf16.msra.mxu1 %v6573_v55  ;;  %4358 = vmatprep.mubr.f32.mxu1 %v8408_v57  ;;  %v6583_v57 = vpack.c.bf16 %v2573_v32, %v2567_v58  ;;  %v2597_v55 = vld [vmem:[#allocation14 + $0x1b58] sm:$0xff]  ;;  %v6599_v1 = vpack.c.bf16 %v2621_v51, %v2615_v54  ;;  %v2620_v58 = vld [vmem:[#allocation14 + $0x1c10] sm:$0xff]  ;;  %v2627_v32 = vld [vmem:[#allocation14 + $0x1c48] sm:$0xff] }
 0x3d9   :  { %6576 = vmatprep.subr.bf16.mxu1 %v6575_v31  ;;  %v6589_v31 = vpack.c.bf16 %v2584_v12, %v2578_v20  ;;  %v6591_v2 = vpack.c.bf16 %v2597_v55, %v2591_v19  ;;  %v2644_v6 = vld [vmem:[#allocation14 + $0x1cd0] sm:$0xff]  ;;  %v2650_v24 = vld [vmem:[#allocation14 + $0x1d00] sm:$0xff]  ;;  %v2669_v8 = vld [vmem:[#allocation14 + $0x1d98] sm:$0xff] }
 0x3da   :  { %6786 = vmatpush1.bf16.msra.mxu0 %v6785_v35  ;;  %v2609_v35 = vld [vmem:[#allocation14 + $0x1bb8] sm:$0xff]  ;;  %v6615_v20 = vpack.c.bf16 %v2669_v8, %v2663_v45  ;;  %v2662_v12 = vld [vmem:[#allocation14 + $0x1d60] sm:$0xff]  ;;  %v2668_v19 = vld [vmem:[#allocation14 + $0x1d90] sm:$0xff] }
 0x3db   :  { %6788 = vmatprep.subr.bf16.mxu0 %v6787_v13  ;;  %v6593_v13 = vpack.c.bf16 %v2596_v47, %v2590_v56  ;;  %v6595_v61 = vpack.c.bf16 %v2609_v35, %v2603_v3  ;;  %v2675_v55 = vld [vmem:[#allocation14 + $0x1dc8] sm:$0xff]  ;;  %v2680_v56 = vld [vmem:[#allocation14 + $0x1df0] sm:$0xff]  ;;  %v2693_v3 = vld [vmem:[#allocation14 + $0x1e58] sm:$0xff] }
 0x3dc   :  { %6578 = vmatpush1.bf16.msra.mxu1 %v6577_v53  ;;  %v2608_v53 = vld [vmem:[#allocation14 + $0x1bb0] sm:$0xff]  ;;  %v2687_v47 = vld [vmem:[#allocation14 + $0x1e28] sm:$0xff]  ;;  %v2705_v54 = vld [vmem:[#allocation14 + $0x1eb8] sm:$0xff] }
 0x3dd   :  { %6580 = vmatprep.subr.bf16.mxu1 %v6579_v30  ;;  %v6597_v30 = vpack.c.bf16 %v2608_v53, %v2602_v52  ;;  %v2692_v52 = vld [vmem:[#allocation14 + $0x1e50] sm:$0xff]  ;;  %v2699_v53 = vld [vmem:[#allocation14 + $0x1e88] sm:$0xff]  ;;  %v2729_v22 = vld [vmem:[#allocation14 + $0x1f78] sm:$0xff] }
 0x3de   :  { %6790 = vmatpush1.bf16.msra.mxu0 %v6789_v28  ;;  %v2633_v28 = vld [vmem:[#allocation14 + $0x1c78] sm:$0xff]  ;;  %v2759_v45 = vld [vmem:[#allocation14 + $0x2068] sm:$0xff] }
 0x3df   :  { %6792 = vmatprep.subr.bf16.mxu0 %v6791_v39  ;;  %v6601_v39 = vpack.c.bf16 %v2620_v58, %v2614_v7  ;;  %v6603_v50 = vpack.c.bf16 %v2633_v28, %v2627_v32  ;;  %v2704_v7 = vld [vmem:[#allocation14 + $0x1eb0] sm:$0xff]  ;;  %v2711_v58 = vld [vmem:[#allocation14 + $0x1ee8] sm:$0xff]  ;;  %v2717_v32 = vld [vmem:[#allocation14 + $0x1f18] sm:$0xff] }
 0x3e0   :  { %6582 = vmatpush1.bf16.msra.mxu1 %v6581_v10  ;;  %v2632_v10 = vld [vmem:[#allocation14 + $0x1c70] sm:$0xff]  ;;  %v2765_v8 = vld [vmem:[#allocation14 + $0x2098] sm:$0xff] }
 0x3e1   :  { %6584 = vmatprep.subr.bf16.mxu1 %v6583_v57  ;;  %v6605_v57 = vpack.c.bf16 %v2632_v10, %v2626_v16  ;;  %v2716_v16 = vld [vmem:[#allocation14 + $0x1f10] sm:$0xff]  ;;  %v2723_v10 = vld [vmem:[#allocation14 + $0x1f48] sm:$0xff] }
 0x3e2   :  { %6794 = vmatpush1.bf16.msra.mxu0 %v6793_v21  ;;  %v2657_v21 = vld [vmem:[#allocation14 + $0x1d38] sm:$0xff] }
 0x3e3   :  { %6796 = vmatprep.subr.bf16.mxu0 %v6795_v14  ;;  %v6609_v14 = vpack.c.bf16 %v2644_v6, %v2638_v0  ;;  %v6611_v27 = vpack.c.bf16 %v2657_v21, %v2651_v48  ;;  %v2735_v0 = vld [vmem:[#allocation14 + $0x1fa8] sm:$0xff]  ;;  %v2741_v6 = vld [vmem:[#allocation14 + $0x1fd8] sm:$0xff]  ;;  %v2734_v21 = vld [vmem:[#allocation14 + $0x1fa0] sm:$0xff] }
 0x3e4   :  { %6586 = vmatpush1.bf16.msra.mxu1 %v6585_v34  ;;  %v2656_v34 = vld [vmem:[#allocation14 + $0x1d30] sm:$0xff]  ;;  %v6639_v48 = vpack.c.bf16 %v2741_v6, %v2735_v0 }
 0x3e5   :  { %6588 = vmatprep.subr.bf16.mxu1 %v6587_v18  ;;  %v6613_v18 = vpack.c.bf16 %v2656_v34, %v2650_v24  ;;  %v2752_v34 = vld [vmem:[#allocation14 + $0x2030] sm:$0xff] }
 0x3e6   :  { %6798 = vmatpush1.bf16.msra.mxu0 %v6797_v17  ;;  %v2681_v17 = vld [vmem:[#allocation14 + $0x1df8] sm:$0xff] }
 0x3e7   :  { %6800 = vmatprep.subr.bf16.mxu0 %v6799_v38  ;;  %v6617_v38 = vpack.c.bf16 %v2668_v19, %v2662_v12  ;;  %v2764_v12 = vld [vmem:[#allocation14 + $0x2090] sm:$0xff]  ;;  %v2771_v19 = vld [vmem:[#allocation14 + $0x20c8] sm:$0xff] }
 0x3e8   :  { %6590 = vmatpush1.bf16.msra.mxu1 %v6589_v31  ;;  %v6619_v31 = vpack.c.bf16 %v2681_v17, %v2675_v55  ;;  %v2777_v55 = vld [vmem:[#allocation14 + $0x20f8] sm:$0xff] }
 0x3e9   :  { %6592 = vmatprep.subr.bf16.mxu1 %v6591_v2  ;;  %v2674_v2 = vld [vmem:[#allocation14 + $0x1dc0] sm:$0xff]  ;;  %v6651_v17 = vpack.c.bf16 %v2777_v55, %v2771_v19  ;;  %v4743_v19 = vld [vmem:[#allocation20 + $0x438] sm:$0xff] }
 0x3ea   :  { %v6621_v35 = vpack.c.bf16 %v2680_v56, %v2674_v2  ;;  %v2789_v2 = vld [vmem:[#allocation14 + $0x2158] sm:$0xff] }
 0x3ec   :  { %6594 = vmatpush1.bf16.msra.mxu1 %v6593_v13  ;;  %v6623_v13 = vpack.c.bf16 %v2693_v3, %v2687_v47  ;;  %v2782_v3 = vld [vmem:[#allocation14 + $0x2120] sm:$0xff] }
 0x3ed   :  { %6596 = vmatprep.subr.bf16.mxu1 %v6595_v61  ;;  %v2686_v61 = vld [vmem:[#allocation14 + $0x1e20] sm:$0xff] }
 0x3ee   :  { %v6625_v51 = vpack.c.bf16 %v2692_v52, %v2686_v61  ;;  %v2801_v61 = vld [vmem:[#allocation14 + $0x21b8] sm:$0xff] }
 0x3f0   :  { %6598 = vmatpush1.bf16.msra.mxu1 %v6597_v30  ;;  %v6627_v30 = vpack.c.bf16 %v2705_v54, %v2699_v53  ;;  %v2794_v54 = vld [vmem:[#allocation14 + $0x2180] sm:$0xff] }
 0x3f1   :  { %6600 = vmatprep.subr.bf16.mxu1 %v6599_v1  ;;  %v2698_v1 = vld [vmem:[#allocation14 + $0x1e80] sm:$0xff] }
 0x3f2   :  { %v6629_v28 = vpack.c.bf16 %v2704_v7, %v2698_v1  ;;  %v2813_v1 = vld [vmem:[#allocation14 + $0x2218] sm:$0xff] }
 0x3f3   :  { %v8874_v7 = vld [vmem:[#allocation33_spill] sm:$0xff] }
 0x3f4   :  { %6602 = vmatpush1.bf16.msra.mxu1 %v6601_v39  ;;  %v6631_v39 = vpack.c.bf16 %v2717_v32, %v2711_v58  ;;  %v8678_v58 = vrot.slane %v8604_v60, %v8874_v7 }
 0x3f5   :  { %6604 = vmatprep.subr.bf16.mxu1 %v6603_v50  ;;  %v2710_v50 = vld [vmem:[#allocation14 + $0x1ee0] sm:$0xff] }
 0x3f6   :  { %v6633_v59 = vpack.c.bf16 %v2716_v16, %v2710_v50  ;;  %v2806_v16 = vld [vmem:[#allocation14 + $0x21e0] sm:$0xff] }
 0x3f8   :  { %6606 = vmatpush1.bf16.msra.mxu1 %v6605_v57  ;;  %v6635_v57 = vpack.c.bf16 %v2729_v22, %v2723_v10  ;;  %v2812_v10 = vld [vmem:[#allocation14 + $0x2210] sm:$0xff]  ;;  %v8686_v22 = vrot.slane %v8607_v15, %v8874_v7 }
 0x3f9   :  { %6608 = vmatprep.subr.bf16.mxu1 %v6607_v63  ;;  %v2722_v63 = vld [vmem:[#allocation14 + $0x1f40] sm:$0xff] }
 0x3fc   :  { %6610 = vmatpush1.bf16.msra.mxu1 %v6609_v14  ;;  %v2747_v14 = vld [vmem:[#allocation14 + $0x2008] sm:$0xff] }
 0x3fd   :  { %6612 = vmatprep.subr.bf16.mxu1 %v6611_v27  ;;  %v2753_v27 = vld [vmem:[#allocation14 + $0x2038] sm:$0xff] }
 0x3fe   :  { %v6643_v24 = vpack.c.bf16 %v2753_v27, %v2747_v14  ;;  %v2824_v14 = vld [vmem:[#allocation14 + $0x2270] sm:$0xff] }
 0x400   :  { %6614 = vmatpush1.bf16.msra.mxu1 %v6613_v18  ;;  %v6647_v18 = vpack.c.bf16 %v2765_v8, %v2759_v45 }
 0x401   :  { %6616 = vmatprep.subr.bf16.mxu1 %v6615_v20  ;;  %v2758_v20 = vld [vmem:[#allocation14 + $0x2060] sm:$0xff] }
 0x404   :  { %6618 = vmatpush1.bf16.msra.mxu1 %v6617_v38  ;;  %v2770_v38 = vld [vmem:[#allocation14 + $0x20c0] sm:$0xff] }
 0x405   :  { %6620 = vmatprep.subr.bf16.mxu1 %v6619_v31  ;;  %v2783_v31 = vld [vmem:[#allocation14 + $0x2128] sm:$0xff] }
 0x406   :  { %v6655_v47 = vpack.c.bf16 %v2789_v2, %v2783_v31 }
 0x408   :  { %6622 = vmatpush1.bf16.msra.mxu1 %v6621_v35  ;;  %v2788_v35 = vld [vmem:[#allocation14 + $0x2150] sm:$0xff] }
 0x409   :  { %6624 = vmatprep.subr.bf16.mxu1 %v6623_v13  ;;  %v2795_v13 = vld [vmem:[#allocation14 + $0x2188] sm:$0xff]  ;;  %v6657_v52 = vpack.c.bf16 %v2788_v35, %v2782_v3  ;;  %v4740_v35 = vld [vmem:[#allocation20 + $0x420] sm:$0xff] }
 0x40a   :  { %v6659_v53 = vpack.c.bf16 %v2801_v61, %v2795_v13  ;;  %v4742_v13 = vld [vmem:[#allocation20 + $0x430] sm:$0xff] }
 0x40b   :  { %4359 = vmatmul.mubr.f32.vlgmr.msra.gmra.mrb[24].mxu1 %v8434_v49  ;;  %v2728_v49 = vld [vmem:[#allocation14 + $0x1f70] sm:$0xff] }
 0x40c   :  { %6626 = vmatpush1.bf16.msra.mxu1 %v6625_v51  ;;  %4364 = vmatprep.mubr.f32.mxu1 %v8438_v9  ;;  %v6637_v9 = vpack.c.bf16 %v2728_v49, %v2722_v63  ;;  %v2800_v51 = vld [vmem:[#allocation14 + $0x21b0] sm:$0xff] }
 0x40d   :  { %6628 = vmatprep.subr.bf16.mxu1 %v6627_v30  ;;  %v2807_v30 = vld [vmem:[#allocation14 + $0x21e8] sm:$0xff]  ;;  %v6661_v32 = vpack.c.bf16 %v2800_v51, %v2794_v54 }
 0x40e   :  { %v6663_v50 = vpack.c.bf16 %v2813_v1, %v2807_v30  ;;  %v4747_v54 = vld [vmem:[#allocation20 + $0x458] sm:$0xff] }
 0x40f   :  { %4365 = vmatmul.mubr.f32.gmra.mrb[26].mxu1 %v8443_v25  ;;  %v2740_v25 = vld [vmem:[#allocation14 + $0x1fd0] sm:$0xff] }
 0x410   :  { %6630 = vmatpush1.bf16.msra.mxu1 %v6629_v28  ;;  %4370 = vmatprep.mubr.f32.mxu1 %v8448_v5  ;;  %v6641_v5 = vpack.c.bf16 %v2740_v25, %v2734_v21  ;;  %v8875_v28 = vld [vmem:[#allocation32_spill] sm:$0xff]  ;;  %v2818_v25 = vld [vmem:[#allocation14 + $0x2240] sm:$0xff] }
 0x411   :  { %6632 = vmatprep.subr.bf16.mxu1 %v6631_v39  ;;  %v8682_v39 = vrot.slane %v8604_v60, %v8875_v28  ;;  %v8690_v49 = vrot.slane %v8607_v15, %v8875_v28  ;;  %v8695_v60 = vrot.slane %v8613_v43, %v8874_v7  ;;  %v8700_v27 = vrot.slane %v8613_v43, %v8875_v28 }
 0x412   :  { %v6669_v8 = vpack.c.bf16 %v2824_v14, %v2818_v25 }
 0x413   :  { %4371 = vmatmul.mubr.f32.gmra.mrb[28].mxu1 %v8452_v41  ;;  %v2746_v41 = vld [vmem:[#allocation14 + $0x2000] sm:$0xff] }
 0x414   :  { %6634 = vmatpush1.bf16.msra.mxu1 %v6633_v59  ;;  %4376 = vmatprep.mubr.f32.mxu1 %v8456_v4  ;;  %v6645_v4 = vpack.c.bf16 %v2752_v34, %v2746_v41  ;;  %v2819_v59 = vld [vmem:[#allocation14 + $0x2248] sm:$0xff] }
 0x415   :  { %6636 = vmatprep.subr.bf16.mxu1 %v6635_v57  ;;  %v2825_v57 = vld [vmem:[#allocation14 + $0x2278] sm:$0xff] }
 0x416   :  { %v6667_v21 = vpack.c.bf16 %v2825_v57, %v2819_v59  ;;  %v4744_v57 = vld [vmem:[#allocation20 + $0x440] sm:$0xff] }
 0x417   :  { %4377 = vmatmul.mubr.f32.gmra.mrb[30].mxu1 %v8459_v36  ;;  %v6649_v36 = vpack.c.bf16 %v2764_v12, %v2758_v20  ;;  %v4741_v12 = vld [vmem:[#allocation20 + $0x428] sm:$0xff] }
 0x418   :  { %6638 = vmatpush1.bf16.msra.mxu1 %v6637_v9  ;;  %5183 = vmatprep.mubr.msk.f32.mxu1 %vm903_vm0, %v8463_v23  ;;  %v2776_v23 = vld [vmem:[#allocation14 + $0x20f0] sm:$0xff]  ;;  %v6665_v9 = vpack.c.bf16 %v2812_v10, %v2806_v16  ;;  %v6803_v3 = vpack.c.bf16 %v4743_v19, %v4741_v12 }
 0x419   :  { %6640 = vmatprep.subr.bf16.mxu1 %v6639_v48  ;;  %v6653_v56 = vpack.c.bf16 %v2776_v23, %v2770_v38  ;;  %v4763_v12 = vld [vmem:[#allocation20 + $0x4d8] sm:$0xff] }
 0x41c   :  { %6642 = vmatpush1.bf16.msra.mxu1 %v6641_v5 }
 0x41d   :  { %6644 = vmatprep.subr.bf16.mxu1 %v6643_v24 }
 0x420   :  { %6646 = vmatpush1.bf16.msra.mxu1 %v6645_v4  ;;  %v4736_v4 = vld [vmem:[#allocation20 + $0x400] sm:$0xff] }
 0x421   :  { %6648 = vmatprep.subr.bf16.mxu1 %v6647_v18  ;;  %v4738_v18 = vld [vmem:[#allocation20 + $0x410] sm:$0xff] }
 0x422   :  { %v6801_v23 = vpack.c.bf16 %v4738_v18, %v4736_v4  ;;  %v4759_v4 = vld [vmem:[#allocation20 + $0x4b8] sm:$0xff]  ;;  %v4756_v18 = vld [vmem:[#allocation20 + $0x4a0] sm:$0xff] }
 0x424   :  { %6650 = vmatpush1.bf16.msra.mxu1 %v6649_v36 }
 0x425   :  { %6652 = vmatprep.subr.bf16.mxu1 %v6651_v17 }
 0x428   :  { %6654 = vmatpush1.bf16.msra.mxu1 %v6653_v56 }
 0x429   :  { %6656 = vmatprep.subr.bf16.mxu1 %v6655_v47 }
 0x42c   :  { %6658 = vmatpush1.bf16.msra.mxu1 %v6657_v52 }
 0x42d   :  { %6660 = vmatprep.subr.bf16.mxu1 %v6659_v53  ;;  %v4745_v53 = vld [vmem:[#allocation20 + $0x448] sm:$0xff] }
 0x42e   :  { %v6807_v59 = vpack.c.bf16 %v4747_v54, %v4745_v53  ;;  %v4775_v53 = vld [vmem:[#allocation20 + $0x538] sm:$0xff] }
 0x42f   :  { %v3915_v63 = vpop.f32.mrb[8].mxu0 }
 0x430   :  { %v6887_v0 = vadd.f32 %v3915_v63, %v8678_v58  ;;  %v3917_v6 = vpop.f32.mrb[9].mxu0  ;;  %6662 = vmatpush1.bf16.msra.mxu1 %v6661_v32  ;;  %v6805_v32 = vpack.c.bf16 %v4742_v13, %v4740_v35  ;;  %v4746_v63 = vld [vmem:[#allocation20 + $0x450] sm:$0xff]  ;;  %v4768_v13 = vld [vmem:[#allocation20 + $0x500] sm:$0xff] }
 0x431   :  { %v6888_v48 = vadd.f32 %v3917_v6, %v8682_v39  ;;  %6664 = vmatprep.subr.bf16.mxu1 %v6663_v50  ;;  %v4749_v6 = vld [vmem:[#allocation20 + $0x468] sm:$0xff] }
 0x432   :  { %v4506_v15 = vmul.f32 %v6887_v0, %v8686_v22 }
 0x433   :  { %v4507_v5 = vmul.f32 %v6888_v48, %v8690_v49  ;;  %v3921_v24 = vpop.f32.mrb[10].mxu0 }
 0x434   :  { %v4562_v41 = vadd.f32 %v8695_v60, %v4506_v15  ;;  %v6889_v34 = vadd.f32 %v3921_v24, %v8678_v58  ;;  %v3923_v45 = vpop.f32.mrb[11].mxu0  ;;  %6666 = vmatpush1.bf16.msra.mxu1 %v6665_v9  ;;  %v4751_v9 = vld [vmem:[#allocation20 + $0x478] sm:$0xff]  ;;  %v4748_v15 = vld [vmem:[#allocation20 + $0x460] sm:$0xff]  ;;  %v4753_v24 = vld [vmem:[#allocation20 + $0x488] sm:$0xff] }
 0x435   :  { %v6890_v20 = vadd.f32 %v3923_v45, %v8682_v39  ;;  %6668 = vmatprep.subr.bf16.mxu1 %v6667_v21  ;;  %v4563_v43 = vadd.f32 %v8700_v27, %v4507_v5  ;;  %v6809_v21 = vpack.c.bf16 %v4746_v63, %v4744_v57  ;;  %v6811_v14 = vpack.c.bf16 %v4751_v9, %v4749_v6  ;;  %v4750_v5 = vld [vmem:[#allocation20 + $0x470] sm:$0xff]  ;;  %v4783_v57 = vld [vmem:[#allocation20 + $0x578] sm:$0xff] }
 0x436   :  { %v4512_v55 = vmul.f32 %v6889_v34, %v8686_v22  ;;  %v4586_v31 = vmax.f32 %v4562_v41, 0.0  ;;  %v6813_v41 = vpack.c.bf16 %v4750_v5, %v4748_v15  ;;  %v4754_v45 = vld [vmem:[#allocation20 + $0x490] sm:$0xff]  ;;  %v4791_v15 = vld [vmem:[#allocation20 + $0x5b8] sm:$0xff] }
 0x437   :  { %v4513_v36 = vmul.f32 %v6890_v20, %v8690_v49  ;;  %v3927_v17 = vpop.f32.mrb[12].mxu0  ;;  %v4587_v38 = vmax.f32 %v4563_v43, 0.0  ;;  %v4758_v20 = vld [vmem:[#allocation20 + $0x4b0] sm:$0xff]  ;;  %v4761_v43 = vld [vmem:[#allocation20 + $0x4c8] sm:$0xff] }
 0x438   :  { %v6891_v2 = vadd.f32 %v3927_v17, %v8678_v58  ;;  %v3929_v56 = vpop.f32.mrb[13].mxu0  ;;  %6670 = vmatpush1.bf16.msra.mxu1 %v6669_v8  ;;  %v4568_v47 = vadd.f32 %v8695_v60, %v4512_v55  ;;  %v4757_v8 = vld [vmem:[#allocation20 + $0x4a8] sm:$0xff]  ;;  %v6823_v19 = vpack.c.bf16 %v4763_v12, %v4761_v43  ;;  %v4760_v55 = vld [vmem:[#allocation20 + $0x4c0] sm:$0xff]  ;;  %v4782_v6 = vld [vmem:[#allocation20 + $0x570] sm:$0xff] }
 0x439   :  { %v6892_v61 = vadd.f32 %v3929_v56, %v8682_v39  ;;  %4970 = vmatprep.mubr.f32.mxu0 %v4587_v38  ;;  %v4569_v52 = vadd.f32 %v8700_v27, %v4513_v36  ;;  %v4762_v36 = vld [vmem:[#allocation20 + $0x4d0] sm:$0xff]  ;;  %v4765_v17 = vld [vmem:[#allocation20 + $0x4e8] sm:$0xff]  ;;  %v4767_v38 = vld [vmem:[#allocation20 + $0x4f8] sm:$0xff] }
 0x43a   :  { %v4518_v51 = vmul.f32 %v6891_v2, %v8686_v22  ;;  %4971 = vmatmul.mubr.f32.vlgmr.msra.gmra.mrb[16].mxu0 %v4586_v31  ;;  %v4592_v16 = vmax.f32 %v4568_v47, 0.0  ;;  %v4764_v31 = vld [vmem:[#allocation20 + $0x4e0] sm:$0xff]  ;;  %v4766_v2 = vld [vmem:[#allocation20 + $0x4f0] sm:$0xff]  ;;  %v4769_v56 = vld [vmem:[#allocation20 + $0x508] sm:$0xff] }
 0x43b   :  { %v4519_v30 = vmul.f32 %v6892_v61, %v8690_v49  ;;  %v3933_v1 = vpop.f32.mrb[14].mxu0  ;;  %4448 = vmatmul.mubr.f32.vlgmr.msra.gmra.mrb[24].mxu1 %v8507_v37  ;;  %v4593_v7 = vmax.f32 %v4569_v52, 0.0  ;;  %6802 = vmatpush1.bf16.msra.mxu0 %v6801_v23  ;;  %v6825_v23 = vpack.c.bf16 %v4762_v36, %v4760_v55  ;;  %v4771_v47 = vld [vmem:[#allocation20 + $0x518] sm:$0xff]  ;;  %v4770_v61 = vld [vmem:[#allocation20 + $0x510] sm:$0xff]  ;;  %v4773_v52 = vld [vmem:[#allocation20 + $0x528] sm:$0xff] }
 0x43c   :  { %v6893_v28 = vadd.f32 %v3933_v1, %v8678_v58  ;;  %v3935_v50 = vpop.f32.mrb[15].mxu0  ;;  %5184 = vmatprep.mubr.msk.f32.mxu1 %vm903_vm0, %v8510_v44  ;;  %v4574_v10 = vadd.f32 %v8695_v60, %v4518_v51  ;;  %6804 = vmatprep.subr.bf16.mxu0 %v6803_v3  ;;  %v6829_v3 = vpack.c.bf16 %v4766_v2, %v4764_v31  ;;  %v4774_v1 = vld [vmem:[#allocation20 + $0x530] sm:$0xff] }
 0x43d   :  { %v6894_v0 = vadd.f32 %v3935_v50, %v8682_v39  ;;  %4976 = vmatprep.mubr.f32.mxu0 %v4593_v7  ;;  %v4575_v37 = vadd.f32 %v8700_v27, %v4519_v30  ;;  %v6831_v35 = vpack.c.bf16 %v4771_v47, %v4769_v56  ;;  %v6833_v54 = vpack.c.bf16 %v4770_v61, %v4768_v13  ;;  %v4772_v30 = vld [vmem:[#allocation20 + $0x520] sm:$0xff]  ;;  %v4777_v7 = vld [vmem:[#allocation20 + $0x548] sm:$0xff] }
 0x43e   :  { %v4524_v58 = vmul.f32 %v6893_v28, %v8686_v22  ;;  %4977 = vmatmul.mubr.f32.gmra.mrb[18].mxu0 %v4592_v16  ;;  %v4598_v25 = vmax.f32 %v4574_v10, 0.0  ;;  %v6835_v51 = vpack.c.bf16 %v4775_v53, %v4773_v52  ;;  %v6837_v28 = vpack.c.bf16 %v4774_v1, %v4772_v30  ;;  %v4776_v16 = vld [vmem:[#allocation20 + $0x540] sm:$0xff]  ;;  %v4778_v10 = vld [vmem:[#allocation20 + $0x550] sm:$0xff] }
 0x43f   :  { %v4525_v48 = vmul.f32 %v6894_v0, %v8690_v49  ;;  %4454 = vmatmul.mubr.f32.gmra.mrb[26].mxu1 %v8524_v40  ;;  %v4599_v44 = vmax.f32 %v4575_v37, 0.0  ;;  %6806 = vmatpush1.bf16.msra.mxu0 %v6805_v32  ;;  %v4755_v49 = vld [vmem:[#allocation20 + $0x498] sm:$0xff]  ;;  %v6841_v63 = vpack.c.bf16 %v4778_v10, %v4776_v16  ;;  %v4780_v37 = vld [vmem:[#allocation20 + $0x560] sm:$0xff] }
 0x440   :  { %5185 = vmatprep.mubr.msk.f32.mxu1 %vm903_vm0, %v8529_v29  ;;  %v4580_v39 = vadd.f32 %v8695_v60, %v4524_v58  ;;  %6808 = vmatprep.subr.bf16.mxu0 %v6807_v59  ;;  %v6815_v29 = vpack.c.bf16 %v4755_v49, %v4753_v24  ;;  %v4752_v60 = vld [vmem:[#allocation20 + $0x480] sm:$0xff]  ;;  %v4779_v32 = vld [vmem:[#allocation20 + $0x558] sm:$0xff]  ;;  %v4781_v59 = vld [vmem:[#allocation20 + $0x568] sm:$0xff]  ;;  %v6845_v9 = vpack.c.bf16 %v4782_v6, %v4780_v37 }
 0x441   :  { %4982 = vmatprep.mubr.f32.mxu0 %v4599_v44  ;;  %v4581_v22 = vadd.f32 %v8700_v27, %v4525_v48  ;;  %v6817_v27 = vpack.c.bf16 %v4754_v45, %v4752_v60  ;;  %v6839_v50 = vpack.c.bf16 %v4779_v32, %v4777_v7  ;;  %v6843_v0 = vpack.c.bf16 %v4783_v57, %v4781_v59  ;;  %v4785_v58 = vld [vmem:[#allocation20 + $0x588] sm:$0xff]  ;;  %v4787_v48 = vld [vmem:[#allocation20 + $0x598] sm:$0xff]  ;;  %v4790_v24 = vld [vmem:[#allocation20 + $0x5b0] sm:$0xff] }
 0x442   :  { %4983 = vmatmul.mubr.f32.gmra.mrb[20].mxu0 %v4598_v25  ;;  %v4604_v34 = vmax.f32 %v4580_v39, 0.0  ;;  %v6847_v44 = vpack.c.bf16 %v4787_v48, %v4785_v58  ;;  %v4786_v25 = vld [vmem:[#allocation20 + $0x590] sm:$0xff] }
 0x443   :  { %4460 = vmatmul.mubr.f32.gmra.mrb[28].mxu1 %v8539_v46  ;;  %v4605_v40 = vmax.f32 %v4581_v22, 0.0  ;;  %6810 = vmatpush1.bf16.msra.mxu0 %v6809_v21  ;;  %v6819_v46 = vpack.c.bf16 %v4759_v4, %v4757_v8  ;;  %v4784_v21 = vld [vmem:[#allocation20 + $0x580] sm:$0xff]  ;;  %v7179_v45 = vld [vmem:[#allocation17] sm:$0x3f] }
 0x444   :  { %5186 = vmatprep.mubr.msk.f32.mxu1 %vm903_vm0, %v8544_v26  ;;  %6812 = vmatprep.subr.bf16.mxu0 %v6811_v14  ;;  %v6821_v26 = vpack.c.bf16 %v4758_v20, %v4756_v18  ;;  %v6849_v39 = vpack.c.bf16 %v4786_v25, %v4784_v21  ;;  %v4789_v14 = vld [vmem:[#allocation20 + $0x5a8] sm:$0xff]  ;;  %v4788_v22 = vld [vmem:[#allocation20 + $0x5a0] sm:$0xff]  ;;  %v7180_v18 = vld [vmem:[#allocation19] sm:$0x3f] }
 0x445   :  { %4988 = vmatprep.mubr.f32.mxu0 %v4605_v40  ;;  %v6851_v5 = vpack.c.bf16 %v4791_v15, %v4789_v14  ;;  %v6853_v49 = vpack.c.bf16 %v4790_v24, %v4788_v22  ;;  %v7178_v40 = vld [vmem:[#allocation16] sm:$0x3f] }
 0x446   :  { %4989 = vmatmul.mubr.f32.gmra.mrb[22].mxu0 %v4604_v34 }
 0x447   :  { %4466 = vmatmul.mubr.f32.gmra.mrb[30].mxu1 %v8548_v33  ;;  %6814 = vmatpush1.bf16.msra.mxu0 %v6813_v41  ;;  %v6827_v33 = vpack.c.bf16 %v4767_v38, %v4765_v17  ;;  %v8876_v41 = vld [vmem:[#allocation35_spill] sm:$0xff] }
 0x448   :  { %6816 = vmatprep.subr.bf16.mxu0 %v6815_v29  ;;  %v2847_v34 = vrot.slane %v7178_v40, %v8876_v41  ;;  %v8877_v29 = vld [vmem:[#allocation34_spill] sm:$0xff]  ;;  %v4493_v8 = vrot.slane %v7179_v45, %v8876_v41  ;;  %v4549_v20 = vrot.slane %v7180_v18, %v8876_v41 }
 0x449   :  { %v2851_v60 = vrot.slane %v7178_v40, %v8877_v29 }
 0x44b   :  { %6818 = vmatpush1.bf16.msra.mxu0 %v6817_v27  ;;  %v4497_v27 = vrot.slane %v7179_v45, %v8877_v29 }
 0x44c   :  { %6820 = vmatprep.subr.bf16.mxu0 %v6819_v46 }
 0x44f   :  { %6822 = vmatpush1.bf16.msra.mxu0 %v6821_v26  ;;  %v4553_v26 = vrot.slane %v7180_v18, %v8877_v29 }
 0x450   :  { %6824 = vmatprep.subr.bf16.mxu0 %v6823_v19 }
 0x453   :  { %6826 = vmatpush1.bf16.msra.mxu0 %v6825_v23 }
 0x454   :  { %6828 = vmatprep.subr.bf16.mxu0 %v6827_v33 }
 0x457   :  { %6830 = vmatpush1.bf16.msra.mxu0 %v6829_v3 }
 0x458   :  { %6832 = vmatprep.subr.bf16.mxu0 %v6831_v35 }
 0x45b   :  { %6834 = vmatpush1.bf16.msra.mxu0 %v6833_v54 }
 0x45c   :  { %6836 = vmatprep.subr.bf16.mxu0 %v6835_v51 }
 0x45f   :  { %6838 = vmatpush1.bf16.msra.mxu0 %v6837_v28 }
 0x460   :  { %6840 = vmatprep.subr.bf16.mxu0 %v6839_v50 }
 0x463   :  { %6842 = vmatpush1.bf16.msra.mxu0 %v6841_v63 }
 0x464   :  { %6844 = vmatprep.subr.bf16.mxu0 %v6843_v0 }
 0x467   :  { %6846 = vmatpush1.bf16.msra.mxu0 %v6845_v9 }
 0x468   :  { %6848 = vmatprep.subr.bf16.mxu0 %v6847_v44  ;;  %v4792_v44 = vld [vmem:[#allocation22] sm:$0x3] }
 0x469   :  { %v4797_v21 = vrot.slane %v4792_v44, %v7807_v42  ;;  %v4801_v25 = vrot.slane %v4792_v44, %v7781_v11  ;;  %v8884_v44 = vld [vmem:[#allocation51_spill] sm:$0xff] }
 0x46b   :  { %6850 = vmatpush1.bf16.msra.mxu0 %v6849_v39 }
 0x46c   :  { %6852 = vmatprep.subr.bf16.mxu0 %v6851_v5 }
 0x46f   :  { %6854 = vmatpush1.bf16.msra.mxu0 %v6853_v49 }
 0x50e   :  { %v4449_v4 = vpop.f32.mrb[24].mxu1 }
 0x50f   :  { %v6895_v46 = vadd.f32 %v4449_v4, %v2847_v34  ;;  %v4451_v43 = vpop.f32.mrb[25].mxu1 }
 0x510   :  { %v6896_v12 = vadd.f32 %v4451_v43, %v2851_v60 }
 0x511   :  { %v4508_v19 = vmul.f32 %v6895_v46, %v4493_v8 }
 0x512   :  { %v4509_v55 = vmul.f32 %v6896_v12, %v4497_v27  ;;  %v4455_v36 = vpop.f32.mrb[26].mxu1 }
 0x513   :  { %v4564_v17 = vadd.f32 %v4549_v20, %v4508_v19  ;;  %v6897_v38 = vadd.f32 %v4455_v36, %v2847_v34  ;;  %v4457_v23 = vpop.f32.mrb[27].mxu1 }
 0x514   :  { %v4565_v33 = vadd.f32 %v4553_v26, %v4509_v55  ;;  %v6898_v31 = vadd.f32 %v4457_v23, %v2851_v60 }
 0x515   :  { %v4514_v2 = vmul.f32 %v6897_v38, %v4493_v8  ;;  %v4588_v35 = vmax.f32 %v4564_v17, 0.0 }
 0x516   :  { %v4589_v56 = vmax.f32 %v4565_v33, 0.0  ;;  %v4515_v47 = vmul.f32 %v6898_v31, %v4497_v27  ;;  %v4461_v3 = vpop.f32.mrb[28].mxu1 }
 0x517   :  { %v6899_v13 = vadd.f32 %v4461_v3, %v2847_v34  ;;  %v4463_v61 = vpop.f32.mrb[29].mxu1  ;;  %v4570_v52 = vadd.f32 %v4549_v20, %v4514_v2 }
 0x518   :  { %v4571_v53 = vadd.f32 %v4553_v26, %v4515_v47  ;;  %v6900_v54 = vadd.f32 %v4463_v61, %v2851_v60  ;;  %5187 = vmatprep.mubr.msk.f32.mxu0 %vm4804_vm1, %v4589_v56 }
 0x519   :  { %v4520_v51 = vmul.f32 %v6899_v13, %v4493_v8  ;;  %5060 = vmatmul.mubr.f32.vlgmr.msra.gmra.mrb[16].mxu0 %v4588_v35  ;;  %v4594_v50 = vmax.f32 %v4570_v52, 0.0 }
 0x51a   :  { %v4595_v30 = vmax.f32 %v4571_v53, 0.0  ;;  %v4521_v1 = vmul.f32 %v6900_v54, %v4497_v27  ;;  %v4467_v7 = vpop.f32.mrb[30].mxu1 }
 0x51b   :  { %v6901_v32 = vadd.f32 %v4467_v7, %v2847_v34  ;;  %v4469_v28 = vpop.f32.mrb[31].mxu1  ;;  %v4576_v16 = vadd.f32 %v4549_v20, %v4520_v51  ;;  %v8878_v51 = vld [vmem:[#allocation65_spill] sm:$0xff] }
 0x51c   :  { %v4577_v10 = vadd.f32 %v4553_v26, %v4521_v1  ;;  %v6902_v59 = vadd.f32 %v4469_v28, %v2851_v60  ;;  %5188 = vmatprep.mubr.msk.f32.mxu0 %vm4804_vm1, %v4595_v30  ;;  %v8879_v28 = vld [vmem:[#allocation53_spill] sm:$0xff] }
 0x51d   :  { %v4526_v57 = vmul.f32 %v6901_v32, %v4493_v8  ;;  %5066 = vmatmul.mubr.f32.gmra.mrb[18].mxu0 %v4594_v50  ;;  %v4600_v37 = vmax.f32 %v4576_v16, 0.0  ;;  %v8880_v16 = vld [vmem:[#allocation50_spill] sm:$0xff] }
 0x51e   :  { %v4601_v63 = vmax.f32 %v4577_v10, 0.0  ;;  %v4527_v0 = vmul.f32 %v6902_v59, %v4497_v27 }
 0x51f   :  { %v4582_v6 = vadd.f32 %v4549_v20, %v4526_v57 }
 0x520   :  { %v4583_v9 = vadd.f32 %v4553_v26, %v4527_v0  ;;  %5189 = vmatprep.mubr.msk.f32.mxu0 %vm4804_vm1, %v4601_v63  ;;  %v8881_v63 = vld [vmem:[#allocation54_spill] sm:$0xff]  ;;  %v8882_v0 = vld [vmem:[#allocation59_spill] sm:$0xff] }
 0x521   :  { %5072 = vmatmul.mubr.f32.gmra.mrb[20].mxu0 %v4600_v37  ;;  %v4606_v48 = vmax.f32 %v4582_v6, 0.0 }
 0x522   :  { %v4607_v58 = vmax.f32 %v4583_v9, 0.0  ;;  %v8883_v9 = vld [vmem:[#allocation60_spill] sm:$0xff] }
 0x524   :  { %5190 = vmatprep.mubr.msk.f32.mxu0 %vm4804_vm1, %v4607_v58 }
 0x525   :  { %5078 = vmatmul.mubr.f32.gmra.mrb[22].mxu0 %v4606_v48 }
 0x5ec   :  { %v5061_v39 = vpop.f32.mrb[16].mxu0 }
 0x5ed   :  { %v6903_v14 = vadd.f32 %v5061_v39, %v4797_v21  ;;  %v5063_v15 = vpop.f32.mrb[17].mxu0 }
 0x5ee   :  { %v6904_v5 = vadd.f32 %v5063_v15, %v4801_v25 }
 0x5ef   :  { %v5191_v22 = vmul.f32 -1.442695, %v6903_v14 }
 0x5f0   :  { %v5192_v24 = vmul.f32 -1.442695, %v6904_v5  ;;  %v5067_v49 = vpop.f32.mrb[18].mxu0 }
 0x5f1   :  { %7091 = vpow2.f32 %v5191_v22  ;;  %v6905_v40 = vadd.f32 %v5067_v49, %v4797_v21  ;;  %v5069_v41 = vpop.f32.mrb[19].mxu0 }
 0x5f2   :  { %7093 = vpow2.f32 %v5192_v24  ;;  %v6906_v34 = vadd.f32 %v5069_v41, %v4801_v25 }
 0x5f3   :  { %v5193_v29 = vmul.f32 -1.442695, %v6905_v40 }
 0x5f4   :  { %v5194_v60 = vmul.f32 -1.442695, %v6906_v34  ;;  %v5073_v45 = vpop.f32.mrb[20].mxu0 }
 0x5f5   :  { %7095 = vpow2.f32 %v5193_v29  ;;  %v6907_v8 = vadd.f32 %v5073_v45, %v4797_v21  ;;  %v5075_v42 = vpop.f32.mrb[21].mxu0 }
 0x5f6   :  { %7097 = vpow2.f32 %v5194_v60  ;;  %v6908_v11 = vadd.f32 %v5075_v42, %v4801_v25 }
 0x5f7   :  { %v5195_v4 = vmul.f32 -1.442695, %v6907_v8 }
 0x5f8   :  { %v5196_v27 = vmul.f32 -1.442695, %v6908_v11  ;;  %v5079_v46 = vpop.f32.mrb[22].mxu0 }
 0x5f9   :  { %7099 = vpow2.f32 %v5195_v4  ;;  %v6909_v18 = vadd.f32 %v5079_v46, %v4797_v21  ;;  %v5081_v20 = vpop.f32.mrb[23].mxu0 }
 0x5fa   :  { %7101 = vpow2.f32 %v5196_v27  ;;  %v6910_v43 = vadd.f32 %v5081_v20, %v4801_v25 }
 0x5fb   :  { %v7092_v12 = vpop.eup %7091  ;;  %v5197_v26 = vmul.f32 -1.442695, %v6909_v18 }
 0x5fc   :  { %v7094_v19 = vpop.eup %7093  ;;  %v5108_v55 = vadd.f32 1.0, %v7092_v12  ;;  %v5198_v36 = vmul.f32 -1.442695, %v6910_v43 }
 0x5fd   :  { %v5109_v17 = vadd.f32 1.0, %v7094_v19  ;;  %7103 = vpow2.f32 %v5197_v26 }
 0x5fe   :  { %7105 = vrcp.f32 %v5108_v55 }
 0x5ff   :  { %v7096_v38 = vpop.eup %7095  ;;  %7107 = vrcp.f32 %v5109_v17 }
 0x600   :  { %v7098_v23 = vpop.eup %7097  ;;  %v5110_v33 = vadd.f32 1.0, %v7096_v38  ;;  %7109 = vpow2.f32 %v5198_v36 }
 0x601   :  { %v5111_v31 = vadd.f32 1.0, %v7098_v23 }
 0x602   :  { %7111 = vrcp.f32 %v5110_v33 }
 0x603   :  { %v7100_v2 = vpop.eup %7099  ;;  %7113 = vrcp.f32 %v5111_v31 }
 0x604   :  { %v7102_v56 = vpop.eup %7101  ;;  %v5112_v47 = vadd.f32 1.0, %v7100_v2 }
 0x605   :  { %v5113_v3 = vadd.f32 1.0, %v7102_v56 }
 0x606   :  { %7115 = vrcp.f32 %v5112_v47 }
 0x607   :  { %v7104_v35 = vpop.eup %7103  ;;  %7117 = vrcp.f32 %v5113_v3 }
 0x608   :  { %v7106_v13 = vpop.eup %7105  ;;  %v5114_v61 = vadd.f32 1.0, %v7104_v35 }
 0x609   :  { %v7108_v52 = vpop.eup %7107  ;;  %v5132_v53 = vmul.f32 %v7106_v13, %v8489_v62 }
 0x60a   :  { %v7110_v54 = vpop.eup %7109  ;;  %v5133_v30 = vmul.f32 %v7108_v52, %v8878_v51  ;;  %7119 = vrcp.f32 %v5114_v61 }
 0x60b   :  { %5140 = vst [vmem:[#allocation23] sm:$0xff] %v5132_v53  ;;  %v5115_v1 = vadd.f32 1.0, %v7110_v54 }
 0x60c   :  { %v7112_v7 = vpop.eup %7111  ;;  %5141 = vst [vmem:[#allocation23 + $0x8] sm:$0xff] %v5133_v30 }
 0x60d   :  { %v7114_v32 = vpop.eup %7113  ;;  %v5134_v50 = vmul.f32 %v7112_v7, %v8879_v28  ;;  %7121 = vrcp.f32 %v5115_v1 }
 0x60e   :  { %v5135_v10 = vmul.f32 %v7114_v32, %v8880_v16 }
 0x60f   :  { %5142 = vst [vmem:[#allocation23 + $0x10] sm:$0xff] %v5134_v50 }
 0x610   :  { %v7116_v59 = vpop.eup %7115  ;;  %5143 = vst [vmem:[#allocation23 + $0x18] sm:$0xff] %v5135_v10 }
 0x611   :  { %v7118_v57 = vpop.eup %7117  ;;  %v5136_v62 = vmul.f32 %v7116_v59, %v8881_v63 }
 0x612   :  { %v5137_v37 = vmul.f32 %v7118_v57, %v8882_v0 }
 0x613   :  { %5144 = vst [vmem:[#allocation23 + $0x20] sm:$0xff] %v5136_v62 }
 0x614   :  { %v7120_v6 = vpop.eup %7119  ;;  %5145 = vst [vmem:[#allocation23 + $0x28] sm:$0xff] %v5137_v37 }
 0x615   :  { %v5138_v58 = vmul.f32 %v7120_v6, %v8883_v9 }
 0x617   :  { %v7122_v48 = vpop.eup %7121  ;;  %5146 = vst [vmem:[#allocation23 + $0x30] sm:$0xff] %v5138_v58 }
 0x618   :  { %v5139_v21 = vmul.f32 %v7122_v48, %v8884_v44 }
 0x61a   :  { %5147 = vst [vmem:[#allocation23 + $0x38] sm:$0xff] %v5139_v21 }
 0x61b   :  { %7478 = shalt.err (!%p7475_p10)
}
 0x61c   :  { %s7479_s25 = scalar_lea.hbm %s8782_s13, 1024 }
 0x61d   :  { %p7480_p11 = scmp.ne.s32.totalorder %s8782_s13, %s7479_s25  ;;  %p7483_p12 = scmp.lt.u32.totalorder %s7479_s25, %s8782_s13 }
 0x61f   :  { %p7485_p13 = pnand %p7483_p12, %p7480_p11 }
 0x621   :  { %7488 = shalt.err (!%p7485_p13)
}
 0x622   :  { %5159 = dma.vmem_to_hbm [thread:$0]  %s5154_s18, 1024, %s8782_s13, [#allocation4], %s7507_s1, %s7507_s1, %s7508_s26  }
 0x623   :  { %7503 = dma.done.wait [#allocation4], 1024  }
 0x624   :  { %7504 = vsyncadd [#allocation4], 4294966272 }
 0x625   :  { %5163 = vsyncpa [#allocation3], 1 }
 0x626   :  { %5164 = vsyncpa [#allocation6], 1 }
 0x627   :  { %5165 = vsyncpa [#allocation9], 1 }
 0x628   :  { %5166 = vsyncpa [#allocation12], 1 }
 0x629   :  { %5167 = vsyncpa [#allocation15], 1 }
 0x62a   :  { %5168 = vsyncpa [#allocation18], 1 }
 0x62b   :  { %5169 = vsyncpa [#allocation21], 1 }
 0x62c   :  { %5170 = vsyncpa [#allocation4], 1 }

</bundles_post_ra>
